<compile_context>
chip_gen: v7x
topology: tpu7x:2x2x1
jax: 0.10.0
libtpu: 0.0.40
codegen_flags: <defaults>
</compile_context>

<pallas_src>
import functools

import jax
import jax.numpy as jnp
import numpy as np
from jax.experimental import pallas as pl
from jax.experimental.pallas import tpu as pltpu

LRELU_SLOPE = 0.01  # nn.LeakyReLU() default negative_slope (module uses the default)
GC = 32             # growth channels, fixed by the module (conv1..conv4 -> 32)


def _lrelu(v):
    return jnp.where(v >= 0, v, LRELU_SLOPE * v)


def _fused_rdb_kernel(H, W, Cin, Cout,
                      x_ref, w1_ref, b1_ref, w2_ref, b2_ref, w3_ref, b3_ref,
                      w4_ref, b4_ref, w5x_ref, w51_ref, w52_ref, w53_ref,
                      w54_ref, b5_ref, o_ref, pad_in, pad_gc):
    """One batch element: conv1..conv4 (3x3+lrelu) and conv5 (1x1), fully fused.

    x1..x4 stay in VMEM; conv5 is accumulated as five partial dots against the
    channel-slices of w5, so the concat is never materialized.
    """
    # Zero the padded scratch buffers (borders must be zero for the 3x3 pad=1
    # convs).  Done unconditionally each grid step so it is correct regardless
    # of how the parallel grid axis is sharded across TensorCores.
    pad_in[...] = jnp.zeros_like(pad_in)
    pad_gc[...] = jnp.zeros_like(pad_gc)

    def conv3x3_lrelu(pad_ref, w_ref, b_ref, C):
        # im2col: build one (H*W, 9*C) patch matrix and do a single MXU dot
        # with contraction depth K = 9*C (fills the MXU far better than 9
        # separate K=C dots).  Tap order (ky, kx, ci) matches the wrapper-side
        # w.reshape(9*C, GC).
        taps = []
        for ky in range(3):
            for kx in range(3):
                taps.append(pad_ref[ky:ky + H, kx:kx + W, :].reshape(H * W, C))
        patches = jnp.concatenate(taps, axis=-1)                   # (H*W, 9C)
        acc = jnp.dot(patches, w_ref[...],
                      preferred_element_type=jnp.float32)          # (H*W, GC)
        return _lrelu(acc + b_ref[...])

    x = x_ref[...].astype(jnp.float32)                             # (H, W, Cin)
    x_flat = x.reshape(H * W, Cin)

    # conv1: Cin -> 32
    pad_in[1:H + 1, 1:W + 1, :] = x
    x1 = conv3x3_lrelu(pad_in, w1_ref, b1_ref, Cin)                # (H*W, GC)

    # conv5 (1x1 over the implicit concat [x, x1, x2, x3, x4]) as partial dots.
    acc5 = jnp.dot(x_flat, w5x_ref[...], preferred_element_type=jnp.float32)
    acc5 = acc5 + jnp.dot(x1, w51_ref[...], preferred_element_type=jnp.float32)

    # conv2: 32 -> 32
    pad_gc[1:H + 1, 1:W + 1, :] = x1.reshape(H, W, GC)
    x2 = conv3x3_lrelu(pad_gc, w2_ref, b2_ref, GC)
    acc5 = acc5 + jnp.dot(x2, w52_ref[...], preferred_element_type=jnp.float32)

    # conv3: 32 -> 32
    pad_gc[1:H + 1, 1:W + 1, :] = x2.reshape(H, W, GC)
    x3 = conv3x3_lrelu(pad_gc, w3_ref, b3_ref, GC)
    acc5 = acc5 + jnp.dot(x3, w53_ref[...], preferred_element_type=jnp.float32)

    # conv4: 32 -> 32
    pad_gc[1:H + 1, 1:W + 1, :] = x3.reshape(H, W, GC)
    x4 = conv3x3_lrelu(pad_gc, w4_ref, b4_ref, GC)
    acc5 = acc5 + jnp.dot(x4, w54_ref[...], preferred_element_type=jnp.float32)

    acc5 = acc5 + b5_ref[...]
    o_ref[...] = acc5.reshape(H, W, Cout).astype(o_ref.dtype)


@jax.jit
def rdb_forward(x_nchw, params):
    # NCHW at the interface (PyTorch-like), NHWC inside the kernel.
    x = jnp.transpose(x_nchw, (0, 2, 3, 1))
    N, H, W, Cin = x.shape
    Cout = params["b5"].shape[-1]

    # Weight plumbing (tiny, fused by XLA under jit): im2col layout for the
    # 3x3 convs, channel-split segments of the 1x1 conv (one per concat part).
    w1 = params["w1"].reshape(9 * Cin, GC)
    w2 = params["w2"].reshape(9 * GC, GC)
    w3 = params["w3"].reshape(9 * GC, GC)
    w4 = params["w4"].reshape(9 * GC, GC)
    w5 = params["w5"]                               # (Cin + 4*GC, Cout)
    w5x = w5[:Cin]
    w51 = w5[Cin:Cin + GC]
    w52 = w5[Cin + GC:Cin + 2 * GC]
    w53 = w5[Cin + 2 * GC:Cin + 3 * GC]
    w54 = w5[Cin + 3 * GC:Cin + 4 * GC]

    kernel = functools.partial(_fused_rdb_kernel, H, W, Cin, Cout)

    def const_spec(shape):
        return pl.BlockSpec(shape, lambda n: (0,) * len(shape))

    out_nhwc = pl.pallas_call(
        kernel,
        out_shape=jax.ShapeDtypeStruct((N, H, W, Cout), x.dtype),
        grid=(N,),
        in_specs=[
            pl.BlockSpec((None, H, W, Cin), lambda n: (n, 0, 0, 0)),  # x
            const_spec((9 * Cin, GC)), const_spec((1, GC)),           # w1, b1
            const_spec((9 * GC, GC)), const_spec((1, GC)),            # w2, b2
            const_spec((9 * GC, GC)), const_spec((1, GC)),            # w3, b3
            const_spec((9 * GC, GC)), const_spec((1, GC)),            # w4, b4
            const_spec((Cin, Cout)),                                  # w5[x]
            const_spec((GC, Cout)), const_spec((GC, Cout)),           # w5[x1,x2]
            const_spec((GC, Cout)), const_spec((GC, Cout)),           # w5[x3,x4]
            const_spec((1, Cout)),                                    # b5
        ],
        out_specs=pl.BlockSpec((None, H, W, Cout), lambda n: (n, 0, 0, 0)),
        scratch_shapes=[
            pltpu.VMEM((H + 2, W + 2, Cin), jnp.float32),  # padded x
            pltpu.VMEM((H + 2, W + 2, GC), jnp.float32),   # padded x1/x2/x3 (reused)
        ],
        compiler_params=pltpu.CompilerParams(
            dimension_semantics=("parallel",)),
    )(x, w1, params["b1"], w2, params["b2"], w3, params["b3"],
      w4, params["b4"], w5x, w51, w52, w53, w54, params["b5"])

    return jnp.transpose(out_nhwc, (0, 3, 1, 2))


def init_params(key, c_in, c_out):
    """Deterministic parameter init. Weight layout HWIO for 3x3, (Cin_total, Cout) for 1x1."""
    ks = jax.random.split(key, 10)

    def conv_w(k, kh, kw, ci, co):
        fan_in = kh * kw * ci
        return (jax.random.normal(k, (kh, kw, ci, co), jnp.float32)
                * np.sqrt(2.0 / fan_in)).astype(jnp.float32)

    p = {}
    p["w1"] = conv_w(ks[0], 3, 3, c_in, GC)
    p["b1"] = jax.random.normal(ks[1], (1, GC), jnp.float32) * 0.01
    p["w2"] = conv_w(ks[2], 3, 3, GC, GC)
    p["b2"] = jax.random.normal(ks[3], (1, GC), jnp.float32) * 0.01
    p["w3"] = conv_w(ks[4], 3, 3, GC, GC)
    p["b3"] = jax.random.normal(ks[5], (1, GC), jnp.float32) * 0.01
    p["w4"] = conv_w(ks[6], 3, 3, GC, GC)
    p["b4"] = jax.random.normal(ks[7], (1, GC), jnp.float32) * 0.01
    c5_in = GC * 4 + c_in
    p["w5"] = conv_w(ks[8], 1, 1, c5_in, c_out)[0, 0]        # (c5_in, Cout)
    p["b5"] = jax.random.normal(ks[9], (1, c_out), jnp.float32) * 0.01
    return p


# ---------------- pure-JAX reference for verification ----------------
def _ref_conv(x_nchw, w_hwio, b, pad):
    out = jax.lax.conv_general_dilated(
        x_nchw, w_hwio, window_strides=(1, 1),
        padding=[(pad, pad), (pad, pad)],
        dimension_numbers=("NCHW", "HWIO", "NCHW"))
    return out + b.reshape(1, -1, 1, 1)


def rdb_forward_ref(x, p):
    x1 = _lrelu(_ref_conv(x, p["w1"], p["b1"], 1))
    x2 = _lrelu(_ref_conv(x1, p["w2"], p["b2"], 1))
    x3 = _lrelu(_ref_conv(x2, p["w3"], p["b3"], 1))
    x4 = _lrelu(_ref_conv(x3, p["w4"], p["b4"], 1))
    cat = jnp.concatenate([x, x1, x2, x3, x4], axis=1)
    return _ref_conv(cat, p["w5"][None, None], p["b5"], 0)


if __name__ == "__main__":
    key = jax.random.PRNGKey(0)
    k_x, k_p = jax.random.split(key)

    N, C_IN, H, W = 2, 4, 16, 16
    C_OUT = 4

    x = jax.random.normal(k_x, (N, C_IN, H, W), jnp.float32)
    params = init_params(k_p, C_IN, C_OUT)

    out = rdb_forward(x, params)
    out = jax.block_until_ready(out)

    ref = jax.block_until_ready(rdb_forward_ref(x, params))
    assert out.shape == (N, C_OUT, H, W), out.shape
    np.testing.assert_allclose(np.asarray(out), np.asarray(ref),
                               rtol=1e-4, atol=1e-4)
    print("KERNEL_OK")
</pallas_src>

<mosaic_0001>
module attributes {stable_mosaic.version = 11 : i64} {
  func.func @_fused_rdb_kernel(%arg0: i32, %arg1: memref<1x16x16x4xf32, #tpu.memory_space<vmem>>, %arg2: memref<36x32xf32, #tpu.memory_space<vmem>>, %arg3: memref<1x32xf32, #tpu.memory_space<vmem>>, %arg4: memref<288x32xf32, #tpu.memory_space<vmem>>, %arg5: memref<1x32xf32, #tpu.memory_space<vmem>>, %arg6: memref<288x32xf32, #tpu.memory_space<vmem>>, %arg7: memref<1x32xf32, #tpu.memory_space<vmem>>, %arg8: memref<288x32xf32, #tpu.memory_space<vmem>>, %arg9: memref<1x32xf32, #tpu.memory_space<vmem>>, %arg10: memref<4x4xf32, #tpu.memory_space<vmem>>, %arg11: memref<32x4xf32, #tpu.memory_space<vmem>>, %arg12: memref<32x4xf32, #tpu.memory_space<vmem>>, %arg13: memref<32x4xf32, #tpu.memory_space<vmem>>, %arg14: memref<32x4xf32, #tpu.memory_space<vmem>>, %arg15: memref<1x4xf32, #tpu.memory_space<vmem>>, %arg16: memref<1x16x16x4xf32, #tpu.memory_space<vmem>>, %arg17: memref<18x18x4xf32, #tpu.memory_space<vmem>>, %arg18: memref<18x18x32xf32, #tpu.memory_space<vmem>>) attributes {dimension_semantics = [#tpu.dimension_semantics<parallel>], iteration_bounds = array<i64: 2>, scalar_prefetch = 0 : i64, scratch_operands = 2 : i64, tpu.core_type = #tpu.core_type<tc>, window_params = [{transform_indices = @transform_0, window_bounds = array<i64: 1, 16, 16, 4>}, {pipeline_mode = #tpu.pipeline_mode<synchronous>, transform_indices = @transform_1, window_bounds = array<i64: 36, 32>}, {pipeline_mode = #tpu.pipeline_mode<synchronous>, transform_indices = @transform_2, window_bounds = array<i64: 1, 32>}, {pipeline_mode = #tpu.pipeline_mode<synchronous>, transform_indices = @transform_3, window_bounds = array<i64: 288, 32>}, {pipeline_mode = #tpu.pipeline_mode<synchronous>, transform_indices = @transform_4, window_bounds = array<i64: 1, 32>}, {pipeline_mode = #tpu.pipeline_mode<synchronous>, transform_indices = @transform_5, window_bounds = array<i64: 288, 32>}, {pipeline_mode = #tpu.pipeline_mode<synchronous>, transform_indices = @transform_6, window_bounds = array<i64: 1, 32>}, {pipeline_mode = #tpu.pipeline_mode<synchronous>, transform_indices = @transform_7, window_bounds = array<i64: 288, 32>}, {pipeline_mode = #tpu.pipeline_mode<synchronous>, transform_indices = @transform_8, window_bounds = array<i64: 1, 32>}, {pipeline_mode = #tpu.pipeline_mode<synchronous>, transform_indices = @transform_9, window_bounds = array<i64: 4, 4>}, {pipeline_mode = #tpu.pipeline_mode<synchronous>, transform_indices = @transform_10, window_bounds = array<i64: 32, 4>}, {pipeline_mode = #tpu.pipeline_mode<synchronous>, transform_indices = @transform_11, window_bounds = array<i64: 32, 4>}, {pipeline_mode = #tpu.pipeline_mode<synchronous>, transform_indices = @transform_12, window_bounds = array<i64: 32, 4>}, {pipeline_mode = #tpu.pipeline_mode<synchronous>, transform_indices = @transform_13, window_bounds = array<i64: 32, 4>}, {pipeline_mode = #tpu.pipeline_mode<synchronous>, transform_indices = @transform_14, window_bounds = array<i64: 1, 4>}, {transform_indices = @transform_15, window_bounds = array<i64: 1, 16, 16, 4>}]} {
    %cst = arith.constant 0.000000e+00 : f32
    %0 = vector.broadcast %cst : f32 to vector<18x18x4xf32>
    %c0 = arith.constant 0 : index
    %c0_0 = arith.constant 0 : index
    %c0_1 = arith.constant 0 : index
    %1 = vector.load %arg17[%c0, %c0_0, %c0_1] : memref<18x18x4xf32, #tpu.memory_space<vmem>>, vector<18x18x4xf32>
    tpu.vector_store %arg17[%c0, %c0_0, %c0_1], %0 {strides = array<i32>} : memref<18x18x4xf32, #tpu.memory_space<vmem>>, vector<18x18x4xf32>,
    %cst_2 = arith.constant 0.000000e+00 : f32
    %2 = vector.broadcast %cst_2 : f32 to vector<18x18x32xf32>
    %c0_3 = arith.constant 0 : index
    %c0_4 = arith.constant 0 : index
    %c0_5 = arith.constant 0 : index
    %3 = vector.load %arg18[%c0_3, %c0_4, %c0_5] : memref<18x18x32xf32, #tpu.memory_space<vmem>>, vector<18x18x32xf32>
    tpu.vector_store %arg18[%c0_3, %c0_4, %c0_5], %2 {strides = array<i32>} : memref<18x18x32xf32, #tpu.memory_space<vmem>>, vector<18x18x32xf32>,
    %c0_6 = arith.constant 0 : index
    %c0_7 = arith.constant 0 : index
    %c0_8 = arith.constant 0 : index
    %c0_9 = arith.constant 0 : index
    %4 = vector.load %arg1[%c0_6, %c0_7, %c0_8, %c0_9] : memref<1x16x16x4xf32, #tpu.memory_space<vmem>>, vector<1x16x16x4xf32>
    %5 = vector.shape_cast %4 : vector<1x16x16x4xf32> to vector<16x16x4xf32>
    %6 = vector.shape_cast %5 : vector<16x16x4xf32> to vector<256x4xf32>
    %c1 = arith.constant 1 : index
    %c1_10 = arith.constant 1 : index
    %c0_11 = arith.constant 0 : index
    %7 = vector.load %arg17[%c1, %c1_10, %c0_11] : memref<18x18x4xf32, #tpu.memory_space<vmem>>, vector<16x16x4xf32>
    tpu.vector_store %arg17[%c1, %c1_10, %c0_11], %5 {strides = array<i32>} : memref<18x18x4xf32, #tpu.memory_space<vmem>>, vector<16x16x4xf32>,
    %c0_12 = arith.constant 0 : index
    %c0_13 = arith.constant 0 : index
    %c0_14 = arith.constant 0 : index
    %8 = vector.load %arg17[%c0_12, %c0_13, %c0_14] : memref<18x18x4xf32, #tpu.memory_space<vmem>>, vector<16x16x4xf32>
    %9 = vector.shape_cast %8 : vector<16x16x4xf32> to vector<256x4xf32>
    %c0_15 = arith.constant 0 : index
    %c1_16 = arith.constant 1 : index
    %c0_17 = arith.constant 0 : index
    %10 = vector.load %arg17[%c0_15, %c1_16, %c0_17] : memref<18x18x4xf32, #tpu.memory_space<vmem>>, vector<16x16x4xf32>
    %11 = vector.shape_cast %10 : vector<16x16x4xf32> to vector<256x4xf32>
    %c0_18 = arith.constant 0 : index
    %c2 = arith.constant 2 : index
    %c0_19 = arith.constant 0 : index
    %12 = vector.load %arg17[%c0_18, %c2, %c0_19] : memref<18x18x4xf32, #tpu.memory_space<vmem>>, vector<16x16x4xf32>
    %13 = vector.shape_cast %12 : vector<16x16x4xf32> to vector<256x4xf32>
    %c1_20 = arith.constant 1 : index
    %c0_21 = arith.constant 0 : index
    %c0_22 = arith.constant 0 : index
    %14 = vector.load %arg17[%c1_20, %c0_21, %c0_22] : memref<18x18x4xf32, #tpu.memory_space<vmem>>, vector<16x16x4xf32>
    %15 = vector.shape_cast %14 : vector<16x16x4xf32> to vector<256x4xf32>
    %c1_23 = arith.constant 1 : index
    %c1_24 = arith.constant 1 : index
    %c0_25 = arith.constant 0 : index
    %16 = vector.load %arg17[%c1_23, %c1_24, %c0_25] : memref<18x18x4xf32, #tpu.memory_space<vmem>>, vector<16x16x4xf32>
    %17 = vector.shape_cast %16 : vector<16x16x4xf32> to vector<256x4xf32>
    %c1_26 = arith.constant 1 : index
    %c2_27 = arith.constant 2 : index
    %c0_28 = arith.constant 0 : index
    %18 = vector.load %arg17[%c1_26, %c2_27, %c0_28] : memref<18x18x4xf32, #tpu.memory_space<vmem>>, vector<16x16x4xf32>
    %19 = vector.shape_cast %18 : vector<16x16x4xf32> to vector<256x4xf32>
    %c2_29 = arith.constant 2 : index
    %c0_30 = arith.constant 0 : index
    %c0_31 = arith.constant 0 : index
    %20 = vector.load %arg17[%c2_29, %c0_30, %c0_31] : memref<18x18x4xf32, #tpu.memory_space<vmem>>, vector<16x16x4xf32>
    %21 = vector.shape_cast %20 : vector<16x16x4xf32> to vector<256x4xf32>
    %c2_32 = arith.constant 2 : index
    %c1_33 = arith.constant 1 : index
    %c0_34 = arith.constant 0 : index
    %22 = vector.load %arg17[%c2_32, %c1_33, %c0_34] : memref<18x18x4xf32, #tpu.memory_space<vmem>>, vector<16x16x4xf32>
    %23 = vector.shape_cast %22 : vector<16x16x4xf32> to vector<256x4xf32>
    %c2_35 = arith.constant 2 : index
    %c2_36 = arith.constant 2 : index
    %c0_37 = arith.constant 0 : index
    %24 = vector.load %arg17[%c2_35, %c2_36, %c0_37] : memref<18x18x4xf32, #tpu.memory_space<vmem>>, vector<16x16x4xf32>
    %25 = vector.shape_cast %24 : vector<16x16x4xf32> to vector<256x4xf32>
    %26 = tpu.concatenate %9, %11, %13, %15, %17, %19, %21, %23, %25 in 1 : vector<256x4xf32>, vector<256x4xf32>, vector<256x4xf32>, vector<256x4xf32>, vector<256x4xf32>, vector<256x4xf32>, vector<256x4xf32>, vector<256x4xf32>, vector<256x4xf32> -> vector<256x36xf32>
    %c0_38 = arith.constant 0 : index
    %c0_39 = arith.constant 0 : index
    %27 = vector.load %arg2[%c0_38, %c0_39] : memref<36x32xf32, #tpu.memory_space<vmem>>, vector<36x32xf32>
    %cst_40 = arith.constant dense<0.000000e+00> : vector<256x32xf32>
    %28 = tpu.matmul %26, %27, %cst_40 {dimension_numbers = #tpu.dot_dimension_numbers<[1], [0], [0], [1], [0, 0, 1, 1], [], []>} : vector<256x36xf32>, vector<36x32xf32>, vector<256x32xf32> -> vector<256x32xf32>
    %c0_41 = arith.constant 0 : index
    %c0_42 = arith.constant 0 : index
    %29 = vector.load %arg3[%c0_41, %c0_42] : memref<1x32xf32, #tpu.memory_space<vmem>>, vector<1x32xf32>
    %30 = vector.broadcast %29 : vector<1x32xf32> to vector<256x32xf32>
    %31 = arith.addf %28, %30 : vector<256x32xf32>
    %cst_43 = arith.constant 0.000000e+00 : f32
    %32 = vector.broadcast %cst_43 : f32 to vector<256x32xf32>
    %33 = arith.cmpf oge, %31, %32 : vector<256x32xf32>
    %cst_44 = arith.constant 0.00999999977 : f32
    %34 = vector.broadcast %cst_44 : f32 to vector<256x32xf32>
    %35 = arith.mulf %34, %31 : vector<256x32xf32>
    %36 = arith.select %33, %31, %35 : vector<256x32xi1>, vector<256x32xf32>
    %c0_45 = arith.constant 0 : index
    %c0_46 = arith.constant 0 : index
    %37 = vector.load %arg10[%c0_45, %c0_46] : memref<4x4xf32, #tpu.memory_space<vmem>>, vector<4x4xf32>
    %cst_47 = arith.constant dense<0.000000e+00> : vector<256x4xf32>
    %38 = tpu.matmul %6, %37, %cst_47 {dimension_numbers = #tpu.dot_dimension_numbers<[1], [0], [0], [1], [0, 0, 1, 1], [], []>} : vector<256x4xf32>, vector<4x4xf32>, vector<256x4xf32> -> vector<256x4xf32>
    %c0_48 = arith.constant 0 : index
    %c0_49 = arith.constant 0 : index
    %39 = vector.load %arg11[%c0_48, %c0_49] : memref<32x4xf32, #tpu.memory_space<vmem>>, vector<32x4xf32>
    %cst_50 = arith.constant dense<0.000000e+00> : vector<256x4xf32>
    %40 = tpu.matmul %36, %39, %cst_50 {dimension_numbers = #tpu.dot_dimension_numbers<[1], [0], [0], [1], [0, 0, 1, 1], [], []>} : vector<256x32xf32>, vector<32x4xf32>, vector<256x4xf32> -> vector<256x4xf32>
    %41 = arith.addf %38, %40 : vector<256x4xf32>
    %42 = vector.shape_cast %36 : vector<256x32xf32> to vector<16x16x32xf32>
    %c1_51 = arith.constant 1 : index
    %c1_52 = arith.constant 1 : index
    %c0_53 = arith.constant 0 : index
    %43 = vector.load %arg18[%c1_51, %c1_52, %c0_53] : memref<18x18x32xf32, #tpu.memory_space<vmem>>, vector<16x16x32xf32>
    tpu.vector_store %arg18[%c1_51, %c1_52, %c0_53], %42 {strides = array<i32>} : memref<18x18x32xf32, #tpu.memory_space<vmem>>, vector<16x16x32xf32>,
    %c0_54 = arith.constant 0 : index
    %c0_55 = arith.constant 0 : index
    %c0_56 = arith.constant 0 : index
    %44 = vector.load %arg18[%c0_54, %c0_55, %c0_56] : memref<18x18x32xf32, #tpu.memory_space<vmem>>, vector<16x16x32xf32>
    %45 = vector.shape_cast %44 : vector<16x16x32xf32> to vector<256x32xf32>
    %c0_57 = arith.constant 0 : index
    %c1_58 = arith.constant 1 : index
    %c0_59 = arith.constant 0 : index
    %46 = vector.load %arg18[%c0_57, %c1_58, %c0_59] : memref<18x18x32xf32, #tpu.memory_space<vmem>>, vector<16x16x32xf32>
    %47 = vector.shape_cast %46 : vector<16x16x32xf32> to vector<256x32xf32>
    %c0_60 = arith.constant 0 : index
    %c2_61 = arith.constant 2 : index
    %c0_62 = arith.constant 0 : index
    %48 = vector.load %arg18[%c0_60, %c2_61, %c0_62] : memref<18x18x32xf32, #tpu.memory_space<vmem>>, vector<16x16x32xf32>
    %49 = vector.shape_cast %48 : vector<16x16x32xf32> to vector<256x32xf32>
    %c1_63 = arith.constant 1 : index
    %c0_64 = arith.constant 0 : index
    %c0_65 = arith.constant 0 : index
    %50 = vector.load %arg18[%c1_63, %c0_64, %c0_65] : memref<18x18x32xf32, #tpu.memory_space<vmem>>, vector<16x16x32xf32>
    %51 = vector.shape_cast %50 : vector<16x16x32xf32> to vector<256x32xf32>
    %c1_66 = arith.constant 1 : index
    %c1_67 = arith.constant 1 : index
    %c0_68 = arith.constant 0 : index
    %52 = vector.load %arg18[%c1_66, %c1_67, %c0_68] : memref<18x18x32xf32, #tpu.memory_space<vmem>>, vector<16x16x32xf32>
    %53 = vector.shape_cast %52 : vector<16x16x32xf32> to vector<256x32xf32>
    %c1_69 = arith.constant 1 : index
    %c2_70 = arith.constant 2 : index
    %c0_71 = arith.constant 0 : index
    %54 = vector.load %arg18[%c1_69, %c2_70, %c0_71] : memref<18x18x32xf32, #tpu.memory_space<vmem>>, vector<16x16x32xf32>
    %55 = vector.shape_cast %54 : vector<16x16x32xf32> to vector<256x32xf32>
    %c2_72 = arith.constant 2 : index
    %c0_73 = arith.constant 0 : index
    %c0_74 = arith.constant 0 : index
    %56 = vector.load %arg18[%c2_72, %c0_73, %c0_74] : memref<18x18x32xf32, #tpu.memory_space<vmem>>, vector<16x16x32xf32>
    %57 = vector.shape_cast %56 : vector<16x16x32xf32> to vector<256x32xf32>
    %c2_75 = arith.constant 2 : index
    %c1_76 = arith.constant 1 : index
    %c0_77 = arith.constant 0 : index
    %58 = vector.load %arg18[%c2_75, %c1_76, %c0_77] : memref<18x18x32xf32, #tpu.memory_space<vmem>>, vector<16x16x32xf32>
    %59 = vector.shape_cast %58 : vector<16x16x32xf32> to vector<256x32xf32>
    %c2_78 = arith.constant 2 : index
    %c2_79 = arith.constant 2 : index
    %c0_80 = arith.constant 0 : index
    %60 = vector.load %arg18[%c2_78, %c2_79, %c0_80] : memref<18x18x32xf32, #tpu.memory_space<vmem>>, vector<16x16x32xf32>
    %61 = vector.shape_cast %60 : vector<16x16x32xf32> to vector<256x32xf32>
    %62 = tpu.concatenate %45, %47, %49, %51, %53, %55, %57, %59, %61 in 1 : vector<256x32xf32>, vector<256x32xf32>, vector<256x32xf32>, vector<256x32xf32>, vector<256x32xf32>, vector<256x32xf32>, vector<256x32xf32>, vector<256x32xf32>, vector<256x32xf32> -> vector<256x288xf32>
    %c0_81 = arith.constant 0 : index
    %c0_82 = arith.constant 0 : index
    %63 = vector.load %arg4[%c0_81, %c0_82] : memref<288x32xf32, #tpu.memory_space<vmem>>, vector<288x32xf32>
    %cst_83 = arith.constant dense<0.000000e+00> : vector<256x32xf32>
    %64 = tpu.matmul %62, %63, %cst_83 {dimension_numbers = #tpu.dot_dimension_numbers<[1], [0], [0], [1], [0, 0, 1, 1], [], []>} : vector<256x288xf32>, vector<288x32xf32>, vector<256x32xf32> -> vector<256x32xf32>
    %c0_84 = arith.constant 0 : index
    %c0_85 = arith.constant 0 : index
    %65 = vector.load %arg5[%c0_84, %c0_85] : memref<1x32xf32, #tpu.memory_space<vmem>>, vector<1x32xf32>
    %66 = vector.broadcast %65 : vector<1x32xf32> to vector<256x32xf32>
    %67 = arith.addf %64, %66 : vector<256x32xf32>
    %cst_86 = arith.constant 0.000000e+00 : f32
    %68 = vector.broadcast %cst_86 : f32 to vector<256x32xf32>
    %69 = arith.cmpf oge, %67, %68 : vector<256x32xf32>
    %cst_87 = arith.constant 0.00999999977 : f32
    %70 = vector.broadcast %cst_87 : f32 to vector<256x32xf32>
    %71 = arith.mulf %70, %67 : vector<256x32xf32>
    %72 = arith.select %69, %67, %71 : vector<256x32xi1>, vector<256x32xf32>
    %c0_88 = arith.constant 0 : index
    %c0_89 = arith.constant 0 : index
    %73 = vector.load %arg12[%c0_88, %c0_89] : memref<32x4xf32, #tpu.memory_space<vmem>>, vector<32x4xf32>
    %cst_90 = arith.constant dense<0.000000e+00> : vector<256x4xf32>
    %74 = tpu.matmul %72, %73, %cst_90 {dimension_numbers = #tpu.dot_dimension_numbers<[1], [0], [0], [1], [0, 0, 1, 1], [], []>} : vector<256x32xf32>, vector<32x4xf32>, vector<256x4xf32> -> vector<256x4xf32>
    %75 = arith.addf %41, %74 : vector<256x4xf32>
    %76 = vector.shape_cast %72 : vector<256x32xf32> to vector<16x16x32xf32>
    %c1_91 = arith.constant 1 : index
    %c1_92 = arith.constant 1 : index
    %c0_93 = arith.constant 0 : index
    %77 = vector.load %arg18[%c1_91, %c1_92, %c0_93] : memref<18x18x32xf32, #tpu.memory_space<vmem>>, vector<16x16x32xf32>
    tpu.vector_store %arg18[%c1_91, %c1_92, %c0_93], %76 {strides = array<i32>} : memref<18x18x32xf32, #tpu.memory_space<vmem>>, vector<16x16x32xf32>,
    %c0_94 = arith.constant 0 : index
    %c0_95 = arith.constant 0 : index
    %c0_96 = arith.constant 0 : index
    %78 = vector.load %arg18[%c0_94, %c0_95, %c0_96] : memref<18x18x32xf32, #tpu.memory_space<vmem>>, vector<16x16x32xf32>
    %79 = vector.shape_cast %78 : vector<16x16x32xf32> to vector<256x32xf32>
    %c0_97 = arith.constant 0 : index
    %c1_98 = arith.constant 1 : index
    %c0_99 = arith.constant 0 : index
    %80 = vector.load %arg18[%c0_97, %c1_98, %c0_99] : memref<18x18x32xf32, #tpu.memory_space<vmem>>, vector<16x16x32xf32>
    %81 = vector.shape_cast %80 : vector<16x16x32xf32> to vector<256x32xf32>
    %c0_100 = arith.constant 0 : index
    %c2_101 = arith.constant 2 : index
    %c0_102 = arith.constant 0 : index
    %82 = vector.load %arg18[%c0_100, %c2_101, %c0_102] : memref<18x18x32xf32, #tpu.memory_space<vmem>>, vector<16x16x32xf32>
    %83 = vector.shape_cast %82 : vector<16x16x32xf32> to vector<256x32xf32>
    %c1_103 = arith.constant 1 : index
    %c0_104 = arith.constant 0 : index
    %c0_105 = arith.constant 0 : index
    %84 = vector.load %arg18[%c1_103, %c0_104, %c0_105] : memref<18x18x32xf32, #tpu.memory_space<vmem>>, vector<16x16x32xf32>
    %85 = vector.shape_cast %84 : vector<16x16x32xf32> to vector<256x32xf32>
    %c1_106 = arith.constant 1 : index
    %c1_107 = arith.constant 1 : index
    %c0_108 = arith.constant 0 : index
    %86 = vector.load %arg18[%c1_106, %c1_107, %c0_108] : memref<18x18x32xf32, #tpu.memory_space<vmem>>, vector<16x16x32xf32>
    %87 = vector.shape_cast %86 : vector<16x16x32xf32> to vector<256x32xf32>
    %c1_109 = arith.constant 1 : index
    %c2_110 = arith.constant 2 : index
    %c0_111 = arith.constant 0 : index
    %88 = vector.load %arg18[%c1_109, %c2_110, %c0_111] : memref<18x18x32xf32, #tpu.memory_space<vmem>>, vector<16x16x32xf32>
    %89 = vector.shape_cast %88 : vector<16x16x32xf32> to vector<256x32xf32>
    %c2_112 = arith.constant 2 : index
    %c0_113 = arith.constant 0 : index
    %c0_114 = arith.constant 0 : index
    %90 = vector.load %arg18[%c2_112, %c0_113, %c0_114] : memref<18x18x32xf32, #tpu.memory_space<vmem>>, vector<16x16x32xf32>
    %91 = vector.shape_cast %90 : vector<16x16x32xf32> to vector<256x32xf32>
    %c2_115 = arith.constant 2 : index
    %c1_116 = arith.constant 1 : index
    %c0_117 = arith.constant 0 : index
    %92 = vector.load %arg18[%c2_115, %c1_116, %c0_117] : memref<18x18x32xf32, #tpu.memory_space<vmem>>, vector<16x16x32xf32>
    %93 = vector.shape_cast %92 : vector<16x16x32xf32> to vector<256x32xf32>
    %c2_118 = arith.constant 2 : index
    %c2_119 = arith.constant 2 : index
    %c0_120 = arith.constant 0 : index
    %94 = vector.load %arg18[%c2_118, %c2_119, %c0_120] : memref<18x18x32xf32, #tpu.memory_space<vmem>>, vector<16x16x32xf32>
    %95 = vector.shape_cast %94 : vector<16x16x32xf32> to vector<256x32xf32>
    %96 = tpu.concatenate %79, %81, %83, %85, %87, %89, %91, %93, %95 in 1 : vector<256x32xf32>, vector<256x32xf32>, vector<256x32xf32>, vector<256x32xf32>, vector<256x32xf32>, vector<256x32xf32>, vector<256x32xf32>, vector<256x32xf32>, vector<256x32xf32> -> vector<256x288xf32>
    %c0_121 = arith.constant 0 : index
    %c0_122 = arith.constant 0 : index
    %97 = vector.load %arg6[%c0_121, %c0_122] : memref<288x32xf32, #tpu.memory_space<vmem>>, vector<288x32xf32>
    %cst_123 = arith.constant dense<0.000000e+00> : vector<256x32xf32>
    %98 = tpu.matmul %96, %97, %cst_123 {dimension_numbers = #tpu.dot_dimension_numbers<[1], [0], [0], [1], [0, 0, 1, 1], [], []>} : vector<256x288xf32>, vector<288x32xf32>, vector<256x32xf32> -> vector<256x32xf32>
    %c0_124 = arith.constant 0 : index
    %c0_125 = arith.constant 0 : index
    %99 = vector.load %arg7[%c0_124, %c0_125] : memref<1x32xf32, #tpu.memory_space<vmem>>, vector<1x32xf32>
    %100 = vector.broadcast %99 : vector<1x32xf32> to vector<256x32xf32>
    %101 = arith.addf %98, %100 : vector<256x32xf32>
    %cst_126 = arith.constant 0.000000e+00 : f32
    %102 = vector.broadcast %cst_126 : f32 to vector<256x32xf32>
    %103 = arith.cmpf oge, %101, %102 : vector<256x32xf32>
    %cst_127 = arith.constant 0.00999999977 : f32
    %104 = vector.broadcast %cst_127 : f32 to vector<256x32xf32>
    %105 = arith.mulf %104, %101 : vector<256x32xf32>
    %106 = arith.select %103, %101, %105 : vector<256x32xi1>, vector<256x32xf32>
    %c0_128 = arith.constant 0 : index
    %c0_129 = arith.constant 0 : index
    %107 = vector.load %arg13[%c0_128, %c0_129] : memref<32x4xf32, #tpu.memory_space<vmem>>, vector<32x4xf32>
    %cst_130 = arith.constant dense<0.000000e+00> : vector<256x4xf32>
    %108 = tpu.matmul %106, %107, %cst_130 {dimension_numbers = #tpu.dot_dimension_numbers<[1], [0], [0], [1], [0, 0, 1, 1], [], []>} : vector<256x32xf32>, vector<32x4xf32>, vector<256x4xf32> -> vector<256x4xf32>
    %109 = arith.addf %75, %108 : vector<256x4xf32>
    %110 = vector.shape_cast %106 : vector<256x32xf32> to vector<16x16x32xf32>
    %c1_131 = arith.constant 1 : index
    %c1_132 = arith.constant 1 : index
    %c0_133 = arith.constant 0 : index
    %111 = vector.load %arg18[%c1_131, %c1_132, %c0_133] : memref<18x18x32xf32, #tpu.memory_space<vmem>>, vector<16x16x32xf32>
    tpu.vector_store %arg18[%c1_131, %c1_132, %c0_133], %110 {strides = array<i32>} : memref<18x18x32xf32, #tpu.memory_space<vmem>>, vector<16x16x32xf32>,
    %c0_134 = arith.constant 0 : index
    %c0_135 = arith.constant 0 : index
    %c0_136 = arith.constant 0 : index
    %112 = vector.load %arg18[%c0_134, %c0_135, %c0_136] : memref<18x18x32xf32, #tpu.memory_space<vmem>>, vector<16x16x32xf32>
    %113 = vector.shape_cast %112 : vector<16x16x32xf32> to vector<256x32xf32>
    %c0_137 = arith.constant 0 : index
    %c1_138 = arith.constant 1 : index
    %c0_139 = arith.constant 0 : index
    %114 = vector.load %arg18[%c0_137, %c1_138, %c0_139] : memref<18x18x32xf32, #tpu.memory_space<vmem>>, vector<16x16x32xf32>
    %115 = vector.shape_cast %114 : vector<16x16x32xf32> to vector<256x32xf32>
    %c0_140 = arith.constant 0 : index
    %c2_141 = arith.constant 2 : index
    %c0_142 = arith.constant 0 : index
    %116 = vector.load %arg18[%c0_140, %c2_141, %c0_142] : memref<18x18x32xf32, #tpu.memory_space<vmem>>, vector<16x16x32xf32>
    %117 = vector.shape_cast %116 : vector<16x16x32xf32> to vector<256x32xf32>
    %c1_143 = arith.constant 1 : index
    %c0_144 = arith.constant 0 : index
    %c0_145 = arith.constant 0 : index
    %118 = vector.load %arg18[%c1_143, %c0_144, %c0_145] : memref<18x18x32xf32, #tpu.memory_space<vmem>>, vector<16x16x32xf32>
    %119 = vector.shape_cast %118 : vector<16x16x32xf32> to vector<256x32xf32>
    %c1_146 = arith.constant 1 : index
    %c1_147 = arith.constant 1 : index
    %c0_148 = arith.constant 0 : index
    %120 = vector.load %arg18[%c1_146, %c1_147, %c0_148] : memref<18x18x32xf32, #tpu.memory_space<vmem>>, vector<16x16x32xf32>
    %121 = vector.shape_cast %120 : vector<16x16x32xf32> to vector<256x32xf32>
    %c1_149 = arith.constant 1 : index
    %c2_150 = arith.constant 2 : index
    %c0_151 = arith.constant 0 : index
    %122 = vector.load %arg18[%c1_149, %c2_150, %c0_151] : memref<18x18x32xf32, #tpu.memory_space<vmem>>, vector<16x16x32xf32>
    %123 = vector.shape_cast %122 : vector<16x16x32xf32> to vector<256x32xf32>
    %c2_152 = arith.constant 2 : index
    %c0_153 = arith.constant 0 : index
    %c0_154 = arith.constant 0 : index
    %124 = vector.load %arg18[%c2_152, %c0_153, %c0_154] : memref<18x18x32xf32, #tpu.memory_space<vmem>>, vector<16x16x32xf32>
    %125 = vector.shape_cast %124 : vector<16x16x32xf32> to vector<256x32xf32>
    %c2_155 = arith.constant 2 : index
    %c1_156 = arith.constant 1 : index
    %c0_157 = arith.constant 0 : index
    %126 = vector.load %arg18[%c2_155, %c1_156, %c0_157] : memref<18x18x32xf32, #tpu.memory_space<vmem>>, vector<16x16x32xf32>
    %127 = vector.shape_cast %126 : vector<16x16x32xf32> to vector<256x32xf32>
    %c2_158 = arith.constant 2 : index
    %c2_159 = arith.constant 2 : index
    %c0_160 = arith.constant 0 : index
    %128 = vector.load %arg18[%c2_158, %c2_159, %c0_160] : memref<18x18x32xf32, #tpu.memory_space<vmem>>, vector<16x16x32xf32>
    %129 = vector.shape_cast %128 : vector<16x16x32xf32> to vector<256x32xf32>
    %130 = tpu.concatenate %113, %115, %117, %119, %121, %123, %125, %127, %129 in 1 : vector<256x32xf32>, vector<256x32xf32>, vector<256x32xf32>, vector<256x32xf32>, vector<256x32xf32>, vector<256x32xf32>, vector<256x32xf32>, vector<256x32xf32>, vector<256x32xf32> -> vector<256x288xf32>
    %c0_161 = arith.constant 0 : index
    %c0_162 = arith.constant 0 : index
    %131 = vector.load %arg8[%c0_161, %c0_162] : memref<288x32xf32, #tpu.memory_space<vmem>>, vector<288x32xf32>
    %cst_163 = arith.constant dense<0.000000e+00> : vector<256x32xf32>
    %132 = tpu.matmul %130, %131, %cst_163 {dimension_numbers = #tpu.dot_dimension_numbers<[1], [0], [0], [1], [0, 0, 1, 1], [], []>} : vector<256x288xf32>, vector<288x32xf32>, vector<256x32xf32> -> vector<256x32xf32>
    %c0_164 = arith.constant 0 : index
    %c0_165 = arith.constant 0 : index
    %133 = vector.load %arg9[%c0_164, %c0_165] : memref<1x32xf32, #tpu.memory_space<vmem>>, vector<1x32xf32>
    %134 = vector.broadcast %133 : vector<1x32xf32> to vector<256x32xf32>
    %135 = arith.addf %132, %134 : vector<256x32xf32>
    %cst_166 = arith.constant 0.000000e+00 : f32
    %136 = vector.broadcast %cst_166 : f32 to vector<256x32xf32>
    %137 = arith.cmpf oge, %135, %136 : vector<256x32xf32>
    %cst_167 = arith.constant 0.00999999977 : f32
    %138 = vector.broadcast %cst_167 : f32 to vector<256x32xf32>
    %139 = arith.mulf %138, %135 : vector<256x32xf32>
    %140 = arith.select %137, %135, %139 : vector<256x32xi1>, vector<256x32xf32>
    %c0_168 = arith.constant 0 : index
    %c0_169 = arith.constant 0 : index
    %141 = vector.load %arg14[%c0_168, %c0_169] : memref<32x4xf32, #tpu.memory_space<vmem>>, vector<32x4xf32>
    %cst_170 = arith.constant dense<0.000000e+00> : vector<256x4xf32>
    %142 = tpu.matmul %140, %141, %cst_170 {dimension_numbers = #tpu.dot_dimension_numbers<[1], [0], [0], [1], [0, 0, 1, 1], [], []>} : vector<256x32xf32>, vector<32x4xf32>, vector<256x4xf32> -> vector<256x4xf32>
    %143 = arith.addf %109, %142 : vector<256x4xf32>
    %c0_171 = arith.constant 0 : index
    %c0_172 = arith.constant 0 : index
    %144 = vector.load %arg15[%c0_171, %c0_172] : memref<1x4xf32, #tpu.memory_space<vmem>>, vector<1x4xf32>
    %145 = vector.broadcast %144 : vector<1x4xf32> to vector<256x4xf32>
    %146 = arith.addf %143, %145 : vector<256x4xf32>
    %147 = vector.shape_cast %146 : vector<256x4xf32> to vector<16x16x4xf32>
    %c0_173 = arith.constant 0 : index
    %c0_174 = arith.constant 0 : index
    %c0_175 = arith.constant 0 : index
    %c0_176 = arith.constant 0 : index
    %148 = vector.load %arg16[%c0_173, %c0_174, %c0_175, %c0_176] : memref<1x16x16x4xf32, #tpu.memory_space<vmem>>, vector<1x16x16x4xf32>
    %149 = vector.shape_cast %148 : vector<1x16x16x4xf32> to vector<16x16x4xf32>
    %150 = vector.shape_cast %147 : vector<16x16x4xf32> to vector<1x16x16x4xf32>
    tpu.vector_store %arg16[%c0_173, %c0_174, %c0_175, %c0_176], %150 {strides = array<i32>} : memref<1x16x16x4xf32, #tpu.memory_space<vmem>>, vector<1x16x16x4xf32>,
    return
  }
  func.func @transform_0(%arg0: i32) -> (i32, i32, i32, i32) {
    %c0_i32 = arith.constant 0 : i32
    %c0_i32_0 = arith.constant 0 : i32
    %c0_i32_1 = arith.constant 0 : i32
    %c0_i32_2 = arith.constant 0 : i32
    return %arg0, %c0_i32, %c0_i32_0, %c0_i32_1 : i32, i32, i32, i32
  }
  func.func @transform_1(%arg0: i32) -> (i32, i32) {
    %c0_i32 = arith.constant 0 : i32
    %c0_i32_0 = arith.constant 0 : i32
    %c0_i32_1 = arith.constant 0 : i32
    return %c0_i32, %c0_i32_0 : i32, i32
  }
  func.func @transform_2(%arg0: i32) -> (i32, i32) {
    %c0_i32 = arith.constant 0 : i32
    %c0_i32_0 = arith.constant 0 : i32
    %c0_i32_1 = arith.constant 0 : i32
    return %c0_i32, %c0_i32_0 : i32, i32
  }
  func.func @transform_3(%arg0: i32) -> (i32, i32) {
    %c0_i32 = arith.constant 0 : i32
    %c0_i32_0 = arith.constant 0 : i32
    %c0_i32_1 = arith.constant 0 : i32
    return %c0_i32, %c0_i32_0 : i32, i32
  }
  func.func @transform_4(%arg0: i32) -> (i32, i32) {
    %c0_i32 = arith.constant 0 : i32
    %c0_i32_0 = arith.constant 0 : i32
    %c0_i32_1 = arith.constant 0 : i32
    return %c0_i32, %c0_i32_0 : i32, i32
  }
  func.func @transform_5(%arg0: i32) -> (i32, i32) {
    %c0_i32 = arith.constant 0 : i32
    %c0_i32_0 = arith.constant 0 : i32
    %c0_i32_1 = arith.constant 0 : i32
    return %c0_i32, %c0_i32_0 : i32, i32
  }
  func.func @transform_6(%arg0: i32) -> (i32, i32) {
    %c0_i32 = arith.constant 0 : i32
    %c0_i32_0 = arith.constant 0 : i32
    %c0_i32_1 = arith.constant 0 : i32
    return %c0_i32, %c0_i32_0 : i32, i32
  }
  func.func @transform_7(%arg0: i32) -> (i32, i32) {
    %c0_i32 = arith.constant 0 : i32
    %c0_i32_0 = arith.constant 0 : i32
    %c0_i32_1 = arith.constant 0 : i32
    return %c0_i32, %c0_i32_0 : i32, i32
  }
  func.func @transform_8(%arg0: i32) -> (i32, i32) {
    %c0_i32 = arith.constant 0 : i32
    %c0_i32_0 = arith.constant 0 : i32
    %c0_i32_1 = arith.constant 0 : i32
    return %c0_i32, %c0_i32_0 : i32, i32
  }
  func.func @transform_9(%arg0: i32) -> (i32, i32) {
    %c0_i32 = arith.constant 0 : i32
    %c0_i32_0 = arith.constant 0 : i32
    %c0_i32_1 = arith.constant 0 : i32
    return %c0_i32, %c0_i32_0 : i32, i32
  }
  func.func @transform_10(%arg0: i32) -> (i32, i32) {
    %c0_i32 = arith.constant 0 : i32
    %c0_i32_0 = arith.constant 0 : i32
    %c0_i32_1 = arith.constant 0 : i32
    return %c0_i32, %c0_i32_0 : i32, i32
  }
  func.func @transform_11(%arg0: i32) -> (i32, i32) {
    %c0_i32 = arith.constant 0 : i32
    %c0_i32_0 = arith.constant 0 : i32
    %c0_i32_1 = arith.constant 0 : i32
    return %c0_i32, %c0_i32_0 : i32, i32
  }
  func.func @transform_12(%arg0: i32) -> (i32, i32) {
    %c0_i32 = arith.constant 0 : i32
    %c0_i32_0 = arith.constant 0 : i32
    %c0_i32_1 = arith.constant 0 : i32
    return %c0_i32, %c0_i32_0 : i32, i32
  }
  func.func @transform_13(%arg0: i32) -> (i32, i32) {
    %c0_i32 = arith.constant 0 : i32
    %c0_i32_0 = arith.constant 0 : i32
    %c0_i32_1 = arith.constant 0 : i32
    return %c0_i32, %c0_i32_0 : i32, i32
  }
  func.func @transform_14(%arg0: i32) -> (i32, i32) {
    %c0_i32 = arith.constant 0 : i32
    %c0_i32_0 = arith.constant 0 : i32
    %c0_i32_1 = arith.constant 0 : i32
    return %c0_i32, %c0_i32_0 : i32, i32
  }
  func.func @transform_15(%arg0: i32) -> (i32, i32, i32, i32) {
    %c0_i32 = arith.constant 0 : i32
    %c0_i32_0 = arith.constant 0 : i32
    %c0_i32_1 = arith.constant 0 : i32
    %c0_i32_2 = arith.constant 0 : i32
    return %arg0, %c0_i32, %c0_i32_0, %c0_i32_1 : i32, i32, i32, i32
  }
}

</mosaic_0001>

<bundles_post_ra>
// kernel: rdb_forward.1
= control target key start
LH: loop header
LB: loop body
LE: loop exit
PB: predicated region body
PF: predicated region fallthrough
CT: control target
= control target key end

     0   :  { %s13468_s18 = smov 0   ;;  %s18275_s0 = inlined_call_operand.vmem [shape: f32[2,16,16,4], index: 0, kind: input, shape index: {}]   ;;  %s18276_s1 = inlined_call_operand.vmem [shape: f32[36,32], index: 1, kind: input, shape index: {}]   ;;  %s18277_s2 = inlined_call_operand.vmem [shape: f32[1,32], index: 2, kind: input, shape index: {}]   ;;  %s18278_s3 = inlined_call_operand.vmem [shape: f32[288,32], index: 3, kind: input, shape index: {}]   ;;  %s18279_s4 = inlined_call_operand.vmem [shape: f32[1,32], index: 4, kind: input, shape index: {}]   ;;  %s18280_s5 = inlined_call_operand.vmem [shape: f32[288,32], index: 5, kind: input, shape index: {}]   ;;  %s18281_s6 = inlined_call_operand.vmem [shape: f32[1,32], index: 6, kind: input, shape index: {}]   ;;  %s18282_s7 = inlined_call_operand.vmem [shape: f32[288,32], index: 7, kind: input, shape index: {}]   ;;  %s18283_s8 = inlined_call_operand.vmem [shape: f32[1,32], index: 8, kind: input, shape index: {}]   ;;  %s18284_s9 = inlined_call_operand.vmem [shape: f32[4,4], index: 9, kind: input, shape index: {}]   ;;  %s18285_s10 = inlined_call_operand.vmem [shape: f32[32,4], index: 10, kind: input, shape index: {}]   ;;  %s18286_s11 = inlined_call_operand.vmem [shape: f32[32,4], index: 11, kind: input, shape index: {}]   ;;  %s18287_s12 = inlined_call_operand.vmem [shape: f32[32,4], index: 12, kind: input, shape index: {}]   ;;  %s18288_s13 = inlined_call_operand.vmem [shape: f32[32,4], index: 13, kind: input, shape index: {}]   ;;  %s18289_s14 = inlined_call_operand.vmem [shape: f32[1,4], index: 14, kind: input, shape index: {}]   ;;  %s18290_s15 = inlined_call_operand.vmem [shape: f32[2,16,16,4], index: 15, kind: output, shape index: {}]  }
   0x1 LB: > { %s10427_s19 = sadd.s32 4294967295, %s13374_s18   ;;  %p10431_p0 = scmp.ge.s32.totalorder %s13374_s18, 1  ;;  %s13374_s18 = sphi %s13468_s18, %s25_s18  }
   0x2   : > { %p437_p1 = scmp.lt.s32.totalorder %s13374_s18, 3 }
   0x4   : > { %p438_p2 = pnand %p10431_p0, %p437_p1 }
   0x6   : > { %441 = sbr.rel (%p438_p2) target bundleno = 2360 (0x938), region = 80 }
   0xd   : > { %vm495_vm0 = vcmask 31744   ;;  %vm498_vm1 = vcmask 25600   ;;  %p13478_p3 = scmp.lt.s32.totalorder %s10427_s19, 1  ;;  %v18291_v0 = vmov 0.0   ;;  %s13377_s25 = smov 4   ;;  %v2247_v48 = vld [vmem:[%s18276_s1] sm:$0xff] }
   0xe   : > { %496 = vst.msk [vmem:[#allocation2] sm:$0xff] %vm495_vm0, %v18291_v0  ;;  %497 = vst.msk [vmem:[#allocation2 + $0x8] sm:$0xff] %vm495_vm0, %v18291_v0  ;;  %s13378_s26 = smov 8   ;;  %s13379_s27 = smov 12   ;;  %v2248_v49 = vld [vmem:[%s18276_s1 + $0x8] sm:$0xff]  ;;  %vm551_vm2 = vcmask 261120  }
   0xf   : > { %500 = vst.msk [vmem:[#allocation2 + $0x18] sm:$0xff] %vm495_vm0, %v18291_v0  ;;  %501 = vst.msk [vmem:[#allocation2 + $0x20] sm:$0xff] %vm495_vm0, %v18291_v0  ;;  %s18358_s19 = smov (!%p13478_p3, %s10427_s19), 1  ;;  %s13380_s28 = smov 16   ;;  %v11557_v50 = vpack.c.bf16 %v2248_v49, %v2247_v48  ;;  %v2249_v51 = vld [vmem:[%s18276_s1 + $0x10] sm:$0xff]  ;;  %v2250_v52 = vld [vmem:[%s18276_s1 + $0x18] sm:$0xff] }
  0x10   : > { %503 = vst.msk [vmem:[#allocation2 + $0x30] sm:$0xff] %vm495_vm0, %v18291_v0  ;;  %504 = vst.msk [vmem:[#allocation2 + $0x38] sm:$0xff] %vm495_vm0, %v18291_v0  ;;  %s18312_s21 = sshll.u32 %s18358_s19, 8  ;;  %s13381_s29 = smov 20   ;;  %v11561_v53 = vpack.c.bf16 %v2250_v52, %v2249_v51  ;;  %v2251_v55 = vld [vmem:[%s18276_s1 + $0x20] sm:$0xf] }
  0x11   : > { %506 = vst.msk [vmem:[#allocation2 + $0x48] sm:$0xff] %vm495_vm0, %v18291_v0  ;;  %507 = vst.msk [vmem:[#allocation2 + $0x50] sm:$0xff] %vm495_vm0, %v18291_v0  ;;  %s13602_s24 = scalar_lea.vmem %s18275_s0, %s18312_s21  ;;  %s13382_s30 = smov 24   ;;  %11558 = vmatprep.subr.bf16.mxu0 %v11557_v50  ;;  %vm2356_vm3 = vcmask 1043456   ;;  %vm2017_vm4 = vcmask 64512   ;;  %vm2050_vm5 = vcmask 97280  }
  0x12   : > { %509 = vst.msk [vmem:[#allocation2 + $0x60] sm:$0xff] %vm495_vm0, %v18291_v0  ;;  %510 = vst.msk [vmem:[#allocation2 + $0x68] sm:$0xff] %vm495_vm0, %v18291_v0  ;;  %v13605_v1 = vld [vmem:[%s13602_s24] sm:$0xff]  ;;  %v13608_v2 = vld [vmem:[%s13602_s24 + $0x10] sm:$0xff]  ;;  %11560 = vmatpush3.bf16.msra.mxu0 %v11557_v50  ;;  %s18313_s22 = smov 28   ;;  %s13384_s17 = smov 32  }
  0x13   : > { %512 = vst.msk [vmem:[#allocation2 + $0x78] sm:$0xff] %vm495_vm0, %v18291_v0  ;;  %513 = vst.msk [vmem:[#allocation2 + $0x80] sm:$0xff] %vm495_vm0, %v18291_v0  ;;  %v13611_v3 = vld [vmem:[%s13602_s24 + $0x8] sm:$0xff]  ;;  %v13620_v4 = vld [vmem:[%s13602_s24 + $0x20] sm:$0xff]  ;;  %11562 = vmatprep.subr.bf16.mxu0 %v11561_v53  ;;  %vm2116_vm6 = vcmask 162816   ;;  %vm2083_vm7 = vcmask 130048  }
  0x14   : > { %515 = vst.msk [vmem:[#allocation2 + $0x90] sm:$0xff] %vm495_vm0, %v18291_v0  ;;  %516 = vst.msk [vmem:[#allocation2 + $0x98] sm:$0xff] %vm495_vm0, %v18291_v0  ;;  %v13623_v5 = vld [vmem:[%s13602_s24 + $0x18] sm:$0xff]  ;;  %v13626_v6 = vld [vmem:[%s13602_s24 + $0x30] sm:$0xff]  ;;  %vm2149_vm8 = vcmask 195584   ;;  %vm2182_vm9 = vcmask 228352  }
  0x15   : > { %518 = vst.msk [vmem:[#allocation2 + $0xa8] sm:$0xff] %vm495_vm0, %v18291_v0  ;;  %519 = vst.msk [vmem:[#allocation2 + $0xb0] sm:$0xff] %vm495_vm0, %v18291_v0  ;;  %v704_v7 = vld [vmem:[#allocation2 + $0x1] sm:$0xff]  ;;  %v13644_v11 = vld [vmem:[%s13602_s24 + $0x38] sm:$0xff]  ;;  %vm2259_vm10 = vcmask 293888   ;;  %vm554_vm11 = vcmask 254976  }
  0x16   : > { %521 = vst.msk [vmem:[#allocation2 + $0xc0] sm:$0xff] %vm495_vm0, %v18291_v0  ;;  %522 = vst.msk [vmem:[#allocation2 + $0xc8] sm:$0xff] %vm495_vm0, %v18291_v0  ;;  %v13635_v9 = vld [vmem:[%s13602_s24 + $0x28] sm:$0xff]  ;;  %993 = vrot.lane.b32.xlu0 %v704_v7, %s13377_s25  ;;  %v13641_v10 = vld [vmem:[%s13602_s24 + $0x40] sm:$0xff]  ;;  %11564 = vmatpush3.bf16.msra.mxu0 %v11561_v53 }
  0x17   : > { %524 = vst.msk [vmem:[#allocation2 + $0xd8] sm:$0xff] %vm495_vm0, %v18291_v0  ;;  %525 = vst.msk [vmem:[#allocation2 + $0xe0] sm:$0xff] %vm495_vm0, %v18291_v0  ;;  %v13647_v12 = vld [vmem:[%s13602_s24 + $0x50] sm:$0xff]  ;;  %v13656_v13 = vld [vmem:[%s13602_s24 + $0x48] sm:$0xff]  ;;  %11065 = vmatprep.subr.msk.mxu0 %vm2356_vm3, %v2251_v55 }
  0x18   : > { %527 = vst.msk [vmem:[#allocation2 + $0xf0] sm:$0xff] %vm495_vm0, %v18291_v0  ;;  %528 = vst.msk [vmem:[#allocation2 + $0xf8] sm:$0xff] %vm495_vm0, %v18291_v0  ;;  %v13659_v14 = vld [vmem:[%s13602_s24 + $0x60] sm:$0xff]  ;;  %v13662_v15 = vld [vmem:[%s13602_s24 + $0x58] sm:$0xff] }
  0x19   : > { %530 = vst.msk [vmem:[#allocation2 + $0x108] sm:$0xff] %vm495_vm0, %v18291_v0  ;;  %531 = vst.msk [vmem:[#allocation2 + $0x110] sm:$0xff] %vm495_vm0, %v18291_v0  ;;  %v13671_v16 = vld [vmem:[%s13602_s24 + $0x70] sm:$0xff]  ;;  %v13674_v17 = vld [vmem:[%s13602_s24 + $0x68] sm:$0xff] }
  0x1a   : > { %533 = vst.msk [vmem:[#allocation2 + $0x120] sm:$0xff] %vm495_vm0, %v18291_v0  ;;  %534 = vst.msk [vmem:[#allocation2 + $0x128] sm:$0xff] %vm495_vm0, %v18291_v0  ;;  %v13677_v18 = vld [vmem:[%s13602_s24 + $0x80] sm:$0xff]  ;;  %v13686_v19 = vld [vmem:[%s13602_s24 + $0x78] sm:$0xff]  ;;  %11066 = vmatpush3.msk.msra.mxu0 %vm2356_vm3, %v2251_v55 }
  0x1b   : > { %536 = vst.msk [vmem:[#allocation2 + $0x138] sm:$0xff] %vm495_vm0, %v18291_v0  ;;  %537 = vst.msk [vmem:[#allocation2 + $0x140] sm:$0xff] %vm495_vm0, %v18291_v0  ;;  %v13689_v20 = vld [vmem:[%s13602_s24 + $0x90] sm:$0xff]  ;;  %v13692_v21 = vld [vmem:[%s13602_s24 + $0x88] sm:$0xff] }
  0x1c   : > { %539 = vst.msk [vmem:[#allocation2 + $0x150] sm:$0xff] %vm495_vm0, %v18291_v0  ;;  %540 = vst.msk [vmem:[#allocation2 + $0x158] sm:$0xff] %vm495_vm0, %v18291_v0  ;;  %v736_v42 = vld [vmem:[#allocation2 + $0x2] sm:$0xff] }
  0x1d   : > { %542 = vst.msk [vmem:[#allocation2 + $0x168] sm:$0xff] %vm495_vm0, %v18291_v0  ;;  %543 = vst.msk [vmem:[#allocation2 + $0x170] sm:$0xff] %vm495_vm0, %v18291_v0 }
  0x1e   : > { %545 = vst.msk [vmem:[#allocation2 + $0x180] sm:$0xff] %vm495_vm0, %v18291_v0  ;;  %546 = vst.msk [vmem:[#allocation2 + $0x188] sm:$0xff] %vm495_vm0, %v18291_v0 }
  0x1f   : > { %548 = vst.msk [vmem:[#allocation2 + $0x198] sm:$0xff] %vm495_vm0, %v18291_v0  ;;  %549 = vst.msk [vmem:[#allocation2 + $0x1a0] sm:$0xff] %vm495_vm0, %v18291_v0 }
  0x20   : > { %499 = vst.msk [vmem:[#allocation2 + $0x10] sm:$0x3] %vm498_vm1, %v18291_v0  ;;  %502 = vst.msk [vmem:[#allocation2 + $0x28] sm:$0x3] %vm498_vm1, %v18291_v0 }
  0x21   : > { %505 = vst.msk [vmem:[#allocation2 + $0x40] sm:$0x3] %vm498_vm1, %v18291_v0  ;;  %508 = vst.msk [vmem:[#allocation2 + $0x58] sm:$0x3] %vm498_vm1, %v18291_v0 }
  0x22   : > { %511 = vst.msk [vmem:[#allocation2 + $0x70] sm:$0x3] %vm498_vm1, %v18291_v0  ;;  %514 = vst.msk [vmem:[#allocation2 + $0x88] sm:$0x3] %vm498_vm1, %v18291_v0 }
  0x23   : > { %517 = vst.msk [vmem:[#allocation2 + $0xa0] sm:$0x3] %vm498_vm1, %v18291_v0  ;;  %520 = vst.msk [vmem:[#allocation2 + $0xb8] sm:$0x3] %vm498_vm1, %v18291_v0 }
  0x24   : > { %523 = vst.msk [vmem:[#allocation2 + $0xd0] sm:$0x3] %vm498_vm1, %v18291_v0  ;;  %526 = vst.msk [vmem:[#allocation2 + $0xe8] sm:$0x3] %vm498_vm1, %v18291_v0 }
  0x25   : > { %529 = vst.msk [vmem:[#allocation2 + $0x100] sm:$0x3] %vm498_vm1, %v18291_v0  ;;  %532 = vst.msk [vmem:[#allocation2 + $0x118] sm:$0x3] %vm498_vm1, %v18291_v0 }
  0x26   : > { %535 = vst.msk [vmem:[#allocation2 + $0x130] sm:$0x3] %vm498_vm1, %v18291_v0  ;;  %538 = vst.msk [vmem:[#allocation2 + $0x148] sm:$0x3] %vm498_vm1, %v18291_v0 }
  0x27   : > { %541 = vst.msk [vmem:[#allocation2 + $0x160] sm:$0x3] %vm498_vm1, %v18291_v0  ;;  %544 = vst.msk [vmem:[#allocation2 + $0x178] sm:$0x3] %vm498_vm1, %v18291_v0  ;;  %v705_v8 = vld [vmem:[#allocation2 + $0x9] sm:$0xff] }
  0x28   : > { %547 = vst.msk [vmem:[#allocation2 + $0x190] sm:$0x3] %vm498_vm1, %v18291_v0  ;;  %550 = vst.msk [vmem:[#allocation2 + $0x1a8] sm:$0x3] %vm498_vm1, %v18291_v0  ;;  %995 = vrot.lane.b32.xlu0 %v705_v8, %s13377_s25  ;;  %v737_v41 = vld [vmem:[#allocation2 + $0xa] sm:$0xff] }
  0x29   : > { %640 = vst.msk [vmem:[#allocation2 + $0x19] sm:$0xff] %vm495_vm0, %v13605_v1  ;;  %642 = vst.msk [vmem:[#allocation2 + $0x31] sm:$0xff] %vm495_vm0, %v13608_v2 }
  0x2a   : > { %641 = vst.msk [vmem:[#allocation2 + $0x21] sm:$0xff] %vm495_vm0, %v13611_v3  ;;  %18316 = vst [vmem:[#allocation4_spill] sm:$0xff] %v13620_v4 }
  0x2b   : > { %18317 = vst [vmem:[#allocation5_spill] sm:$0xff] %v13623_v5  ;;  %18318 = vst [vmem:[#allocation6_spill] sm:$0xff] %v13626_v6 }
  0x2c   : > { %644 = vst.msk [vmem:[#allocation2 + $0x49] sm:$0xff] %vm495_vm0, %v13620_v4  ;;  %643 = vst.msk [vmem:[#allocation2 + $0x39] sm:$0xff] %vm495_vm0, %v13623_v5 }
  0x2d   : > { %646 = vst.msk [vmem:[#allocation2 + $0x61] sm:$0xff] %vm495_vm0, %v13626_v6  ;;  %18319 = vst [vmem:[#allocation7_spill] sm:$0xff] %v13635_v9 }
  0x2e   : > { %645 = vst.msk [vmem:[#allocation2 + $0x51] sm:$0xff] %vm495_vm0, %v13635_v9  ;;  %18320 = vst [vmem:[#allocation8_spill] sm:$0xff] %v13641_v10  ;;  %v14057_v9 = vld [vmem:[%s13602_s24 + $0xa8] sm:$0xff] }
  0x2f   : > { %18321 = vst [vmem:[#allocation9_spill] sm:$0xff] %v13644_v11  ;;  %18322 = vst [vmem:[#allocation10_spill] sm:$0xff] %v13647_v12 }
  0x30   : > { %648 = vst.msk [vmem:[#allocation2 + $0x79] sm:$0xff] %vm495_vm0, %v13641_v10  ;;  %647 = vst.msk [vmem:[#allocation2 + $0x69] sm:$0xff] %vm495_vm0, %v13644_v11  ;;  %v706_v22 = vld [vmem:[#allocation2 + $0x19] sm:$0xff]  ;;  %v13701_v23 = vld [vmem:[#allocation2 + $0x31] sm:$0xff] }
  0x31   : > { %650 = vst.msk [vmem:[#allocation2 + $0x91] sm:$0xff] %vm495_vm0, %v13647_v12  ;;  %18323 = vst [vmem:[#allocation11_spill] sm:$0xff] %v13656_v13  ;;  %997 = vrot.lane.b32.xlu1 %v706_v22, %s13377_s25  ;;  %v707_v24 = vld [vmem:[#allocation2 + $0x21] sm:$0xff]  ;;  %1001 = vrot.lane.b32.xlu0 %v13701_v23, %s13377_s25  ;;  %v13772_v44 = vld [vmem:[#allocation2 + $0x18] sm:$0xff] }
  0x32   : > { %18324 = vst [vmem:[#allocation12_spill] sm:$0xff] %v13659_v14  ;;  %18325 = vst [vmem:[#allocation13_spill] sm:$0xff] %v13662_v15  ;;  %v13769_v43 = vld [vmem:[#allocation2 + $0x20] sm:$0xff]  ;;  %v13781_v46 = vld [vmem:[#allocation2 + $0x30] sm:$0xff] }
  0x33   : > { %649 = vst.msk [vmem:[#allocation2 + $0x81] sm:$0xff] %vm495_vm0, %v13656_v13  ;;  %652 = vst.msk [vmem:[#allocation2 + $0xa9] sm:$0xff] %vm495_vm0, %v13659_v14  ;;  %v13706_v25 = vld [vmem:[#allocation2 + $0x49] sm:$0xff]  ;;  %v13709_v26 = vld [vmem:[#allocation2 + $0x39] sm:$0xff] }
  0x34   : > { %651 = vst.msk [vmem:[#allocation2 + $0x99] sm:$0xff] %vm495_vm0, %v13662_v15  ;;  %18326 = vst [vmem:[#allocation14_spill] sm:$0xff] %v13671_v16  ;;  %v13713_v27 = vld [vmem:[#allocation2 + $0x61] sm:$0xff]  ;;  %v13874_v54 = vld [vmem:[#allocation2 + $0x38] sm:$0xff] }
  0x35   : > { %18327 = vst [vmem:[#allocation15_spill] sm:$0xff] %v13674_v17  ;;  %18328 = vst [vmem:[#allocation16_spill] sm:$0xff] %v13677_v18  ;;  %999 = vrot.lane.b32.xlu1 %v707_v24, %s13377_s25  ;;  %1005 = vrot.lane.b32.xlu0 %v13706_v25, %s13377_s25  ;;  %v13717_v28 = vld [vmem:[#allocation2 + $0x51] sm:$0xff]  ;;  %v738_v45 = vld [vmem:[#allocation2 + $0x1a] sm:$0xff] }
  0x36   : > { %654 = vst.msk [vmem:[#allocation2 + $0xc1] sm:$0xff] %vm495_vm0, %v13671_v16  ;;  %653 = vst.msk [vmem:[#allocation2 + $0xb1] sm:$0xff] %vm495_vm0, %v13674_v17  ;;  %v833_v47 = vld [vmem:[#allocation2 + $0x22] sm:$0xff]  ;;  %v929_v56 = vld [vmem:[#allocation2 + $0x32] sm:$0xff] }
  0x37   : > { %656 = vst.msk [vmem:[#allocation2 + $0xd9] sm:$0xff] %vm495_vm0, %v13677_v18  ;;  %18329 = vst [vmem:[#allocation17_spill] sm:$0xff] %v13686_v19  ;;  %v13721_v29 = vld [vmem:[#allocation2 + $0x79] sm:$0xff]  ;;  %v13725_v30 = vld [vmem:[#allocation2 + $0x69] sm:$0xff] }
  0x38   : > { %18330 = vst [vmem:[#allocation18_spill] sm:$0xff] %v13689_v20  ;;  %18331 = vst [vmem:[#allocation19_spill] sm:$0xff] %v13692_v21  ;;  %v13729_v31 = vld [vmem:[#allocation2 + $0x91] sm:$0xff]  ;;  %v930_v57 = vld [vmem:[#allocation2 + $0x3a] sm:$0xff] }
  0x39   : > { %655 = vst.msk [vmem:[#allocation2 + $0xc9] sm:$0xff] %vm495_vm0, %v13686_v19  ;;  %658 = vst.msk [vmem:[#allocation2 + $0xf1] sm:$0xff] %vm495_vm0, %v13689_v20  ;;  %1003 = vrot.lane.b32.xlu1 %v13709_v26, %s13377_s25  ;;  %1009 = vrot.lane.b32.xlu0 %v13713_v27, %s13377_s25  ;;  %v13896_v58 = vld [vmem:[#allocation2 + $0x48] sm:$0xff]  ;;  %v13905_v59 = vld [vmem:[#allocation2 + $0x50] sm:$0xff] }
  0x3a   : > { %657 = vst.msk [vmem:[#allocation2 + $0xe1] sm:$0xff] %vm495_vm0, %v13692_v21  ;;  %v13733_v32 = vld [vmem:[#allocation2 + $0x81] sm:$0xff]  ;;  %v13737_v33 = vld [vmem:[#allocation2 + $0xa9] sm:$0xff]  ;;  %v932_v61 = vld [vmem:[#allocation2 + $0x52] sm:$0xff] }
  0x3b   : > { %v13741_v34 = vld [vmem:[#allocation2 + $0x99] sm:$0xff]  ;;  %552 = vst.msk [vmem:[#allocation3] sm:$0xff] %vm551_vm2, %v18291_v0  ;;  %553 = vst.msk [vmem:[#allocation3 + $0x8] sm:$0xff] %vm551_vm2, %v18291_v0  ;;  %v931_v60 = vld [vmem:[#allocation2 + $0x4a] sm:$0xff] }
  0x3c   : > { %556 = vst.msk [vmem:[#allocation3 + $0x18] sm:$0xff] %vm551_vm2, %v18291_v0  ;;  %557 = vst.msk [vmem:[#allocation3 + $0x20] sm:$0xff] %vm551_vm2, %v18291_v0  ;;  %v13922_v62 = vld [vmem:[#allocation2 + $0x60] sm:$0xff]  ;;  %v13977_v50 = vld [vmem:[#allocation2 + $0x78] sm:$0xff] }
  0x3d   : > { %1007 = vrot.lane.b32.xlu1 %v13717_v28, %s13377_s25  ;;  %1013 = vrot.lane.b32.xlu0 %v13721_v29, %s13377_s25  ;;  %v13745_v35 = vld [vmem:[#allocation2 + $0xc1] sm:$0xff]  ;;  %v13749_v36 = vld [vmem:[#allocation2 + $0xb1] sm:$0xff]  ;;  %559 = vst.msk [vmem:[#allocation3 + $0x30] sm:$0xff] %vm551_vm2, %v18291_v0  ;;  %560 = vst.msk [vmem:[#allocation3 + $0x38] sm:$0xff] %vm551_vm2, %v18291_v0 }
  0x3e   : > { %v13753_v37 = vld [vmem:[#allocation2 + $0xd9] sm:$0xff]  ;;  %562 = vst.msk [vmem:[#allocation3 + $0x48] sm:$0xff] %vm551_vm2, %v18291_v0  ;;  %563 = vst.msk [vmem:[#allocation3 + $0x50] sm:$0xff] %vm551_vm2, %v18291_v0  ;;  %v936_v18 = vld [vmem:[#allocation2 + $0x82] sm:$0xff] }
  0x3f   : > { %565 = vst.msk [vmem:[#allocation3 + $0x60] sm:$0xff] %vm551_vm2, %v18291_v0  ;;  %566 = vst.msk [vmem:[#allocation3 + $0x68] sm:$0xff] %vm551_vm2, %v18291_v0  ;;  %v14030_v16 = vld [vmem:[#allocation2 + $0x90] sm:$0xff]  ;;  %v672_v15 = vld [vmem:[#allocation2] sm:$0xff] }
  0x40   : > { %v13757_v38 = vld [vmem:[#allocation2 + $0xc9] sm:$0xff]  ;;  %v724_v39 = vld [vmem:[#allocation2 + $0xf1] sm:$0xff]  ;;  %568 = vst.msk [vmem:[#allocation3 + $0x78] sm:$0xff] %vm551_vm2, %v18291_v0  ;;  %569 = vst.msk [vmem:[#allocation3 + $0x80] sm:$0xff] %vm551_vm2, %v18291_v0 }
  0x41   : > { %1011 = vrot.lane.b32.xlu1 %v13725_v30, %s13377_s25  ;;  %1017 = vrot.lane.b32.xlu0 %v13729_v31, %s13377_s25  ;;  %v13763_v40 = vld [vmem:[#allocation2 + $0xe1] sm:$0xff]  ;;  %571 = vst.msk [vmem:[#allocation3 + $0x90] sm:$0xff] %vm551_vm2, %v18291_v0  ;;  %572 = vst.msk [vmem:[#allocation3 + $0x98] sm:$0xff] %vm551_vm2, %v18291_v0  ;;  %v14044_v13 = vld [vmem:[#allocation2 + $0x98] sm:$0xff] }
  0x42   : > { %574 = vst.msk [vmem:[#allocation3 + $0xa8] sm:$0xff] %vm551_vm2, %v18291_v0  ;;  %575 = vst.msk [vmem:[#allocation3 + $0xb0] sm:$0xff] %vm551_vm2, %v18291_v0  ;;  %v14047_v10 = vld [vmem:[%s13602_s24 + $0xa0] sm:$0xff]  ;;  %v937_v5 = vld [vmem:[#allocation2 + $0x92] sm:$0xff] }
  0x43   : > { %577 = vst.msk [vmem:[#allocation3 + $0xc0] sm:$0xff] %vm551_vm2, %v18291_v0  ;;  %578 = vst.msk [vmem:[#allocation3 + $0xc8] sm:$0xff] %vm551_vm2, %v18291_v0 }
  0x44   : > { %580 = vst.msk [vmem:[#allocation3 + $0xd8] sm:$0xff] %vm551_vm2, %v18291_v0  ;;  %581 = vst.msk [vmem:[#allocation3 + $0xe0] sm:$0xff] %vm551_vm2, %v18291_v0 }
  0x45   : > { %1015 = vrot.lane.b32.xlu1 %v13733_v32, %s13377_s25  ;;  %1021 = vrot.lane.b32.xlu0 %v13737_v33, %s13377_s25  ;;  %583 = vst.msk [vmem:[#allocation3 + $0xf0] sm:$0xff] %vm551_vm2, %v18291_v0  ;;  %584 = vst.msk [vmem:[#allocation3 + $0xf8] sm:$0xff] %vm551_vm2, %v18291_v0 }
  0x46   : > { %586 = vst.msk [vmem:[#allocation3 + $0x108] sm:$0xff] %vm551_vm2, %v18291_v0  ;;  %587 = vst.msk [vmem:[#allocation3 + $0x110] sm:$0xff] %vm551_vm2, %v18291_v0 }
  0x47   : > { %589 = vst.msk [vmem:[#allocation3 + $0x120] sm:$0xff] %vm551_vm2, %v18291_v0  ;;  %590 = vst.msk [vmem:[#allocation3 + $0x128] sm:$0xff] %vm551_vm2, %v18291_v0 }
  0x48   : > { %592 = vst.msk [vmem:[#allocation3 + $0x138] sm:$0xff] %vm551_vm2, %v18291_v0  ;;  %593 = vst.msk [vmem:[#allocation3 + $0x140] sm:$0xff] %vm551_vm2, %v18291_v0 }
  0x49   : > { %1019 = vrot.lane.b32.xlu1 %v13741_v34, %s13377_s25  ;;  %1025 = vrot.lane.b32.xlu0 %v13745_v35, %s13377_s25  ;;  %595 = vst.msk [vmem:[#allocation3 + $0x150] sm:$0xff] %vm551_vm2, %v18291_v0  ;;  %596 = vst.msk [vmem:[#allocation3 + $0x158] sm:$0xff] %vm551_vm2, %v18291_v0 }
  0x4a   : > { %598 = vst.msk [vmem:[#allocation3 + $0x168] sm:$0xff] %vm551_vm2, %v18291_v0  ;;  %599 = vst.msk [vmem:[#allocation3 + $0x170] sm:$0xff] %vm551_vm2, %v18291_v0 }
  0x4b   : > { %601 = vst.msk [vmem:[#allocation3 + $0x180] sm:$0xff] %vm551_vm2, %v18291_v0  ;;  %602 = vst.msk [vmem:[#allocation3 + $0x188] sm:$0xff] %vm551_vm2, %v18291_v0 }
  0x4c   : > { %604 = vst.msk [vmem:[#allocation3 + $0x198] sm:$0xff] %vm551_vm2, %v18291_v0  ;;  %605 = vst.msk [vmem:[#allocation3 + $0x1a0] sm:$0xff] %vm551_vm2, %v18291_v0 }
  0x4d   : > { %1023 = vrot.lane.b32.xlu1 %v13749_v36, %s13377_s25  ;;  %1029 = vrot.lane.b32.xlu0 %v13753_v37, %s13377_s25  ;;  %18333 = vst [vmem:[#allocation21_spill] sm:$0xff] %v14047_v10  ;;  %660 = vst.msk [vmem:[#allocation2 + $0x109] sm:$0xff] %vm495_vm0, %v14047_v10 }
  0x4e   : > { %18334 = vst [vmem:[#allocation22_spill] sm:$0xff] %v14057_v9  ;;  %661 = vst.msk [vmem:[#allocation2 + $0x111] sm:$0xff] %vm495_vm0, %v14057_v9 }
  0x51   : > { %1027 = vrot.lane.b32.xlu1 %v13757_v38, %s13377_s25  ;;  %1033 = vrot.lane.b32.xlu0 %v724_v39, %s13377_s25 }
  0x55   : > { %1031 = vrot.lane.b32.xlu1 %v13763_v40, %s13377_s25  ;;  %1123 = vrot.lane.b32.xlu0 %v737_v41, %s13378_s26 }
  0x59   : > { %1121 = vrot.lane.b32.xlu1 %v736_v42, %s13378_s26  ;;  %1251 = vrot.lane.b32.xlu0 %v13769_v43, %s13379_s27 }
  0x5d   : > { %1249 = vrot.lane.b32.xlu1 %v13772_v44, %s13379_s27  ;;  %1379 = vrot.lane.b32.xlu0 %v707_v24, %s13380_s28 }
  0x61   : > { %1377 = vrot.lane.b32.xlu1 %v706_v22, %s13380_s28  ;;  %1125 = vrot.lane.b32.xlu0 %v738_v45, %s13378_s26 }
  0x65   : > { %1505 = vrot.lane.b32.xlu1 %v738_v45, %s13381_s29  ;;  %1633 = vrot.lane.b32.xlu0 %v13781_v46, %s13382_s30 }
  0x69   : > { %1507 = vrot.lane.b32.xlu1 %v833_v47, %s13381_s29  ;;  %1253 = vrot.lane.b32.xlu0 %v13781_v46, %s13379_s27 }
  0x6d   : > { %1127 = vrot.lane.b32.xlu1 %v833_v47, %s13378_s26  ;;  %1761 = vrot.lane.b32.xlu0 %v13701_v23, %s18313_s22  ;;  %v934_v47 = vld [vmem:[#allocation2 + $0x6a] sm:$0xff] }
  0x71   : > { %1635 = vrot.lane.b32.xlu1 %v13874_v54, %s13382_s30  ;;  %1381 = vrot.lane.b32.xlu0 %v13701_v23, %s13380_s28  ;;  %v13939_v23 = vld [vmem:[#allocation2 + $0x68] sm:$0xff] }
  0x75   : > { %1255 = vrot.lane.b32.xlu1 %v13874_v54, %s13379_s27  ;;  %1889 = vrot.lane.b32.xlu0 %v929_v56, %s13384_s17 }
  0x79   : > { %1763 = vrot.lane.b32.xlu1 %v13709_v26, %s18313_s22  ;;  %1509 = vrot.lane.b32.xlu0 %v929_v56, %s13381_s29 }
  0x7d   : > { %1383 = vrot.lane.b32.xlu1 %v13709_v26, %s13380_s28  ;;  %1129 = vrot.lane.b32.xlu0 %v929_v56, %s13378_s26  ;;  %v13997_v56 = vld [vmem:[#allocation2 + $0x80] sm:$0xff] }
  0x81   : > { %1891 = vrot.lane.b32.xlu1 %v930_v57, %s13384_s17  ;;  %1637 = vrot.lane.b32.xlu0 %v13896_v58, %s13382_s30 }
  0x85   : > { %1511 = vrot.lane.b32.xlu1 %v930_v57, %s13381_s29  ;;  %1257 = vrot.lane.b32.xlu0 %v13896_v58, %s13379_s27 }
  0x88   : > { %v13924_v63 = vpop.permute.xlu0 %993 }
  0x89   : > { %1131 = vrot.lane.b32.xlu1 %v930_v57, %s13378_s26  ;;  %1765 = vrot.lane.b32.xlu0 %v13706_v25, %s18313_s22  ;;  %v1985_v11 = vsel %vm495_vm0, %v672_v15, %v13924_v63 }
  0x8d   : > { %1639 = vrot.lane.b32.xlu1 %v13905_v59, %s13382_s30  ;;  %1385 = vrot.lane.b32.xlu0 %v13706_v25, %s13380_s28 }
  0x91   : > { %1259 = vrot.lane.b32.xlu1 %v13905_v59, %s13379_s27  ;;  %1893 = vrot.lane.b32.xlu0 %v931_v60, %s13384_s17 }
  0x95   : > { %1767 = vrot.lane.b32.xlu1 %v13717_v28, %s18313_s22  ;;  %1513 = vrot.lane.b32.xlu0 %v931_v60, %s13381_s29 }
  0x99   : > { %1387 = vrot.lane.b32.xlu1 %v13717_v28, %s13380_s28  ;;  %1133 = vrot.lane.b32.xlu0 %v931_v60, %s13378_s26  ;;  %v933_v28 = vld [vmem:[#allocation2 + $0x62] sm:$0xff] }
  0x9a   : > { %v13929_v7 = vpop.permute.xlu0 %995 }
  0x9d   : > { %1895 = vrot.lane.b32.xlu1 %v932_v61, %s13384_s17  ;;  %1641 = vrot.lane.b32.xlu0 %v13922_v62, %s13382_s30 }
  0xa1   : > { %1515 = vrot.lane.b32.xlu1 %v932_v61, %s13381_s29  ;;  %1261 = vrot.lane.b32.xlu0 %v13922_v62, %s13379_s27 }
  0xa3   : > { %v13934_v8 = vpop.permute.xlu1 %997  ;;  %v13936_v22 = vpop.permute.xlu0 %1001 }
  0xa5   : > { %1135 = vrot.lane.b32.xlu1 %v932_v61, %s13378_s26  ;;  %1769 = vrot.lane.b32.xlu0 %v13713_v27, %s18313_s22  ;;  %v935_v61 = vld [vmem:[#allocation2 + $0x7a] sm:$0xff] }
  0xa7   : > { %v13943_v24 = vpop.permute.xlu1 %999  ;;  %v13945_v25 = vpop.permute.xlu0 %1005 }
  0xa9   : > { %1643 = vrot.lane.b32.xlu1 %v13939_v23, %s13382_s30  ;;  %1389 = vrot.lane.b32.xlu0 %v13713_v27, %s13380_s28 }
  0xab   : > { %v13951_v26 = vpop.permute.xlu1 %1003  ;;  %v13953_v39 = vpop.permute.xlu0 %1009 }
  0xad   : > { %1263 = vrot.lane.b32.xlu1 %v13939_v23, %s13379_s27  ;;  %1897 = vrot.lane.b32.xlu0 %v933_v28, %s13384_s17 }
  0xaf   : > { %v13958_v41 = vpop.permute.xlu1 %1007  ;;  %v13960_v42 = vpop.permute.xlu0 %1013 }
  0xb1   : > { %1771 = vrot.lane.b32.xlu1 %v13725_v30, %s18313_s22  ;;  %1517 = vrot.lane.b32.xlu0 %v933_v28, %s13381_s29 }
  0xb3   : > { %v13965_v27 = vpop.permute.xlu1 %1011  ;;  %v13967_v45 = vpop.permute.xlu0 %1017 }
  0xb5   : > { %1391 = vrot.lane.b32.xlu1 %v13725_v30, %s13380_s28  ;;  %1137 = vrot.lane.b32.xlu0 %v933_v28, %s13378_s26  ;;  %v14008_v28 = vld [vmem:[%s13602_s24 + $0x98] sm:$0xff] }
  0xb6   : > { %18332 = vst [vmem:[#allocation20_spill] sm:$0xff] %v14008_v28  ;;  %659 = vst.msk [vmem:[#allocation2 + $0xf9] sm:$0xff] %vm495_vm0, %v14008_v28 }
  0xb7   : > { %v13972_v48 = vpop.permute.xlu1 %1015  ;;  %v13974_v49 = vpop.permute.xlu0 %1021 }
  0xb9   : > { %1899 = vrot.lane.b32.xlu1 %v934_v47, %s13384_s17  ;;  %1645 = vrot.lane.b32.xlu0 %v13977_v50, %s13382_s30 }
  0xbb   : > { %v13981_v51 = vpop.permute.xlu1 %1019  ;;  %v13983_v52 = vpop.permute.xlu0 %1025 }
  0xbd   : > { %1519 = vrot.lane.b32.xlu1 %v934_v47, %s13381_s29  ;;  %1265 = vrot.lane.b32.xlu0 %v13977_v50, %s13379_s27 }
  0xbf   : > { %v13988_v30 = vpop.permute.xlu1 %1023  ;;  %v13990_v53 = vpop.permute.xlu0 %1029 }
  0xc1   : > { %1139 = vrot.lane.b32.xlu1 %v934_v47, %s13378_s26  ;;  %1773 = vrot.lane.b32.xlu0 %v13721_v29, %s18313_s22 }
  0xc3   : > { %v13995_v55 = vpop.permute.xlu1 %1027  ;;  %v13999_v57 = vpop.permute.xlu0 %1033 }
  0xc5   : > { %1647 = vrot.lane.b32.xlu1 %v13997_v56, %s13382_s30  ;;  %1393 = vrot.lane.b32.xlu0 %v13721_v29, %s13380_s28 }
  0xc7   : > { %v14005_v60 = vpop.permute.xlu1 %1031  ;;  %v14010_v47 = vpop.permute.xlu0 %1123 }
  0xc9   : > { %1267 = vrot.lane.b32.xlu1 %v13997_v56, %s13379_s27  ;;  %1901 = vrot.lane.b32.xlu0 %v935_v61, %s13384_s17 }
  0xcb   : > { %v1122_v0 = vpop.permute.xlu1 %1121  ;;  %v14017_v20 = vpop.permute.xlu0 %1251 }
  0xcd   : > { %1775 = vrot.lane.b32.xlu1 %v13733_v32, %s18313_s22  ;;  %1521 = vrot.lane.b32.xlu0 %v935_v61, %s13381_s29 }
  0xcf   : > { %v1250_v29 = vpop.permute.xlu1 %1249  ;;  %v14022_v21 = vpop.permute.xlu0 %1379 }
  0xd1   : > { %1395 = vrot.lane.b32.xlu1 %v13733_v32, %s13380_s28  ;;  %1141 = vrot.lane.b32.xlu0 %v935_v61, %s13378_s26 }
  0xd3   : > { %v1378_v28 = vpop.permute.xlu1 %1377  ;;  %v14027_v19 = vpop.permute.xlu0 %1125 }
  0xd5   : > { %1903 = vrot.lane.b32.xlu1 %v936_v18, %s13384_s17  ;;  %1649 = vrot.lane.b32.xlu0 %v14030_v16, %s13382_s30 }
  0xd7   : > { %v1506_v17 = vpop.permute.xlu1 %1505  ;;  %v1634_v14 = vpop.permute.xlu0 %1633 }
  0xd9   : > { %1523 = vrot.lane.b32.xlu1 %v936_v18, %s13381_s29  ;;  %1269 = vrot.lane.b32.xlu0 %v14030_v16, %s13379_s27 }
  0xdb   : > { %v1508_v32 = vpop.permute.xlu1 %1507  ;;  %v14037_v61 = vpop.permute.xlu0 %1253 }
  0xdd   : > { %1143 = vrot.lane.b32.xlu1 %v936_v18, %s13378_s26  ;;  %1777 = vrot.lane.b32.xlu0 %v13729_v31, %s18313_s22  ;;  %v2018_v18 = vsel %vm2017_vm4, %v1985_v11, %v1122_v0 }
  0xde   : > { %v2051_v4 = vsel %vm2050_vm5, %v2018_v18, %v1250_v29 }
  0xdf   : > { %v14042_v12 = vpop.permute.xlu1 %1127  ;;  %v1762_v6 = vpop.permute.xlu0 %1761  ;;  %v2084_v63 = vsel %vm2083_vm7, %v2051_v4, %v1378_v28  ;;  %v673_v4 = vld [vmem:[#allocation2 + $0x8] sm:$0xff] }
  0xe0   : > { %v2117_v10 = vsel %vm2116_vm6, %v2084_v63, %v1506_v17  ;;  %v1986_v63 = vsel %vm495_vm0, %v673_v4, %v13929_v7 }
  0xe1   : > { %1651 = vrot.lane.b32.xlu1 %v14044_v13, %s13382_s30  ;;  %1397 = vrot.lane.b32.xlu0 %v13729_v31, %s13380_s28  ;;  %v2150_v31 = vsel %vm2149_vm8, %v2117_v10, %v1634_v14  ;;  %v938_v10 = vld [vmem:[#allocation2 + $0x9a] sm:$0xff] }
  0xe2   : > { %v2183_v29 = vsel %vm2182_vm9, %v2150_v31, %v1762_v6  ;;  %v2019_v6 = vsel %vm2017_vm4, %v1986_v63, %v14010_v47 }
  0xe3   : > { %v1636_v15 = vpop.permute.xlu1 %1635  ;;  %v1382_v0 = vpop.permute.xlu0 %1381  ;;  %v2052_v14 = vsel %vm2050_vm5, %v2019_v6, %v14017_v20  ;;  %v1987_v6 = vsel %vm495_vm0, %v13772_v44, %v13934_v8 }
  0xe5   : > { %1271 = vrot.lane.b32.xlu1 %v14044_v13, %s13379_s27  ;;  %1905 = vrot.lane.b32.xlu0 %v937_v5, %s13384_s17 }
  0xe7   : > { %v14069_v11 = vpop.permute.xlu1 %1255  ;;  %v1890_v18 = vpop.permute.xlu0 %1889 }
  0xe8   : > { %v2215_v17 = vsel %vm551_vm2, %v2183_v29, %v1890_v18  ;;  %v2085_v29 = vsel %vm2083_vm7, %v2052_v14, %v14022_v21  ;;  %v2020_v14 = vsel %vm2017_vm4, %v1987_v6, %v14027_v19  ;;  %v1988_v6 = vsel %vm495_vm0, %v13769_v43, %v13943_v24  ;;  %v14163_v43 = vld [vmem:[#allocation2 + $0xc0] sm:$0xff] }
  0xe9   : > { %1779 = vrot.lane.b32.xlu1 %v13741_v34, %s18313_s22  ;;  %1525 = vrot.lane.b32.xlu0 %v937_v5, %s13381_s29  ;;  %v2118_v18 = vsel %vm2116_vm6, %v2085_v29, %v1508_v32  ;;  %v939_v29 = vld [vmem:[#allocation2 + $0xaa] sm:$0xff] }
  0xea   : > { %11067 = vmatprep.mubr.msk.f32.mxu0 %vm2259_vm10, %v2215_v17  ;;  %v2151_v47 = vsel %vm2149_vm8, %v2118_v18, %v1636_v15  ;;  %v14123_v18 = vld [vmem:[%s13602_s24 + $0xb0] sm:$0xff] }
  0xeb   : > { %v1764_v28 = vpop.permute.xlu1 %1763  ;;  %v1510_v9 = vpop.permute.xlu0 %1509  ;;  %662 = vst.msk [vmem:[#allocation2 + $0x121] sm:$0xff] %vm495_vm0, %v14123_v18 }
  0xec   : > { %v2184_v4 = vsel %vm2182_vm9, %v2151_v47, %v1764_v28  ;;  %v14111_v28 = vld [vmem:[#allocation2 + $0xb0] sm:$0xff]  ;;  %v2053_v47 = vsel %vm2050_vm5, %v2020_v14, %v14037_v61 }
  0xed   : > { %1399 = vrot.lane.b32.xlu1 %v13741_v34, %s13380_s28  ;;  %1145 = vrot.lane.b32.xlu0 %v937_v5, %s13378_s26  ;;  %v14093_v34 = vld [vmem:[#allocation2 + $0xa8] sm:$0xff]  ;;  %v2086_v44 = vsel %vm2083_vm7, %v2053_v47, %v1382_v0 }
  0xee   : > { %v2119_v8 = vsel %vm2116_vm6, %v2086_v44, %v1510_v9 }
  0xef   : > { %v1384_v31 = vpop.permute.xlu1 %1383  ;;  %v14090_v7 = vpop.permute.xlu0 %1129 }
  0xf1   : > { %1907 = vrot.lane.b32.xlu1 %v938_v10, %s13384_s17  ;;  %1653 = vrot.lane.b32.xlu0 %v14093_v34, %s13382_s30 }
  0xf3   : > { %v1892_v5 = vpop.permute.xlu1 %1891  ;;  %v1638_v17 = vpop.permute.xlu0 %1637 }
  0xf4   : > { %v2216_v20 = vsel %vm551_vm2, %v2184_v4, %v1892_v5  ;;  %v2152_v61 = vsel %vm2149_vm8, %v2119_v8, %v1638_v17  ;;  %v2021_v17 = vsel %vm2017_vm4, %v1988_v6, %v14042_v12 }
  0xf5   : > { %1527 = vrot.lane.b32.xlu1 %v938_v10, %s13381_s29  ;;  %11068 = vmatmul.mubr.msk.f32.vlgmr.msra.gmra.mrb[0].mxu0 %vm2259_vm10, %v2216_v20  ;;  %v2054_v47 = vsel %vm2050_vm5, %v2021_v17, %v14069_v11 }
  0xf6   : > { %1273 = vrot.lane.b32.xlu0 %v14093_v34, %s13379_s27  ;;  %v2087_v8 = vsel %vm2083_vm7, %v2054_v47, %v1384_v31 }
  0xf7   : > { %v1512_v21 = vpop.permute.xlu1 %1511  ;;  %v14104_v32 = vpop.permute.xlu0 %1257 }
  0xf9   : > { %1147 = vrot.lane.b32.xlu1 %v938_v10, %s13378_s26 }
  0xfa   : > { %1781 = vrot.lane.b32.xlu0 %v13737_v33, %s18313_s22 }
  0xfb   : > { %v14109_v15 = vpop.permute.xlu1 %1131  ;;  %v1766_v63 = vpop.permute.xlu0 %1765 }
  0xfc   : > { %v2185_v5 = vsel %vm2182_vm9, %v2152_v61, %v1766_v63  ;;  %v940_v63 = vld [vmem:[#allocation2 + $0xb2] sm:$0xff]  ;;  %v2120_v61 = vsel %vm2116_vm6, %v2087_v8, %v1512_v21 }
  0xfd   : > { %1655 = vrot.lane.b32.xlu1 %v14111_v28, %s13382_s30 }
  0xfe   : > { %1401 = vrot.lane.b32.xlu0 %v13737_v33, %s13380_s28  ;;  %v14133_v33 = vld [vmem:[%s13602_s24 + $0xb8] sm:$0xff] }
  0xff   : > { %v1640_v10 = vpop.permute.xlu1 %1639  ;;  %v1386_v4 = vpop.permute.xlu0 %1385  ;;  %663 = vst.msk [vmem:[#allocation2 + $0x129] sm:$0xff] %vm495_vm0, %v14133_v33 }
 0x101   : > { %1275 = vrot.lane.b32.xlu1 %v14111_v28, %s13379_s27 }
 0x102   : > { %1909 = vrot.lane.b32.xlu0 %v939_v29, %s13384_s17 }
 0x103   : > { %v14137_v19 = vpop.permute.xlu1 %1259  ;;  %v1894_v20 = vpop.permute.xlu0 %1893 }
 0x104   : > { %v2217_v0 = vsel %vm551_vm2, %v2185_v5, %v1894_v20  ;;  %v14181_v20 = vld [vmem:[#allocation2 + $0xc8] sm:$0xff] }
 0x105   : > { %1783 = vrot.lane.b32.xlu1 %v13749_v36, %s18313_s22  ;;  %11070 = vmatprep.mubr.msk.f32.mxu0 %vm2259_vm10, %v2217_v0 }
 0x106   : > { %1529 = vrot.lane.b32.xlu0 %v939_v29, %s13381_s29 }
 0x107   : > { %v1768_v9 = vpop.permute.xlu1 %1767  ;;  %v1514_v14 = vpop.permute.xlu0 %1513 }
 0x109   : > { %1403 = vrot.lane.b32.xlu1 %v13749_v36, %s13380_s28  ;;  %v2153_v36 = vsel %vm2149_vm8, %v2120_v61, %v1640_v10 }
 0x10a   : > { %1149 = vrot.lane.b32.xlu0 %v939_v29, %s13378_s26  ;;  %v2186_v12 = vsel %vm2182_vm9, %v2153_v36, %v1768_v9  ;;  %v1989_v9 = vsel %vm495_vm0, %v13781_v46, %v13936_v22 }
 0x10b   : > { %v1388_v44 = vpop.permute.xlu1 %1387  ;;  %v14160_v5 = vpop.permute.xlu0 %1133  ;;  %v2022_v17 = vsel %vm2017_vm4, %v1989_v9, %v14090_v7  ;;  %v14203_v7 = vld [vmem:[%s13602_s24 + $0xc0] sm:$0xff] }
 0x10c   : > { %v2055_v47 = vsel %vm2050_vm5, %v2022_v17, %v14104_v32  ;;  %664 = vst.msk [vmem:[#allocation2 + $0x139] sm:$0xff] %vm495_vm0, %v14203_v7 }
 0x10d   : > { %1911 = vrot.lane.b32.xlu1 %v940_v63, %s13384_s17  ;;  %v2088_v61 = vsel %vm2083_vm7, %v2055_v47, %v1386_v4  ;;  %v14212_v4 = vld [vmem:[%s13602_s24 + $0xc8] sm:$0xff] }
 0x10e   : > { %1657 = vrot.lane.b32.xlu0 %v14163_v43, %s13382_s30  ;;  %v2121_v46 = vsel %vm2116_vm6, %v2088_v61, %v1514_v14  ;;  %665 = vst.msk [vmem:[#allocation2 + $0x141] sm:$0xff] %vm495_vm0, %v14212_v4 }
 0x10f   : > { %v1896_v24 = vpop.permute.xlu1 %1895  ;;  %v1642_v29 = vpop.permute.xlu0 %1641 }
 0x110   : > { %v2218_v11 = vsel %vm551_vm2, %v2186_v12, %v1896_v24  ;;  %v2154_v22 = vsel %vm2149_vm8, %v2121_v46, %v1642_v29  ;;  %v1990_v24 = vsel %vm495_vm0, %v13874_v54, %v13951_v26  ;;  %v14233_v54 = vld [vmem:[#allocation2 + $0xd8] sm:$0xff] }
 0x111   : > { %1531 = vrot.lane.b32.xlu1 %v940_v63, %s13381_s29  ;;  %11071 = vmatmul.mubr.msk.f32.gmra.mrb[2].mxu0 %vm2259_vm10, %v2218_v11  ;;  %v2023_v29 = vsel %vm2017_vm4, %v1990_v24, %v14109_v15  ;;  %v943_v24 = vld [vmem:[#allocation2 + $0xda] sm:$0xff] }
 0x112   : > { %1277 = vrot.lane.b32.xlu0 %v14163_v43, %s13379_s27  ;;  %v2056_v9 = vsel %vm2050_vm5, %v2023_v29, %v14137_v19 }
 0x113   : > { %v1516_v31 = vpop.permute.xlu1 %1515  ;;  %v14174_v21 = vpop.permute.xlu0 %1261  ;;  %v2089_v47 = vsel %vm2083_vm7, %v2056_v9, %v1388_v44 }
 0x114   : > { %v2122_v61 = vsel %vm2116_vm6, %v2089_v47, %v1516_v31 }
 0x115   : > { %1151 = vrot.lane.b32.xlu1 %v940_v63, %s13378_s26  ;;  %v941_v63 = vld [vmem:[#allocation2 + $0xc2] sm:$0xff] }
 0x116   : > { %1785 = vrot.lane.b32.xlu0 %v13745_v35, %s18313_s22 }
 0x117   : > { %v14179_v10 = vpop.permute.xlu1 %1135  ;;  %v1770_v0 = vpop.permute.xlu0 %1769 }
 0x118   : > { %v2187_v36 = vsel %vm2182_vm9, %v2154_v22, %v1770_v0  ;;  %v942_v0 = vld [vmem:[#allocation2 + $0xca] sm:$0xff]  ;;  %v14251_v22 = vld [vmem:[#allocation2 + $0xe0] sm:$0xff] }
 0x119   : > { %1659 = vrot.lane.b32.xlu1 %v14181_v20, %s13382_s30 }
 0x11a   : > { %1405 = vrot.lane.b32.xlu0 %v13745_v35, %s13380_s28 }
 0x11b   : > { %v1644_v6 = vpop.permute.xlu1 %1643  ;;  %v1390_v8 = vpop.permute.xlu0 %1389 }
 0x11d   : > { %1279 = vrot.lane.b32.xlu1 %v14181_v20, %s13379_s27 }
 0x11e   : > { %1913 = vrot.lane.b32.xlu0 %v941_v63, %s13384_s17 }
 0x11f   : > { %v14199_v35 = vpop.permute.xlu1 %1263  ;;  %v1898_v12 = vpop.permute.xlu0 %1897 }
 0x120   : > { %v2219_v32 = vsel %vm551_vm2, %v2187_v36, %v1898_v12  ;;  %v1991_v12 = vsel %vm495_vm0, %v13896_v58, %v13945_v25 }
 0x121   : > { %1787 = vrot.lane.b32.xlu1 %v13757_v38, %s18313_s22  ;;  %11073 = vmatprep.mubr.msk.f32.mxu0 %vm2259_vm10, %v2219_v32 }
 0x122   : > { %1533 = vrot.lane.b32.xlu0 %v941_v63, %s13381_s29 }
 0x123   : > { %v1772_v14 = vpop.permute.xlu1 %1771  ;;  %v1518_v11 = vpop.permute.xlu0 %1517 }
 0x125   : > { %1407 = vrot.lane.b32.xlu1 %v13757_v38, %s13380_s28  ;;  %v2155_v38 = vsel %vm2149_vm8, %v2122_v61, %v1644_v6  ;;  %v1992_v61 = vsel %vm495_vm0, %v13905_v59, %v13958_v41 }
 0x126   : > { %1153 = vrot.lane.b32.xlu0 %v941_v63, %s13378_s26  ;;  %v2188_v26 = vsel %vm2182_vm9, %v2155_v38, %v1772_v14  ;;  %v2024_v14 = vsel %vm2017_vm4, %v1991_v12, %v14160_v5  ;;  %v14315_v12 = vld [vmem:[#allocation2 + $0xf0] sm:$0xff] }
 0x127   : > { %v1392_v17 = vpop.permute.xlu1 %1391  ;;  %v14230_v46 = vpop.permute.xlu0 %1137  ;;  %v2057_v29 = vsel %vm2050_vm5, %v2024_v14, %v14174_v21 }
 0x128   : > { %v2090_v9 = vsel %vm2083_vm7, %v2057_v29, %v1390_v8 }
 0x129   : > { %1915 = vrot.lane.b32.xlu1 %v942_v0, %s13384_s17  ;;  %v2123_v58 = vsel %vm2116_vm6, %v2090_v9, %v1518_v11  ;;  %v14281_v11 = vld [vmem:[%s13602_s24 + $0xd0] sm:$0xff] }
 0x12a   : > { %1661 = vrot.lane.b32.xlu0 %v14233_v54, %s13382_s30  ;;  %666 = vst.msk [vmem:[#allocation2 + $0x151] sm:$0xff] %vm495_vm0, %v14281_v11 }
 0x12b   : > { %v1900_v15 = vpop.permute.xlu1 %1899  ;;  %v1646_v63 = vpop.permute.xlu0 %1645 }
 0x12c   : > { %v2220_v19 = vsel %vm551_vm2, %v2188_v26, %v1900_v15  ;;  %v2156_v25 = vsel %vm2149_vm8, %v2123_v58, %v1646_v63  ;;  %v2025_v26 = vsel %vm2017_vm4, %v1992_v61, %v14179_v10  ;;  %v944_v15 = vld [vmem:[#allocation2 + $0xe2] sm:$0xff]  ;;  %v2684_v58 = vld [vmem:[%s18285_s10 + $0x10] sm:$0xff]  ;;  %v14371_v61 = vld [vmem:[#allocation2 + $0xf8] sm:$0xff] }
 0x12d   : > { %1535 = vrot.lane.b32.xlu1 %v942_v0, %s13381_s29  ;;  %11074 = vmatmul.mubr.msk.f32.gmra.mrb[4].mxu0 %vm2259_vm10, %v2220_v19  ;;  %v14295_v19 = vld [vmem:[%s13602_s24 + $0xd8] sm:$0xff]  ;;  %v2058_v63 = vsel %vm2050_vm5, %v2025_v26, %v14199_v35  ;;  %v2682_v10 = vld [vmem:[%s18285_s10] sm:$0xff]  ;;  %v2683_v35 = vld [vmem:[%s18285_s10 + $0x8] sm:$0xff] }
 0x12e   : > { %1281 = vrot.lane.b32.xlu0 %v14233_v54, %s13379_s27  ;;  %667 = vst.msk [vmem:[#allocation2 + $0x159] sm:$0xff] %vm495_vm0, %v14295_v19 }
 0x12f   : > { %v1520_v44 = vpop.permute.xlu1 %1519  ;;  %v14244_v31 = vpop.permute.xlu0 %1265 }
 0x131   : > { %1155 = vrot.lane.b32.xlu1 %v942_v0, %s13378_s26 }
 0x132   : > { %1789 = vrot.lane.b32.xlu0 %v13753_v37, %s18313_s22 }
 0x133   : > { %v14249_v6 = vpop.permute.xlu1 %1139  ;;  %v1774_v36 = vpop.permute.xlu0 %1773 }
 0x134   : > { %v2189_v5 = vsel %vm2182_vm9, %v2156_v25, %v1774_v36 }
 0x135   : > { %1663 = vrot.lane.b32.xlu1 %v14251_v22, %s13382_s30 }
 0x136   : > { %1409 = vrot.lane.b32.xlu0 %v13753_v37, %s13380_s28 }
 0x137   : > { %v1648_v32 = vpop.permute.xlu1 %1647  ;;  %v14264_v0 = vpop.permute.xlu0 %1393 }
 0x139   : > { %1283 = vrot.lane.b32.xlu1 %v14251_v22, %s13379_s27 }
 0x13a   : > { %1917 = vrot.lane.b32.xlu0 %v943_v24, %s13384_s17 }
 0x13b   : > { %v14271_v37 = vpop.permute.xlu1 %1267  ;;  %v1902_v47 = vpop.permute.xlu0 %1901 }
 0x13c   : > { %v2221_v21 = vsel %vm551_vm2, %v2189_v5, %v1902_v47  ;;  %v913_v47 = vld [vmem:[#allocation2 + $0xf1] sm:$0xff] }
 0x13d   : > { %1791 = vrot.lane.b32.xlu1 %v13763_v40, %s18313_s22  ;;  %11076 = vmatprep.mubr.msk.f32.mxu0 %vm2259_vm10, %v2221_v21 }
 0x13e   : > { %1537 = vrot.lane.b32.xlu0 %v943_v24, %s13381_s29 }
 0x13f   : > { %v1776_v8 = vpop.permute.xlu1 %1775  ;;  %v14286_v38 = vpop.permute.xlu0 %1521 }
 0x141   : > { %1411 = vrot.lane.b32.xlu1 %v13763_v40, %s13380_s28  ;;  %v2091_v40 = vsel %vm2083_vm7, %v2058_v63, %v1392_v17  ;;  %v1993_v63 = vsel %vm495_vm0, %v13922_v62, %v13953_v39 }
 0x142   : > { %1157 = vrot.lane.b32.xlu0 %v943_v24, %s13378_s26  ;;  %v2124_v41 = vsel %vm2116_vm6, %v2091_v40, %v1520_v44  ;;  %v11565_v24 = vpack.c.bf16 %v2683_v35, %v2682_v10  ;;  %v945_v10 = vld [vmem:[#allocation2 + $0xf2] sm:$0xff] }
 0x143   : > { %v14300_v59 = vpop.permute.xlu1 %1395  ;;  %v14306_v36 = vpop.permute.xlu0 %1141  ;;  %v2157_v14 = vsel %vm2149_vm8, %v2124_v41, %v1648_v32  ;;  %v2685_v32 = vld [vmem:[%s18285_s10 + $0x18] sm:$0xff]  ;;  %v2026_v41 = vsel %vm2017_vm4, %v1993_v63, %v14230_v46 }
 0x144   : > { %v2190_v17 = vsel %vm2182_vm9, %v2157_v14, %v1776_v8  ;;  %11566 = vmatprep.subr.bf16.mxu1 %v11565_v24  ;;  %v11569_v25 = vpack.c.bf16 %v2685_v32, %v2684_v58  ;;  %v18335_v8 = vmov 0.0   ;;  %v2059_v35 = vsel %vm2050_vm5, %v2026_v41, %v14244_v31  ;;  %v946_v32 = vld [vmem:[#allocation2 + $0xfa] sm:$0xff] }
 0x145   : > { %1919 = vrot.lane.b32.xlu1 %v944_v15, %s13384_s17  ;;  %11568 = vmatpush3.bf16.msra.mxu1 %v11565_v24  ;;  %558 = vst.msk [vmem:[#allocation3 + $0x28] sm:$0x3] %vm554_vm11, %v18335_v8  ;;  %555 = vst.msk [vmem:[#allocation3 + $0x10] sm:$0x3] %vm554_vm11, %v18335_v8  ;;  %v2092_v24 = vsel %vm2083_vm7, %v2059_v35, %v14264_v0  ;;  %v14432_v35 = vld [vmem:[#allocation2 + $0x108] sm:$0xff] }
 0x146   : > { %1665 = vrot.lane.b32.xlu0 %v14315_v12, %s13382_s30  ;;  %11570 = vmatprep.subr.bf16.mxu1 %v11569_v25  ;;  %561 = vst.msk [vmem:[#allocation3 + $0x40] sm:$0x3] %vm554_vm11, %v18335_v8  ;;  %564 = vst.msk [vmem:[#allocation3 + $0x58] sm:$0x3] %vm554_vm11, %v18335_v8  ;;  %v2125_v62 = vsel %vm2116_vm6, %v2092_v24, %v14286_v38  ;;  %v1994_v38 = vsel %vm495_vm0, %v13939_v23, %v13965_v27  ;;  %v14435_v24 = vld [vmem:[#allocation2 + $0x110] sm:$0xff] }
 0x147   : > { %v1904_v44 = vpop.permute.xlu1 %1903  ;;  %v1650_v9 = vpop.permute.xlu0 %1649  ;;  %567 = vst.msk [vmem:[#allocation3 + $0x70] sm:$0x3] %vm554_vm11, %v18335_v8  ;;  %570 = vst.msk [vmem:[#allocation3 + $0x88] sm:$0x3] %vm554_vm11, %v18335_v8 }
 0x148   : > { %v2222_v29 = vsel %vm551_vm2, %v2190_v17, %v1904_v44  ;;  %573 = vst.msk [vmem:[#allocation3 + $0xa0] sm:$0x3] %vm554_vm11, %v18335_v8  ;;  %576 = vst.msk [vmem:[#allocation3 + $0xb8] sm:$0x3] %vm554_vm11, %v18335_v8  ;;  %v914_v17 = vld [vmem:[#allocation2 + $0xf9] sm:$0xff]  ;;  %v2158_v46 = vsel %vm2149_vm8, %v2125_v62, %v1650_v9  ;;  %v2027_v9 = vsel %vm2017_vm4, %v1994_v38, %v14249_v6 }
 0x149   : > { %1539 = vrot.lane.b32.xlu1 %v944_v15, %s13381_s29  ;;  %11077 = vmatmul.mubr.msk.f32.gmra.mrb[6].mxu0 %vm2259_vm10, %v2222_v29  ;;  %579 = vst.msk [vmem:[#allocation3 + $0xd0] sm:$0x3] %vm554_vm11, %v18335_v8  ;;  %582 = vst.msk [vmem:[#allocation3 + $0xe8] sm:$0x3] %vm554_vm11, %v18335_v8 }
 0x14a   : > { %1285 = vrot.lane.b32.xlu0 %v14315_v12, %s13379_s27  ;;  %585 = vst.msk [vmem:[#allocation3 + $0x100] sm:$0x3] %vm554_vm11, %v18335_v8  ;;  %588 = vst.msk [vmem:[#allocation3 + $0x118] sm:$0x3] %vm554_vm11, %v18335_v8  ;;  %11572 = vmatpush3.bf16.msra.mxu1 %v11569_v25  ;;  %v2060_v25 = vsel %vm2050_vm5, %v2027_v9, %v14271_v37  ;;  %v14423_v37 = vld [vmem:[%s13602_s24 + $0xe8] sm:$0xff] }
 0x14b   : > { %v1524_v5 = vpop.permute.xlu1 %1523  ;;  %v14332_v21 = vpop.permute.xlu0 %1269  ;;  %591 = vst.msk [vmem:[#allocation3 + $0x130] sm:$0x3] %vm554_vm11, %v18335_v8  ;;  %594 = vst.msk [vmem:[#allocation3 + $0x148] sm:$0x3] %vm554_vm11, %v18335_v8 }
 0x14c   : > { %597 = vst.msk [vmem:[#allocation3 + $0x160] sm:$0x3] %vm554_vm11, %v18335_v8  ;;  %600 = vst.msk [vmem:[#allocation3 + $0x178] sm:$0x3] %vm554_vm11, %v18335_v8 }
 0x14d   : > { %1159 = vrot.lane.b32.xlu1 %v944_v15, %s13378_s26  ;;  %603 = vst.msk [vmem:[#allocation3 + $0x190] sm:$0x3] %vm554_vm11, %v18335_v8  ;;  %606 = vst.msk [vmem:[#allocation3 + $0x1a8] sm:$0x3] %vm554_vm11, %v18335_v8  ;;  %v2093_v8 = vsel %vm2083_vm7, %v2060_v25, %v14300_v59 }
 0x14e   : > { %1793 = vrot.lane.b32.xlu0 %v913_v47, %s18313_s22  ;;  %v2126_v23 = vsel %vm2116_vm6, %v2093_v8, %v1524_v5  ;;  %669 = vst.msk [vmem:[#allocation2 + $0x171] sm:$0xff] %vm495_vm0, %v14423_v37 }
 0x14f   : > { %v14374_v26 = vpop.permute.xlu1 %1143  ;;  %v1778_v15 = vpop.permute.xlu0 %1777 }
 0x150   : > { %v2191_v44 = vsel %vm2182_vm9, %v2158_v46, %v1778_v15  ;;  %v14413_v15 = vld [vmem:[%s13602_s24 + $0xe0] sm:$0xff]  ;;  %v915_v46 = vld [vmem:[#allocation2 + $0x109] sm:$0xff] }
 0x151   : > { %1667 = vrot.lane.b32.xlu1 %v14371_v61, %s13382_s30  ;;  %668 = vst.msk [vmem:[#allocation2 + $0x169] sm:$0xff] %vm495_vm0, %v14413_v15 }
 0x152   : > { %1413 = vrot.lane.b32.xlu0 %v913_v47, %s13380_s28 }
 0x153   : > { %v1652_v40 = vpop.permute.xlu1 %1651  ;;  %v1398_v14 = vpop.permute.xlu0 %1397 }
 0x154   : > { %v2159_v6 = vsel %vm2149_vm8, %v2126_v23, %v1652_v40  ;;  %v947_v23 = vld [vmem:[#allocation2 + $0x10a] sm:$0xff] }
 0x155   : > { %1287 = vrot.lane.b32.xlu1 %v14371_v61, %s13379_s27 }
 0x156   : > { %1921 = vrot.lane.b32.xlu0 %v945_v10, %s13384_s17 }
 0x157   : > { %v14393_v39 = vpop.permute.xlu1 %1271  ;;  %v1906_v31 = vpop.permute.xlu0 %1905 }
 0x158   : > { %v2223_v29 = vsel %vm551_vm2, %v2191_v44, %v1906_v31  ;;  %v1995_v44 = vsel %vm495_vm0, %v13977_v50, %v13960_v42 }
 0x159   : > { %1795 = vrot.lane.b32.xlu1 %v914_v17, %s18313_s22  ;;  %11079 = vmatprep.mubr.msk.f32.mxu0 %vm2259_vm10, %v2223_v29  ;;  %v2028_v29 = vsel %vm2017_vm4, %v1995_v44, %v14306_v36 }
 0x15a   : > { %1541 = vrot.lane.b32.xlu0 %v945_v10, %s13381_s29  ;;  %v2061_v38 = vsel %vm2050_vm5, %v2028_v29, %v14332_v21  ;;  %v14487_v29 = vld [vmem:[%s13602_s24 + $0xf0] sm:$0xff] }
 0x15b   : > { %v1780_v0 = vpop.permute.xlu1 %1779  ;;  %v1526_v58 = vpop.permute.xlu0 %1525  ;;  %670 = vst.msk [vmem:[#allocation2 + $0x181] sm:$0xff] %vm495_vm0, %v14487_v29 }
 0x15c   : > { %v2192_v63 = vsel %vm2182_vm9, %v2159_v6, %v1780_v0  ;;  %v916_v0 = vld [vmem:[#allocation2 + $0x111] sm:$0xff] }
 0x15d   : > { %1415 = vrot.lane.b32.xlu1 %v914_v17, %s13380_s28 }
 0x15e   : > { %1035 = vrot.lane.b32.xlu0 %v914_v17, %s13377_s25 }
 0x15f   : > { %v1400_v47 = vpop.permute.xlu1 %1399  ;;  %v14416_v27 = vpop.permute.xlu0 %1145 }
 0x161   : > { %1923 = vrot.lane.b32.xlu1 %v946_v32, %s13384_s17 }
 0x162   : > { %1543 = vrot.lane.b32.xlu0 %v946_v32, %s13381_s29 }
 0x163   : > { %v1908_v59 = vpop.permute.xlu1 %1907  ;;  %v1654_v41 = vpop.permute.xlu0 %1653 }
 0x164   : > { %v2224_v5 = vsel %vm551_vm2, %v2192_v63, %v1908_v59 }
 0x165   : > { %1161 = vrot.lane.b32.xlu1 %v945_v10, %s13378_s26  ;;  %11080 = vmatmul.mubr.msk.f32.gmra.mrb[8].mxu0 %vm2259_vm10, %v2224_v5 }
 0x166   : > { %1163 = vrot.lane.b32.xlu0 %v946_v32, %s13378_s26  ;;  %v2094_v32 = vsel %vm2083_vm7, %v2061_v38, %v1398_v14  ;;  %v1996_v14 = vsel %vm495_vm0, %v13997_v56, %v13972_v48  ;;  %v948_v56 = vld [vmem:[#allocation2 + $0x112] sm:$0xff] }
 0x167   : > { %v1528_v40 = vpop.permute.xlu1 %1527  ;;  %v2127_v25 = vsel %vm2116_vm6, %v2094_v32, %v1526_v58  ;;  %v2029_v63 = vsel %vm2017_vm4, %v1996_v14, %v14374_v26 }
 0x168   : > { %v14437_v17 = vpop.permute.xlu0 %1273  ;;  %v2160_v50 = vsel %vm2149_vm8, %v2127_v25, %v1654_v41  ;;  %v2062_v59 = vsel %vm2050_vm5, %v2029_v63, %v14393_v39  ;;  %v886_v25 = vld [vmem:[#allocation2 + $0x128] sm:$0xff] }
 0x169   : > { %1669 = vrot.lane.b32.xlu1 %v14432_v35, %s13382_s30  ;;  %v2095_v41 = vsel %vm2083_vm7, %v2062_v59, %v1400_v47  ;;  %v14494_v47 = vld [vmem:[%s13602_s24 + $0xf8] sm:$0xff]  ;;  %v917_v63 = vld [vmem:[#allocation2 + $0x121] sm:$0xff] }
 0x16a   : > { %1671 = vrot.lane.b32.xlu0 %v14435_v24, %s13382_s30  ;;  %671 = vst.msk [vmem:[#allocation2 + $0x189] sm:$0xff] %vm495_vm0, %v14494_v47 }
 0x16b   : > { %v14443_v62 = vpop.permute.xlu1 %1147 }
 0x16c   : > { %v1782_v10 = vpop.permute.xlu0 %1781 }
 0x16d   : > { %1289 = vrot.lane.b32.xlu1 %v14432_v35, %s13379_s27  ;;  %v2193_v8 = vsel %vm2182_vm9, %v2160_v50, %v1782_v10  ;;  %v2128_v10 = vsel %vm2116_vm6, %v2095_v41, %v1528_v40  ;;  %v918_v41 = vld [vmem:[#allocation2 + $0x129] sm:$0xff] }
 0x16e   : > { %1291 = vrot.lane.b32.xlu0 %v14435_v24, %s13379_s27 }
 0x16f   : > { %v1656_v31 = vpop.permute.xlu1 %1655 }
 0x170   : > { %v1402_v9 = vpop.permute.xlu0 %1401  ;;  %v2161_v48 = vsel %vm2149_vm8, %v2128_v10, %v1656_v31 }
 0x171   : > { %1797 = vrot.lane.b32.xlu1 %v915_v46, %s18313_s22 }
 0x172   : > { %1799 = vrot.lane.b32.xlu0 %v916_v0, %s18313_s22 }
 0x173   : > { %v14460_v42 = vpop.permute.xlu1 %1275 }
 0x174   : > { %v1910_v36 = vpop.permute.xlu0 %1909 }
 0x175   : > { %1417 = vrot.lane.b32.xlu1 %v915_v46, %s13380_s28  ;;  %v2225_v21 = vsel %vm551_vm2, %v2193_v8, %v1910_v36  ;;  %v1997_v8 = vsel %vm495_vm0, %v14030_v16, %v13967_v45 }
 0x176   : > { %1037 = vrot.lane.b32.xlu0 %v915_v46, %s13377_s25  ;;  %11082 = vmatprep.mubr.msk.f32.mxu0 %vm2259_vm10, %v2225_v21  ;;  %v2030_v21 = vsel %vm2017_vm4, %v1997_v8, %v14416_v27 }
 0x177   : > { %v1784_v6 = vpop.permute.xlu1 %1783 }
 0x178   : > { %v1530_v58 = vpop.permute.xlu0 %1529  ;;  %v2194_v26 = vsel %vm2182_vm9, %v2161_v48, %v1784_v6 }
 0x179   : > { %1925 = vrot.lane.b32.xlu1 %v947_v23, %s13384_s17 }
 0x17a   : > { %1545 = vrot.lane.b32.xlu0 %v947_v23, %s13381_s29 }
 0x17b   : > { %v1404_v5 = vpop.permute.xlu1 %1403 }
 0x17c   : > { %v14479_v46 = vpop.permute.xlu0 %1149 }
 0x17d   : > { %1419 = vrot.lane.b32.xlu1 %v916_v0, %s13380_s28 }
 0x17e   : > { %1039 = vrot.lane.b32.xlu0 %v916_v0, %s13377_s25  ;;  %v885_v0 = vld [vmem:[#allocation2 + $0x120] sm:$0xff] }
 0x17f   : > { %v1912_v39 = vpop.permute.xlu1 %1911 }
 0x180   : > { %v2226_v44 = vsel %vm551_vm2, %v2194_v26, %v1912_v39  ;;  %v1658_v38 = vpop.permute.xlu0 %1657  ;;  %v949_v26 = vld [vmem:[#allocation2 + $0x122] sm:$0xff] }
 0x181   : > { %1927 = vrot.lane.b32.xlu1 %v948_v56, %s13384_s17  ;;  %11083 = vmatmul.mubr.msk.f32.gmra.mrb[10].mxu0 %vm2259_vm10, %v2226_v44 }
 0x182   : > { %1547 = vrot.lane.b32.xlu0 %v948_v56, %s13381_s29 }
 0x183   : > { %v1532_v40 = vpop.permute.xlu1 %1531 }
 0x184   : > { %v14499_v31 = vpop.permute.xlu0 %1277 }
 0x185   : > { %1165 = vrot.lane.b32.xlu1 %v947_v23, %s13378_s26  ;;  %v2063_v23 = vsel %vm2050_vm5, %v2030_v21, %v14437_v17 }
 0x186   : > { %1167 = vrot.lane.b32.xlu0 %v948_v56, %s13378_s26  ;;  %v2096_v14 = vsel %vm2083_vm7, %v2063_v23, %v1402_v9  ;;  %v887_v23 = vld [vmem:[#allocation2 + $0x138] sm:$0xff] }
 0x187   : > { %v14503_v32 = vpop.permute.xlu1 %1151  ;;  %v2129_v59 = vsel %vm2116_vm6, %v2096_v14, %v1530_v58  ;;  %v1998_v58 = vsel %vm495_vm0, %v14044_v13, %v13981_v51  ;;  %v1999_v14 = vsel %vm495_vm0, %v14093_v34, %v13974_v49 }
 0x188   : > { %v1786_v50 = vpop.permute.xlu0 %1785  ;;  %v2162_v45 = vsel %vm2149_vm8, %v2129_v59, %v1658_v38  ;;  %v2031_v56 = vsel %vm2017_vm4, %v1998_v58, %v14443_v62  ;;  %v2032_v59 = vsel %vm2017_vm4, %v1999_v14, %v14479_v46  ;;  %v919_v58 = vld [vmem:[#allocation2 + $0x139] sm:$0xff]  ;;  %v2001_v14 = vsel %vm495_vm0, %v14163_v43, %v13983_v52  ;;  %v889_v52 = vld [vmem:[#allocation2 + $0x150] sm:$0xff] }
 0x189   : > { %1673 = vrot.lane.b32.xlu1 %v885_v0, %s13382_s30  ;;  %v2195_v27 = vsel %vm2182_vm9, %v2162_v45, %v1786_v50  ;;  %v2064_v39 = vsel %vm2050_vm5, %v2031_v56, %v14460_v42  ;;  %v888_v45 = vld [vmem:[#allocation2 + $0x140] sm:$0xff] }
 0x18a   : > { %1675 = vrot.lane.b32.xlu0 %v886_v25, %s13382_s30  ;;  %v2097_v38 = vsel %vm2083_vm7, %v2064_v39, %v1404_v5  ;;  %v950_v5 = vld [vmem:[#allocation2 + $0x12a] sm:$0xff] }
 0x18b   : > { %v1660_v36 = vpop.permute.xlu1 %1659 }
 0x18c   : > { %v1406_v6 = vpop.permute.xlu0 %1405 }
 0x18d   : > { %1293 = vrot.lane.b32.xlu1 %v885_v0, %s13379_s27  ;;  %v2130_v0 = vsel %vm2116_vm6, %v2097_v38, %v1532_v40 }
 0x18e   : > { %1295 = vrot.lane.b32.xlu0 %v886_v25, %s13379_s27  ;;  %v2163_v13 = vsel %vm2149_vm8, %v2130_v0, %v1660_v36 }
 0x18f   : > { %v14518_v16 = vpop.permute.xlu1 %1279 }
 0x190   : > { %v1914_v10 = vpop.permute.xlu0 %1913 }
 0x191   : > { %1801 = vrot.lane.b32.xlu1 %v917_v63, %s18313_s22  ;;  %v2227_v17 = vsel %vm551_vm2, %v2195_v27, %v1914_v10 }
 0x192   : > { %1803 = vrot.lane.b32.xlu0 %v918_v41, %s18313_s22  ;;  %11085 = vmatprep.mubr.msk.f32.mxu0 %vm2259_vm10, %v2227_v17 }
 0x193   : > { %v1788_v9 = vpop.permute.xlu1 %1787 }
 0x194   : > { %v1534_v48 = vpop.permute.xlu0 %1533  ;;  %v2196_v51 = vsel %vm2182_vm9, %v2163_v13, %v1788_v9 }
 0x195   : > { %1421 = vrot.lane.b32.xlu1 %v917_v63, %s13380_s28 }
 0x196   : > { %1041 = vrot.lane.b32.xlu0 %v917_v63, %s13377_s25 }
 0x197   : > { %v1408_v44 = vpop.permute.xlu1 %1407 }
 0x198   : > { %v14537_v25 = vpop.permute.xlu0 %1153 }
 0x199   : > { %1929 = vrot.lane.b32.xlu1 %v949_v26, %s13384_s17 }
 0x19a   : > { %1549 = vrot.lane.b32.xlu0 %v949_v26, %s13381_s29 }
 0x19b   : > { %v1916_v62 = vpop.permute.xlu1 %1915 }
 0x19c   : > { %v2228_v42 = vsel %vm551_vm2, %v2196_v51, %v1916_v62  ;;  %v1662_v50 = vpop.permute.xlu0 %1661 }
 0x19d   : > { %1423 = vrot.lane.b32.xlu1 %v918_v41, %s13380_s28  ;;  %11086 = vmatmul.mubr.msk.f32.gmra.mrb[12].mxu0 %vm2259_vm10, %v2228_v42 }
 0x19e   : > { %1043 = vrot.lane.b32.xlu0 %v918_v41, %s13377_s25  ;;  %v2065_v41 = vsel %vm2050_vm5, %v2032_v59, %v14499_v31  ;;  %v2034_v59 = vsel %vm2017_vm4, %v2001_v14, %v14537_v25 }
 0x19f   : > { %v1536_v40 = vpop.permute.xlu1 %1535  ;;  %v2098_v10 = vsel %vm2083_vm7, %v2065_v41, %v1406_v6  ;;  %v920_v6 = vld [vmem:[#allocation2 + $0x141] sm:$0xff] }
 0x1a0   : > { %v14547_v8 = vpop.permute.xlu0 %1281  ;;  %v2131_v17 = vsel %vm2116_vm6, %v2098_v10, %v1534_v48  ;;  %v2000_v48 = vsel %vm495_vm0, %v14111_v28, %v13988_v30  ;;  %v951_v28 = vld [vmem:[#allocation2 + $0x13a] sm:$0xff] }
 0x1a1   : > { %1931 = vrot.lane.b32.xlu1 %v950_v5, %s13384_s17  ;;  %v2164_v34 = vsel %vm2149_vm8, %v2131_v17, %v1662_v50  ;;  %v2033_v39 = vsel %vm2017_vm4, %v2000_v48, %v14503_v32  ;;  %v14619_v17 = vld [vmem:[%s18277_s2] ss:$0 sm:$0xff] }
 0x1a2   : > { %1551 = vrot.lane.b32.xlu0 %v950_v5, %s13381_s29  ;;  %v2066_v38 = vsel %vm2050_vm5, %v2033_v39, %v14518_v16 }
 0x1a3   : > { %v14551_v36 = vpop.permute.xlu1 %1155  ;;  %v2099_v13 = vsel %vm2083_vm7, %v2066_v38, %v1408_v44  ;;  %v2002_v38 = vsel %vm495_vm0, %v14181_v20, %v13995_v55 }
 0x1a4   : > { %v1790_v21 = vpop.permute.xlu0 %1789  ;;  %v2132_v51 = vsel %vm2116_vm6, %v2099_v13, %v1536_v40  ;;  %v952_v40 = vld [vmem:[#allocation2 + $0x142] sm:$0xff] }
 0x1a5   : > { %1169 = vrot.lane.b32.xlu1 %v949_v26, %s13378_s26  ;;  %v2197_v9 = vsel %vm2182_vm9, %v2164_v34, %v1790_v21 }
 0x1a6   : > { %1171 = vrot.lane.b32.xlu0 %v950_v5, %s13378_s26 }
 0x1a7   : > { %v1664_v63 = vpop.permute.xlu1 %1663 }
 0x1a8   : > { %v1410_v27 = vpop.permute.xlu0 %1409  ;;  %v2165_v30 = vsel %vm2149_vm8, %v2132_v51, %v1664_v63 }
 0x1a9   : > { %1677 = vrot.lane.b32.xlu1 %v887_v23, %s13382_s30 }
 0x1aa   : > { %1679 = vrot.lane.b32.xlu0 %v888_v45, %s13382_s30 }
 0x1ab   : > { %v14566_v49 = vpop.permute.xlu1 %1283 }
 0x1ac   : > { %v1918_v46 = vpop.permute.xlu0 %1917 }
 0x1ad   : > { %1297 = vrot.lane.b32.xlu1 %v887_v23, %s13379_s27  ;;  %v2229_v31 = vsel %vm551_vm2, %v2197_v9, %v1918_v46  ;;  %v890_v9 = vld [vmem:[#allocation2 + $0x158] sm:$0xff] }
 0x1ae   : > { %1299 = vrot.lane.b32.xlu0 %v888_v45, %s13379_s27  ;;  %11088 = vmatprep.mubr.msk.f32.mxu0 %vm2259_vm10, %v2229_v31  ;;  %v2067_v45 = vsel %vm2050_vm5, %v2034_v59, %v14547_v8 }
 0x1af   : > { %v1792_v56 = vpop.permute.xlu1 %1791  ;;  %v2100_v10 = vsel %vm2083_vm7, %v2067_v45, %v1410_v27 }
 0x1b0   : > { %v1538_v26 = vpop.permute.xlu0 %1537  ;;  %v2198_v32 = vsel %vm2182_vm9, %v2165_v30, %v1792_v56  ;;  %v2035_v30 = vsel %vm2017_vm4, %v2002_v38, %v14551_v36  ;;  %v922_v36 = vld [vmem:[#allocation2 + $0x159] sm:$0xff] }
 0x1b1   : > { %1805 = vrot.lane.b32.xlu1 %v919_v58, %s18313_s22  ;;  %v2133_v43 = vsel %vm2116_vm6, %v2100_v10, %v1538_v26 }
 0x1b2   : > { %1807 = vrot.lane.b32.xlu0 %v920_v6, %s18313_s22 }
 0x1b3   : > { %v14583_v0 = vpop.permute.xlu1 %1411 }
 0x1b4   : > { %v14587_v62 = vpop.permute.xlu0 %1157 }
 0x1b5   : > { %1425 = vrot.lane.b32.xlu1 %v919_v58, %s13380_s28 }
 0x1b6   : > { %1045 = vrot.lane.b32.xlu0 %v919_v58, %s13377_s25 }
 0x1b7   : > { %v1920_v16 = vpop.permute.xlu1 %1919 }
 0x1b8   : > { %v2230_v42 = vsel %vm551_vm2, %v2198_v32, %v1920_v16  ;;  %v1666_v50 = vpop.permute.xlu0 %1665  ;;  %v921_v32 = vld [vmem:[#allocation2 + $0x151] sm:$0xff]  ;;  %v2068_v16 = vsel %vm2050_vm5, %v2035_v30, %v14566_v49 }
 0x1b9   : > { %1933 = vrot.lane.b32.xlu1 %v951_v28, %s13384_s17  ;;  %11089 = vmatmul.mubr.msk.f32.gmra.mrb[14].mxu0 %vm2259_vm10, %v2230_v42  ;;  %v2166_v8 = vsel %vm2149_vm8, %v2133_v43, %v1666_v50  ;;  %v2101_v20 = vsel %vm2083_vm7, %v2068_v16, %v14583_v0  ;;  %v953_v0 = vld [vmem:[#allocation2 + $0x152] sm:$0xff]  ;;  %v13385_v16 = vmov 0.0|0.0  }
 0x1ba   : > { %1553 = vrot.lane.b32.xlu0 %v951_v28, %s13381_s29  ;;  %11573 = vmatprep.subr.bf16.mxu0 %v13385_v16 }
 0x1bb   : > { %v1540_v44 = vpop.permute.xlu1 %1539 }
 0x1bc   : > { %v14597_v5 = vpop.permute.xlu0 %1285  ;;  %v2134_v42 = vsel %vm2116_vm6, %v2101_v20, %v1540_v44 }
 0x1bd   : > { %1427 = vrot.lane.b32.xlu1 %v920_v6, %s13380_s28 }
 0x1be   : > { %1047 = vrot.lane.b32.xlu0 %v920_v6, %s13377_s25 }
 0x1bf   : > { %v14601_v21 = vpop.permute.xlu1 %1159 }
 0x1c0   : > { %v1794_v23 = vpop.permute.xlu0 %1793 }
 0x1c1   : > { %1935 = vrot.lane.b32.xlu1 %v952_v40, %s13384_s17  ;;  %v2199_v46 = vsel %vm2182_vm9, %v2166_v8, %v1794_v23 }
 0x1c2   : > { %1555 = vrot.lane.b32.xlu0 %v952_v40, %s13381_s29 }
 0x1c3   : > { %v1668_v63 = vpop.permute.xlu1 %1667 }
 0x1c4   : > { %v14612_v41 = vpop.permute.xlu0 %1413  ;;  %v2167_v49 = vsel %vm2149_vm8, %v2134_v42, %v1668_v63 }
 0x1c5   : > { %1173 = vrot.lane.b32.xlu1 %v951_v28, %s13378_s26 }
 0x1c6   : > { %1175 = vrot.lane.b32.xlu0 %v952_v40, %s13378_s26 }
 0x1c7   : > { %v14623_v25 = vpop.permute.xlu1 %1287 }
 0x1c8   : > { %v11069_v34 = vpop.f32.mrb[0].mxu0  ;;  %v1922_v31 = vpop.permute.xlu0 %1921 }
 0x1c9   : > { %v2432_v27 = vadd.f32 %v11069_v34, %v14619_v17  ;;  %v2426_v58 = vpop.f32.mrb[1].mxu0  ;;  %1681 = vrot.lane.b32.xlu1 %v889_v52, %s13382_s30  ;;  %v2231_v56 = vsel %vm551_vm2, %v2199_v46, %v1922_v31  ;;  %v2003_v46 = vsel %vm495_vm0, %v14233_v54, %v13990_v53  ;;  %v892_v54 = vld [vmem:[#allocation2 + $0x170] sm:$0xff] }
 0x1ca   : > { %v2427_v6 = vadd.f32 %v14619_v17, %v2426_v58  ;;  %1683 = vrot.lane.b32.xlu0 %v890_v9, %s13382_s30  ;;  %11091 = vmatprep.mubr.msk.f32.mxu0 %vm2259_vm10, %v2231_v56  ;;  %v2036_v56 = vsel %vm2017_vm4, %v2003_v46, %v14587_v62  ;;  %v4615_v62 = vld [vmem:[%s18278_s3] sm:$0xff] }
 0x1cb   : > { %vm2586_vm12 = vcmp.ge.f32.partialorder %v2432_v27, 0.0  ;;  %v2618_v48 = vmul.f32 0.01, %v2432_v27  ;;  %v1796_v26 = vpop.permute.xlu1 %1795 }
 0x1cc   : > { %vm2585_vm13 = vcmp.ge.f32.partialorder %v2427_v6, 0.0  ;;  %v2617_v39 = vmul.f32 0.01, %v2427_v6  ;;  %v14636_v13 = vpop.permute.xlu0 %1541  ;;  %v2200_v40 = vsel %vm2182_vm9, %v2167_v49, %v1796_v26  ;;  %v2069_v26 = vsel %vm2050_vm5, %v2036_v56, %v14597_v5  ;;  %v4616_v5 = vld [vmem:[%s18278_s3 + $0x8] sm:$0xff] }
 0x1cd   : > { %1301 = vrot.lane.b32.xlu1 %v889_v52, %s13379_s27  ;;  %v2650_v51 = vsel %vm2586_vm12, %v2432_v27, %v2618_v48  ;;  %v954_v52 = vld [vmem:[#allocation2 + $0x15a] sm:$0xff]  ;;  %v891_v48 = vld [vmem:[#allocation2 + $0x168] sm:$0xff]  ;;  %v2102_v38 = vsel %vm2083_vm7, %v2069_v26, %v14612_v41  ;;  %v11574_v41 = vpack.c.bf16 %v4616_v5, %v4615_v62 }
 0x1ce   : > { %v2649_v28 = vsel %vm2585_vm13, %v2427_v6, %v2617_v39  ;;  %3333 = vst.msk [vmem:[#allocation3 + $0x21] sm:$0xff] %vm551_vm2, %v2650_v51  ;;  %1303 = vrot.lane.b32.xlu0 %v890_v9, %s13379_s27  ;;  %v2135_v30 = vsel %vm2116_vm6, %v2102_v38, %v14636_v13  ;;  %v4624_v62 = vld [vmem:[%s18278_s3 + $0x48] sm:$0xff] }
 0x1cf   : > { %11123 = vmatprep.mubr.msk.f32.mxu1 %vm551_vm2, %v2649_v28  ;;  %3332 = vst.msk [vmem:[#allocation3 + $0x19] sm:$0xff] %vm551_vm2, %v2649_v28  ;;  %v14647_v55 = vpop.permute.xlu1 %1415  ;;  %11575 = vmatpush1.bf16.msra.mxu0 %v11574_v41  ;;  %v4625_v41 = vld [vmem:[%s18278_s3 + $0x50] sm:$0xff] }
 0x1d0   : > { %11124 = vmatmul.mubr.msk.f32.vlgmr.msra.gmra.mrb[0].mxu1 %vm551_vm2, %v2650_v51  ;;  %v14653_v50 = vpop.permute.xlu0 %1035  ;;  %11576 = vmatprep.subr.bf16.mxu0 %v13385_v16 }
 0x1d1   : > { %1809 = vrot.lane.b32.xlu1 %v921_v32, %s18313_s22 }
 0x1d2   : > { %1811 = vrot.lane.b32.xlu0 %v922_v36, %s18313_s22 }
 0x1d3   : > { %v1924_v23 = vpop.permute.xlu1 %1923 }
 0x1d4   : > { %v2232_v14 = vsel %vm551_vm2, %v2200_v40, %v1924_v23  ;;  %v14660_v59 = vpop.permute.xlu0 %1543  ;;  %v4617_v40 = vld [vmem:[%s18278_s3 + $0x10] sm:$0xff]  ;;  %v4618_v23 = vld [vmem:[%s18278_s3 + $0x18] sm:$0xff] }
 0x1d5   : > { %1429 = vrot.lane.b32.xlu1 %v921_v32, %s13380_s28  ;;  %11092 = vmatmul.mubr.msk.f32.gmra.mrb[16].mxu0 %vm2259_vm10, %v2232_v14  ;;  %v2004_v14 = vsel %vm495_vm0, %v14251_v22, %v14005_v60  ;;  %v924_v22 = vld [vmem:[#allocation2 + $0x171] sm:$0xff] }
 0x1d6   : > { %1049 = vrot.lane.b32.xlu0 %v921_v32, %s13377_s25 }
 0x1d7   : > { %v14665_v44 = vpop.permute.xlu1 %1161 }
 0x1d8   : > { %v14667_v45 = vpop.permute.xlu0 %1163 }
 0x1d9   : > { %1937 = vrot.lane.b32.xlu1 %v953_v0, %s13384_s17 }
 0x1da   : > { %1557 = vrot.lane.b32.xlu0 %v953_v0, %s13381_s29 }
 0x1db   : > { %v1670_v63 = vpop.permute.xlu1 %1669 }
 0x1dc   : > { %v14671_v10 = vpop.permute.xlu0 %1671  ;;  %v2168_v20 = vsel %vm2149_vm8, %v2135_v30, %v1670_v63  ;;  %v11577_v63 = vpack.c.bf16 %v4618_v23, %v4617_v40  ;;  %v4627_v23 = vld [vmem:[%s18278_s3 + $0x60] sm:$0xff] }
 0x1dd   : > { %1431 = vrot.lane.b32.xlu1 %v922_v36, %s13380_s28 }
 0x1de   : > { %1051 = vrot.lane.b32.xlu0 %v922_v36, %s13377_s25  ;;  %11578 = vmatpush1.bf16.msra.mxu0 %v11577_v63 }
 0x1df   : > { %v14675_v43 = vpop.permute.xlu1 %1289  ;;  %11579 = vmatprep.subr.bf16.mxu0 %v13385_v16 }
 0x1e0   : > { %v14677_v8 = vpop.permute.xlu0 %1291 }
 0x1e1   : > { %1939 = vrot.lane.b32.xlu1 %v954_v52, %s13384_s17 }
 0x1e2   : > { %1559 = vrot.lane.b32.xlu0 %v954_v52, %s13381_s29 }
 0x1e3   : > { %v1798_v34 = vpop.permute.xlu1 %1797 }
 0x1e4   : > { %v11072_v9 = vpop.f32.mrb[2].mxu0  ;;  %v1800_v31 = vpop.permute.xlu0 %1799  ;;  %v2201_v42 = vsel %vm2182_vm9, %v2168_v20, %v1798_v34  ;;  %v923_v34 = vld [vmem:[#allocation2 + $0x169] sm:$0xff]  ;;  %v4626_v20 = vld [vmem:[%s18278_s3 + $0x58] sm:$0xff] }
 0x1e5   : > { %v2442_v27 = vadd.f32 %v11072_v9, %v14619_v17  ;;  %1177 = vrot.lane.b32.xlu1 %v953_v0, %s13378_s26  ;;  %v2436_v58 = vpop.f32.mrb[3].mxu0 }
 0x1e6   : > { %v2437_v6 = vadd.f32 %v14619_v17, %v2436_v58  ;;  %1179 = vrot.lane.b32.xlu0 %v954_v52, %s13378_s26  ;;  %v2037_v52 = vsel %vm2017_vm4, %v2004_v14, %v14601_v21  ;;  %v4620_v21 = vld [vmem:[%s18278_s3 + $0x28] sm:$0xff] }
 0x1e7   : > { %vm2588_vm14 = vcmp.ge.f32.partialorder %v2442_v27, 0.0  ;;  %v2620_v39 = vmul.f32 0.01, %v2442_v27  ;;  %v14692_v53 = vpop.permute.xlu1 %1417  ;;  %v2070_v9 = vsel %vm2050_vm5, %v2037_v52, %v14623_v25  ;;  %v4628_v14 = vld [vmem:[%s18278_s3 + $0x68] sm:$0xff] }
 0x1e8   : > { %vm2587_vm15 = vcmp.ge.f32.partialorder %v2437_v6, 0.0  ;;  %v2619_v51 = vmul.f32 0.01, %v2437_v6  ;;  %v14704_v28 = vpop.permute.xlu0 %1037  ;;  %v2103_v60 = vsel %vm2083_vm7, %v2070_v9, %v14647_v55  ;;  %v11592_v9 = vpack.c.bf16 %v4628_v14, %v4627_v23 }
 0x1e9   : > { %1685 = vrot.lane.b32.xlu1 %v891_v48, %s13382_s30  ;;  %v2652_v32 = vsel %vm2588_vm14, %v2442_v27, %v2620_v39  ;;  %v4619_v27 = vld [vmem:[%s18278_s3 + $0x20] sm:$0xff]  ;;  %v2136_v25 = vsel %vm2116_vm6, %v2103_v60, %v14660_v59  ;;  %v4621_v59 = vld [vmem:[%s18278_s3 + $0x30] sm:$0xff]  ;;  %v4622_v39 = vld [vmem:[%s18278_s3 + $0x38] sm:$0xff] }
 0x1ea   : > { %v2651_v36 = vsel %vm2587_vm15, %v2437_v6, %v2619_v51  ;;  %3335 = vst.msk [vmem:[#allocation3 + $0x39] sm:$0xff] %vm551_vm2, %v2652_v32  ;;  %1687 = vrot.lane.b32.xlu0 %v892_v54, %s13382_s30  ;;  %v11580_v55 = vpack.c.bf16 %v4620_v21, %v4619_v27  ;;  %v2169_v56 = vsel %vm2149_vm8, %v2136_v25, %v14671_v10  ;;  %v4623_v51 = vld [vmem:[%s18278_s3 + $0x40] sm:$0xff]  ;;  %v4629_v25 = vld [vmem:[%s18278_s3 + $0x70] sm:$0xff] }
 0x1eb   : > { %v1926_v49 = vpop.permute.xlu1 %1925  ;;  %11126 = vmatprep.mubr.msk.f32.mxu1 %vm551_vm2, %v2651_v36  ;;  %3334 = vst.msk [vmem:[#allocation3 + $0x31] sm:$0xff] %vm551_vm2, %v2651_v36  ;;  %v2202_v6 = vsel %vm2182_vm9, %v2169_v56, %v1800_v31  ;;  %v11583_v10 = vpack.c.bf16 %v4622_v39, %v4621_v59  ;;  %v955_v31 = vld [vmem:[#allocation2 + $0x16a] sm:$0xff]  ;;  %v11586_v30 = vpack.c.bf16 %v4624_v62, %v4623_v51 }
 0x1ec   : > { %v2233_v13 = vsel %vm551_vm2, %v2201_v42, %v1926_v49  ;;  %11127 = vmatmul.mubr.msk.f32.gmra.mrb[2].mxu1 %vm551_vm2, %v2652_v32  ;;  %v14725_v0 = vpop.permute.xlu0 %1545  ;;  %11581 = vmatpush1.bf16.msra.mxu0 %v11580_v55  ;;  %v11589_v42 = vpack.c.bf16 %v4626_v20, %v4625_v41  ;;  %v956_v49 = vld [vmem:[#allocation2 + $0x172] sm:$0xff]  ;;  %v2005_v56 = vsel %vm495_vm0, %v14315_v12, %v13999_v57 }
 0x1ed   : > { %1305 = vrot.lane.b32.xlu1 %v891_v48, %s13379_s27  ;;  %11094 = vmatprep.mubr.msk.f32.mxu0 %vm2259_vm10, %v2233_v13  ;;  %v4630_v55 = vld [vmem:[%s18278_s3 + $0x78] sm:$0xff]  ;;  %v2038_v59 = vsel %vm2017_vm4, %v2005_v56, %v14665_v44  ;;  %v894_v44 = vld [vmem:[#allocation2 + $0x188] sm:$0xff] }
 0x1ee   : > { %1307 = vrot.lane.b32.xlu0 %v892_v54, %s13379_s27  ;;  %11582 = vmatprep.subr.bf16.mxu0 %v13385_v16  ;;  %v2071_v51 = vsel %vm2050_vm5, %v2038_v59, %v14675_v43  ;;  %v4632_v43 = vld [vmem:[%s18278_s3 + $0x88] sm:$0xff] }
 0x1ef   : > { %v14735_v46 = vpop.permute.xlu1 %1419  ;;  %v2104_v12 = vsel %vm2083_vm7, %v2071_v51, %v14692_v53  ;;  %v4640_v51 = vld [vmem:[%s18278_s3 + $0xc8] sm:$0xff] }
 0x1f0   : > { %v14747_v58 = vpop.permute.xlu0 %1039  ;;  %11584 = vmatpush1.bf16.msra.mxu0 %v11583_v10  ;;  %v893_v10 = vld [vmem:[#allocation2 + $0x180] sm:$0xff]  ;;  %v2137_v62 = vsel %vm2116_vm6, %v2104_v12, %v14725_v0  ;;  %v4633_v0 = vld [vmem:[%s18278_s3 + $0x90] sm:$0xff] }
 0x1f1   : > { %1813 = vrot.lane.b32.xlu1 %v923_v34, %s18313_s22  ;;  %11585 = vmatprep.subr.bf16.mxu0 %v13385_v16 }
 0x1f2   : > { %1815 = vrot.lane.b32.xlu0 %v924_v22, %s18313_s22 }
 0x1f3   : > { %v1928_v48 = vpop.permute.xlu1 %1927 }
 0x1f4   : > { %v2234_v26 = vsel %vm551_vm2, %v2202_v6, %v1928_v48  ;;  %v14762_v54 = vpop.permute.xlu0 %1547  ;;  %11587 = vmatpush1.bf16.msra.mxu0 %v11586_v30 }
 0x1f5   : > { %1433 = vrot.lane.b32.xlu1 %v923_v34, %s13380_s28  ;;  %11095 = vmatmul.mubr.msk.f32.gmra.mrb[18].mxu0 %vm2259_vm10, %v2234_v26  ;;  %v11595_v26 = vpack.c.bf16 %v4630_v55, %v4629_v25 }
 0x1f6   : > { %1053 = vrot.lane.b32.xlu0 %v923_v34, %s13377_s25  ;;  %11588 = vmatprep.subr.bf16.mxu0 %v13385_v16 }
 0x1f7   : > { %v14768_v38 = vpop.permute.xlu1 %1165 }
 0x1f8   : > { %v14776_v5 = vpop.permute.xlu0 %1167  ;;  %11590 = vmatpush1.bf16.msra.mxu0 %v11589_v42 }
 0x1f9   : > { %1941 = vrot.lane.b32.xlu1 %v955_v31, %s13384_s17  ;;  %11591 = vmatprep.subr.bf16.mxu0 %v13385_v16 }
 0x1fa   : > { %1561 = vrot.lane.b32.xlu0 %v955_v31, %s13381_s29 }
 0x1fb   : > { %v1674_v32 = vpop.permute.xlu1 %1673 }
 0x1fc   : > { %v14787_v36 = vpop.permute.xlu0 %1675  ;;  %11593 = vmatpush1.bf16.msra.mxu0 %v11592_v9  ;;  %v2170_v41 = vsel %vm2149_vm8, %v2137_v62, %v1674_v32  ;;  %v2006_v32 = vsel %vm495_vm0, %v14371_v61, %v14653_v50  ;;  %v926_v50 = vld [vmem:[#allocation2 + $0x189] sm:$0xff]  ;;  %v895_v62 = vld [vmem:[#allocation2 + $0x198] sm:$0xff] }
 0x1fd   : > { %1435 = vrot.lane.b32.xlu1 %v924_v22, %s13380_s28  ;;  %11594 = vmatprep.subr.bf16.mxu0 %v13385_v16 }
 0x1fe   : > { %1055 = vrot.lane.b32.xlu0 %v924_v22, %s13377_s25 }
 0x1ff   : > { %v14792_v13 = vpop.permute.xlu1 %1293 }
 0x200   : > { %v11075_v40 = vpop.f32.mrb[4].mxu0  ;;  %v14801_v52 = vpop.permute.xlu0 %1295  ;;  %11596 = vmatpush1.bf16.msra.mxu0 %v11595_v26 }
 0x201   : > { %v2452_v63 = vadd.f32 %v11075_v40, %v14619_v17  ;;  %1943 = vrot.lane.b32.xlu1 %v956_v49, %s13384_s17  ;;  %v2446_v34 = vpop.f32.mrb[5].mxu0  ;;  %11597 = vmatprep.subr.bf16.mxu0 %v13385_v16  ;;  %v4634_v40 = vld [vmem:[%s18278_s3 + $0x98] sm:$0xff] }
 0x202   : > { %v2447_v60 = vadd.f32 %v14619_v17, %v2446_v34  ;;  %1563 = vrot.lane.b32.xlu0 %v956_v49, %s13381_s29  ;;  %v11601_v14 = vpack.c.bf16 %v4634_v40, %v4633_v0  ;;  %v925_v34 = vld [vmem:[#allocation2 + $0x181] sm:$0xff] }
 0x203   : > { %vm2590_vm1 = vcmp.ge.f32.partialorder %v2452_v63, 0.0  ;;  %v2622_v22 = vmul.f32 0.01, %v2452_v63  ;;  %v1802_v27 = vpop.permute.xlu1 %1801 }
 0x204   : > { %vm2589_vm11 = vcmp.ge.f32.partialorder %v2447_v60, 0.0  ;;  %v2621_v21 = vmul.f32 0.01, %v2447_v60  ;;  %v1804_v6 = vpop.permute.xlu0 %1803  ;;  %v2203_v20 = vsel %vm2182_vm9, %v2170_v41, %v1802_v27  ;;  %v4642_v41 = vld [vmem:[%s18278_s3 + $0xd8] sm:$0xff] }
 0x205   : > { %1181 = vrot.lane.b32.xlu1 %v955_v31, %s13378_s26  ;;  %v2654_v48 = vsel %vm2590_vm1, %v2452_v63, %v2622_v22  ;;  %v4631_v31 = vld [vmem:[%s18278_s3 + $0x80] sm:$0xff]  ;;  %v2039_v63 = vsel %vm2017_vm4, %v2006_v32, %v14667_v45  ;;  %v4636_v45 = vld [vmem:[%s18278_s3 + $0xa8] sm:$0xff] }
 0x206   : > { %v2653_v39 = vsel %vm2589_vm11, %v2447_v60, %v2621_v21  ;;  %3337 = vst.msk [vmem:[#allocation3 + $0x51] sm:$0xff] %vm551_vm2, %v2654_v48  ;;  %1183 = vrot.lane.b32.xlu0 %v956_v49, %s13378_s26  ;;  %v11598_v53 = vpack.c.bf16 %v4632_v43, %v4631_v31  ;;  %v2072_v9 = vsel %vm2050_vm5, %v2039_v63, %v14677_v8  ;;  %v4635_v22 = vld [vmem:[%s18278_s3 + $0xa0] sm:$0xff]  ;;  %s18356_s26 = sshll.u32 %s18358_s19, 8 }
 0x207   : > { %v14824_v57 = vpop.permute.xlu1 %1421  ;;  %11129 = vmatprep.mubr.msk.f32.mxu1 %vm551_vm2, %v2653_v39  ;;  %3336 = vst.msk [vmem:[#allocation3 + $0x49] sm:$0xff] %vm551_vm2, %v2653_v39  ;;  %v2105_v61 = vsel %vm2083_vm7, %v2072_v9, %v14735_v46  ;;  %v11604_v46 = vpack.c.bf16 %v4636_v45, %v4635_v22  ;;  %v958_v39 = vld [vmem:[#allocation2 + $0x18a] sm:$0xff]  ;;  %v4643_v9 = vld [vmem:[%s18278_s3 + $0xe0] sm:$0xff] }
 0x208   : > { %11130 = vmatmul.mubr.msk.f32.gmra.mrb[4].mxu1 %vm551_vm2, %v2654_v48  ;;  %v14839_v30 = vpop.permute.xlu0 %1041  ;;  %11599 = vmatpush1.bf16.msra.mxu0 %v11598_v53  ;;  %v2138_v8 = vsel %vm2116_vm6, %v2105_v61, %v14762_v54  ;;  %v4637_v54 = vld [vmem:[%s18278_s3 + $0xb0] sm:$0xff]  ;;  %v4638_v48 = vld [vmem:[%s18278_s3 + $0xb8] sm:$0xff]  ;;  %v4644_v61 = vld [vmem:[%s18278_s3 + $0xe8] sm:$0xff] }
 0x209   : > { %1689 = vrot.lane.b32.xlu1 %v893_v10, %s13382_s30  ;;  %11600 = vmatprep.subr.bf16.mxu0 %v13385_v16  ;;  %v2171_v21 = vsel %vm2149_vm8, %v2138_v8, %v14787_v36  ;;  %v11607_v36 = vpack.c.bf16 %v4638_v48, %v4637_v54  ;;  %v4641_v53 = vld [vmem:[%s18278_s3 + $0xd0] sm:$0xff]  ;;  %v11616_v45 = vpack.c.bf16 %v4644_v61, %v4643_v9  ;;  %v3429_v9 = vld [vmem:[#allocation3 + $0xa] sm:$0xff]  ;;  %v14990_v61 = vld [vmem:[#allocation3 + $0x38] sm:$0xff] }
 0x20a   : > { %1691 = vrot.lane.b32.xlu0 %v894_v44, %s13382_s30  ;;  %v2204_v25 = vsel %vm2182_vm9, %v2171_v21, %v1804_v6  ;;  %v957_v6 = vld [vmem:[#allocation2 + $0x182] sm:$0xff]  ;;  %v11613_v0 = vpack.c.bf16 %v4642_v41, %v4641_v53  ;;  %v2007_v54 = vsel %vm495_vm0, %v14432_v35, %v14704_v28 }
 0x20b   : > { %v1930_v42 = vpop.permute.xlu1 %1929  ;;  %v960_v53 = vld [vmem:[#allocation2 + $0x1a2] sm:$0xff] }
 0x20c   : > { %v2235_v49 = vsel %vm551_vm2, %v2203_v20, %v1930_v42  ;;  %v14856_v23 = vpop.permute.xlu0 %1549  ;;  %11602 = vmatpush1.bf16.msra.mxu0 %v11601_v14  ;;  %v14972_v41 = vld [vmem:[#allocation3 + $0x31] sm:$0xff] }
 0x20d   : > { %1309 = vrot.lane.b32.xlu1 %v893_v10, %s13379_s27  ;;  %11097 = vmatprep.mubr.msk.f32.mxu0 %vm2259_vm10, %v2235_v49  ;;  %v4639_v10 = vld [vmem:[%s18278_s3 + $0xc0] sm:$0xff] }
 0x20e   : > { %1311 = vrot.lane.b32.xlu0 %v894_v44, %s13379_s27  ;;  %s18336_s27 = smov 28   ;;  %11603 = vmatprep.subr.bf16.mxu0 %v13385_v16  ;;  %v11610_v44 = vpack.c.bf16 %v4640_v51, %v4639_v10  ;;  %v3396_v10 = vld [vmem:[#allocation3 + $0x1] sm:$0xff] }
 0x20f   : > { %v14866_v60 = vpop.permute.xlu1 %1423  ;;  %v14955_v51 = vld [vmem:[#allocation3 + $0x1a] sm:$0xff] }
 0x210   : > { %v14878_v27 = vpop.permute.xlu0 %1043  ;;  %11605 = vmatpush1.bf16.msra.mxu0 %v11604_v46  ;;  %v896_v46 = vld [vmem:[#allocation2 + $0x1a0] sm:$0xff] }
 0x211   : > { %1817 = vrot.lane.b32.xlu1 %v925_v34, %s18336_s27  ;;  %11606 = vmatprep.subr.bf16.mxu0 %v13385_v16 }
 0x212   : > { %1819 = vrot.lane.b32.xlu0 %v926_v50, %s18336_s27 }
 0x213   : > { %v1932_v55 = vpop.permute.xlu1 %1931 }
 0x214   : > { %v2236_v56 = vsel %vm551_vm2, %v2204_v25, %v1932_v55  ;;  %v14893_v26 = vpop.permute.xlu0 %1551  ;;  %11608 = vmatpush1.bf16.msra.mxu0 %v11607_v36  ;;  %v959_v25 = vld [vmem:[#allocation2 + $0x19a] sm:$0xff]  ;;  %v4645_v55 = vld [vmem:[%s18278_s3 + $0xf0] sm:$0xff] }
 0x215   : > { %1437 = vrot.lane.b32.xlu1 %v925_v34, %s13380_s28  ;;  %11098 = vmatmul.mubr.msk.f32.gmra.mrb[20].mxu0 %vm2259_vm10, %v2236_v56  ;;  %v927_v34 = vld [vmem:[#allocation2 + $0x199] sm:$0xff] }
 0x216   : > { %1439 = vrot.lane.b32.xlu0 %v926_v50, %s13380_s28  ;;  %11609 = vmatprep.subr.bf16.mxu0 %v13385_v16  ;;  %v4646_v56 = vld [vmem:[%s18278_s3 + $0xf8] sm:$0xff] }
 0x217   : > { %v14899_v59 = vpop.permute.xlu1 %1169  ;;  %v11619_v36 = vpack.c.bf16 %v4646_v56, %v4645_v55  ;;  %v15007_v55 = vld [vmem:[#allocation3 + $0x32] sm:$0xff] }
 0x218   : > { %v14907_v12 = vpop.permute.xlu0 %1171  ;;  %11611 = vmatpush1.bf16.msra.mxu0 %v11610_v44 }
 0x219   : > { %1945 = vrot.lane.b32.xlu1 %v957_v6, %s13384_s17  ;;  %11612 = vmatprep.subr.bf16.mxu0 %v13385_v16 }
 0x21a   : > { %1947 = vrot.lane.b32.xlu0 %v958_v39, %s13384_s17 }
 0x21b   : > { %v1678_v31 = vpop.permute.xlu1 %1677 }
 0x21c   : > { %v11078_v43 = vpop.f32.mrb[6].mxu0  ;;  %v14919_v42 = vpop.permute.xlu0 %1679  ;;  %11614 = vmatpush1.bf16.msra.mxu0 %v11613_v0  ;;  %v3428_v0 = vld [vmem:[#allocation3 + $0x2] sm:$0xff] }
 0x21d   : > { %v2462_v20 = vadd.f32 %v11078_v43, %v14619_v17  ;;  %1565 = vrot.lane.b32.xlu1 %v957_v6, %s13381_s29  ;;  %v2456_v49 = vpop.f32.mrb[7].mxu0  ;;  %11615 = vmatprep.subr.bf16.mxu0 %v13385_v16  ;;  %v2040_v6 = vsel %vm2017_vm4, %v2007_v54, %v14768_v38  ;;  %v11917_v38 = vpack.i.bf16 %v3396_v10, %v14955_v51  ;;  %v15024_v10 = vld [vmem:[#allocation3 + $0x49] sm:$0xff] }
 0x21e   : > { %v2457_v40 = vadd.f32 %v14619_v17, %v2456_v49  ;;  %1693 = vrot.lane.b32.xlu0 %v895_v62, %s13382_s30  ;;  %v2073_v44 = vsel %vm2050_vm5, %v2040_v6, %v14792_v13  ;;  %v14977_v49 = vld [vmem:[#allocation3 + $0x18] sm:$0xff] }
 0x21f   : > { %vm2592_vm12 = vcmp.ge.f32.partialorder %v2462_v20, 0.0  ;;  %v2624_v32 = vmul.f32 0.01, %v2462_v20  ;;  %v14925_v14 = vpop.permute.xlu1 %1297  ;;  %v2106_v35 = vsel %vm2083_vm7, %v2073_v44, %v14824_v57  ;;  %v15014_v6 = vld [vmem:[#allocation3 + $0x39] sm:$0xff] }
 0x220   : > { %vm2591_vm13 = vcmp.ge.f32.partialorder %v2457_v40, 0.0  ;;  %v2623_v63 = vmul.f32 0.01, %v2457_v40  ;;  %v14933_v50 = vpop.permute.xlu0 %1299  ;;  %11617 = vmatpush1.bf16.msra.mxu0 %v11616_v45  ;;  %v2139_v28 = vsel %vm2116_vm6, %v2106_v35, %v14856_v23 }
 0x221   : > { %1567 = vrot.lane.b32.xlu1 %v958_v39, %s13381_s29  ;;  %v2656_v22 = vsel %vm2592_vm12, %v2462_v20, %v2624_v32  ;;  %11618 = vmatprep.subr.bf16.mxu0 %v13385_v16  ;;  %v928_v39 = vld [vmem:[#allocation2 + $0x1a1] sm:$0xff]  ;;  %v2172_v13 = vsel %vm2149_vm8, %v2139_v28, %v1678_v31  ;;  %v2008_v32 = vsel %vm495_vm0, %v14435_v24, %v14747_v58 }
 0x222   : > { %v2655_v8 = vsel %vm2591_vm13, %v2457_v40, %v2623_v63  ;;  %3339 = vst.msk [vmem:[#allocation3 + $0x69] sm:$0xff] %vm551_vm2, %v2656_v22  ;;  %1821 = vrot.lane.b32.xlu0 %v927_v34, %s18336_s27  ;;  %v3557_v40 = vld [vmem:[#allocation3 + $0x30] sm:$0xff]  ;;  %v11927_v31 = vpack.i.bf16 %v14977_v49, %v14972_v41  ;;  %v2041_v34 = vsel %vm2017_vm4, %v2008_v32, %v14776_v5 }
 0x223   : > { %v1806_v21 = vpop.permute.xlu1 %1805  ;;  %11132 = vmatprep.mubr.msk.f32.mxu1 %vm551_vm2, %v2655_v8  ;;  %3338 = vst.msk [vmem:[#allocation3 + $0x61] sm:$0xff] %vm551_vm2, %v2655_v8  ;;  %v11922_v24 = vpack.i.bf16 %v3428_v0, %v3557_v40  ;;  %v3397_v8 = vld [vmem:[#allocation3 + $0x9] sm:$0xff] }
 0x224   : > { %11133 = vmatmul.mubr.msk.f32.gmra.mrb[6].mxu1 %vm551_vm2, %v2656_v22  ;;  %v1808_v48 = vpop.permute.xlu0 %1807  ;;  %11620 = vmatpush1.bf16.msra.mxu0 %v11619_v36  ;;  %v2205_v20 = vsel %vm2182_vm9, %v2172_v13, %v1806_v21  ;;  %v2074_v22 = vsel %vm2050_vm5, %v2041_v34, %v14801_v52  ;;  %v11937_v52 = vpack.i.bf16 %v3429_v9, %v14990_v61  ;;  %v15012_v36 = vld [vmem:[#allocation3 + $0x19] sm:$0xff]  ;;  %v15037_v0 = vld [vmem:[#allocation3 + $0x50] sm:$0xff] }
 0x225   : > { %1695 = vrot.lane.b32.xlu1 %v896_v46, %s13382_s30  ;;  %11637 = vmatprep.subr.bf16.mxu0 %v13385_v16  ;;  %s13386_s30 = smov 96   ;;  %v2107_v58 = vsel %vm2083_vm7, %v2074_v22, %v14866_v60  ;;  %v3525_v46 = vld [vmem:[#allocation3 + $0x22] sm:$0xff]  ;;  %v3527_v22 = vld [vmem:[#allocation3 + $0x3a] sm:$0xff] }
 0x226   : > { %1949 = vrot.lane.b32.xlu0 %v959_v25, %s13384_s17  ;;  %v2140_v5 = vsel %vm2116_vm6, %v2107_v58, %v14893_v26  ;;  %v11932_v54 = vpack.i.bf16 %v3397_v8, %v3525_v46 }
 0x227   : > { %v14960_v43 = vpop.permute.xlu1 %1425  ;;  %v2173_v25 = vsel %vm2149_vm8, %v2140_v5, %v14919_v42  ;;  %v11947_v42 = vpack.i.bf16 %v15012_v36, %v15007_v55  ;;  %v15046_v5 = vld [vmem:[#allocation3 + $0x21] sm:$0xff] }
 0x228   : > { %v14966_v62 = vpop.permute.xlu0 %1045  ;;  %v2206_v56 = vsel %vm2182_vm9, %v2173_v25, %v1808_v48  ;;  %v15022_v48 = vld [vmem:[#allocation3 + $0x20] sm:$0xff] }
 0x229   : > { %1823 = vrot.lane.b32.xlu1 %v928_v39, %s18336_s27  ;;  %s13387_s27 = smov 64   ;;  %v11942_v35 = vpack.i.bf16 %v15022_v48, %v15014_v6 }
 0x22a   : > { %11918 = vrot.lane.b32.xlu0 %v11917_v38, %s13384_s17  ;;  %v3559_v38 = vld [vmem:[#allocation3 + $0x48] sm:$0xff] }
 0x22b   : > { %v1934_v57 = vpop.permute.xlu1 %1933  ;;  %v11952_v34 = vpack.i.bf16 %v14955_v51, %v3559_v38  ;;  %v11962_v51 = vpack.i.bf16 %v15046_v5, %v3527_v22 }
 0x22c   : > { %v2237_v23 = vsel %vm551_vm2, %v2205_v20, %v1934_v57  ;;  %v14982_v63 = vpop.permute.xlu0 %1553  ;;  %v11957_v57 = vpack.i.bf16 %v3557_v40, %v15024_v10  ;;  %v11967_v40 = vpack.i.bf16 %v3525_v46, %v15037_v0  ;;  %v15057_v46 = vld [vmem:[#allocation3 + $0x51] sm:$0xff] }
 0x22d   : > { %1951 = vrot.lane.b32.xlu1 %v960_v53, %s13384_s17  ;;  %11100 = vmatprep.mubr.msk.f32.mxu0 %vm2259_vm10, %v2237_v23 }
 0x22e   : > { %11928 = vrot.lane.b32.xlu0 %v11927_v31, %s13386_s30 }
 0x22f   : > { %v14994_v45 = vpop.permute.xlu1 %1427 }
 0x230   : > { %v15001_v21 = vpop.permute.xlu0 %1047 }
 0x231   : > { %11923 = vrot.lane.b32.xlu1 %v11922_v24, %s13387_s27 }
 0x232   : > { %11938 = vrot.lane.b32.xlu0 %v11937_v52, %s13387_s27  ;;  %v15048_v52 = vld [vmem:[#allocation3 + $0x4a] sm:$0xff] }
 0x233   : > { %v1936_v60 = vpop.permute.xlu1 %1935 }
 0x234   : > { %v2238_v26 = vsel %vm551_vm2, %v2206_v56, %v1936_v60  ;;  %v15016_v39 = vpop.permute.xlu0 %1555  ;;  %v11977_v60 = vpack.i.bf16 %v14972_v41, %v15048_v52 }
 0x235   : > { %11101 = vmatmul.mubr.msk.f32.gmra.mrb[22].mxu0 %vm2259_vm10, %v2238_v26  ;;  %11933 = vrot.lane.b32.xlu1 %v11932_v54, %s13384_s17  ;;  %v15064_v54 = vld [vmem:[#allocation3 + $0x61] sm:$0xff] }
 0x236   : > { %11948 = vrot.lane.b32.xlu0 %v11947_v42, %s13384_s17  ;;  %v11972_v42 = vpack.i.bf16 %v14990_v61, %v15057_v46 }
 0x237   : > { %v15026_v44 = vpop.permute.xlu1 %1173 }
 0x238   : > { %v11081_v28 = vpop.f32.mrb[8].mxu0  ;;  %v15032_v53 = vpop.permute.xlu0 %1175 }
 0x239   : > { %v2472_v13 = vadd.f32 %v11081_v28, %v14619_v17  ;;  %v2466_v20 = vpop.f32.mrb[9].mxu0  ;;  %11943 = vrot.lane.b32.xlu1 %v11942_v35, %s13386_s30  ;;  %v3561_v35 = vld [vmem:[#allocation3 + $0x60] sm:$0xff]  ;;  %v13357_v28 = vld [vmem:[#allocation2 + $0x120] sm:$0xff] }
 0x23a   : > { %v2467_v23 = vadd.f32 %v14619_v17, %v2466_v20  ;;  %11958 = vrot.lane.b32.xlu0 %v11957_v57, %s13386_s30  ;;  %v11987_v57 = vpack.i.bf16 %v3559_v38, %v15064_v54  ;;  %v11982_v61 = vpack.i.bf16 %v15007_v55, %v3561_v35 }
 0x23b   : > { %vm2594_vm14 = vcmp.ge.f32.partialorder %v2472_v13, 0.0  ;;  %v2626_v32 = vmul.f32 0.01, %v2472_v13  ;;  %v1682_v31 = vpop.permute.xlu1 %1681 }
 0x23c   : > { %vm2593_vm15 = vcmp.ge.f32.partialorder %v2467_v23, 0.0  ;;  %v2625_v9 = vmul.f32 0.01, %v2467_v23  ;;  %v15041_v24 = vpop.permute.xlu0 %1683 }
 0x23d   : > { %11953 = vrot.lane.b32.xlu1 %v11952_v34, %s13387_s27  ;;  %v2658_v58 = vsel %vm2594_vm14, %v2472_v13, %v2626_v32  ;;  %v2009_v13 = vsel %vm495_vm0, %v13357_v28, %v14839_v30  ;;  %v15075_v32 = vld [vmem:[#allocation3 + $0x68] sm:$0xff] }
 0x23e   : > { %v2657_v8 = vsel %vm2593_vm15, %v2467_v23, %v2625_v9  ;;  %3341 = vst.msk [vmem:[#allocation3 + $0x81] sm:$0xff] %vm551_vm2, %v2658_v58  ;;  %11968 = vrot.lane.b32.xlu0 %v11967_v40, %s13387_s27  ;;  %v2042_v23 = vsel %vm2017_vm4, %v2009_v13, %v14899_v59  ;;  %v3529_v40 = vld [vmem:[#allocation3 + $0x52] sm:$0xff]  ;;  %v11997_v59 = vpack.i.bf16 %v3527_v22, %v15075_v32 }
 0x23f   : > { %v15050_v25 = vpop.permute.xlu1 %1301  ;;  %11135 = vmatprep.mubr.msk.f32.mxu1 %vm551_vm2, %v2657_v8  ;;  %3340 = vst.msk [vmem:[#allocation3 + $0x79] sm:$0xff] %vm551_vm2, %v2657_v8  ;;  %v2075_v34 = vsel %vm2050_vm5, %v2042_v23, %v14925_v14  ;;  %v15092_v8 = vld [vmem:[#allocation3 + $0x62] sm:$0xff] }
 0x240   : > { %11136 = vmatmul.mubr.msk.f32.gmra.mrb[8].mxu1 %vm551_vm2, %v2658_v58  ;;  %v15059_v56 = vpop.permute.xlu0 %1303  ;;  %v2108_v30 = vsel %vm2083_vm7, %v2075_v34, %v14960_v43  ;;  %v11992_v43 = vpack.i.bf16 %v15014_v6, %v3529_v40 }
 0x241   : > { %11963 = vrot.lane.b32.xlu1 %v11962_v51, %s13384_s17  ;;  %v2141_v38 = vsel %vm2116_vm6, %v2108_v30, %v14982_v63  ;;  %v15098_v63 = vld [vmem:[#allocation3 + $0x69] sm:$0xff] }
 0x242   : > { %11978 = vrot.lane.b32.xlu0 %v11977_v60, %s13384_s17  ;;  %v2174_v14 = vsel %vm2149_vm8, %v2141_v38, %v1682_v31  ;;  %v12007_v31 = vpack.i.bf16 %v15024_v10, %v15092_v8 }
 0x243   : > { %v1810_v26 = vpop.permute.xlu1 %1809 }
 0x244   : > { %v1812_v20 = vpop.permute.xlu0 %1811  ;;  %v2207_v51 = vsel %vm2182_vm9, %v2174_v14, %v1810_v26 }
 0x245   : > { %11973 = vrot.lane.b32.xlu1 %v11972_v42, %s13386_s30  ;;  %v13358_v42 = vld [vmem:[#allocation2 + $0x128] sm:$0xff] }
 0x246   : > { %11988 = vrot.lane.b32.xlu0 %v11987_v57, %s13386_s30  ;;  %v2010_v28 = vsel %vm495_vm0, %v13358_v42, %v14878_v27  ;;  %v15110_v13 = vld [vmem:[#allocation3 + $0x79] sm:$0xff]  ;;  %v12002_v27 = vpack.i.bf16 %v15037_v0, %v15098_v63 }
 0x247   : > { %v15079_v9 = vpop.permute.xlu1 %1429  ;;  %v2043_v26 = vsel %vm2017_vm4, %v2010_v28, %v14907_v12  ;;  %v15142_v42 = vld [vmem:[#allocation3 + $0x7a] sm:$0xff] }
 0x248   : > { %v15087_v58 = vpop.permute.xlu0 %1049  ;;  %v2076_v57 = vsel %vm2050_vm5, %v2043_v26, %v14933_v50  ;;  %v12017_v50 = vpack.i.bf16 %v3561_v35, %v15110_v13 }
 0x249   : > { %11983 = vrot.lane.b32.xlu1 %v11982_v61, %s13387_s27  ;;  %v2109_v34 = vsel %vm2083_vm7, %v2076_v57, %v14994_v45  ;;  %v3563_v61 = vld [vmem:[#allocation3 + $0x78] sm:$0xff]  ;;  %v15148_v57 = vld [vmem:[#allocation3 + $0x81] sm:$0xff] }
 0x24a   : > { %11998 = vrot.lane.b32.xlu0 %v11997_v59, %s13387_s27  ;;  %v2142_v30 = vsel %vm2116_vm6, %v2109_v34, %v15016_v39  ;;  %v15129_v59 = vld [vmem:[#allocation3 + $0x80] sm:$0xff]  ;;  %v12012_v45 = vpack.i.bf16 %v15048_v52, %v3563_v61 }
 0x24b   : > { %v1938_v55 = vpop.permute.xlu1 %1937  ;;  %v2175_v38 = vsel %vm2149_vm8, %v2142_v30, %v15041_v24  ;;  %v12027_v24 = vpack.i.bf16 %v3529_v40, %v15129_v59 }
 0x24c   : > { %v2239_v60 = vsel %vm551_vm2, %v2207_v51, %v1938_v55  ;;  %v15102_v22 = vpop.permute.xlu0 %1557  ;;  %v2208_v0 = vsel %vm2182_vm9, %v2175_v38, %v1812_v20  ;;  %v3531_v55 = vld [vmem:[#allocation3 + $0x6a] sm:$0xff] }
 0x24d   : > { %11103 = vmatprep.mubr.msk.f32.mxu0 %vm2259_vm10, %v2239_v60  ;;  %11993 = vrot.lane.b32.xlu1 %v11992_v43, %s13384_s17 }
 0x24e   : > { %12008 = vrot.lane.b32.xlu0 %v12007_v31, %s13384_s17  ;;  %v12022_v31 = vpack.i.bf16 %v15057_v46, %v3531_v55 }
 0x24f   : > { %v15114_v23 = vpop.permute.xlu1 %1431 }
 0x250   : > { %v15123_v12 = vpop.permute.xlu0 %1051 }
 0x251   : > { %12003 = vrot.lane.b32.xlu1 %v12002_v27, %s13386_s30 }
 0x252   : > { %12018 = vrot.lane.b32.xlu0 %v12017_v50, %s13386_s30  ;;  %v12032_v50 = vpack.i.bf16 %v15075_v32, %v15148_v57  ;;  %v15174_v32 = vld [vmem:[#allocation3 + $0x82] sm:$0xff] }
 0x253   : > { %v1940_v14 = vpop.permute.xlu1 %1939 }
 0x254   : > { %v2240_v39 = vsel %vm551_vm2, %v2208_v0, %v1940_v14  ;;  %v11084_v51 = vpop.f32.mrb[10].mxu0  ;;  %v15136_v60 = vpop.permute.xlu0 %1559 }
 0x255   : > { %v2482_v43 = vadd.f32 %v11084_v51, %v14619_v17  ;;  %v2476_v35 = vpop.f32.mrb[11].mxu0  ;;  %11104 = vmatmul.mubr.msk.f32.gmra.mrb[24].mxu0 %vm2259_vm10, %v2240_v39  ;;  %12013 = vrot.lane.b32.xlu1 %v12012_v45, %s13387_s27 }
 0x256   : > { %v2477_v20 = vadd.f32 %v14619_v17, %v2476_v35  ;;  %12028 = vrot.lane.b32.xlu0 %v12027_v24, %s13387_s27  ;;  %v12037_v17 = vpack.i.bf16 %v15064_v54, %v15142_v42  ;;  %v13359_v24 = vld [vmem:[#allocation2 + $0x138] sm:$0xff] }
 0x257   : > { %vm2596_vm1 = vcmp.ge.f32.partialorder %v2482_v43, 0.0  ;;  %v2628_v52 = vmul.f32 0.01, %v2482_v43  ;;  %v15144_v28 = vpop.permute.xlu1 %1177 }
 0x258   : > { %vm2595_vm11 = vcmp.ge.f32.partialorder %v2477_v20, 0.0  ;;  %v2627_v26 = vmul.f32 0.01, %v2477_v20  ;;  %v15150_v27 = vpop.permute.xlu0 %1179 }
 0x259   : > { %12023 = vrot.lane.b32.xlu1 %v12022_v31, %s13384_s17  ;;  %v2660_v40 = vsel %vm2596_vm1, %v2482_v43, %v2628_v52 }
 0x25a   : > { %v2659_v34 = vsel %vm2595_vm11, %v2477_v20, %v2627_v26  ;;  %3343 = vst.msk [vmem:[#allocation3 + $0x99] sm:$0xff] %vm551_vm2, %v2660_v40  ;;  %12038 = vrot.lane.b32.xlu0 %v12037_v17, %s13384_s17  ;;  %v2011_v20 = vsel %vm495_vm0, %v13359_v24, %v14966_v62  ;;  %v12052_v26 = vpack.i.bf16 %v15098_v63, %v15174_v32  ;;  %v13360_v24 = vld [vmem:[#allocation2 + $0x140] sm:$0xff] }
 0x25b   : > { %v1686_v30 = vpop.permute.xlu1 %1685  ;;  %11138 = vmatprep.mubr.msk.f32.mxu1 %vm551_vm2, %v2659_v34  ;;  %3342 = vst.msk [vmem:[#allocation3 + $0x91] sm:$0xff] %vm551_vm2, %v2659_v34  ;;  %v2044_v31 = vsel %vm2017_vm4, %v2011_v20, %v15026_v44  ;;  %v2012_v20 = vsel %vm495_vm0, %v13360_v24, %v15001_v21 }
 0x25c   : > { %11139 = vmatmul.mubr.msk.f32.gmra.mrb[10].mxu1 %vm551_vm2, %v2660_v40  ;;  %v1688_v38 = vpop.permute.xlu0 %1687 }
 0x25d   : > { %12033 = vrot.lane.b32.xlu1 %v12032_v50, %s13386_s30 }
 0x25f   : > { %v15163_v54 = vpop.permute.xlu1 %1305 }
 0x260   : > { %v15165_v0 = vpop.permute.xlu0 %1307 }
 0x261   : > { %v15193_v40 = vld [vmem:[#allocation3 + $0x99] sm:$0xff] }
 0x262   : > { %v15167_v14 = vld [vmem:[#allocation3 + $0x90] sm:$0xff]  ;;  %v15176_v35 = vld [vmem:[#allocation3 + $0x98] sm:$0xff] }
 0x263   : > { %v15169_v45 = vld [vmem:[#allocation3 + $0x91] sm:$0xff]  ;;  %v1814_v39 = vpop.permute.xlu1 %1813  ;;  %v12042_v51 = vpack.i.bf16 %v15092_v8, %v15167_v14  ;;  %v2077_v8 = vsel %vm2050_vm5, %v2044_v31, %v15050_v25  ;;  %v12057_v17 = vpack.i.bf16 %v3531_v55, %v15176_v35 }
 0x264   : > { %v12047_v43 = vpack.i.bf16 %v3563_v61, %v15169_v45  ;;  %v1816_v52 = vpop.permute.xlu0 %1815  ;;  %v2110_v62 = vsel %vm2083_vm7, %v2077_v8, %v15079_v9  ;;  %v15201_v44 = vld [vmem:[#allocation3 + $0x92] sm:$0xff]  ;;  %v12062_v9 = vpack.i.bf16 %v15129_v59, %v15193_v40 }
 0x265   : > { %12043 = vrot.lane.b32.xlu1 %v12042_v51, %s13387_s27  ;;  %v2143_v34 = vsel %vm2116_vm6, %v2110_v62, %v15102_v22  ;;  %v12067_v22 = vpack.i.bf16 %v15110_v13, %v15201_v44 }
 0x266   : > { %12048 = vrot.lane.b32.xlu0 %v12047_v43, %s13386_s30  ;;  %v2176_v25 = vsel %vm2149_vm8, %v2143_v34, %v1686_v30  ;;  %v2045_v30 = vsel %vm2017_vm4, %v2012_v20, %v15032_v53 }
 0x267   : > { %v15186_v61 = vpop.permute.xlu1 %1433  ;;  %v2209_v55 = vsel %vm2182_vm9, %v2176_v25, %v1814_v39  ;;  %v2078_v59 = vsel %vm2050_vm5, %v2045_v30, %v15059_v56 }
 0x268   : > { %v15197_v50 = vpop.permute.xlu0 %1053  ;;  %v2111_v13 = vsel %vm2083_vm7, %v2078_v59, %v15114_v23 }
 0x269   : > { %12053 = vrot.lane.b32.xlu1 %v12052_v26, %s13384_s17  ;;  %v2144_v8 = vsel %vm2116_vm6, %v2111_v13, %v15136_v60  ;;  %v15230_v26 = vld [vmem:[%s18277_s2] ss:$0 sm:$0xff] }
 0x26a   : > { %12058 = vrot.lane.b32.xlu0 %v12057_v17, %s13387_s27  ;;  %v2177_v56 = vsel %vm2149_vm8, %v2144_v8, %v1688_v38 }
 0x26b   : > { %v1942_v51 = vpop.permute.xlu1 %1941  ;;  %v2210_v23 = vsel %vm2182_vm9, %v2177_v56, %v1816_v52 }
 0x26c   : > { %v2241_v43 = vsel %vm551_vm2, %v2209_v55, %v1942_v51  ;;  %v15212_v31 = vpop.permute.xlu0 %1561 }
 0x26d   : > { %11106 = vmatprep.mubr.msk.f32.mxu0 %vm2259_vm10, %v2241_v43  ;;  %12063 = vrot.lane.b32.xlu1 %v12062_v9, %s13386_s30 }
 0x26e   : > { %12068 = vrot.lane.b32.xlu0 %v12067_v22, %s13384_s17 }
 0x26f   : > { %v15221_v39 = vpop.permute.xlu1 %1435 }
 0x270   : > { %v11087_v21 = vpop.f32.mrb[12].mxu0  ;;  %v15233_v17 = vpop.permute.xlu0 %1055 }
 0x271   : > { %v2492_v53 = vadd.f32 %v15230_v26, %v11087_v21  ;;  %v2486_v62 = vpop.f32.mrb[13].mxu0 }
 0x272   : > { %v2487_v34 = vadd.f32 %v15230_v26, %v2486_v62 }
 0x273   : > { %vm2598_vm12 = vcmp.ge.f32.partialorder %v2492_v53, 0.0  ;;  %v2630_v25 = vmul.f32 0.01, %v2492_v53  ;;  %v1944_v55 = vpop.permute.xlu1 %1943 }
 0x274   : > { %vm2597_vm13 = vcmp.ge.f32.partialorder %v2487_v34, 0.0  ;;  %v2629_v60 = vmul.f32 0.01, %v2487_v34  ;;  %v2242_v51 = vsel %vm551_vm2, %v2210_v23, %v1944_v55  ;;  %v1564_v9 = vpop.permute.xlu0 %1563  ;;  %v13362_v55 = vld [vmem:[#allocation2 + $0x150] sm:$0xff] }
 0x275   : > { %11107 = vmatmul.mubr.msk.f32.gmra.mrb[26].mxu0 %vm2259_vm10, %v2242_v51  ;;  %v2662_v43 = vsel %vm2598_vm12, %v2492_v53, %v2630_v25  ;;  %v15256_v53 = vld [vmem:[#allocation3 + $0x9a] sm:$0xff] }
 0x276   : > { %v2661_v22 = vsel %vm2597_vm13, %v2487_v34, %v2629_v60  ;;  %3345 = vst.msk [vmem:[#allocation3 + $0xb1] sm:$0xff] %vm551_vm2, %v2662_v43  ;;  %v12082_v23 = vpack.i.bf16 %v15148_v57, %v15256_v53  ;;  %v2013_v60 = vsel %vm495_vm0, %v13362_v55, %v15087_v58  ;;  %v13363_v57 = vld [vmem:[#allocation2 + $0x158] sm:$0xff] }
 0x277   : > { %v15241_v24 = vpop.permute.xlu1 %1181  ;;  %11141 = vmatprep.mubr.msk.f32.mxu1 %vm551_vm2, %v2661_v22  ;;  %3344 = vst.msk [vmem:[#allocation3 + $0xa9] sm:$0xff] %vm551_vm2, %v2661_v22 }
 0x278   : > { %11142 = vmatmul.mubr.msk.f32.gmra.mrb[12].mxu1 %vm551_vm2, %v2662_v43  ;;  %v15246_v38 = vpop.permute.xlu0 %1183  ;;  %v2046_v43 = vsel %vm2017_vm4, %v2013_v60, %v15144_v28 }
 0x279   : > { %v2079_v22 = vsel %vm2050_vm5, %v2046_v43, %v15163_v54 }
 0x27a   : > { %v2112_v28 = vsel %vm2083_vm7, %v2079_v22, %v15186_v61 }
 0x27b   : > { %v1690_v52 = vpop.permute.xlu1 %1689 }
 0x27c   : > { %v1692_v20 = vpop.permute.xlu0 %1691 }
 0x27d   : > { %v15268_v25 = vld [vmem:[#allocation3 + $0xb1] sm:$0xff] }
 0x27e   : > { %v15248_v30 = vld [vmem:[#allocation3 + $0xa8] sm:$0xff]  ;;  %v15258_v62 = vld [vmem:[#allocation3 + $0xb0] sm:$0xff] }
 0x27f   : > { %v15250_v59 = vld [vmem:[#allocation3 + $0xa9] sm:$0xff]  ;;  %v1310_v13 = vpop.permute.xlu1 %1309  ;;  %v12072_v21 = vpack.i.bf16 %v15142_v42, %v15248_v30  ;;  %v12087_v42 = vpack.i.bf16 %v15174_v32, %v15258_v62  ;;  %v2014_v32 = vsel %vm495_vm0, %v13363_v57, %v15123_v12  ;;  %v2145_v12 = vsel %vm2116_vm6, %v2112_v28, %v15212_v31 }
 0x280   : > { %v12077_v8 = vpack.i.bf16 %v15167_v14, %v15250_v59  ;;  %v15260_v56 = vpop.permute.xlu0 %1311  ;;  %v15270_v14 = vld [vmem:[#allocation3 + $0xaa] sm:$0xff] }
 0x281   : > { %12073 = vrot.lane.b32.xlu1 %v12072_v21, %s13387_s27  ;;  %v12097_v58 = vpack.i.bf16 %v15169_v45, %v15270_v14 }
 0x282   : > { %12078 = vrot.lane.b32.xlu0 %v12077_v8, %s13386_s30  ;;  %v12092_v8 = vpack.i.bf16 %v15176_v35, %v15268_v25  ;;  %v2178_v35 = vsel %vm2149_vm8, %v2145_v12, %v1690_v52 }
 0x283   : > { %v1818_v34 = vpop.permute.xlu1 %1817 }
 0x284   : > { %v1820_v51 = vpop.permute.xlu0 %1819  ;;  %v2211_v61 = vsel %vm2182_vm9, %v2178_v35, %v1818_v34 }
 0x285   : > { %12083 = vrot.lane.b32.xlu1 %v12082_v23, %s13384_s17  ;;  %v2047_v23 = vsel %vm2017_vm4, %v2014_v32, %v15150_v27 }
 0x286   : > { %12088 = vrot.lane.b32.xlu0 %v12087_v42, %s13387_s27  ;;  %v2080_v42 = vsel %vm2050_vm5, %v2047_v23, %v15165_v0 }
 0x287   : > { %v1438_v21 = vpop.permute.xlu1 %1437  ;;  %v2113_v45 = vsel %vm2083_vm7, %v2080_v42, %v15221_v39 }
 0x288   : > { %v1440_v54 = vpop.permute.xlu0 %1439  ;;  %v2146_v27 = vsel %vm2116_vm6, %v2113_v45, %v1564_v9 }
 0x289   : > { %12093 = vrot.lane.b32.xlu1 %v12092_v8, %s13386_s30  ;;  %v2179_v0 = vsel %vm2149_vm8, %v2146_v27, %v1692_v20  ;;  %v13364_v8 = vld [vmem:[#allocation2 + $0x168] sm:$0xff] }
 0x28a   : > { %12098 = vrot.lane.b32.xlu0 %v12097_v58, %s13384_s17  ;;  %v2212_v43 = vsel %vm2182_vm9, %v2179_v0, %v1820_v51  ;;  %v2015_v51 = vsel %vm495_vm0, %v13364_v8, %v15197_v50 }
 0x28b   : > { %v1946_v55 = vpop.permute.xlu1 %1945  ;;  %v2048_v28 = vsel %vm2017_vm4, %v2015_v51, %v15241_v24 }
 0x28c   : > { %v2243_v60 = vsel %vm551_vm2, %v2211_v61, %v1946_v55  ;;  %v11090_v31 = vpop.f32.mrb[14].mxu0  ;;  %v1948_v32 = vpop.permute.xlu0 %1947  ;;  %v2081_v12 = vsel %vm2050_vm5, %v2048_v28, %v1310_v13  ;;  %v13365_v55 = vld [vmem:[#allocation2 + $0x170] sm:$0xff] }
 0x28d   : > { %v2502_v57 = vadd.f32 %v15230_v26, %v11090_v31  ;;  %v2496_v22 = vpop.f32.mrb[15].mxu0  ;;  %11109 = vmatprep.mubr.msk.f32.mxu0 %vm2259_vm10, %v2243_v60  ;;  %v2244_v39 = vsel %vm551_vm2, %v2212_v43, %v1948_v32  ;;  %v2114_v35 = vsel %vm2083_vm7, %v2081_v12, %v1438_v21  ;;  %v2016_v0 = vsel %vm495_vm0, %v13365_v55, %v15233_v17 }
 0x28e   : > { %v2497_v9 = vadd.f32 %v15230_v26, %v2496_v22  ;;  %11110 = vmatmul.mubr.msk.f32.gmra.mrb[28].mxu0 %vm2259_vm10, %v2244_v39  ;;  %v2049_v31 = vsel %vm2017_vm4, %v2016_v0, %v15246_v38  ;;  %vm4453_vm4 = vcmask 523264  }
 0x28f   : > { %vm2600_vm14 = vcmp.ge.f32.partialorder %v2502_v57, 0.0  ;;  %v2632_v52 = vmul.f32 0.01, %v2502_v57  ;;  %v1566_v34 = vpop.permute.xlu1 %1565  ;;  %v2082_v32 = vsel %vm2050_vm5, %v2049_v31, %v15260_v56  ;;  %vm4486_vm5 = vcmask 785408  }
 0x290   : > { %vm2599_vm15 = vcmp.ge.f32.partialorder %v2497_v9, 0.0  ;;  %v2631_v20 = vmul.f32 0.01, %v2497_v9  ;;  %v1694_v58 = vpop.permute.xlu0 %1693  ;;  %v2147_v50 = vsel %vm2116_vm6, %v2114_v35, %v1566_v34  ;;  %v2115_v38 = vsel %vm2083_vm7, %v2082_v32, %v1440_v54 }
 0x291   : > { %v2664_v23 = vsel %vm2600_vm14, %v2502_v57, %v2632_v52  ;;  %v2180_v24 = vsel %vm2149_vm8, %v2147_v50, %v1694_v58 }
 0x292   : > { %v2663_v42 = vsel %vm2599_vm15, %v2497_v9, %v2631_v20  ;;  %3347 = vst.msk [vmem:[#allocation3 + $0xc9] sm:$0xff] %vm551_vm2, %v2664_v23  ;;  %v15339_v9 = vld [vmem:[#allocation3 + $0xb2] sm:$0xff] }
 0x293   : > { %v1568_v45 = vpop.permute.xlu1 %1567  ;;  %11144 = vmatprep.mubr.msk.f32.mxu1 %vm551_vm2, %v2663_v42  ;;  %3346 = vst.msk [vmem:[#allocation3 + $0xc1] sm:$0xff] %vm551_vm2, %v2663_v42 }
 0x294   : > { %11145 = vmatmul.mubr.msk.f32.gmra.mrb[14].mxu1 %vm551_vm2, %v2664_v23  ;;  %v1822_v27 = vpop.permute.xlu0 %1821  ;;  %v2148_v52 = vsel %vm2116_vm6, %v2115_v38, %v1568_v45  ;;  %v3364_v45 = vld [vmem:[#allocation3] sm:$0xff]  ;;  %v3365_v38 = vld [vmem:[#allocation3 + $0x8] sm:$0xff] }
 0x295   : > { %v2213_v13 = vsel %vm2182_vm9, %v2180_v24, %v1822_v27 }
 0x297   : > { %v1696_v61 = vpop.permute.xlu1 %1695 }
 0x298   : > { %v1950_v60 = vpop.permute.xlu0 %1949  ;;  %v2181_v20 = vsel %vm2149_vm8, %v2148_v52, %v1696_v61 }
 0x299   : > { %v2245_v21 = vsel %vm551_vm2, %v2213_v13, %v1950_v60  ;;  %v15353_v58 = vld [vmem:[#allocation3 + $0xc9] sm:$0xff] }
 0x29a   : > { %v15327_v43 = vld [vmem:[#allocation3 + $0xc0] sm:$0xff]  ;;  %11112 = vmatprep.mubr.msk.f32.mxu0 %vm2259_vm10, %v2245_v21  ;;  %v15344_v56 = vld [vmem:[#allocation3 + $0xc8] sm:$0xff]  ;;  %v12122_v35 = vpack.i.bf16 %v15258_v62, %v15353_v58 }
 0x29b   : > { %v15329_v57 = vld [vmem:[#allocation3 + $0xc1] sm:$0xff]  ;;  %v1824_v22 = vpop.permute.xlu1 %1823  ;;  %v12102_v17 = vpack.i.bf16 %v15201_v44, %v15327_v43  ;;  %v12117_v51 = vpack.i.bf16 %v15256_v53, %v15344_v56 }
 0x29c   : > { %v12107_v39 = vpack.i.bf16 %v15248_v30, %v15329_v57  ;;  %v11919_v34 = vpop.permute.xlu0 %11918  ;;  %v2214_v44 = vsel %vm2182_vm9, %v2181_v20, %v1824_v22  ;;  %v12112_v30 = vpack.i.bf16 %v15193_v40, %v15339_v9  ;;  %v15357_v12 = vld [vmem:[#allocation3 + $0xc2] sm:$0xff] }
 0x29d   : > { %12103 = vrot.lane.b32.xlu1 %v12102_v17, %s13387_s27  ;;  %v11921_v23 = vunpack.i.h.bf16 %v11919_v34  ;;  %v11920_v28 = vunpack.i.l.bf16 %v11919_v34  ;;  %v12127_v27 = vpack.i.bf16 %v15250_v59, %v15357_v12 }
 0x29e   : > { %12108 = vrot.lane.b32.xlu0 %v12107_v39, %s13386_s30 }
 0x29f   : > { %v1952_v8 = vpop.permute.xlu1 %1951  ;;  %v4421_v61 = vsel %vm551_vm2, %v3364_v45, %v11921_v23  ;;  %v4519_v13 = vsel %vm551_vm2, %v15012_v36, %v11920_v28 }
 0x2a0   : > { %v2246_v54 = vsel %vm551_vm2, %v2214_v44, %v1952_v8  ;;  %v11929_v42 = vpop.permute.xlu0 %11928 }
 0x2a1   : > { %11113 = vmatmul.mubr.msk.f32.gmra.mrb[30].mxu0 %vm2259_vm10, %v2246_v54  ;;  %12113 = vrot.lane.b32.xlu1 %v12112_v30, %s13384_s17  ;;  %v11931_v24 = vunpack.i.h.bf16 %v11929_v42  ;;  %v11930_v55 = vunpack.i.l.bf16 %v11929_v42 }
 0x2a2   : > { %12118 = vrot.lane.b32.xlu0 %v12117_v51, %s13387_s27 }
 0x2a3   : > { %v11924_v40 = vpop.permute.xlu1 %11923 }
 0x2a4   : > { %v11926_v53 = vunpack.i.h.bf16 %v11924_v40  ;;  %v11925_v50 = vunpack.i.l.bf16 %v11924_v40  ;;  %v11939_v0 = vpop.permute.xlu0 %11938 }
 0x2a5   : > { %12123 = vrot.lane.b32.xlu1 %v12122_v35, %s13386_s30  ;;  %v11941_v20 = vunpack.i.h.bf16 %v11939_v0  ;;  %v11940_v30 = vunpack.i.l.bf16 %v11939_v0 }
 0x2a6   : > { %12128 = vrot.lane.b32.xlu0 %v12127_v27, %s13384_s17  ;;  %v4551_v62 = vsel %vm4453_vm4, %v4519_v13, %v11925_v50  ;;  %v4454_v60 = vsel %vm4453_vm4, %v4421_v61, %v11926_v53 }
 0x2a7   : > { %v11934_v31 = vpop.permute.xlu1 %11933  ;;  %v4583_v21 = vsel %vm4486_vm5, %v4551_v62, %v11930_v55  ;;  %v4487_v32 = vsel %vm4486_vm5, %v4454_v60, %v11931_v24 }
 0x2a8   : > { %v11936_v22 = vunpack.i.h.bf16 %v11934_v31  ;;  %v11935_v17 = vunpack.i.l.bf16 %v11934_v31  ;;  %v11093_v39 = vpop.f32.mrb[16].mxu0  ;;  %4818 = vmatprep.mubr.f32.mxu0 %v4583_v21  ;;  %v11949_v36 = vpop.permute.xlu0 %11948 }
 0x2a9   : > { %v2512_v52 = vadd.f32 %v15230_v26, %v11093_v39  ;;  %v2506_v34 = vpop.f32.mrb[17].mxu0  ;;  %4819 = vmatmul.mubr.f32.vlgmr.msra.gmra.mrb[32].mxu0 %v4487_v32  ;;  %v11951_v40 = vunpack.i.h.bf16 %v11949_v36  ;;  %v11950_v35 = vunpack.i.l.bf16 %v11949_v36 }
 0x2aa   : > { %v2507_v44 = vadd.f32 %v15230_v26, %v2506_v34  ;;  %v4520_v8 = vsel %vm551_vm2, %v15046_v5, %v11935_v17  ;;  %v4422_v23 = vsel %vm551_vm2, %v3365_v38, %v11936_v22 }
 0x2ab   : > { %vm2602_vm6 = vcmp.ge.f32.partialorder %v2512_v52, 0.0  ;;  %v2634_v54 = vmul.f32 0.01, %v2512_v52  ;;  %v11944_v51 = vpop.permute.xlu1 %11943  ;;  %v4552_v50 = vsel %vm4453_vm4, %v4520_v8, %v11940_v30  ;;  %v4455_v5 = vsel %vm4453_vm4, %v4422_v23, %v11941_v20 }
 0x2ac   : > { %vm2601_vm7 = vcmp.ge.f32.partialorder %v2507_v44, 0.0  ;;  %v2633_v28 = vmul.f32 0.01, %v2507_v44  ;;  %v11946_v42 = vunpack.i.h.bf16 %v11944_v51  ;;  %v11945_v45 = vunpack.i.l.bf16 %v11944_v51  ;;  %v11959_v53 = vpop.permute.xlu0 %11958 }
 0x2ad   : > { %v2666_v27 = vsel %vm2602_vm6, %v2512_v52, %v2634_v54  ;;  %v11961_v60 = vunpack.i.h.bf16 %v11959_v53  ;;  %v11960_v31 = vunpack.i.l.bf16 %v11959_v53  ;;  %v4521_v32 = vsel %vm551_vm2, %v14972_v41, %v11950_v35  ;;  %v15406_v35 = vld [vmem:[#allocation3 + $0xca] sm:$0xff] }
 0x2ae   : > { %v2665_v61 = vsel %vm2601_vm7, %v2507_v44, %v2633_v28  ;;  %v4584_v24 = vsel %vm4486_vm5, %v4552_v50, %v11945_v45  ;;  %3349 = vst.msk [vmem:[#allocation3 + $0xe1] sm:$0xff] %vm551_vm2, %v2666_v27  ;;  %v4488_v0 = vsel %vm4486_vm5, %v4455_v5, %v11946_v42  ;;  %v4423_v22 = vsel %vm551_vm2, %v14977_v49, %v11951_v40 }
 0x2af   : > { %v11954_v55 = vpop.permute.xlu1 %11953  ;;  %11147 = vmatprep.mubr.msk.f32.mxu1 %vm551_vm2, %v2665_v61  ;;  %3348 = vst.msk [vmem:[#allocation3 + $0xd9] sm:$0xff] %vm551_vm2, %v2665_v61  ;;  %4823 = vmatprep.mubr.f32.mxu0 %v4584_v24  ;;  %v12142_v5 = vpack.i.bf16 %v15268_v25, %v15406_v35 }
 0x2b0   : > { %v11956_v13 = vunpack.i.h.bf16 %v11954_v55  ;;  %v11955_v62 = vunpack.i.l.bf16 %v11954_v55  ;;  %11148 = vmatmul.mubr.msk.f32.gmra.mrb[16].mxu1 %vm551_vm2, %v2666_v27  ;;  %4824 = vmatmul.mubr.f32.gmra.mrb[34].mxu0 %v4488_v0  ;;  %v11969_v21 = vpop.permute.xlu0 %11968 }
 0x2b1   : > { %v11971_v54 = vunpack.i.h.bf16 %v11969_v21  ;;  %v11970_v51 = vunpack.i.l.bf16 %v11969_v21 }
 0x2b2   : > { %v4553_v17 = vsel %vm4453_vm4, %v4521_v32, %v11955_v62  ;;  %v4456_v39 = vsel %vm4453_vm4, %v4423_v22, %v11956_v13 }
 0x2b3   : > { %v11964_v38 = vpop.permute.xlu1 %11963  ;;  %v4585_v52 = vsel %vm4486_vm5, %v4553_v17, %v11960_v31  ;;  %v4489_v34 = vsel %vm4486_vm5, %v4456_v39, %v11961_v60  ;;  %v3368_v31 = vld [vmem:[#allocation3 + $0x30] sm:$0xff] }
 0x2b4   : > { %v11966_v36 = vunpack.i.h.bf16 %v11964_v38  ;;  %v11965_v20 = vunpack.i.l.bf16 %v11964_v38  ;;  %4828 = vmatprep.mubr.f32.mxu0 %v4585_v52  ;;  %v11979_v44 = vpop.permute.xlu0 %11978  ;;  %v2681_v39 = vld [vmem:[%s18284_s9] sm:$0xf] }
 0x2b5   : > { %4829 = vmatmul.mubr.f32.gmra.mrb[36].mxu0 %v4489_v34  ;;  %v11981_v50 = vunpack.i.h.bf16 %v11979_v44  ;;  %v15420_v62 = vld [vmem:[#allocation3 + $0xe1] sm:$0xff]  ;;  %11171 = vmatprep.subr.msk.mxu1 %vm2356_vm3, %v2681_v39 }
 0x2b6   : > { %v15394_v8 = vld [vmem:[#allocation3 + $0xd8] sm:$0xff]  ;;  %v4522_v49 = vsel %vm551_vm2, %v15014_v6, %v11965_v20  ;;  %v4424_v30 = vsel %vm551_vm2, %v15022_v48, %v11966_v36  ;;  %v15408_v53 = vld [vmem:[#allocation3 + $0xe0] sm:$0xff]  ;;  %v11980_v6 = vunpack.i.l.bf16 %v11979_v44  ;;  %v12152_v20 = vpack.i.bf16 %v15344_v56, %v15420_v62  ;;  %11172 = vmatpush3.msk.msra.mxu1 %vm2356_vm3, %v2681_v39 }
 0x2b7   : > { %v15396_v41 = vld [vmem:[#allocation3 + $0xd9] sm:$0xff]  ;;  %v11974_v23 = vpop.permute.xlu1 %11973  ;;  %v12132_v28 = vpack.i.bf16 %v15270_v14, %v15394_v8  ;;  %v4554_v27 = vsel %vm4453_vm4, %v4522_v49, %v11970_v51  ;;  %v4457_v14 = vsel %vm4453_vm4, %v4424_v30, %v11971_v54  ;;  %v12147_v55 = vpack.i.bf16 %v15339_v9, %v15408_v53 }
 0x2b8   : > { %v12137_v42 = vpack.i.bf16 %v15327_v43, %v15396_v41  ;;  %v11976_v45 = vunpack.i.h.bf16 %v11974_v23  ;;  %v11975_v40 = vunpack.i.l.bf16 %v11974_v23  ;;  %v11989_v48 = vpop.permute.xlu0 %11988  ;;  %v15422_v60 = vld [vmem:[#allocation3 + $0xda] sm:$0xff]  ;;  %v4523_v17 = vsel %vm551_vm2, %v15024_v10, %v11980_v6 }
 0x2b9   : > { %12133 = vrot.lane.b32.xlu1 %v12132_v28, %s13387_s27  ;;  %v11991_v21 = vunpack.i.h.bf16 %v11989_v48  ;;  %v11990_v32 = vunpack.i.l.bf16 %v11989_v48  ;;  %v4425_v9 = vsel %vm551_vm2, %v3368_v31, %v11981_v50  ;;  %v12157_v10 = vpack.i.bf16 %v15329_v57, %v15422_v60  ;;  %v3369_v51 = vld [vmem:[#allocation3 + $0x38] sm:$0xff] }
 0x2ba   : > { %12138 = vrot.lane.b32.xlu0 %v12137_v42, %s13386_s30  ;;  %v4586_v61 = vsel %vm4486_vm5, %v4554_v27, %v11975_v40  ;;  %v4490_v43 = vsel %vm4486_vm5, %v4457_v14, %v11976_v45 }
 0x2bb   : > { %4833 = vmatprep.mubr.f32.mxu0 %v4586_v61  ;;  %v11984_v24 = vpop.permute.xlu1 %11983 }
 0x2bc   : > { %v11986_v0 = vunpack.i.h.bf16 %v11984_v24  ;;  %v11985_v13 = vunpack.i.l.bf16 %v11984_v24  ;;  %4834 = vmatmul.mubr.f32.gmra.mrb[38].mxu0 %v4490_v43  ;;  %v11999_v22 = vpop.permute.xlu0 %11998 }
 0x2bd   : > { %12143 = vrot.lane.b32.xlu1 %v12142_v5, %s13384_s17  ;;  %v12001_v28 = vunpack.i.h.bf16 %v11999_v22  ;;  %v12000_v42 = vunpack.i.l.bf16 %v11999_v22 }
 0x2be   : > { %12148 = vrot.lane.b32.xlu0 %v12147_v55, %s13387_s27  ;;  %v4555_v38 = vsel %vm4453_vm4, %v4523_v17, %v11985_v13  ;;  %v4458_v52 = vsel %vm4453_vm4, %v4425_v9, %v11986_v0  ;;  %v3498_v13 = vld [vmem:[#allocation3 + $0x61] sm:$0xff] }
 0x2bf   : > { %v11994_v34 = vpop.permute.xlu1 %11993  ;;  %v4587_v36 = vsel %vm4486_vm5, %v4555_v38, %v11990_v32  ;;  %v4491_v44 = vsel %vm4486_vm5, %v4458_v52, %v11991_v21  ;;  %v3370_v17 = vld [vmem:[#allocation3 + $0x48] sm:$0xff] }
 0x2c0   : > { %v11996_v49 = vunpack.i.h.bf16 %v11994_v34  ;;  %v11995_v30 = vunpack.i.l.bf16 %v11994_v34  ;;  %4838 = vmatprep.mubr.f32.mxu0 %v4587_v36  ;;  %v12009_v54 = vpop.permute.xlu0 %12008 }
 0x2c1   : > { %12153 = vrot.lane.b32.xlu1 %v12152_v20, %s13386_s30  ;;  %4839 = vmatmul.mubr.f32.gmra.mrb[40].mxu0 %v4491_v44  ;;  %v12010_v6 = vunpack.i.l.bf16 %v12009_v54  ;;  %v12011_v14 = vunpack.i.h.bf16 %v12009_v54 }
 0x2c2   : > { %12158 = vrot.lane.b32.xlu0 %v12157_v10, %s13384_s17  ;;  %v4524_v56 = vsel %vm551_vm2, %v15057_v46, %v11995_v30  ;;  %v4426_v23 = vsel %vm551_vm2, %v3369_v51, %v11996_v49 }
 0x2c3   : > { %v12004_v45 = vpop.permute.xlu1 %12003  ;;  %v4556_v48 = vsel %vm4453_vm4, %v4524_v56, %v12000_v42  ;;  %v4459_v27 = vsel %vm4453_vm4, %v4426_v23, %v12001_v28  ;;  %v4525_v22 = vsel %vm551_vm2, %v3498_v13, %v12010_v6  ;;  %v4427_v52 = vsel %vm551_vm2, %v3370_v17, %v12011_v14  ;;  %v3371_v42 = vld [vmem:[#allocation3 + $0x50] sm:$0xff] }
 0x2c4   : > { %v12006_v40 = vunpack.i.h.bf16 %v12004_v45  ;;  %v12005_v50 = vunpack.i.l.bf16 %v12004_v45  ;;  %v12019_v61 = vpop.permute.xlu0 %12018 }
 0x2c5   : > { %v12020_v31 = vunpack.i.l.bf16 %v12019_v61  ;;  %v12021_v9 = vunpack.i.h.bf16 %v12019_v61 }
 0x2c6   : > { %v4588_v43 = vsel %vm4486_vm5, %v4556_v48, %v12005_v50  ;;  %v4492_v24 = vsel %vm4486_vm5, %v4459_v27, %v12006_v40 }
 0x2c7   : > { %v12014_v5 = vpop.permute.xlu1 %12013  ;;  %4843 = vmatprep.mubr.f32.mxu0 %v4588_v43 }
 0x2c8   : > { %v12016_v46 = vunpack.i.h.bf16 %v12014_v5  ;;  %v12015_v55 = vunpack.i.l.bf16 %v12014_v5  ;;  %v11096_v0 = vpop.f32.mrb[18].mxu0  ;;  %4844 = vmatmul.mubr.f32.gmra.mrb[42].mxu0 %v4492_v24  ;;  %v12029_v49 = vpop.permute.xlu0 %12028 }
 0x2c9   : > { %v2522_v21 = vadd.f32 %v15230_v26, %v11096_v0  ;;  %v2516_v32 = vpop.f32.mrb[19].mxu0  ;;  %v12031_v45 = vunpack.i.h.bf16 %v12029_v49  ;;  %v12030_v40 = vunpack.i.l.bf16 %v12029_v49 }
 0x2ca   : > { %v2517_v39 = vadd.f32 %v15230_v26, %v2516_v32  ;;  %v4557_v38 = vsel %vm4453_vm4, %v4525_v22, %v12015_v55  ;;  %v4460_v10 = vsel %vm4453_vm4, %v4427_v52, %v12016_v46  ;;  %v3372_v22 = vld [vmem:[#allocation3 + $0x60] sm:$0xff] }
 0x2cb   : > { %vm2604_vm3 = vcmp.ge.f32.partialorder %v2522_v21, 0.0  ;;  %v2636_v34 = vmul.f32 0.01, %v2522_v21  ;;  %v12024_v36 = vpop.permute.xlu1 %12023  ;;  %v4589_v20 = vsel %vm4486_vm5, %v4557_v38, %v12020_v31  ;;  %v4493_v51 = vsel %vm4486_vm5, %v4460_v10, %v12021_v9  ;;  %v3500_v52 = vld [vmem:[#allocation3 + $0x79] sm:$0xff] }
 0x2cc   : > { %vm2603_vm8 = vcmp.ge.f32.partialorder %v2517_v39, 0.0  ;;  %v2635_v44 = vmul.f32 0.01, %v2517_v39  ;;  %v12026_v30 = vunpack.i.h.bf16 %v12024_v36  ;;  %v12025_v54 = vunpack.i.l.bf16 %v12024_v36  ;;  %4848 = vmatprep.mubr.f32.mxu0 %v4589_v20  ;;  %v12039_v43 = vpop.permute.xlu0 %12038 }
 0x2cd   : > { %v2668_v56 = vsel %vm2604_vm3, %v2522_v21, %v2636_v34  ;;  %4849 = vmatmul.mubr.f32.gmra.mrb[44].mxu0 %v4493_v51  ;;  %v12041_v5 = vunpack.i.h.bf16 %v12039_v43  ;;  %v12040_v46 = vunpack.i.l.bf16 %v12039_v43  ;;  %v15478_v34 = vld [vmem:[#allocation3 + $0xe2] sm:$0xff] }
 0x2ce   : > { %v2667_v23 = vsel %vm2603_vm8, %v2517_v39, %v2635_v44  ;;  %3351 = vst.msk [vmem:[#allocation3 + $0xf9] sm:$0xff] %vm551_vm2, %v2668_v56  ;;  %v4526_v28 = vsel %vm551_vm2, %v15098_v63, %v12025_v54  ;;  %v4428_v6 = vsel %vm551_vm2, %v3371_v42, %v12026_v30  ;;  %v12172_v54 = vpack.i.bf16 %v15353_v58, %v15478_v34 }
 0x2cf   : > { %v12034_v50 = vpop.permute.xlu1 %12033  ;;  %11150 = vmatprep.mubr.msk.f32.mxu1 %vm551_vm2, %v2667_v23  ;;  %3350 = vst.msk [vmem:[#allocation3 + $0xf1] sm:$0xff] %vm551_vm2, %v2667_v23  ;;  %v4558_v14 = vsel %vm4453_vm4, %v4526_v28, %v12030_v40  ;;  %v4461_v61 = vsel %vm4453_vm4, %v4428_v6, %v12031_v45  ;;  %v4527_v20 = vsel %vm551_vm2, %v3500_v52, %v12040_v46  ;;  %v3501_v6 = vld [vmem:[#allocation3 + $0x81] sm:$0xff] }
 0x2d0   : > { %v12036_v48 = vunpack.i.h.bf16 %v12034_v50  ;;  %v12035_v27 = vunpack.i.l.bf16 %v12034_v50  ;;  %11151 = vmatmul.mubr.msk.f32.gmra.mrb[18].mxu1 %vm551_vm2, %v2668_v56 }
 0x2d2   : > { %v4590_v63 = vsel %vm4486_vm5, %v4558_v14, %v12035_v27  ;;  %v4494_v24 = vsel %vm4486_vm5, %v4461_v61, %v12036_v48  ;;  %v3373_v48 = vld [vmem:[#allocation3 + $0x68] sm:$0xff] }
 0x2d3   : > { %4853 = vmatprep.mubr.f32.mxu0 %v4590_v63 }
 0x2d4   : > { %4854 = vmatmul.mubr.f32.gmra.mrb[46].mxu0 %v4494_v24 }
 0x2d5   : > { %v15494_v42 = vld [vmem:[#allocation3 + $0xf9] sm:$0xff] }
 0x2d6   : > { %v15470_v55 = vld [vmem:[#allocation3 + $0xf0] sm:$0xff]  ;;  %v15480_v36 = vld [vmem:[#allocation3 + $0xf8] sm:$0xff]  ;;  %v12182_v61 = vpack.i.bf16 %v15408_v53, %v15494_v42 }
 0x2d7   : > { %v15472_v0 = vld [vmem:[#allocation3 + $0xf1] sm:$0xff]  ;;  %v12044_v13 = vpop.permute.xlu1 %12043  ;;  %v12162_v21 = vpack.i.bf16 %v15357_v12, %v15470_v55  ;;  %v4429_v12 = vsel %vm551_vm2, %v3372_v22, %v12041_v5  ;;  %v12177_v51 = vpack.i.bf16 %v15406_v35, %v15480_v36 }
 0x2d8   : > { %v12049_v31 = vpop.permute.xlu0 %12048  ;;  %v12167_v32 = vpack.i.bf16 %v15394_v8, %v15472_v0  ;;  %v12046_v17 = vunpack.i.h.bf16 %v12044_v13  ;;  %v12045_v9 = vunpack.i.l.bf16 %v12044_v13  ;;  %v15496_v45 = vld [vmem:[#allocation3 + $0xf2] sm:$0xff] }
 0x2d9   : > { %v12051_v39 = vunpack.i.h.bf16 %v12049_v31  ;;  %v12050_v38 = vunpack.i.l.bf16 %v12049_v31  ;;  %12163 = vrot.lane.b32.xlu1 %v12162_v21, %s13387_s27  ;;  %v12187_v43 = vpack.i.bf16 %v15396_v41, %v15496_v45 }
 0x2da   : > { %12168 = vrot.lane.b32.xlu0 %v12167_v32, %s13386_s30  ;;  %v4559_v8 = vsel %vm4453_vm4, %v4527_v20, %v12045_v9  ;;  %v4462_v10 = vsel %vm4453_vm4, %v4429_v12, %v12046_v17 }
 0x2db   : > { %v12054_v44 = vpop.permute.xlu1 %12053  ;;  %v4591_v30 = vsel %vm4486_vm5, %v4559_v8, %v12050_v38  ;;  %v4495_v56 = vsel %vm4486_vm5, %v4462_v10, %v12051_v39 }
 0x2dc   : > { %v12059_v49 = vpop.permute.xlu0 %12058  ;;  %v12056_v23 = vunpack.i.h.bf16 %v12054_v44  ;;  %v12055_v28 = vunpack.i.l.bf16 %v12054_v44  ;;  %4858 = vmatprep.mubr.f32.mxu0 %v4591_v30 }
 0x2dd   : > { %v12061_v40 = vunpack.i.h.bf16 %v12059_v49  ;;  %v12060_v50 = vunpack.i.l.bf16 %v12059_v49  ;;  %12173 = vrot.lane.b32.xlu1 %v12172_v54, %s13384_s17  ;;  %4859 = vmatmul.mubr.f32.gmra.mrb[48].mxu0 %v4495_v56  ;;  %v3374_v56 = vld [vmem:[#allocation3 + $0x78] sm:$0xff] }
 0x2de   : > { %12178 = vrot.lane.b32.xlu0 %v12177_v51, %s13387_s27  ;;  %v4528_v35 = vsel %vm551_vm2, %v3501_v6, %v12055_v28  ;;  %v4430_v27 = vsel %vm551_vm2, %v3373_v48, %v12056_v23  ;;  %v3502_v51 = vld [vmem:[#allocation3 + $0x91] sm:$0xff] }
 0x2df   : > { %v12064_v14 = vpop.permute.xlu1 %12063  ;;  %v4560_v5 = vsel %vm4453_vm4, %v4528_v35, %v12060_v50  ;;  %v4463_v46 = vsel %vm4453_vm4, %v4430_v27, %v12061_v40 }
 0x2e0   : > { %v12066_v63 = vunpack.i.h.bf16 %v12064_v14  ;;  %v12065_v24 = vunpack.i.l.bf16 %v12064_v14  ;;  %v12069_v38 = vpop.permute.xlu0 %12068 }
 0x2e1   : > { %12183 = vrot.lane.b32.xlu1 %v12182_v61, %s13386_s30  ;;  %v12071_v20 = vunpack.i.h.bf16 %v12069_v38  ;;  %v12070_v12 = vunpack.i.l.bf16 %v12069_v38 }
 0x2e2   : > { %12188 = vrot.lane.b32.xlu0 %v12187_v43, %s13384_s17  ;;  %v4592_v13 = vsel %vm4486_vm5, %v4560_v5, %v12065_v24  ;;  %v4496_v31 = vsel %vm4486_vm5, %v4463_v46, %v12066_v63  ;;  %v15532_v46 = vld [vmem:[#allocation3 + $0xfa] sm:$0xff] }
 0x2e3   : > { %4863 = vmatprep.mubr.f32.mxu0 %v4592_v13  ;;  %v4529_v23 = vsel %vm551_vm2, %v3502_v51, %v12070_v12  ;;  %v4431_v28 = vsel %vm551_vm2, %v3374_v56, %v12071_v20 }
 0x2e4   : > { %4864 = vmatmul.mubr.f32.gmra.mrb[50].mxu0 %v4496_v31 }
 0x2e8   : > { %v11099_v53 = vpop.f32.mrb[20].mxu0 }
 0x2e9   : > { %v2532_v21 = vadd.f32 %v15230_v26, %v11099_v53  ;;  %v2526_v32 = vpop.f32.mrb[21].mxu0 }
 0x2ea   : > { %v2527_v22 = vadd.f32 %v15230_v26, %v2526_v32 }
 0x2eb   : > { %vm2606_vm9 = vcmp.ge.f32.partialorder %v2532_v21, 0.0  ;;  %v2638_v17 = vmul.f32 0.01, %v2532_v21 }
 0x2ec   : > { %vm2605_vm10 = vcmp.ge.f32.partialorder %v2527_v22, 0.0  ;;  %v2637_v9 = vmul.f32 0.01, %v2527_v22 }
 0x2ed   : > { %v2670_v39 = vsel %vm2606_vm9, %v2532_v21, %v2638_v17  ;;  %v3503_v21 = vld [vmem:[#allocation3 + $0x99] sm:$0xff]  ;;  %v12202_v17 = vpack.i.bf16 %v15420_v62, %v15532_v46 }
 0x2ee   : > { %v2669_v52 = vsel %vm2605_vm10, %v2527_v22, %v2637_v9  ;;  %3353 = vst.msk [vmem:[#allocation3 + $0x111] sm:$0xff] %vm551_vm2, %v2670_v39 }
 0x2ef   : > { %11153 = vmatprep.mubr.msk.f32.mxu1 %vm551_vm2, %v2669_v52  ;;  %3352 = vst.msk [vmem:[#allocation3 + $0x109] sm:$0xff] %vm551_vm2, %v2669_v52 }
 0x2f0   : > { %11154 = vmatmul.mubr.msk.f32.gmra.mrb[20].mxu1 %vm551_vm2, %v2670_v39 }
 0x2f3   : > { %v12074_v8 = vpop.permute.xlu1 %12073 }
 0x2f4   : > { %v12079_v10 = vpop.permute.xlu0 %12078  ;;  %v12076_v44 = vunpack.i.h.bf16 %v12074_v8  ;;  %v12075_v49 = vunpack.i.l.bf16 %v12074_v8 }
 0x2f5   : > { %v12081_v30 = vunpack.i.h.bf16 %v12079_v10  ;;  %v12080_v54 = vunpack.i.l.bf16 %v12079_v10  ;;  %v15544_v52 = vld [vmem:[#allocation3 + $0x111] sm:$0xff] }
 0x2f6   : > { %v4561_v40 = vsel %vm4453_vm4, %v4529_v23, %v12075_v49  ;;  %v15521_v50 = vld [vmem:[#allocation3 + $0x108] sm:$0xff]  ;;  %v4464_v48 = vsel %vm4453_vm4, %v4431_v28, %v12076_v44  ;;  %v15534_v13 = vld [vmem:[#allocation3 + $0x110] sm:$0xff]  ;;  %v4648_v49 = vld [vmem:[%s18278_s3 + $0x108] sm:$0xff] }
 0x2f7   : > { %v15523_v6 = vld [vmem:[#allocation3 + $0x109] sm:$0xff]  ;;  %v12084_v35 = vpop.permute.xlu1 %12083  ;;  %v4593_v14 = vsel %vm4486_vm5, %v4561_v40, %v12080_v54  ;;  %v12192_v61 = vpack.i.bf16 %v15422_v60, %v15521_v50  ;;  %v4497_v63 = vsel %vm4486_vm5, %v4464_v48, %v12081_v30  ;;  %v3375_v60 = vld [vmem:[#allocation3 + $0x80] sm:$0xff]  ;;  %v12207_v9 = vpack.i.bf16 %v15478_v34, %v15534_v13 }
 0x2f8   : > { %v12089_v27 = vpop.permute.xlu0 %12088  ;;  %v12197_v43 = vpack.i.bf16 %v15470_v55, %v15523_v6  ;;  %v12086_v24 = vunpack.i.h.bf16 %v12084_v35  ;;  %v12085_v5 = vunpack.i.l.bf16 %v12084_v35  ;;  %4868 = vmatprep.mubr.f32.mxu0 %v4593_v14  ;;  %v15546_v20 = vld [vmem:[#allocation3 + $0x10a] sm:$0xff]  ;;  %v12212_v30 = vpack.i.bf16 %v15480_v36, %v15544_v52 }
 0x2f9   : > { %v12091_v31 = vunpack.i.h.bf16 %v12089_v27  ;;  %v12090_v53 = vunpack.i.l.bf16 %v12089_v27  ;;  %12193 = vrot.lane.b32.xlu1 %v12192_v61, %s13387_s27  ;;  %4869 = vmatmul.mubr.f32.gmra.mrb[52].mxu0 %v4497_v63  ;;  %v4647_v34 = vld [vmem:[%s18278_s3 + $0x100] sm:$0xff]  ;;  %v12217_v54 = vpack.i.bf16 %v15472_v0, %v15546_v20 }
 0x2fa   : > { %12198 = vrot.lane.b32.xlu0 %v12197_v43, %s13386_s30  ;;  %v4530_v55 = vsel %vm551_vm2, %v3503_v21, %v12085_v5  ;;  %v4432_v32 = vsel %vm551_vm2, %v3375_v60, %v12086_v24  ;;  %v15564_v51 = vpack.c.bf16 %v4648_v49, %v4647_v34  ;;  %v3376_v21 = vld [vmem:[#allocation3 + $0x90] sm:$0xff]  ;;  %v3377_v34 = vld [vmem:[#allocation3 + $0x98] sm:$0xff] }
 0x2fb   : > { %v12094_v22 = vpop.permute.xlu1 %12093  ;;  %v4562_v12 = vsel %vm4453_vm4, %v4530_v55, %v12090_v53  ;;  %v4465_v8 = vsel %vm4453_vm4, %v4432_v32, %v12091_v31 }
 0x2fc   : > { %v12096_v39 = vunpack.i.h.bf16 %v12094_v22  ;;  %v12095_v38 = vunpack.i.l.bf16 %v12094_v22  ;;  %11622 = vmatprep.subr.bf16.mxu1 %v15564_v51  ;;  %v12099_v40 = vpop.permute.xlu0 %12098 }
 0x2fd   : > { %12203 = vrot.lane.b32.xlu1 %v12202_v17, %s13384_s17  ;;  %v12101_v27 = vunpack.i.h.bf16 %v12099_v40  ;;  %v12100_v14 = vunpack.i.l.bf16 %v12099_v40 }
 0x2fe   : > { %12208 = vrot.lane.b32.xlu0 %v12207_v9, %s13387_s27  ;;  %v4594_v10 = vsel %vm4486_vm5, %v4562_v12, %v12095_v38  ;;  %v4498_v44 = vsel %vm4486_vm5, %v4465_v8, %v12096_v39 }
 0x2ff   : > { %4873 = vmatprep.mubr.f32.mxu0 %v4594_v10  ;;  %v4531_v60 = vsel %vm551_vm2, %v15250_v59, %v12100_v14  ;;  %v4433_v55 = vsel %vm551_vm2, %v3376_v21, %v12101_v27  ;;  %v15622_v21 = vld [vmem:[%s18277_s2] ss:$0 sm:$0xff] }
 0x300   : > { %4874 = vmatmul.mubr.f32.gmra.mrb[54].mxu0 %v4498_v44 }
 0x301   : > { %12213 = vrot.lane.b32.xlu1 %v12212_v30, %s13386_s30 }
 0x302   : > { %12218 = vrot.lane.b32.xlu0 %v12217_v54, %s13384_s17 }
 0x308   : > { %v11102_v56 = vpop.f32.mrb[22].mxu0 }
 0x309   : > { %v2542_v23 = vadd.f32 %v15230_v26, %v11102_v56  ;;  %v2536_v28 = vpop.f32.mrb[23].mxu0 }
 0x30a   : > { %v2537_v48 = vadd.f32 %v15230_v26, %v2536_v28 }
 0x30b   : > { %vm2608_vm1 = vcmp.ge.f32.partialorder %v2542_v23, 0.0  ;;  %v2640_v36 = vmul.f32 0.01, %v2542_v23 }
 0x30c   : > { %vm2607_vm11 = vcmp.ge.f32.partialorder %v2537_v48, 0.0  ;;  %v2639_v35 = vmul.f32 0.01, %v2537_v48 }
 0x30d   : > { %v2672_v61 = vsel %vm2608_vm1, %v2542_v23, %v2640_v36  ;;  %v15593_v36 = vld [vmem:[#allocation3 + $0x112] sm:$0xff] }
 0x30e   : > { %v2671_v43 = vsel %vm2607_vm11, %v2537_v48, %v2639_v35  ;;  %3355 = vst.msk [vmem:[#allocation3 + $0x129] sm:$0xff] %vm551_vm2, %v2672_v61 }
 0x30f   : > { %v12104_v63 = vpop.permute.xlu1 %12103  ;;  %11156 = vmatprep.mubr.msk.f32.mxu1 %vm551_vm2, %v2671_v43  ;;  %3354 = vst.msk [vmem:[#allocation3 + $0x121] sm:$0xff] %vm551_vm2, %v2671_v43 }
 0x310   : > { %v12109_v24 = vpop.permute.xlu0 %12108  ;;  %v12106_v5 = vunpack.i.h.bf16 %v12104_v63  ;;  %v12105_v31 = vunpack.i.l.bf16 %v12104_v63  ;;  %11157 = vmatmul.mubr.msk.f32.gmra.mrb[22].mxu1 %vm551_vm2, %v2672_v61 }
 0x311   : > { %v12111_v53 = vunpack.i.h.bf16 %v12109_v24  ;;  %v12110_v26 = vunpack.i.l.bf16 %v12109_v24 }
 0x312   : > { %v4563_v32 = vsel %vm4453_vm4, %v4531_v60, %v12105_v31  ;;  %v4466_v22 = vsel %vm4453_vm4, %v4433_v55, %v12106_v5 }
 0x313   : > { %v12114_v17 = vpop.permute.xlu1 %12113  ;;  %v4595_v9 = vsel %vm4486_vm5, %v4563_v32, %v12110_v26  ;;  %v4499_v39 = vsel %vm4486_vm5, %v4466_v22, %v12111_v53 }
 0x314   : > { %v12116_v38 = vunpack.i.h.bf16 %v12114_v17  ;;  %v12115_v12 = vunpack.i.l.bf16 %v12114_v17  ;;  %v12119_v8 = vpop.permute.xlu0 %12118  ;;  %4878 = vmatprep.mubr.f32.mxu0 %v4595_v9 }
 0x315   : > { %v12121_v10 = vunpack.i.h.bf16 %v12119_v8  ;;  %v12120_v44 = vunpack.i.l.bf16 %v12119_v8  ;;  %4879 = vmatmul.mubr.f32.gmra.mrb[56].mxu0 %v4499_v39  ;;  %v15607_v43 = vld [vmem:[#allocation3 + $0x129] sm:$0xff] }
 0x316   : > { %v15582_v59 = vld [vmem:[#allocation3 + $0x120] sm:$0xff]  ;;  %v4532_v30 = vsel %vm551_vm2, %v15268_v25, %v12115_v12  ;;  %v4434_v54 = vsel %vm551_vm2, %v3377_v34, %v12116_v38  ;;  %v15595_v35 = vld [vmem:[#allocation3 + $0x128] sm:$0xff]  ;;  %v12242_v24 = vpack.i.bf16 %v15534_v13, %v15607_v43 }
 0x317   : > { %v15584_v49 = vld [vmem:[#allocation3 + $0x121] sm:$0xff]  ;;  %v12124_v56 = vpop.permute.xlu1 %12123  ;;  %v12222_v23 = vpack.i.bf16 %v15496_v45, %v15582_v59  ;;  %v4564_v25 = vsel %vm4453_vm4, %v4532_v30, %v12120_v44  ;;  %v4467_v27 = vsel %vm4453_vm4, %v4434_v54, %v12121_v10  ;;  %v12237_v61 = vpack.i.bf16 %v15532_v46, %v15595_v35 }
 0x318   : > { %v12227_v28 = vpack.i.bf16 %v15521_v50, %v15584_v49  ;;  %v12126_v40 = vunpack.i.h.bf16 %v12124_v56  ;;  %v12125_v48 = vunpack.i.l.bf16 %v12124_v56  ;;  %v12232_v50 = vpack.i.bf16 %v15494_v42, %v15593_v36  ;;  %v15609_v63 = vld [vmem:[#allocation3 + $0x122] sm:$0xff]  ;;  %v12129_v46 = vpop.permute.xlu0 %12128 }
 0x319   : > { %12223 = vrot.lane.b32.xlu1 %v12222_v23, %s13387_s27  ;;  %v12247_v5 = vpack.i.bf16 %v15523_v6, %v15609_v63  ;;  %v12130_v31 = vunpack.i.l.bf16 %v12129_v46  ;;  %v12131_v26 = vunpack.i.h.bf16 %v12129_v46  ;;  %v3378_v8 = vld [vmem:[#allocation3 + $0xa8] sm:$0xff] }
 0x31a   : > { %12228 = vrot.lane.b32.xlu0 %v12227_v28, %s13386_s30  ;;  %v4596_v14 = vsel %vm4486_vm5, %v4564_v25, %v12125_v48  ;;  %v4500_v45 = vsel %vm4486_vm5, %v4467_v27, %v12126_v40 }
 0x31b   : > { %4883 = vmatprep.mubr.f32.mxu0 %v4596_v14  ;;  %v4533_v9 = vsel %vm551_vm2, %v15329_v57, %v12130_v31  ;;  %v4435_v30 = vsel %vm551_vm2, %v3378_v8, %v12131_v26 }
 0x31c   : > { %4884 = vmatmul.mubr.f32.gmra.mrb[58].mxu0 %v4500_v45 }
 0x31d   : > { %12233 = vrot.lane.b32.xlu1 %v12232_v50, %s13384_s17  ;;  %v3379_v50 = vld [vmem:[#allocation3 + $0xb0] sm:$0xff] }
 0x31e   : > { %12238 = vrot.lane.b32.xlu0 %v12237_v61, %s13387_s27 }
 0x321   : > { %12243 = vrot.lane.b32.xlu1 %v12242_v24, %s13386_s30 }
 0x322   : > { %12248 = vrot.lane.b32.xlu0 %v12247_v5, %s13384_s17 }
 0x328   : > { %v11105_v53 = vpop.f32.mrb[24].mxu0 }
 0x329   : > { %v2552_v60 = vadd.f32 %v15622_v21, %v11105_v53  ;;  %v2546_v55 = vpop.f32.mrb[25].mxu0 }
 0x32a   : > { %v2547_v13 = vadd.f32 %v15622_v21, %v2546_v55 }
 0x32b   : > { %vm2610_vm12 = vcmp.ge.f32.partialorder %v2552_v60, 0.0  ;;  %v2642_v32 = vmul.f32 0.01, %v2552_v60  ;;  %v12134_v22 = vpop.permute.xlu1 %12133 }
 0x32c   : > { %v12139_v17 = vpop.permute.xlu0 %12138  ;;  %vm2609_vm13 = vcmp.ge.f32.partialorder %v2547_v13, 0.0  ;;  %v2641_v39 = vmul.f32 0.01, %v2547_v13  ;;  %v12136_v38 = vunpack.i.h.bf16 %v12134_v22  ;;  %v12135_v12 = vunpack.i.l.bf16 %v12134_v22 }
 0x32d   : > { %v12141_v10 = vunpack.i.h.bf16 %v12139_v17  ;;  %v12140_v44 = vunpack.i.l.bf16 %v12139_v17  ;;  %v2674_v34 = vsel %vm2610_vm12, %v2552_v60, %v2642_v32  ;;  %v15652_v17 = vld [vmem:[#allocation3 + $0x12a] sm:$0xff] }
 0x32e   : > { %v2673_v54 = vsel %vm2609_vm13, %v2547_v13, %v2641_v39  ;;  %3357 = vst.msk [vmem:[#allocation3 + $0x141] sm:$0xff] %vm551_vm2, %v2674_v34  ;;  %v4565_v56 = vsel %vm4453_vm4, %v4533_v9, %v12135_v12  ;;  %v4468_v23 = vsel %vm4453_vm4, %v4435_v30, %v12136_v38  ;;  %v12262_v39 = vpack.i.bf16 %v15544_v52, %v15652_v17 }
 0x32f   : > { %v12144_v28 = vpop.permute.xlu1 %12143  ;;  %11159 = vmatprep.mubr.msk.f32.mxu1 %vm551_vm2, %v2673_v54  ;;  %3356 = vst.msk [vmem:[#allocation3 + $0x139] sm:$0xff] %vm551_vm2, %v2673_v54  ;;  %v4597_v57 = vsel %vm4486_vm5, %v4565_v56, %v12140_v44  ;;  %v4501_v48 = vsel %vm4486_vm5, %v4468_v23, %v12141_v10 }
 0x330   : > { %v12149_v40 = vpop.permute.xlu0 %12148  ;;  %v12146_v25 = vunpack.i.h.bf16 %v12144_v28  ;;  %v12145_v27 = vunpack.i.l.bf16 %v12144_v28  ;;  %11160 = vmatmul.mubr.msk.f32.gmra.mrb[24].mxu1 %vm551_vm2, %v2674_v34  ;;  %4888 = vmatprep.mubr.f32.mxu0 %v4597_v57 }
 0x331   : > { %v12151_v14 = vunpack.i.h.bf16 %v12149_v40  ;;  %v12150_v45 = vunpack.i.l.bf16 %v12149_v40  ;;  %4889 = vmatmul.mubr.f32.gmra.mrb[60].mxu0 %v4501_v48 }
 0x332   : > { %v4534_v61 = vsel %vm551_vm2, %v15353_v58, %v12145_v27  ;;  %v4436_v24 = vsel %vm551_vm2, %v3379_v50, %v12146_v25 }
 0x333   : > { %v12154_v5 = vpop.permute.xlu1 %12153  ;;  %v4566_v53 = vsel %vm4453_vm4, %v4534_v61, %v12150_v45  ;;  %v4469_v26 = vsel %vm4453_vm4, %v4436_v24, %v12151_v14  ;;  %v3380_v14 = vld [vmem:[#allocation3 + $0xc0] sm:$0xff] }
 0x334   : > { %v12156_v46 = vunpack.i.h.bf16 %v12154_v5  ;;  %v12155_v31 = vunpack.i.l.bf16 %v12154_v5  ;;  %v12159_v44 = vpop.permute.xlu0 %12158 }
 0x335   : > { %v15662_v12 = vld [vmem:[#allocation3 + $0x141] sm:$0xff]  ;;  %v12161_v30 = vunpack.i.h.bf16 %v12159_v44 }
 0x336   : > { %v4598_v60 = vsel %vm4486_vm5, %v4566_v53, %v12155_v31  ;;  %v4502_v55 = vsel %vm4486_vm5, %v4469_v26, %v12156_v46  ;;  %v15644_v13 = vld [vmem:[#allocation3 + $0x138] sm:$0xff]  ;;  %v15654_v9 = vld [vmem:[#allocation3 + $0x140] sm:$0xff]  ;;  %v12272_v8 = vpack.i.bf16 %v15595_v35, %v15662_v12 }
 0x337   : > { %v15646_v32 = vld [vmem:[#allocation3 + $0x139] sm:$0xff]  ;;  %4893 = vmatprep.mubr.f32.mxu0 %v4598_v60  ;;  %v12252_v58 = vpack.i.bf16 %v15546_v20, %v15644_v13  ;;  %v12267_v38 = vpack.i.bf16 %v15593_v36, %v15654_v9  ;;  %v12160_v36 = vunpack.i.l.bf16 %v12159_v44  ;;  %v4437_v24 = vsel %vm551_vm2, %v3380_v14, %v12161_v30 }
 0x338   : > { %v12257_v22 = vpack.i.bf16 %v15582_v59, %v15646_v32  ;;  %4894 = vmatmul.mubr.f32.gmra.mrb[62].mxu0 %v4502_v55  ;;  %v15664_v20 = vld [vmem:[#allocation3 + $0x13a] sm:$0xff] }
 0x339   : > { %12253 = vrot.lane.b32.xlu1 %v12252_v58, %s13387_s27  ;;  %v12277_v10 = vpack.i.bf16 %v15584_v49, %v15664_v20  ;;  %v4535_v57 = vsel %vm551_vm2, %v15396_v41, %v12160_v36 }
 0x33a   : > { %12258 = vrot.lane.b32.xlu0 %v12257_v22, %s13386_s30 }
 0x33d   : > { %12263 = vrot.lane.b32.xlu1 %v12262_v39, %s13384_s17 }
 0x33e   : > { %12268 = vrot.lane.b32.xlu0 %v12267_v38, %s13387_s27  ;;  %v3381_v38 = vld [vmem:[#allocation3 + $0xc8] sm:$0xff] }
 0x341   : > { %12273 = vrot.lane.b32.xlu1 %v12272_v8, %s13386_s30 }
 0x342   : > { %12278 = vrot.lane.b32.xlu0 %v12277_v10, %s13384_s17 }
 0x348   : > { %v11108_v34 = vpop.f32.mrb[26].mxu0 }
 0x349   : > { %v2562_v54 = vadd.f32 %v15622_v21, %v11108_v34  ;;  %v2556_v56 = vpop.f32.mrb[27].mxu0 }
 0x34a   : > { %v2557_v23 = vadd.f32 %v15622_v21, %v2556_v56 }
 0x34b   : > { %vm2612_vm14 = vcmp.ge.f32.partialorder %v2562_v54, 0.0  ;;  %v2644_v28 = vmul.f32 0.01, %v2562_v54  ;;  %v12164_v40 = vpop.permute.xlu1 %12163 }
 0x34c   : > { %v12169_v35 = vpop.permute.xlu0 %12168  ;;  %vm2611_vm15 = vcmp.ge.f32.partialorder %v2557_v23, 0.0  ;;  %v2643_v48 = vmul.f32 0.01, %v2557_v23  ;;  %v12166_v25 = vunpack.i.h.bf16 %v12164_v40  ;;  %v12165_v27 = vunpack.i.l.bf16 %v12164_v40 }
 0x34d   : > { %v12171_v45 = vunpack.i.h.bf16 %v12169_v35  ;;  %v12170_v50 = vunpack.i.l.bf16 %v12169_v35  ;;  %v2676_v61 = vsel %vm2612_vm14, %v2562_v54, %v2644_v28 }
 0x34e   : > { %v2675_v5 = vsel %vm2611_vm15, %v2557_v23, %v2643_v48  ;;  %3359 = vst.msk [vmem:[#allocation3 + $0x159] sm:$0xff] %vm551_vm2, %v2676_v61  ;;  %v4567_v46 = vsel %vm4453_vm4, %v4535_v57, %v12165_v27  ;;  %v4470_v31 = vsel %vm4453_vm4, %v4437_v24, %v12166_v25  ;;  %v15702_v57 = vld [vmem:[#allocation3 + $0x142] sm:$0xff] }
 0x34f   : > { %v12174_v53 = vpop.permute.xlu1 %12173  ;;  %11162 = vmatprep.mubr.msk.f32.mxu1 %vm551_vm2, %v2675_v5  ;;  %3358 = vst.msk [vmem:[#allocation3 + $0x151] sm:$0xff] %vm551_vm2, %v2675_v5  ;;  %v4599_v41 = vsel %vm4486_vm5, %v4567_v46, %v12170_v50  ;;  %v4503_v60 = vsel %vm4486_vm5, %v4470_v31, %v12171_v45  ;;  %v12292_v25 = vpack.i.bf16 %v15607_v43, %v15702_v57 }
 0x350   : > { %v12179_v26 = vpop.permute.xlu0 %12178  ;;  %v12176_v55 = vunpack.i.h.bf16 %v12174_v53  ;;  %v12175_v58 = vunpack.i.l.bf16 %v12174_v53  ;;  %11163 = vmatmul.mubr.msk.f32.gmra.mrb[26].mxu1 %vm551_vm2, %v2676_v61  ;;  %4898 = vmatprep.mubr.f32.mxu0 %v4599_v41 }
 0x351   : > { %v12181_v22 = vunpack.i.h.bf16 %v12179_v26  ;;  %v12180_v39 = vunpack.i.l.bf16 %v12179_v26  ;;  %4899 = vmatmul.mubr.f32.gmra.mrb[64].mxu0 %v4503_v60 }
 0x352   : > { %v4536_v8 = vsel %vm551_vm2, %v15420_v62, %v12175_v58  ;;  %v4438_v10 = vsel %vm551_vm2, %v3381_v38, %v12176_v55 }
 0x353   : > { %v12184_v44 = vpop.permute.xlu1 %12183  ;;  %v4568_v30 = vsel %vm4453_vm4, %v4536_v8, %v12180_v39  ;;  %v4471_v54 = vsel %vm4453_vm4, %v4438_v10, %v12181_v22 }
 0x354   : > { %v12186_v36 = vunpack.i.h.bf16 %v12184_v44  ;;  %v12185_v34 = vunpack.i.l.bf16 %v12184_v44  ;;  %v12189_v53 = vpop.permute.xlu0 %12188 }
 0x355   : > { %v15712_v14 = vld [vmem:[#allocation3 + $0x159] sm:$0xff]  ;;  %v12191_v55 = vunpack.i.h.bf16 %v12189_v53  ;;  %v12190_v58 = vunpack.i.l.bf16 %v12189_v53 }
 0x356   : > { %v4600_v56 = vsel %vm4486_vm5, %v4568_v30, %v12185_v34  ;;  %v4504_v23 = vsel %vm4486_vm5, %v4471_v54, %v12186_v36  ;;  %v15694_v28 = vld [vmem:[#allocation3 + $0x150] sm:$0xff]  ;;  %v15704_v48 = vld [vmem:[#allocation3 + $0x158] sm:$0xff]  ;;  %v12302_v45 = vpack.i.bf16 %v15654_v9, %v15712_v14  ;;  %v3383_v53 = vld [vmem:[#allocation3 + $0xe0] sm:$0xff] }
 0x357   : > { %v15696_v40 = vld [vmem:[#allocation3 + $0x151] sm:$0xff]  ;;  %4903 = vmatprep.mubr.f32.mxu0 %v4600_v56  ;;  %v12282_v62 = vpack.i.bf16 %v15609_v63, %v15694_v28  ;;  %v12297_v27 = vpack.i.bf16 %v15652_v17, %v15704_v48  ;;  %v4537_v34 = vsel %vm551_vm2, %v15472_v0, %v12190_v58 }
 0x358   : > { %v12287_v35 = vpack.i.bf16 %v15644_v13, %v15696_v40  ;;  %4904 = vmatmul.mubr.f32.gmra.mrb[66].mxu0 %v4504_v23  ;;  %v15714_v63 = vld [vmem:[#allocation3 + $0x152] sm:$0xff] }
 0x359   : > { %12283 = vrot.lane.b32.xlu1 %v12282_v62, %s13387_s27  ;;  %v12307_v50 = vpack.i.bf16 %v15646_v32, %v15714_v63  ;;  %v3382_v36 = vld [vmem:[#allocation3 + $0xd8] sm:$0xff] }
 0x35a   : > { %12288 = vrot.lane.b32.xlu0 %v12287_v35, %s13386_s30  ;;  %v4439_v30 = vsel %vm551_vm2, %v3382_v36, %v12191_v55 }
 0x35d   : > { %12293 = vrot.lane.b32.xlu1 %v12292_v25, %s13384_s17 }
 0x35e   : > { %12298 = vrot.lane.b32.xlu0 %v12297_v27, %s13387_s27 }
 0x361   : > { %12303 = vrot.lane.b32.xlu1 %v12302_v45, %s13386_s30  ;;  %v11111_v61 = vpop.f32.mrb[28].mxu0 }
 0x362   : > { %12308 = vrot.lane.b32.xlu0 %v12307_v50, %s13384_s17  ;;  %v2572_v24 = vadd.f32 %v15622_v21, %v11111_v61  ;;  %v2566_v5 = vpop.f32.mrb[29].mxu0 }
 0x363   : > { %v2567_v46 = vadd.f32 %v15622_v21, %v2566_v5 }
 0x364   : > { %vm2614_vm6 = vcmp.ge.f32.partialorder %v2572_v24, 0.0  ;;  %v2646_v31 = vmul.f32 0.01, %v2572_v24 }
 0x365   : > { %vm2613_vm7 = vcmp.ge.f32.partialorder %v2567_v46, 0.0  ;;  %v2645_v26 = vmul.f32 0.01, %v2567_v46 }
 0x366   : > { %v2678_v41 = vsel %vm2614_vm6, %v2572_v24, %v2646_v31  ;;  %v15745_v31 = vld [vmem:[#allocation3 + $0x15a] sm:$0xff] }
 0x367   : > { %v2677_v60 = vsel %vm2613_vm7, %v2567_v46, %v2645_v26  ;;  %3361 = vst.msk [vmem:[#allocation3 + $0x171] sm:$0xff] %vm551_vm2, %v2678_v41 }
 0x368   : > { %11165 = vmatprep.mubr.msk.f32.mxu1 %vm551_vm2, %v2677_v60  ;;  %3360 = vst.msk [vmem:[#allocation3 + $0x169] sm:$0xff] %vm551_vm2, %v2677_v60 }
 0x369   : > { %11166 = vmatmul.mubr.msk.f32.gmra.mrb[28].mxu1 %vm551_vm2, %v2678_v41 }
 0x36b   : > { %v12194_v22 = vpop.permute.xlu1 %12193 }
 0x36c   : > { %v12199_v39 = vpop.permute.xlu0 %12198  ;;  %v12196_v38 = vunpack.i.h.bf16 %v12194_v22  ;;  %v12195_v8 = vunpack.i.l.bf16 %v12194_v22 }
 0x36d   : > { %v12201_v10 = vunpack.i.h.bf16 %v12199_v39  ;;  %v12200_v44 = vunpack.i.l.bf16 %v12199_v39 }
 0x36e   : > { %v4569_v54 = vsel %vm4453_vm4, %v4537_v34, %v12195_v8  ;;  %v4472_v56 = vsel %vm4453_vm4, %v4439_v30, %v12196_v38  ;;  %v12322_v38 = vpack.i.bf16 %v15662_v12, %v15745_v31 }
 0x36f   : > { %v12204_v23 = vpop.permute.xlu1 %12203  ;;  %v4601_v35 = vsel %vm4486_vm5, %v4569_v54, %v12200_v44  ;;  %v4505_v25 = vsel %vm4486_vm5, %v4472_v56, %v12201_v10  ;;  %v15737_v50 = vld [vmem:[#allocation3 + $0x168] sm:$0xff]  ;;  %v15747_v26 = vld [vmem:[#allocation3 + $0x170] sm:$0xff] }
 0x370   : > { %v12209_v62 = vpop.permute.xlu0 %12208  ;;  %v12206_v27 = vunpack.i.h.bf16 %v12204_v23  ;;  %v12205_v45 = vunpack.i.l.bf16 %v12204_v23  ;;  %4908 = vmatprep.mubr.f32.mxu0 %v4601_v35  ;;  %v15739_v61 = vld [vmem:[#allocation3 + $0x169] sm:$0xff]  ;;  %v12312_v5 = vpack.i.bf16 %v15664_v20, %v15737_v50  ;;  %v12327_v44 = vpack.i.bf16 %v15702_v57, %v15747_v26  ;;  %v15764_v56 = vld [vmem:[#allocation3 + $0x171] sm:$0xff] }
 0x371   : > { %v12211_v0 = vunpack.i.h.bf16 %v12209_v62  ;;  %v12210_v24 = vunpack.i.l.bf16 %v12209_v62  ;;  %4909 = vmatmul.mubr.f32.gmra.mrb[68].mxu0 %v4505_v25  ;;  %v12317_v46 = vpack.i.bf16 %v15694_v28, %v15739_v61  ;;  %v15766_v23 = vld [vmem:[#allocation3 + $0x16a] sm:$0xff] }
 0x372   : > { %v4538_v41 = vsel %vm551_vm2, %v15494_v42, %v12205_v45  ;;  %v4440_v60 = vsel %vm551_vm2, %v3383_v53, %v12206_v27  ;;  %12313 = vrot.lane.b32.xlu1 %v12312_v5, %s13387_s27  ;;  %v12337_v25 = vpack.i.bf16 %v15696_v40, %v15766_v23  ;;  %v4650_v5 = vld [vmem:[%s18278_s3 + $0x118] sm:$0xff] }
 0x373   : > { %v12214_v55 = vpop.permute.xlu1 %12213  ;;  %12318 = vrot.lane.b32.xlu0 %v12317_v46, %s13386_s30  ;;  %v4570_v42 = vsel %vm4453_vm4, %v4538_v41, %v12210_v24  ;;  %v4473_v36 = vsel %vm4453_vm4, %v4440_v60, %v12211_v0  ;;  %v4649_v24 = vld [vmem:[%s18278_s3 + $0x110] sm:$0xff] }
 0x374   : > { %v12216_v58 = vunpack.i.h.bf16 %v12214_v55  ;;  %v12215_v22 = vunpack.i.l.bf16 %v12214_v55  ;;  %v11114_v39 = vpop.f32.mrb[30].mxu0  ;;  %v11625_v53 = vpack.c.bf16 %v4650_v5, %v4649_v24 }
 0x375   : > { %v2582_v8 = vadd.f32 %v15622_v21, %v11114_v39  ;;  %v2576_v10 = vpop.f32.mrb[31].mxu0  ;;  %v12219_v39 = vpop.permute.xlu0 %12218 }
 0x376   : > { %v2577_v34 = vadd.f32 %v15622_v21, %v2576_v10  ;;  %v4602_v30 = vsel %vm4486_vm5, %v4570_v42, %v12215_v22  ;;  %v4506_v54 = vsel %vm4486_vm5, %v4473_v36, %v12216_v58  ;;  %12323 = vrot.lane.b32.xlu1 %v12322_v38, %s13384_s17  ;;  %v12332_v21 = vpack.i.bf16 %v15704_v48, %v15764_v56  ;;  %v18338_v38 = vld [vmem:[#allocation4_spill] sm:$0xff] }
 0x377   : > { %vm2616_vm3 = vcmp.ge.f32.partialorder %v2582_v8, 0.0  ;;  %v2648_v62 = vmul.f32 0.01, %v2582_v8  ;;  %12328 = vrot.lane.b32.xlu0 %v12327_v44, %s13387_s27  ;;  %4913 = vmatprep.mubr.f32.mxu0 %v4602_v30  ;;  %v12220_v30 = vunpack.i.l.bf16 %v12219_v39 }
 0x378   : > { %vm2615_vm8 = vcmp.ge.f32.partialorder %v2577_v34, 0.0  ;;  %v2647_v35 = vmul.f32 0.01, %v2577_v34  ;;  %4914 = vmatmul.mubr.f32.gmra.mrb[70].mxu0 %v4506_v54  ;;  %v18339_v54 = vld [vmem:[#allocation7_spill] sm:$0xff] }
 0x379   : > { %v2680_v27 = vsel %vm2616_vm3, %v2582_v8, %v2648_v62 }
 0x37a   : > { %v2679_v45 = vsel %vm2615_vm8, %v2577_v34, %v2647_v35  ;;  %3363 = vst.msk [vmem:[#allocation3 + $0x189] sm:$0xff] %vm551_vm2, %v2680_v27  ;;  %12333 = vrot.lane.b32.xlu1 %v12332_v21, %s13386_s30  ;;  %v12221_v34 = vunpack.i.h.bf16 %v12219_v39  ;;  %v18340_v35 = vld [vmem:[#allocation6_spill] sm:$0xff] }
 0x37b   : > { %12338 = vrot.lane.b32.xlu0 %v12337_v25, %s13384_s17  ;;  %3362 = vst.msk [vmem:[#allocation3 + $0x181] sm:$0xff] %vm551_vm2, %v2679_v45  ;;  %11168 = vmatprep.mubr.msk.f32.mxu1 %vm551_vm2, %v2679_v45  ;;  %v3619_v39 = vld [vmem:[#allocation3 + $0x199] sm:$0xff] }
 0x37c   : > { %v15779_v0 = vpop.f32.mrb[32].mxu0  ;;  %11169 = vmatmul.mubr.msk.f32.gmra.mrb[30].mxu1 %vm551_vm2, %v2680_v27 }
 0x37d   : > { %v4822_v46 = vpop.f32.mrb[33].mxu0  ;;  %11173 = vmatprep.mubr.msk.f32.mxu1 %vm495_vm0, %v13605_v1 }
 0x380   : > { %11174 = vmatmul.mubr.msk.f32.vlgmr.msra.gmra.mrb[0].mxu1 %vm495_vm0, %v13611_v3  ;;  %v15805_v3 = vld [vmem:[#allocation3 + $0x172] sm:$0xff] }
 0x381   : > { %11624 = vmatpush3.bf16.msra.mxu1 %v15564_v51  ;;  %11176 = vmatprep.mubr.msk.f32.mxu1 %vm495_vm0, %v13608_v2  ;;  %v18337_v51 = vld [vmem:[#allocation5_spill] sm:$0xff]  ;;  %v12352_v8 = vpack.i.bf16 %v15712_v14, %v15805_v3  ;;  %v15821_v42 = vld [vmem:[#allocation3 + $0x189] sm:$0xff] }
 0x382   : > { %v15795_v41 = vld [vmem:[#allocation3 + $0x180] sm:$0xff]  ;;  %11626 = vmatprep.subr.bf16.mxu1 %v11625_v53  ;;  %v15810_v2 = vld [vmem:[#allocation3 + $0x188] sm:$0xff]  ;;  %v12362_v27 = vpack.i.bf16 %v15747_v26, %v15821_v42 }
 0x383   : > { %v15797_v60 = vld [vmem:[#allocation3 + $0x181] sm:$0xff]  ;;  %v15799_v55 = vpop.f32.mrb[34].mxu0  ;;  %v12342_v58 = vpack.i.bf16 %v15714_v63, %v15795_v41  ;;  %v12357_v44 = vpack.i.bf16 %v15745_v31, %v15810_v2 }
 0x384   : > { %v12347_v1 = vpack.i.bf16 %v15737_v50, %v15797_v60  ;;  %v4827_v22 = vpop.f32.mrb[35].mxu0  ;;  %11177 = vmatmul.mubr.msk.f32.gmra.mrb[2].mxu1 %vm495_vm0, %v18337_v51  ;;  %v15823_v36 = vld [vmem:[#allocation3 + $0x182] sm:$0xff]  ;;  %v4539_v51 = vsel %vm551_vm2, %v15523_v6, %v12220_v30 }
 0x385   : > { %12343 = vrot.lane.b32.xlu1 %v12342_v58, %s13387_s27  ;;  %11179 = vmatprep.mubr.msk.f32.mxu1 %vm495_vm0, %v18338_v38  ;;  %v12367_v45 = vpack.i.bf16 %v15739_v61, %v15823_v36  ;;  %v3587_v58 = vld [vmem:[#allocation3 + $0x198] sm:$0xff] }
 0x386   : > { %12348 = vrot.lane.b32.xlu0 %v12347_v1, %s13386_s30  ;;  %11628 = vmatpush3.bf16.msra.mxu1 %v11625_v53  ;;  %v3384_v1 = vld [vmem:[#allocation3 + $0xf0] sm:$0xff]  ;;  %v18341_v22 = vld [vmem:[#allocation9_spill] sm:$0xff] }
 0x387   : > { %v4441_v38 = vsel %vm551_vm2, %v3384_v1, %v12221_v34  ;;  %v12377_v1 = vpack.i.bf16 %v15795_v41, %v3619_v39  ;;  %v18344_v39 = vld [vmem:[#allocation10_spill] sm:$0xff] }
 0x388   : > { %v15817_v10 = vpop.f32.mrb[36].mxu0  ;;  %11180 = vmatmul.mubr.msk.f32.gmra.mrb[4].mxu1 %vm495_vm0, %v18339_v54 }
 0x389   : > { %v4832_v62 = vpop.f32.mrb[37].mxu0  ;;  %12353 = vrot.lane.b32.xlu1 %v12352_v8, %s13384_s17  ;;  %11182 = vmatprep.mubr.msk.f32.mxu1 %vm495_vm0, %v18340_v35  ;;  %v18342_v8 = vld [vmem:[#allocation8_spill] sm:$0xff] }
 0x38a   : > { %12358 = vrot.lane.b32.xlu0 %v12357_v44, %s13387_s27 }
 0x38b   : > { %v12224_v21 = vpop.permute.xlu1 %12223 }
 0x38c   : > { %v12229_v25 = vpop.permute.xlu0 %12228  ;;  %v12226_v24 = vunpack.i.h.bf16 %v12224_v21  ;;  %v12225_v5 = vunpack.i.l.bf16 %v12224_v21  ;;  %11183 = vmatmul.mubr.msk.f32.gmra.mrb[6].mxu1 %vm495_vm0, %v18341_v22  ;;  %v15852_v22 = vld [vmem:[#allocation3 + $0x18a] sm:$0xff] }
 0x38d   : > { %v12231_v46 = vunpack.i.h.bf16 %v12229_v25  ;;  %v12230_v53 = vunpack.i.l.bf16 %v12229_v25  ;;  %12363 = vrot.lane.b32.xlu1 %v12362_v27, %s13386_s30  ;;  %11185 = vmatprep.mubr.msk.f32.mxu1 %vm495_vm0, %v18342_v8  ;;  %v12372_v25 = vpack.i.bf16 %v15766_v23, %v3587_v58  ;;  %v3385_v58 = vld [vmem:[#allocation3 + $0xf8] sm:$0xff]  ;;  %v12382_v8 = vpack.i.bf16 %v15764_v56, %v15852_v22 }
 0x38e   : > { %12368 = vrot.lane.b32.xlu0 %v12367_v45, %s13384_s17  ;;  %v4571_v44 = vsel %vm4453_vm4, %v4539_v51, %v12225_v5  ;;  %v4474_v54 = vsel %vm4453_vm4, %v4441_v38, %v12226_v24  ;;  %v18343_v51 = vld [vmem:[#allocation11_spill] sm:$0xff] }
 0x38f   : > { %v15846_v62 = vpop.f32.mrb[38].mxu0  ;;  %v12234_v35 = vpop.permute.xlu1 %12233  ;;  %v4603_v21 = vsel %vm4486_vm5, %v4571_v44, %v12230_v53  ;;  %v4507_v6 = vsel %vm4486_vm5, %v4474_v54, %v12231_v46  ;;  %v3588_v53 = vld [vmem:[#allocation3 + $0x1a0] sm:$0xff] }
 0x390   : > { %v12236_v30 = vunpack.i.h.bf16 %v12234_v35  ;;  %v12235_v34 = vunpack.i.l.bf16 %v12234_v35  ;;  %v12239_v27 = vpop.permute.xlu0 %12238  ;;  %v4837_v45 = vpop.f32.mrb[39].mxu0  ;;  %4918 = vmatprep.mubr.f32.mxu0 %v4603_v21  ;;  %11186 = vmatmul.mubr.msk.f32.gmra.mrb[8].mxu1 %vm495_vm0, %v18343_v51  ;;  %v12387_v35 = vpack.i.bf16 %v15805_v3, %v3588_v53  ;;  %v3620_v21 = vld [vmem:[#allocation3 + $0x1a1] sm:$0xff] }
 0x391   : > { %v12241_v5 = vunpack.i.h.bf16 %v12239_v27  ;;  %v12240_v24 = vunpack.i.l.bf16 %v12239_v27  ;;  %12373 = vrot.lane.b32.xlu1 %v12372_v25, %s13387_s27  ;;  %4919 = vmatmul.mubr.f32.gmra.mrb[72].mxu0 %v4507_v6  ;;  %v18345_v25 = vld [vmem:[#allocation13_spill] sm:$0xff]  ;;  %v18346_v27 = vld [vmem:[#allocation12_spill] sm:$0xff]  ;;  %v12392_v51 = vpack.i.bf16 %v15810_v2, %v3620_v21  ;;  %v18347_v53 = vld [vmem:[#allocation15_spill] sm:$0xff] }
 0x392   : > { %12378 = vrot.lane.b32.xlu0 %v12377_v1, %s13386_s30  ;;  %v4540_v46 = vsel %vm551_vm2, %v15544_v52, %v12235_v34  ;;  %v4442_v38 = vsel %vm551_vm2, %v3385_v58, %v12236_v30  ;;  %11188 = vmatprep.mubr.msk.f32.mxu1 %vm495_vm0, %v18344_v39 }
 0x393   : > { %v12244_v41 = vpop.permute.xlu1 %12243  ;;  %v4572_v52 = vsel %vm4453_vm4, %v4540_v46, %v12240_v24  ;;  %v4475_v30 = vsel %vm4453_vm4, %v4442_v38, %v12241_v5  ;;  %v18348_v5 = vld [vmem:[#allocation14_spill] sm:$0xff]  ;;  %v18349_v46 = vld [vmem:[#allocation17_spill] sm:$0xff]  ;;  %v18350_v38 = vld [vmem:[#allocation16_spill] sm:$0xff] }
 0x394   : > { %v12246_v44 = vunpack.i.h.bf16 %v12244_v41  ;;  %v12245_v54 = vunpack.i.l.bf16 %v12244_v41  ;;  %11189 = vmatmul.mubr.msk.f32.gmra.mrb[10].mxu1 %vm495_vm0, %v18345_v25  ;;  %v15868_v6 = vpop.f32.mrb[40].mxu0  ;;  %v18351_v41 = vld [vmem:[#allocation19_spill] sm:$0xff] }
 0x395   : > { %12383 = vrot.lane.b32.xlu1 %v12382_v8, %s13384_s17  ;;  %v4842_v34 = vpop.f32.mrb[41].mxu0  ;;  %11191 = vmatprep.mubr.msk.f32.mxu1 %vm495_vm0, %v18346_v27  ;;  %v18352_v8 = vld [vmem:[#allocation18_spill] sm:$0xff] }
 0x396   : > { %12388 = vrot.lane.b32.xlu0 %v12387_v35, %s13387_s27  ;;  %v4604_v45 = vsel %vm4486_vm5, %v4572_v52, %v12245_v54  ;;  %v4508_v1 = vsel %vm4486_vm5, %v4475_v30, %v12246_v44  ;;  %v18353_v44 = vld [vmem:[#allocation20_spill] sm:$0xff]  ;;  %v12249_v54 = vpop.permute.xlu0 %12248  ;;  %v18354_v35 = vld [vmem:[#allocation21_spill] sm:$0xff]  ;;  %v18355_v34 = vld [vmem:[#allocation22_spill] sm:$0xff] }
 0x397   : > { %4923 = vmatprep.mubr.f32.mxu0 %v4604_v45  ;;  %v12251_v52 = vunpack.i.h.bf16 %v12249_v54  ;;  %v12250_v30 = vunpack.i.l.bf16 %v12249_v54 }
 0x398   : > { %4924 = vmatmul.mubr.f32.gmra.mrb[74].mxu0 %v4508_v1  ;;  %11192 = vmatmul.mubr.msk.f32.gmra.mrb[12].mxu1 %vm495_vm0, %v18347_v53 }
 0x399   : > { %12393 = vrot.lane.b32.xlu1 %v12392_v51, %s13386_s30  ;;  %11194 = vmatprep.mubr.msk.f32.mxu1 %vm495_vm0, %v18348_v5 }
 0x39b   : > { %v15884_v24 = vpop.f32.mrb[42].mxu0 }
 0x39c   : > { %v4847_v58 = vpop.f32.mrb[43].mxu0  ;;  %11195 = vmatmul.mubr.msk.f32.gmra.mrb[14].mxu1 %vm495_vm0, %v18349_v46  ;;  %v4541_v46 = vsel %vm551_vm2, %v15584_v49, %v12250_v30 }
 0x39d   : > { %11197 = vmatprep.mubr.msk.f32.mxu1 %vm495_vm0, %v18350_v38  ;;  %v3386_v58 = vld [vmem:[#allocation3 + $0x108] sm:$0xff] }
 0x39e   : > { %v4443_v38 = vsel %vm551_vm2, %v3386_v58, %v12251_v52 }
 0x3a0   : > { %11198 = vmatmul.mubr.msk.f32.gmra.mrb[16].mxu1 %vm495_vm0, %v18351_v41  ;;  %v15892_v2 = vpop.f32.mrb[44].mxu0 }
 0x3a1   : > { %v4852_v39 = vpop.f32.mrb[45].mxu0  ;;  %11200 = vmatprep.mubr.msk.f32.mxu1 %vm495_vm0, %v18352_v8 }
 0x3a4   : > { %11201 = vmatmul.mubr.msk.f32.gmra.mrb[18].mxu1 %vm495_vm0, %v18353_v44 }
 0x3a5   : > { %11203 = vmatprep.mubr.msk.f32.mxu1 %vm495_vm0, %v18354_v35 }
 0x3a7   : > { %v15900_v21 = vpop.f32.mrb[46].mxu0 }
 0x3a8   : > { %v4857_v25 = vpop.f32.mrb[47].mxu0  ;;  %11204 = vmatmul.mubr.msk.f32.gmra.mrb[20].mxu1 %vm495_vm0, %v18355_v34 }
 0x3a9   : > { %11206 = vmatprep.mubr.msk.f32.mxu1 %vm495_vm0, %v14123_v18 }
 0x3ab   : > { %v12254_v27 = vpop.permute.xlu1 %12253 }
 0x3ac   : > { %v12259_v45 = vpop.permute.xlu0 %12258  ;;  %v12256_v1 = vunpack.i.h.bf16 %v12254_v27  ;;  %v12255_v51 = vunpack.i.l.bf16 %v12254_v27  ;;  %11207 = vmatmul.mubr.msk.f32.gmra.mrb[22].mxu1 %vm495_vm0, %v14133_v33 }
 0x3ad   : > { %v12261_v53 = vunpack.i.h.bf16 %v12259_v45  ;;  %v12260_v5 = vunpack.i.l.bf16 %v12259_v45  ;;  %11209 = vmatprep.mubr.msk.f32.mxu1 %vm495_vm0, %v14203_v7  ;;  %v3387_v7 = vld [vmem:[#allocation3 + $0x110] sm:$0xff] }
 0x3ae   : > { %v4573_v18 = vsel %vm4453_vm4, %v4541_v46, %v12255_v51  ;;  %v4476_v41 = vsel %vm4453_vm4, %v4443_v38, %v12256_v1  ;;  %v3623_v46 = vld [vmem:[#allocation3 + $0x4a] sm:$0xff]  ;;  %v3624_v38 = vld [vmem:[#allocation3 + $0x52] sm:$0xff] }
 0x3af   : > { %v12264_v39 = vpop.permute.xlu1 %12263  ;;  %v4605_v44 = vsel %vm4486_vm5, %v4573_v18, %v12260_v5  ;;  %v4509_v54 = vsel %vm4486_vm5, %v4476_v41, %v12261_v53  ;;  %v3625_v18 = vld [vmem:[#allocation3 + $0x62] sm:$0xff] }
 0x3b0   : > { %v12269_v8 = vpop.permute.xlu0 %12268  ;;  %v12266_v35 = vunpack.i.h.bf16 %v12264_v39  ;;  %v12265_v33 = vunpack.i.l.bf16 %v12264_v39  ;;  %4928 = vmatprep.mubr.f32.mxu0 %v4605_v44  ;;  %11210 = vmatmul.mubr.msk.f32.gmra.mrb[24].mxu1 %vm495_vm0, %v14212_v4  ;;  %v15919_v52 = vpop.f32.mrb[48].mxu0 }
 0x3b1   : > { %v12271_v25 = vunpack.i.h.bf16 %v12269_v8  ;;  %v12270_v49 = vunpack.i.l.bf16 %v12269_v8  ;;  %4929 = vmatmul.mubr.f32.gmra.mrb[76].mxu0 %v4509_v54  ;;  %v4862_v30 = vpop.f32.mrb[49].mxu0  ;;  %11212 = vmatprep.mubr.msk.f32.mxu1 %vm495_vm0, %v14281_v11 }
 0x3b2   : > { %v4542_v34 = vsel %vm551_vm2, %v15607_v43, %v12265_v33  ;;  %v4444_v27 = vsel %vm551_vm2, %v3387_v7, %v12266_v35  ;;  %v3629_v30 = vld [vmem:[#allocation3 + $0x92] sm:$0xff] }
 0x3b3   : > { %v12274_v45 = vpop.permute.xlu1 %12273  ;;  %v4574_v4 = vsel %vm4453_vm4, %v4542_v34, %v12270_v49  ;;  %v4477_v53 = vsel %vm4453_vm4, %v4444_v27, %v12271_v25  ;;  %v3628_v49 = vld [vmem:[#allocation3 + $0x82] sm:$0xff] }
 0x3b4   : > { %v12276_v1 = vunpack.i.h.bf16 %v12274_v45  ;;  %v12275_v51 = vunpack.i.l.bf16 %v12274_v45  ;;  %11213 = vmatmul.mubr.msk.f32.gmra.mrb[26].mxu1 %vm495_vm0, %v14295_v19  ;;  %v3621_v19 = vld [vmem:[#allocation3 + $0x32] sm:$0xff] }
 0x3b5   : > { %11215 = vmatprep.mubr.msk.f32.mxu1 %vm495_vm0, %v14413_v15  ;;  %v3622_v15 = vld [vmem:[#allocation3 + $0x3a] sm:$0xff] }
 0x3b6   : > { %v4606_v11 = vsel %vm4486_vm5, %v4574_v4, %v12275_v51  ;;  %v4510_v5 = vsel %vm4486_vm5, %v4477_v53, %v12276_v1 }
 0x3b7   : > { %v15934_v43 = vpop.f32.mrb[50].mxu0  ;;  %4933 = vmatprep.mubr.f32.mxu0 %v4606_v11 }
 0x3b8   : > { %v4867_v58 = vpop.f32.mrb[51].mxu0  ;;  %4934 = vmatmul.mubr.f32.gmra.mrb[78].mxu0 %v4510_v5  ;;  %11216 = vmatmul.mubr.msk.f32.gmra.mrb[28].mxu1 %vm495_vm0, %v14423_v37  ;;  %v12279_v37 = vpop.permute.xlu0 %12278 }
 0x3b9   : > { %11218 = vmatprep.mubr.msk.f32.mxu1 %vm495_vm0, %v14487_v29  ;;  %v3626_v29 = vld [vmem:[#allocation3 + $0x6a] sm:$0xff]  ;;  %v12281_v41 = vunpack.i.h.bf16 %v12279_v37  ;;  %v12280_v39 = vunpack.i.l.bf16 %v12279_v37 }
 0x3bb   : > { %v4543_v34 = vsel %vm551_vm2, %v15646_v32, %v12280_v39  ;;  %v4445_v27 = vsel %vm551_vm2, %v15582_v59, %v12281_v41  ;;  %v3630_v32 = vld [vmem:[#allocation3 + $0x9a] sm:$0xff]  ;;  %v3631_v59 = vld [vmem:[#allocation3 + $0xaa] sm:$0xff] }
 0x3bc   : > { %11219 = vmatmul.mubr.msk.f32.gmra.mrb[30].mxu1 %vm495_vm0, %v14494_v47  ;;  %v3627_v47 = vld [vmem:[#allocation3 + $0x7a] sm:$0xff] }
 0x3bd   : > { %11229 = vmatprep.mubr.msk.f32.mxu1 %vm551_vm2, %v3621_v19 }
 0x3c0   : > { %11230 = vmatmul.mubr.msk.f32.vlgmr.msra.gmra.mrb[32].mxu1 %vm551_vm2, %v3622_v15 }
 0x3c1   : > { %11232 = vmatprep.mubr.msk.f32.mxu1 %vm551_vm2, %v3623_v46 }
 0x3c4   : > { %11233 = vmatmul.mubr.msk.f32.gmra.mrb[34].mxu1 %vm551_vm2, %v3624_v38  ;;  %v3389_v38 = vld [vmem:[#allocation3 + $0x128] sm:$0xff] }
 0x3c5   : > { %11235 = vmatprep.mubr.msk.f32.mxu1 %vm551_vm2, %v3625_v18 }
 0x3c8   : > { %11236 = vmatmul.mubr.msk.f32.gmra.mrb[36].mxu1 %vm551_vm2, %v3626_v29 }
 0x3c9   : > { %11238 = vmatprep.mubr.msk.f32.mxu1 %vm551_vm2, %v3627_v47 }
 0x3cb   : > { %v12284_v8 = vpop.permute.xlu1 %12283 }
 0x3cc   : > { %v12289_v44 = vpop.permute.xlu0 %12288  ;;  %v12286_v54 = vunpack.i.h.bf16 %v12284_v8  ;;  %v12285_v35 = vunpack.i.l.bf16 %v12284_v8  ;;  %v15949_v7 = vpop.f32.mrb[52].mxu0  ;;  %11239 = vmatmul.mubr.msk.f32.gmra.mrb[38].mxu1 %vm551_vm2, %v3628_v49  ;;  %v3632_v8 = vld [vmem:[#allocation3 + $0xb2] sm:$0xff]  ;;  %v3634_v49 = vld [vmem:[#allocation3 + $0xca] sm:$0xff] }
 0x3cd   : > { %v12291_v33 = vunpack.i.h.bf16 %v12289_v44  ;;  %v12290_v25 = vunpack.i.l.bf16 %v12289_v44  ;;  %v4872_v45 = vpop.f32.mrb[53].mxu0  ;;  %11241 = vmatprep.mubr.msk.f32.mxu1 %vm551_vm2, %v3629_v30  ;;  %v3635_v30 = vld [vmem:[#allocation3 + $0xda] sm:$0xff] }
 0x3ce   : > { %v4575_v1 = vsel %vm4453_vm4, %v4543_v34, %v12285_v35  ;;  %v4478_v51 = vsel %vm4453_vm4, %v4445_v27, %v12286_v54  ;;  %v3633_v54 = vld [vmem:[#allocation3 + $0xc2] sm:$0xff]  ;;  %v3637_v27 = vld [vmem:[#allocation3 + $0xf2] sm:$0xff] }
 0x3cf   : > { %v12294_v4 = vpop.permute.xlu1 %12293  ;;  %v4607_v11 = vsel %vm4486_vm5, %v4575_v1, %v12290_v25  ;;  %v4511_v5 = vsel %vm4486_vm5, %v4478_v51, %v12291_v33  ;;  %v3636_v34 = vld [vmem:[#allocation3 + $0xe2] sm:$0xff]  ;;  %v3638_v1 = vld [vmem:[#allocation3 + $0xfa] sm:$0xff]  ;;  %v3639_v51 = vld [vmem:[#allocation3 + $0x10a] sm:$0xff] }
 0x3d0   : > { %v12299_v53 = vpop.permute.xlu0 %12298  ;;  %v12296_v58 = vunpack.i.h.bf16 %v12294_v4  ;;  %v12295_v19 = vunpack.i.l.bf16 %v12294_v4  ;;  %4938 = vmatprep.mubr.f32.mxu0 %v4607_v11  ;;  %11242 = vmatmul.mubr.msk.f32.gmra.mrb[40].mxu1 %vm551_vm2, %v3630_v32  ;;  %v3640_v11 = vld [vmem:[#allocation3 + $0x112] sm:$0xff] }
 0x3d1   : > { %v12301_v15 = vunpack.i.h.bf16 %v12299_v53  ;;  %v12300_v46 = vunpack.i.l.bf16 %v12299_v53  ;;  %4939 = vmatmul.mubr.f32.gmra.mrb[80].mxu0 %v4511_v5  ;;  %11244 = vmatprep.mubr.msk.f32.mxu1 %vm551_vm2, %v3631_v59 }
 0x3d2   : > { %v4544_v18 = vsel %vm551_vm2, %v15662_v12, %v12295_v19  ;;  %v4446_v37 = vsel %vm551_vm2, %v3389_v38, %v12296_v58  ;;  %v3641_v19 = vld [vmem:[#allocation3 + $0x122] sm:$0xff] }
 0x3d3   : > { %v12304_v29 = vpop.permute.xlu1 %12303  ;;  %v15966_v47 = vpop.f32.mrb[54].mxu0  ;;  %v4576_v35 = vsel %vm4453_vm4, %v4544_v18, %v12300_v46  ;;  %v4479_v33 = vsel %vm4453_vm4, %v4446_v37, %v12301_v15 }
 0x3d4   : > { %v12306_v41 = vunpack.i.h.bf16 %v12304_v29  ;;  %v12305_v39 = vunpack.i.l.bf16 %v12304_v29  ;;  %v4877_v44 = vpop.f32.mrb[55].mxu0  ;;  %11245 = vmatmul.mubr.msk.f32.gmra.mrb[42].mxu1 %vm551_vm2, %v3632_v8  ;;  %v12309_v45 = vpop.permute.xlu0 %12308 }
 0x3d5   : > { %11247 = vmatprep.mubr.msk.f32.mxu1 %vm551_vm2, %v3633_v54  ;;  %v12311_v4 = vunpack.i.h.bf16 %v12309_v45  ;;  %v12310_v53 = vunpack.i.l.bf16 %v12309_v45 }
 0x3d6   : > { %v4608_v12 = vsel %vm4486_vm5, %v4576_v35, %v12305_v39  ;;  %v4512_v25 = vsel %vm4486_vm5, %v4479_v33, %v12306_v41 }
 0x3d7   : > { %4943 = vmatprep.mubr.f32.mxu0 %v4608_v12  ;;  %v4545_v38 = vsel %vm551_vm2, %v15696_v40, %v12310_v53  ;;  %v4447_v18 = vsel %vm551_vm2, %v15644_v13, %v12311_v4  ;;  %v3651_v53 = vld [vmem:[#allocation3 + $0x19a] sm:$0xff] }
 0x3d8   : > { %4944 = vmatmul.mubr.f32.gmra.mrb[82].mxu0 %v4512_v25  ;;  %11248 = vmatmul.mubr.msk.f32.gmra.mrb[44].mxu1 %vm551_vm2, %v3634_v49 }
 0x3d9   : > { %11250 = vmatprep.mubr.msk.f32.mxu1 %vm551_vm2, %v3635_v30 }
 0x3dc   : > { %11251 = vmatmul.mubr.msk.f32.gmra.mrb[46].mxu1 %vm551_vm2, %v3636_v34 }
 0x3dd   : > { %11253 = vmatprep.mubr.msk.f32.mxu1 %vm551_vm2, %v3637_v27 }
 0x3e0   : > { %11254 = vmatmul.mubr.msk.f32.gmra.mrb[48].mxu1 %vm551_vm2, %v3638_v1 }
 0x3e1   : > { %11256 = vmatprep.mubr.msk.f32.mxu1 %vm551_vm2, %v3639_v51 }
 0x3e4   : > { %11257 = vmatmul.mubr.msk.f32.gmra.mrb[50].mxu1 %vm551_vm2, %v3640_v11  ;;  %v12314_v5 = vpop.permute.xlu1 %12313 }
 0x3e5   : > { %v12319_v58 = vpop.permute.xlu0 %12318  ;;  %v12316_v32 = vunpack.i.h.bf16 %v12314_v5  ;;  %v12315_v15 = vunpack.i.l.bf16 %v12314_v5  ;;  %11259 = vmatprep.mubr.msk.f32.mxu1 %vm551_vm2, %v3641_v19 }
 0x3e6   : > { %v12321_v46 = vunpack.i.h.bf16 %v12319_v58  ;;  %v12320_v59 = vunpack.i.l.bf16 %v12319_v58 }
 0x3e7   : > { %v4577_v29 = vsel %vm4453_vm4, %v4545_v38, %v12315_v15  ;;  %v4480_v41 = vsel %vm4453_vm4, %v4447_v18, %v12316_v32  ;;  %v3652_v15 = vld [vmem:[#allocation3 + $0x1a2] sm:$0xff] }
 0x3e8   : > { %v15986_v37 = vpop.f32.mrb[56].mxu0  ;;  %11260 = vmatmul.mubr.msk.f32.gmra.mrb[52].mxu1 %vm551_vm2, %v15652_v17  ;;  %v12324_v39 = vpop.permute.xlu1 %12323  ;;  %v4609_v44 = vsel %vm4486_vm5, %v4577_v29, %v12320_v59  ;;  %v4513_v54 = vsel %vm4486_vm5, %v4480_v41, %v12321_v46 }
 0x3e9   : > { %v12329_v8 = vpop.permute.xlu0 %12328  ;;  %v12326_v35 = vunpack.i.h.bf16 %v12324_v39  ;;  %v12325_v40 = vunpack.i.l.bf16 %v12324_v39  ;;  %v4882_v33 = vpop.f32.mrb[57].mxu0  ;;  %11262 = vmatprep.mubr.msk.f32.mxu1 %vm551_vm2, %v15664_v20  ;;  %4948 = vmatprep.mubr.f32.mxu0 %v4609_v44 }
 0x3ea   : > { %v12331_v13 = vunpack.i.h.bf16 %v12329_v8  ;;  %v12330_v12 = vunpack.i.l.bf16 %v12329_v8  ;;  %4949 = vmatmul.mubr.f32.gmra.mrb[84].mxu0 %v4513_v54 }
 0x3eb   : > { %v4546_v25 = vsel %vm551_vm2, %v15712_v14, %v12325_v40  ;;  %v4448_v17 = vsel %vm551_vm2, %v15654_v9, %v12326_v35 }
 0x3ec   : > { %11263 = vmatmul.mubr.msk.f32.gmra.mrb[54].mxu1 %vm551_vm2, %v15702_v57  ;;  %v12334_v49 = vpop.permute.xlu1 %12333  ;;  %v4578_v27 = vsel %vm4453_vm4, %v4546_v25, %v12330_v12  ;;  %v4481_v45 = vsel %vm4453_vm4, %v4448_v17, %v12331_v13 }
 0x3ed   : > { %v12336_v30 = vunpack.i.h.bf16 %v12334_v49  ;;  %v12335_v34 = vunpack.i.l.bf16 %v12334_v49  ;;  %11265 = vmatprep.mubr.msk.f32.mxu1 %vm551_vm2, %v15714_v63  ;;  %v12339_v57 = vpop.permute.xlu0 %12338 }
 0x3ee   : > { %v12341_v63 = vunpack.i.h.bf16 %v12339_v57  ;;  %v12340_v51 = vunpack.i.l.bf16 %v12339_v57 }
 0x3ef   : > { %v16004_v20 = vpop.f32.mrb[58].mxu0  ;;  %v4610_v14 = vsel %vm4486_vm5, %v4578_v27, %v12335_v34  ;;  %v4514_v9 = vsel %vm4486_vm5, %v4481_v45, %v12336_v30 }
 0x3f0   : > { %v4887_v1 = vpop.f32.mrb[59].mxu0  ;;  %11266 = vmatmul.mubr.msk.f32.gmra.mrb[56].mxu1 %vm551_vm2, %v15745_v31  ;;  %4953 = vmatprep.mubr.f32.mxu0 %v4610_v14  ;;  %v4449_v32 = vsel %vm551_vm2, %v15694_v28, %v12341_v63 }
 0x3f1   : > { %11268 = vmatprep.mubr.msk.f32.mxu1 %vm551_vm2, %v15766_v23  ;;  %4954 = vmatmul.mubr.f32.gmra.mrb[86].mxu0 %v4514_v9  ;;  %v4547_v23 = vsel %vm551_vm2, %v15739_v61, %v12340_v51 }
 0x3f4   : > { %11269 = vmatmul.mubr.msk.f32.gmra.mrb[58].mxu1 %vm551_vm2, %v15805_v3 }
 0x3f5   : > { %11271 = vmatprep.mubr.msk.f32.mxu1 %vm551_vm2, %v15823_v36 }
 0x3f7   : > { %v12344_v4 = vpop.permute.xlu1 %12343 }
 0x3f8   : > { %v12346_v11 = vunpack.i.h.bf16 %v12344_v4  ;;  %v12345_v5 = vunpack.i.l.bf16 %v12344_v4  ;;  %v12349_v58 = vpop.permute.xlu0 %12348  ;;  %11272 = vmatmul.mubr.msk.f32.gmra.mrb[60].mxu1 %vm551_vm2, %v15852_v22 }
 0x3f9   : > { %v12351_v31 = vunpack.i.h.bf16 %v12349_v58  ;;  %v12350_v19 = vunpack.i.l.bf16 %v12349_v58  ;;  %11274 = vmatprep.mubr.msk.f32.mxu1 %vm551_vm2, %v3651_v53 }
 0x3fa   : > { %v4579_v3 = vsel %vm4453_vm4, %v4547_v23, %v12345_v5  ;;  %v4482_v36 = vsel %vm4453_vm4, %v4449_v32, %v12346_v11 }
 0x3fb   : > { %v12354_v46 = vpop.permute.xlu1 %12353  ;;  %v4611_v59 = vsel %vm4486_vm5, %v4579_v3, %v12350_v19  ;;  %v4515_v38 = vsel %vm4486_vm5, %v4482_v36, %v12351_v31 }
 0x3fc   : > { %v12356_v18 = vunpack.i.h.bf16 %v12354_v46  ;;  %v12355_v22 = vunpack.i.l.bf16 %v12354_v46  ;;  %v12359_v29 = vpop.permute.xlu0 %12358  ;;  %4958 = vmatprep.mubr.f32.mxu0 %v4611_v59  ;;  %11275 = vmatmul.mubr.msk.f32.gmra.mrb[62].mxu1 %vm551_vm2, %v3652_v15 }
 0x3fd   : > { %v12361_v61 = vunpack.i.h.bf16 %v12359_v29  ;;  %v12360_v41 = vunpack.i.l.bf16 %v12359_v29  ;;  %4959 = vmatmul.mubr.f32.gmra.mrb[88].mxu0 %v4515_v38  ;;  %v5302_v29 = vld [vmem:[%s18286_s11 + $0x10] sm:$0xff] }
 0x3fe   : > { %v4548_v28 = vsel %vm551_vm2, %v15764_v56, %v12355_v22  ;;  %v4450_v39 = vsel %vm551_vm2, %v15704_v48, %v12356_v18 }
 0x3ff   : > { %v12364_v8 = vpop.permute.xlu1 %12363  ;;  %v4580_v13 = vsel %vm4453_vm4, %v4548_v28, %v12360_v41  ;;  %v4483_v12 = vsel %vm4453_vm4, %v4450_v39, %v12361_v61  ;;  %v5303_v61 = vld [vmem:[%s18286_s11 + $0x18] sm:$0xff] }
 0x400   : > { %v12366_v44 = vunpack.i.h.bf16 %v12364_v8  ;;  %v12365_v54 = vunpack.i.l.bf16 %v12364_v8  ;;  %v12369_v35 = vpop.permute.xlu0 %12368  ;;  %v11633_v41 = vpack.c.bf16 %v5303_v61, %v5302_v29  ;;  %v6937_v8 = vld [vmem:[%s18280_s5] sm:$0xff] }
 0x401   : > { %v12371_v40 = vunpack.i.h.bf16 %v12369_v35  ;;  %v12370_v33 = vunpack.i.l.bf16 %v12369_v35  ;;  %v6957_v61 = vld [vmem:[%s18280_s5 + $0xa0] sm:$0xff] }
 0x402   : > { %v4612_v25 = vsel %vm4486_vm5, %v4580_v13, %v12365_v54  ;;  %v4516_v17 = vsel %vm4486_vm5, %v4483_v12, %v12366_v44  ;;  %v6938_v44 = vld [vmem:[%s18280_s5 + $0x8] sm:$0xff]  ;;  %v6940_v13 = vld [vmem:[%s18280_s5 + $0x18] sm:$0xff] }
 0x403   : > { %v12374_v49 = vpop.permute.xlu1 %12373  ;;  %4963 = vmatprep.mubr.f32.mxu0 %v4612_v25  ;;  %v4549_v14 = vsel %vm551_vm2, %v15797_v60, %v12370_v33  ;;  %v4451_v9 = vsel %vm551_vm2, %v15737_v50, %v12371_v40  ;;  %v11638_v54 = vpack.c.bf16 %v6938_v44, %v6937_v8  ;;  %v6939_v33 = vld [vmem:[%s18280_s5 + $0x10] sm:$0xff]  ;;  %v6941_v25 = vld [vmem:[%s18280_s5 + $0x20] sm:$0xff]  ;;  %v6960_v44 = vld [vmem:[%s18280_s5 + $0xb8] sm:$0xff] }
 0x404   : > { %v12376_v56 = vunpack.i.h.bf16 %v12374_v49  ;;  %v12375_v30 = vunpack.i.l.bf16 %v12374_v49  ;;  %v12379_v34 = vpop.permute.xlu0 %12378  ;;  %v16038_v48 = vpop.f32.mrb[60].mxu0  ;;  %4964 = vmatmul.mubr.f32.gmra.mrb[90].mxu0 %v4516_v17  ;;  %v11641_v12 = vpack.c.bf16 %v6940_v13, %v6939_v33  ;;  %v6942_v17 = vld [vmem:[%s18280_s5 + $0x28] sm:$0xff]  ;;  %v6959_v8 = vld [vmem:[%s18280_s5 + $0xb0] sm:$0xff] }
 0x405   : > { %v12381_v27 = vunpack.i.h.bf16 %v12379_v34  ;;  %v12380_v45 = vunpack.i.l.bf16 %v12379_v34  ;;  %v4892_v1 = vpop.f32.mrb[61].mxu0  ;;  %11639 = vmatpush1.bf16.msra.mxu0 %v11638_v54  ;;  %v11644_v49 = vpack.c.bf16 %v6942_v17, %v6941_v25  ;;  %v11671_v54 = vpack.c.bf16 %v6960_v44, %v6959_v8  ;;  %v6962_v33 = vld [vmem:[%s18280_s5 + $0xc8] sm:$0xff] }
 0x406   : > { %v4581_v57 = vsel %vm4453_vm4, %v4549_v14, %v12375_v30  ;;  %v4484_v63 = vsel %vm4453_vm4, %v4451_v9, %v12376_v56  ;;  %11640 = vmatprep.subr.bf16.mxu0 %v13385_v16  ;;  %v6943_v56 = vld [vmem:[%s18280_s5 + $0x30] sm:$0xff]  ;;  %v6944_v30 = vld [vmem:[%s18280_s5 + $0x38] sm:$0xff]  ;;  %v6945_v1 = vld [vmem:[%s18280_s5 + $0x40] sm:$0xff] }
 0x407   : > { %v12384_v51 = vpop.permute.xlu1 %12383  ;;  %v4613_v4 = vsel %vm4486_vm5, %v4581_v57, %v12380_v45  ;;  %v4517_v53 = vsel %vm4486_vm5, %v4484_v63, %v12381_v27  ;;  %v11647_v34 = vpack.c.bf16 %v6944_v30, %v6943_v56  ;;  %v6946_v14 = vld [vmem:[%s18280_s5 + $0x48] sm:$0xff]  ;;  %v6964_v56 = vld [vmem:[%s18280_s5 + $0xd8] sm:$0xff] }
 0x408   : > { %v12386_v11 = vunpack.i.h.bf16 %v12384_v51  ;;  %v12385_v5 = vunpack.i.l.bf16 %v12384_v51  ;;  %v12389_v58 = vpop.permute.xlu0 %12388  ;;  %4968 = vmatprep.mubr.f32.mxu0 %v4613_v4  ;;  %v11650_v9 = vpack.c.bf16 %v6946_v14, %v6945_v1  ;;  %v6947_v51 = vld [vmem:[%s18280_s5 + $0x50] sm:$0xff]  ;;  %v6948_v4 = vld [vmem:[%s18280_s5 + $0x58] sm:$0xff]  ;;  %v6965_v14 = vld [vmem:[%s18280_s5 + $0xe0] sm:$0xff] }
 0x409   : > { %v12391_v31 = vunpack.i.h.bf16 %v12389_v58  ;;  %v12390_v19 = vunpack.i.l.bf16 %v12389_v58  ;;  %4969 = vmatmul.mubr.f32.gmra.mrb[92].mxu0 %v4517_v53  ;;  %v11653_v53 = vpack.c.bf16 %v6948_v4, %v6947_v51 }
 0x40a   : > { %v4550_v60 = vsel %vm551_vm2, %v15821_v42, %v12385_v5  ;;  %v4452_v50 = vsel %vm551_vm2, %v15747_v26, %v12386_v11  ;;  %v5300_v26 = vld [vmem:[%s18286_s11] sm:$0xff]  ;;  %v5301_v42 = vld [vmem:[%s18286_s11 + $0x8] sm:$0xff]  ;;  %11642 = vmatpush1.bf16.msra.mxu0 %v11641_v12 }
 0x40b   : > { %v12394_v23 = vpop.permute.xlu1 %12393  ;;  %v16052_v32 = vpop.f32.mrb[62].mxu0  ;;  %v4582_v46 = vsel %vm4453_vm4, %v4550_v60, %v12390_v19  ;;  %v4485_v59 = vsel %vm4453_vm4, %v4452_v50, %v12391_v31  ;;  %v11629_v22 = vpack.c.bf16 %v5301_v42, %v5300_v26  ;;  %11643 = vmatprep.subr.bf16.mxu0 %v13385_v16  ;;  %v6949_v11 = vld [vmem:[%s18280_s5 + $0x60] sm:$0xff]  ;;  %v6950_v5 = vld [vmem:[%s18280_s5 + $0x68] sm:$0xff]  ;;  %v6951_v31 = vld [vmem:[%s18280_s5 + $0x70] sm:$0xff] }
 0x40c   : > { %v12396_v3 = vunpack.i.h.bf16 %v12394_v23  ;;  %v12395_v36 = vunpack.i.l.bf16 %v12394_v23  ;;  %v4897_v15 = vpop.f32.mrb[63].mxu0  ;;  %v11656_v58 = vpack.c.bf16 %v6950_v5, %v6949_v11  ;;  %v6952_v19 = vld [vmem:[%s18280_s5 + $0x78] sm:$0xff]  ;;  %v6955_v26 = vld [vmem:[%s18280_s5 + $0x90] sm:$0xff] }
 0x40d   : > { %11630 = vmatprep.subr.bf16.mxu1 %v11629_v22  ;;  %v11659_v60 = vpack.c.bf16 %v6952_v19, %v6951_v31  ;;  %v6969_v15 = vld [vmem:[%s18280_s5 + $0x100] sm:$0xff]  ;;  %v6971_v31 = vld [vmem:[%s18280_s5 + $0x110] sm:$0xff]  ;;  %v6972_v19 = vld [vmem:[%s18280_s5 + $0x118] sm:$0xff] }
 0x40e   : > { %v4614_v38 = vsel %vm4486_vm5, %v4582_v46, %v12395_v36  ;;  %v4518_v18 = vsel %vm4486_vm5, %v4485_v59, %v12396_v3  ;;  %11632 = vmatpush3.bf16.msra.mxu1 %v11629_v22  ;;  %11645 = vmatpush1.bf16.msra.mxu0 %v11644_v49  ;;  %v6953_v3 = vld [vmem:[%s18280_s5 + $0x80] sm:$0xff]  ;;  %v6954_v36 = vld [vmem:[%s18280_s5 + $0x88] sm:$0xff]  ;;  %v6956_v22 = vld [vmem:[%s18280_s5 + $0x98] sm:$0xff] }
 0x40f   : > { %4973 = vmatprep.mubr.f32.mxu0 %v4614_v38  ;;  %11634 = vmatprep.subr.bf16.mxu1 %v11633_v41  ;;  %v11662_v46 = vpack.c.bf16 %v6954_v36, %v6953_v3  ;;  %v6970_v59 = vld [vmem:[%s18280_s5 + $0x108] sm:$0xff]  ;;  %v11665_v29 = vpack.c.bf16 %v6956_v22, %v6955_v26  ;;  %v6963_v49 = vld [vmem:[%s18280_s5 + $0xd0] sm:$0xff] }
 0x410   : > { %4974 = vmatmul.mubr.f32.gmra.mrb[94].mxu0 %v4518_v18  ;;  %11646 = vmatprep.subr.bf16.mxu0 %v13385_v16  ;;  %v16148_v38 = vpack.c.bf16 %v6970_v59, %v6969_v15  ;;  %v11689_v59 = vpack.c.bf16 %v6972_v19, %v6971_v31 }
 0x412   : > { %11636 = vmatpush3.bf16.msra.mxu1 %v11633_v41  ;;  %11648 = vmatpush1.bf16.msra.mxu0 %v11647_v34  ;;  %v6958_v41 = vld [vmem:[%s18280_s5 + $0xa8] sm:$0xff]  ;;  %v11677_v34 = vpack.c.bf16 %v6964_v56, %v6963_v49  ;;  %v5721_v56 = vld [vmem:[#allocation3 + $0x1] sm:$0xff] }
 0x413   : > { %11649 = vmatprep.subr.bf16.mxu0 %v13385_v16  ;;  %11686 = vmatprep.subr.bf16.mxu1 %v16148_v38 }
 0x416   : > { %11651 = vmatpush1.bf16.msra.mxu0 %v11650_v9  ;;  %v6966_v9 = vld [vmem:[%s18280_s5 + $0xe8] sm:$0xff] }
 0x417   : > { %11652 = vmatprep.subr.bf16.mxu0 %v13385_v16  ;;  %v11680_v4 = vpack.c.bf16 %v6966_v9, %v6965_v14 }
 0x41a   : > { %11654 = vmatpush1.bf16.msra.mxu0 %v11653_v53 }
 0x41b   : > { %11655 = vmatprep.subr.bf16.mxu0 %v13385_v16 }
 0x41e   : > { %11657 = vmatpush1.bf16.msra.mxu0 %v11656_v58 }
 0x41f   : > { %11658 = vmatprep.subr.bf16.mxu0 %v13385_v16 }
 0x422   : > { %11660 = vmatpush1.bf16.msra.mxu0 %v11659_v60 }
 0x423   : > { %11661 = vmatprep.subr.bf16.mxu0 %v13385_v16 }
 0x424   : > { %v16070_v28 = vpop.f32.mrb[64].mxu0 }
 0x425   : > { %v4902_v39 = vpop.f32.mrb[65].mxu0 }
 0x426   : > { %11663 = vmatpush1.bf16.msra.mxu0 %v11662_v46  ;;  %v11668_v39 = vpack.c.bf16 %v6958_v41, %v6957_v61  ;;  %v6967_v61 = vld [vmem:[%s18280_s5 + $0xf0] sm:$0xff] }
 0x427   : > { %11664 = vmatprep.subr.bf16.mxu0 %v13385_v16 }
 0x42a   : > { %11666 = vmatpush1.bf16.msra.mxu0 %v11665_v29 }
 0x42b   : > { %v16078_v35 = vpop.f32.mrb[66].mxu0  ;;  %11667 = vmatprep.subr.bf16.mxu0 %v13385_v16 }
 0x42c   : > { %v4907_v40 = vpop.f32.mrb[67].mxu0 }
 0x42d   : > { %v6961_v40 = vld [vmem:[%s18280_s5 + $0xc0] sm:$0xff] }
 0x42e   : > { %11669 = vmatpush1.bf16.msra.mxu0 %v11668_v39  ;;  %v11674_v12 = vpack.c.bf16 %v6962_v33, %v6961_v40 }
 0x42f   : > { %11670 = vmatprep.subr.bf16.mxu0 %v13385_v16 }
 0x432   : > { %11672 = vmatpush1.bf16.msra.mxu0 %v11671_v54 }
 0x433   : > { %11673 = vmatprep.subr.bf16.mxu0 %v13385_v16 }
 0x436   : > { %11675 = vmatpush1.bf16.msra.mxu0 %v11674_v12  ;;  %v5722_v12 = vld [vmem:[#allocation3 + $0x9] sm:$0xff] }
 0x437   : > { %11676 = vmatprep.subr.bf16.mxu0 %v13385_v16 }
 0x43a   : > { %11678 = vmatpush1.bf16.msra.mxu0 %v11677_v34 }
 0x43b   : > { %11679 = vmatprep.subr.bf16.mxu0 %v13385_v16 }
 0x43e   : > { %11681 = vmatpush1.bf16.msra.mxu0 %v11680_v4 }
 0x43f   : > { %11682 = vmatprep.subr.bf16.mxu0 %v13385_v16 }
 0x444   : > { %v16101_v27 = vpop.f32.mrb[68].mxu0 }
 0x445   : > { %v4912_v45 = vpop.f32.mrb[69].mxu0 }
 0x446   : > { %v16196_v45 = vld [vmem:[%s18279_s4] ss:$0 sm:$0xff] }
 0x447   : > { %v4826_v1 = vadd.f32 %v16196_v45, %v15799_v55  ;;  %v4836_v55 = vadd.f32 %v16196_v45, %v15846_v62  ;;  %v4846_v26 = vadd.f32 %v16196_v45, %v15884_v24  ;;  %v6968_v24 = vld [vmem:[%s18280_s5 + $0xf8] sm:$0xff]  ;;  %v4856_v40 = vadd.f32 %v16196_v45, %v15900_v21 }
 0x448   : > { %v11683_v44 = vpack.c.bf16 %v6968_v24, %v6967_v61 }
 0x44a   : > { %11684 = vmatpush1.bf16.msra.mxu0 %v11683_v44 }
 0x44b   : > { %v16110_v57 = vpop.f32.mrb[70].mxu0  ;;  %11701 = vmatprep.subr.bf16.mxu0 %v13385_v16 }
 0x44c   : > { %v4917_v63 = vpop.f32.mrb[71].mxu0 }
 0x44d   : > { %v4821_v63 = vadd.f32 %v16196_v45, %v15779_v0  ;;  %v4831_v0 = vadd.f32 %v16196_v45, %v15817_v10  ;;  %v4841_v10 = vadd.f32 %v16196_v45, %v15868_v6 }
 0x464   : > { %v16134_v50 = vpop.f32.mrb[72].mxu0 }
 0x465   : > { %v4922_v23 = vpop.f32.mrb[73].mxu0 }
 0x46b   : > { %v16150_v18 = vpop.f32.mrb[74].mxu0 }
 0x46c   : > { %v4927_v42 = vpop.f32.mrb[75].mxu0 }
 0x484   : > { %v16181_v13 = vpop.f32.mrb[76].mxu0 }
 0x485   : > { %v4932_v25 = vpop.f32.mrb[77].mxu0 }
 0x48b   : > { %v16184_v17 = vpop.f32.mrb[78].mxu0 }
 0x48c   : > { %v4937_v30 = vpop.f32.mrb[79].mxu0 }
 0x493   : > { %v11231_v51 = vpop.f32.mrb[32].mxu1 }
 0x494   : > { %v5051_v53 = vadd.f32 %v11231_v51, %v4826_v1  ;;  %v5045_v11 = vpop.f32.mrb[33].mxu1  ;;  %v4866_v51 = vadd.f32 %v16196_v45, %v15934_v43  ;;  %v5753_v43 = vld [vmem:[#allocation3 + $0x2] sm:$0xff] }
 0x495   : > { %v5046_v5 = vadd.f32 %v5045_v11, %v4821_v63  ;;  %v4861_v11 = vadd.f32 %v16196_v45, %v15919_v52  ;;  %v4876_v52 = vadd.f32 %v16196_v45, %v15966_v47  ;;  %v5754_v47 = vld [vmem:[#allocation3 + $0xa] sm:$0xff] }
 0x496   : > { %vm5205_vm9 = vcmp.ge.f32.partialorder %v5051_v53, 0.0  ;;  %v5237_v58 = vmul.f32 0.01, %v5051_v53 }
 0x497   : > { %vm5204_vm10 = vcmp.ge.f32.partialorder %v5046_v5, 0.0  ;;  %v5236_v60 = vmul.f32 0.01, %v5046_v5  ;;  %v11234_v23 = vpop.f32.mrb[34].mxu1 }
 0x498   : > { %v5269_v3 = vsel %vm5205_vm9, %v5051_v53, %v5237_v58  ;;  %v5061_v62 = vadd.f32 %v11234_v23, %v4836_v55  ;;  %v5055_v36 = vpop.f32.mrb[35].mxu1 }
 0x499   : > { %5658 = vst.msk [vmem:[#allocation3 + $0x21] sm:$0xff] %vm551_vm2, %v5269_v3  ;;  %v5056_v15 = vadd.f32 %v5055_v36, %v4831_v0  ;;  %v5268_v46 = vsel %vm5204_vm10, %v5046_v5, %v5236_v60 }
 0x49a   : > { %vm5207_vm1 = vcmp.ge.f32.partialorder %v5061_v62, 0.0  ;;  %v5239_v42 = vmul.f32 0.01, %v5061_v62  ;;  %11285 = vmatprep.mubr.msk.f32.mxu1 %vm551_vm2, %v5268_v46  ;;  %5657 = vst.msk [vmem:[#allocation3 + $0x19] sm:$0xff] %vm551_vm2, %v5268_v46 }
 0x49b   : > { %vm5206_vm11 = vcmp.ge.f32.partialorder %v5056_v15, 0.0  ;;  %v5238_v22 = vmul.f32 0.01, %v5056_v15  ;;  %v11237_v29 = vpop.f32.mrb[36].mxu1  ;;  %11286 = vmatmul.mubr.msk.f32.vlgmr.msra.gmra.mrb[0].mxu1 %vm551_vm2, %v5269_v3 }
 0x49c   : > { %v5071_v41 = vadd.f32 %v11237_v29, %v4846_v26  ;;  %v5065_v39 = vpop.f32.mrb[37].mxu1  ;;  %v5271_v8 = vsel %vm5207_vm1, %v5061_v62, %v5239_v42  ;;  %11688 = vmatpush3.bf16.msra.mxu1 %v16148_v38  ;;  %v4851_v38 = vadd.f32 %v16196_v45, %v15892_v2  ;;  %v4871_v42 = vadd.f32 %v16196_v45, %v15949_v7 }
 0x49d   : > { %v5066_v6 = vadd.f32 %v5065_v39, %v4841_v10  ;;  %v5270_v54 = vsel %vm5206_vm11, %v5056_v15, %v5238_v22  ;;  %5660 = vst.msk [vmem:[#allocation3 + $0x39] sm:$0xff] %vm551_vm2, %v5271_v8  ;;  %11690 = vmatprep.subr.bf16.mxu1 %v11689_v59  ;;  %v4886_v7 = vadd.f32 %v16196_v45, %v16004_v20 }
 0x49e   : > { %vm5209_vm12 = vcmp.ge.f32.partialorder %v5071_v41, 0.0  ;;  %v5241_v33 = vmul.f32 0.01, %v5071_v41  ;;  %11288 = vmatprep.mubr.msk.f32.mxu1 %vm551_vm2, %v5270_v54  ;;  %5659 = vst.msk [vmem:[#allocation3 + $0x31] sm:$0xff] %vm551_vm2, %v5270_v54  ;;  %v4881_v20 = vadd.f32 %v16196_v45, %v15986_v37 }
 0x49f   : > { %vm5208_vm13 = vcmp.ge.f32.partialorder %v5066_v6, 0.0  ;;  %v5240_v25 = vmul.f32 0.01, %v5066_v6  ;;  %v11240_v49 = vpop.f32.mrb[38].mxu1  ;;  %11289 = vmatmul.mubr.msk.f32.gmra.mrb[2].mxu1 %vm551_vm2, %v5271_v8 }
 0x4a0   : > { %v5081_v21 = vadd.f32 %v11240_v49, %v4856_v40  ;;  %v5075_v30 = vpop.f32.mrb[39].mxu1  ;;  %v16243_v34 = vld [vmem:[#allocation3 + $0x22] sm:$0xff]  ;;  %v5273_v1 = vsel %vm5209_vm12, %v5071_v41, %v5241_v33  ;;  %11692 = vmatpush3.bf16.msra.mxu1 %v11689_v59 }
 0x4a1   : > { %v5076_v14 = vadd.f32 %v5075_v30, %v4851_v38  ;;  %v5272_v9 = vsel %vm5208_vm13, %v5066_v6, %v5240_v25  ;;  %v12402_v63 = vpack.i.bf16 %v5722_v12, %v16243_v34  ;;  %5662 = vst.msk [vmem:[#allocation3 + $0x51] sm:$0xff] %vm551_vm2, %v5273_v1  ;;  %v16248_v2 = vld [vmem:[#allocation3 + $0x1a] sm:$0xff] }
 0x4a2   : > { %vm5211_vm14 = vcmp.ge.f32.partialorder %v5081_v21, 0.0  ;;  %v5243_v4 = vmul.f32 0.01, %v5081_v21  ;;  %11291 = vmatprep.mubr.msk.f32.mxu1 %vm551_vm2, %v5272_v9  ;;  %5661 = vst.msk [vmem:[#allocation3 + $0x49] sm:$0xff] %vm551_vm2, %v5272_v9  ;;  %v12397_v53 = vpack.i.bf16 %v5721_v56, %v16248_v2  ;;  %v5785_v36 = vld [vmem:[#allocation3 + $0x18] sm:$0xff]  ;;  %v5786_v6 = vld [vmem:[#allocation3 + $0x20] sm:$0xff]  ;;  %v4896_v9 = vadd.f32 %v16196_v45, %v16052_v32 }
 0x4a3   : > { %vm5210_vm15 = vcmp.ge.f32.partialorder %v5076_v14, 0.0  ;;  %v5242_v5 = vmul.f32 0.01, %v5076_v14  ;;  %12403 = vrot.lane.b32.xlu1 %v12402_v63, %s13384_s17  ;;  %v11243_v55 = vpop.f32.mrb[40].mxu1  ;;  %11292 = vmatmul.mubr.msk.f32.gmra.mrb[4].mxu1 %vm551_vm2, %v5273_v1  ;;  %v4891_v32 = vadd.f32 %v16196_v45, %v16038_v48  ;;  %v4906_v48 = vadd.f32 %v16196_v45, %v16078_v35 }
 0x4a4   : > { %v16259_v58 = vpop.f32.mrb[80].mxu0  ;;  %v5091_v31 = vadd.f32 %v11243_v55, %v4866_v51  ;;  %v5085_v19 = vpop.f32.mrb[41].mxu1  ;;  %12398 = vrot.lane.b32.xlu0 %v12397_v53, %s13384_s17  ;;  %v5275_v60 = vsel %vm5211_vm14, %v5081_v21, %v5243_v4  ;;  %v16277_v29 = vld [vmem:[#allocation3 + $0x39] sm:$0xff]  ;;  %v5724_v51 = vld [vmem:[#allocation3 + $0x21] sm:$0xff] }
 0x4a5   : > { %v4942_v0 = vpop.f32.mrb[81].mxu0  ;;  %v5086_v23 = vadd.f32 %v5085_v19, %v4861_v11  ;;  %v5274_v3 = vsel %vm5210_vm15, %v5076_v14, %v5242_v5  ;;  %5664 = vst.msk [vmem:[#allocation3 + $0x69] sm:$0xff] %vm551_vm2, %v5275_v60  ;;  %v16266_v62 = vld [vmem:[#allocation3 + $0x30] sm:$0xff]  ;;  %v16279_v61 = vld [vmem:[#allocation3 + $0x38] sm:$0xff]  ;;  %v12422_v33 = vpack.i.bf16 %v5786_v6, %v16277_v29 }
 0x4a6   : > { %v16268_v15 = vld [vmem:[#allocation3 + $0x31] sm:$0xff]  ;;  %vm5213_vm6 = vcmp.ge.f32.partialorder %v5091_v31, 0.0  ;;  %v5245_v46 = vmul.f32 0.01, %v5091_v31  ;;  %11294 = vmatprep.mubr.msk.f32.mxu1 %vm551_vm2, %v5274_v3  ;;  %5663 = vst.msk [vmem:[#allocation3 + $0x61] sm:$0xff] %vm551_vm2, %v5274_v3  ;;  %v12407_v59 = vpack.i.bf16 %v5753_v43, %v16266_v62  ;;  %v12417_v12 = vpack.i.bf16 %v5754_v47, %v16279_v61  ;;  %v16293_v38 = vld [vmem:[#allocation3 + $0x3a] sm:$0xff] }
 0x4a7   : > { %v12412_v26 = vpack.i.bf16 %v5785_v36, %v16268_v15  ;;  %vm5212_vm7 = vcmp.ge.f32.partialorder %v5086_v23, 0.0  ;;  %v5244_v10 = vmul.f32 0.01, %v5086_v23  ;;  %v11246_v22 = vpop.f32.mrb[42].mxu1  ;;  %11295 = vmatmul.mubr.msk.f32.gmra.mrb[6].mxu1 %vm551_vm2, %v5275_v60  ;;  %v16298_v21 = vld [vmem:[#allocation3 + $0x32] sm:$0xff]  ;;  %v12432_v11 = vpack.i.bf16 %v5724_v51, %v16293_v38 }
 0x4a8   : > { %v5101_v24 = vadd.f32 %v11246_v22, %v4876_v52  ;;  %v5095_v41 = vpop.f32.mrb[43].mxu1  ;;  %12408 = vrot.lane.b32.xlu1 %v12407_v59, %s13387_s27  ;;  %v5277_v39 = vsel %vm5213_vm6, %v5091_v31, %v5245_v46  ;;  %v16306_v4 = vld [vmem:[#allocation3 + $0x19] sm:$0xff] }
 0x4a9   : > { %12413 = vrot.lane.b32.xlu0 %v12412_v26, %s13386_s30  ;;  %v5096_v8 = vadd.f32 %v5095_v41, %v4871_v42  ;;  %v5276_v44 = vsel %vm5212_vm7, %v5086_v23, %v5244_v10  ;;  %5666 = vst.msk [vmem:[#allocation3 + $0x81] sm:$0xff] %vm551_vm2, %v5277_v39  ;;  %v12427_v5 = vpack.i.bf16 %v16306_v4, %v16298_v21  ;;  %v16316_v31 = vld [vmem:[#allocation3 + $0x48] sm:$0xff]  ;;  %v16335_v42 = vld [vmem:[#allocation3 + $0x51] sm:$0xff] }
 0x4aa   : > { %vm5215_vm3 = vcmp.ge.f32.partialorder %v5101_v24, 0.0  ;;  %v5247_v54 = vmul.f32 0.01, %v5101_v24  ;;  %11297 = vmatprep.mubr.msk.f32.mxu1 %vm551_vm2, %v5276_v44  ;;  %5665 = vst.msk [vmem:[#allocation3 + $0x79] sm:$0xff] %vm551_vm2, %v5276_v44  ;;  %v16318_v19 = vld [vmem:[#allocation3 + $0x49] sm:$0xff]  ;;  %v12437_v46 = vpack.i.bf16 %v16248_v2, %v16316_v31  ;;  %v4901_v26 = vadd.f32 %v16196_v45, %v16070_v28 }
 0x4ab   : > { %v16289_v40 = vpop.f32.mrb[82].mxu0  ;;  %vm5214_vm8 = vcmp.ge.f32.partialorder %v5096_v8, 0.0  ;;  %v5246_v25 = vmul.f32 0.01, %v5096_v8  ;;  %v11249_v49 = vpop.f32.mrb[44].mxu1  ;;  %11298 = vmatmul.mubr.msk.f32.gmra.mrb[8].mxu1 %vm551_vm2, %v5277_v39  ;;  %v12442_v59 = vpack.i.bf16 %v16266_v62, %v16318_v19  ;;  %v16337_v10 = vld [vmem:[#allocation3 + $0x50] sm:$0xff]  ;;  %v4916_v28 = vadd.f32 %v16196_v45, %v16110_v57 }
 0x4ac   : > { %v4947_v56 = vpop.f32.mrb[83].mxu0  ;;  %v5111_v30 = vadd.f32 %v11249_v49, %v4886_v7  ;;  %v5105_v1 = vpop.f32.mrb[45].mxu1  ;;  %12423 = vrot.lane.b32.xlu1 %v12422_v33, %s13386_s30  ;;  %v5279_v14 = vsel %vm5215_vm3, %v5101_v24, %v5247_v54  ;;  %v12452_v7 = vpack.i.bf16 %v16279_v61, %v16335_v42  ;;  %v4911_v44 = vadd.f32 %v16196_v45, %v16101_v27  ;;  %v16354_v54 = vld [vmem:[#allocation3 + $0x52] sm:$0xff]  ;;  %v16356_v33 = vld [vmem:[#allocation3 + $0x4a] sm:$0xff] }
 0x4ad   : > { %12418 = vrot.lane.b32.xlu0 %v12417_v12, %s13387_s27  ;;  %v5106_v37 = vadd.f32 %v5105_v1, %v4881_v20  ;;  %v5278_v63 = vsel %vm5214_vm8, %v5096_v8, %v5246_v25  ;;  %5668 = vst.msk [vmem:[#allocation3 + $0x99] sm:$0xff] %vm551_vm2, %v5279_v14  ;;  %v12447_v8 = vpack.i.bf16 %v16243_v34, %v16337_v10 }
 0x4ae   : > { %vm5217_vm9 = vcmp.ge.f32.partialorder %v5111_v30, 0.0  ;;  %v5249_v53 = vmul.f32 0.01, %v5111_v30  ;;  %11300 = vmatprep.mubr.msk.f32.mxu1 %vm551_vm2, %v5278_v63  ;;  %5667 = vst.msk [vmem:[#allocation3 + $0x91] sm:$0xff] %vm551_vm2, %v5278_v63  ;;  %v4926_v27 = vadd.f32 %v16196_v45, %v16150_v18  ;;  %v12462_v56 = vpack.i.bf16 %v16277_v29, %v16354_v54 }
 0x4af   : > { %vm5216_vm10 = vcmp.ge.f32.partialorder %v5106_v37, 0.0  ;;  %v5248_v55 = vmul.f32 0.01, %v5106_v37  ;;  %v11252_v43 = vpop.f32.mrb[46].mxu1  ;;  %11301 = vmatmul.mubr.msk.f32.gmra.mrb[10].mxu1 %vm551_vm2, %v5279_v14  ;;  %v4921_v1 = vadd.f32 %v16196_v45, %v16134_v50  ;;  %v4936_v50 = vadd.f32 %v16196_v45, %v16184_v17 }
 0x4b0   : > { %v5121_v0 = vadd.f32 %v11252_v43, %v4896_v9  ;;  %v5115_v60 = vpop.f32.mrb[47].mxu1  ;;  %12433 = vrot.lane.b32.xlu1 %v12432_v11, %s13384_s17  ;;  %v5281_v52 = vsel %vm5217_vm9, %v5111_v30, %v5249_v53  ;;  %v12457_v30 = vpack.i.bf16 %v16268_v15, %v16356_v33  ;;  %v16373_v9 = vld [vmem:[#allocation3 + $0x60] sm:$0xff]  ;;  %v4931_v17 = vadd.f32 %v16196_v45, %v16181_v13 }
 0x4b1   : > { %12428 = vrot.lane.b32.xlu0 %v12427_v5, %s13384_s17  ;;  %v5116_v23 = vadd.f32 %v5115_v60, %v4891_v32  ;;  %v5280_v3 = vsel %vm5216_vm10, %v5106_v37, %v5248_v55  ;;  %5670 = vst.msk [vmem:[#allocation3 + $0xb1] sm:$0xff] %vm551_vm2, %v5281_v52  ;;  %v16375_v37 = vld [vmem:[#allocation3 + $0x61] sm:$0xff]  ;;  %v12467_v55 = vpack.i.bf16 %v16298_v21, %v16373_v9 }
 0x4b2   : > { %vm5219_vm1 = vcmp.ge.f32.partialorder %v5121_v0, 0.0  ;;  %v5251_v36 = vmul.f32 0.01, %v5121_v0  ;;  %11303 = vmatprep.mubr.msk.f32.mxu1 %vm551_vm2, %v5280_v3  ;;  %5669 = vst.msk [vmem:[#allocation3 + $0xa9] sm:$0xff] %vm551_vm2, %v5280_v3  ;;  %v12472_v43 = vpack.i.bf16 %v16316_v31, %v16375_v37  ;;  %v4946_v13 = vadd.f32 %v16196_v45, %v16289_v40 }
 0x4b3   : > { %vm5218_vm11 = vcmp.ge.f32.partialorder %v5116_v23, 0.0  ;;  %v5250_v35 = vmul.f32 0.01, %v5116_v23  ;;  %v11255_v47 = vpop.f32.mrb[48].mxu1  ;;  %11304 = vmatmul.mubr.msk.f32.gmra.mrb[12].mxu1 %vm551_vm2, %v5281_v52  ;;  %v16392_v52 = vld [vmem:[#allocation3 + $0x69] sm:$0xff] }
 0x4b4   : > { %v5131_v22 = vadd.f32 %v11255_v47, %v4906_v48  ;;  %v5125_v24 = vpop.f32.mrb[49].mxu1  ;;  %12438 = vrot.lane.b32.xlu1 %v12437_v46, %s13387_s27  ;;  %v5283_v2 = vsel %vm5219_vm1, %v5121_v0, %v5251_v36  ;;  %v16394_v48 = vld [vmem:[#allocation3 + $0x68] sm:$0xff]  ;;  %v4941_v47 = vadd.f32 %v16196_v45, %v16259_v58 }
 0x4b5   : > { %12443 = vrot.lane.b32.xlu0 %v12442_v59, %s13386_s30  ;;  %v5126_v62 = vadd.f32 %v5125_v24, %v4901_v26  ;;  %v5282_v41 = vsel %vm5218_vm11, %v5116_v23, %v5250_v35  ;;  %5672 = vst.msk [vmem:[#allocation3 + $0xc9] sm:$0xff] %vm551_vm2, %v5283_v2  ;;  %v12482_v26 = vpack.i.bf16 %v16337_v10, %v16392_v52  ;;  %v16411_v24 = vld [vmem:[#allocation3 + $0x6a] sm:$0xff] }
 0x4b6   : > { %vm5221_vm12 = vcmp.ge.f32.partialorder %v5131_v22, 0.0  ;;  %v5253_v39 = vmul.f32 0.01, %v5131_v22  ;;  %11306 = vmatprep.mubr.msk.f32.mxu1 %vm551_vm2, %v5282_v41  ;;  %5671 = vst.msk [vmem:[#allocation3 + $0xc1] sm:$0xff] %vm551_vm2, %v5282_v41  ;;  %v12477_v35 = vpack.i.bf16 %v16293_v38, %v16394_v48 }
 0x4b7   : > { %vm5220_vm13 = vcmp.ge.f32.partialorder %v5126_v62, 0.0  ;;  %v5252_v57 = vmul.f32 0.01, %v5126_v62  ;;  %v11258_v6 = vpop.f32.mrb[50].mxu1  ;;  %11307 = vmatmul.mubr.msk.f32.gmra.mrb[14].mxu1 %vm551_vm2, %v5283_v2  ;;  %v16413_v2 = vld [vmem:[#allocation3 + $0x62] sm:$0xff] }
 0x4b8   : > { %v5141_v12 = vadd.f32 %v11258_v6, %v4916_v28  ;;  %v5135_v20 = vpop.f32.mrb[51].mxu1  ;;  %12453 = vrot.lane.b32.xlu1 %v12452_v7, %s13386_s30  ;;  %v5285_v34 = vsel %vm5221_vm12, %v5131_v22, %v5253_v39  ;;  %v12487_v6 = vpack.i.bf16 %v16318_v19, %v16413_v2 }
 0x4b9   : > { %12448 = vrot.lane.b32.xlu0 %v12447_v8, %s13387_s27  ;;  %v5136_v61 = vadd.f32 %v5135_v20, %v4911_v44  ;;  %v5284_v25 = vsel %vm5220_vm13, %v5126_v62, %v5252_v57  ;;  %5674 = vst.msk [vmem:[#allocation3 + $0xe1] sm:$0xff] %vm551_vm2, %v5285_v34  ;;  %v12492_v57 = vpack.i.bf16 %v16335_v42, %v16411_v24 }
 0x4ba   : > { %vm5223_vm14 = vcmp.ge.f32.partialorder %v5141_v12, 0.0  ;;  %v5255_v49 = vmul.f32 0.01, %v5141_v12  ;;  %11309 = vmatprep.mubr.msk.f32.mxu1 %vm551_vm2, %v5284_v25  ;;  %5673 = vst.msk [vmem:[#allocation3 + $0xd9] sm:$0xff] %vm551_vm2, %v5284_v25 }
 0x4bb   : > { %vm5222_vm15 = vcmp.ge.f32.partialorder %v5136_v61, 0.0  ;;  %v5254_v18 = vmul.f32 0.01, %v5136_v61  ;;  %v11261_v14 = vpop.f32.mrb[52].mxu1  ;;  %11310 = vmatmul.mubr.msk.f32.gmra.mrb[16].mxu1 %vm551_vm2, %v5285_v34 }
 0x4bc   : > { %v5151_v63 = vadd.f32 %v11261_v14, %v4926_v27  ;;  %v5145_v51 = vpop.f32.mrb[53].mxu1  ;;  %12463 = vrot.lane.b32.xlu1 %v12462_v56, %s13384_s17  ;;  %v5287_v15 = vsel %vm5223_vm14, %v5141_v12, %v5255_v49  ;;  %v5887_v27 = vld [vmem:[#allocation3 + $0x78] sm:$0xff] }
 0x4bd   : > { %12458 = vrot.lane.b32.xlu0 %v12457_v30, %s13384_s17  ;;  %v5146_v29 = vadd.f32 %v5145_v51, %v4921_v1  ;;  %v4950_v53 = vpop.f32.mrb[84].mxu0  ;;  %v5286_v11 = vsel %vm5222_vm15, %v5136_v61, %v5254_v18  ;;  %5676 = vst.msk [vmem:[#allocation3 + $0xf9] sm:$0xff] %vm551_vm2, %v5287_v15  ;;  %v16428_v61 = vld [vmem:[#allocation3 + $0x79] sm:$0xff]  ;;  %v12497_v1 = vpack.i.bf16 %v16356_v33, %v5887_v27  ;;  %v16440_v51 = vld [vmem:[#allocation3 + $0x81] sm:$0xff] }
 0x4be   : > { %vm5225_vm6 = vcmp.ge.f32.partialorder %v5151_v63, 0.0  ;;  %v5257_v5 = vmul.f32 0.01, %v5151_v63  ;;  %11312 = vmatprep.mubr.msk.f32.mxu1 %vm551_vm2, %v5286_v11  ;;  %5675 = vst.msk [vmem:[#allocation3 + $0xf1] sm:$0xff] %vm551_vm2, %v5286_v11  ;;  %v4952_v32 = vpop.f32.mrb[85].mxu0  ;;  %v4951_v12 = vadd.f32 %v16196_v45, %v4950_v53  ;;  %v12502_v18 = vpack.i.bf16 %v16373_v9, %v16428_v61 }
 0x4bf   : > { %vm5224_vm7 = vcmp.ge.f32.partialorder %v5146_v29, 0.0  ;;  %v5256_v0 = vmul.f32 0.01, %v5146_v29  ;;  %v11264_v60 = vpop.f32.mrb[54].mxu1  ;;  %11313 = vmatmul.mubr.msk.f32.gmra.mrb[18].mxu1 %vm551_vm2, %v5287_v15  ;;  %v5888_v15 = vld [vmem:[#allocation3 + $0x80] sm:$0xff]  ;;  %v12512_v9 = vpack.i.bf16 %v16394_v48, %v16440_v51  ;;  %v16451_v32 = vld [vmem:[#allocation3 + $0x90] sm:$0xff] }
 0x4c0   : > { %v5161_v23 = vadd.f32 %v11264_v60, %v4936_v50  ;;  %v5155_v3 = vpop.f32.mrb[55].mxu1  ;;  %12468 = vrot.lane.b32.xlu1 %v12467_v55, %s13387_s27  ;;  %v5289_v31 = vsel %vm5225_vm6, %v5151_v63, %v5257_v5  ;;  %v12507_v11 = vpack.i.bf16 %v16354_v54, %v5888_v15  ;;  %v16453_v55 = vld [vmem:[#allocation3 + $0x7a] sm:$0xff] }
 0x4c1   : > { %12473 = vrot.lane.b32.xlu0 %v12472_v43, %s13386_s30  ;;  %v5156_v36 = vadd.f32 %v5155_v3, %v4931_v17  ;;  %v5288_v46 = vsel %vm5224_vm7, %v5146_v29, %v5256_v0  ;;  %5678 = vst.msk [vmem:[#allocation3 + $0x111] sm:$0xff] %vm551_vm2, %v5289_v31  ;;  %v12517_v3 = vpack.i.bf16 %v16375_v37, %v16453_v55 }
 0x4c2   : > { %vm5227_vm3 = vcmp.ge.f32.partialorder %v5161_v23, 0.0  ;;  %v5259_v59 = vmul.f32 0.01, %v5161_v23  ;;  %11315 = vmatprep.mubr.msk.f32.mxu1 %vm551_vm2, %v5288_v46  ;;  %5677 = vst.msk [vmem:[#allocation3 + $0x109] sm:$0xff] %vm551_vm2, %v5288_v46 }
 0x4c3   : > { %vm5226_vm8 = vcmp.ge.f32.partialorder %v5156_v36, 0.0  ;;  %v5258_v40 = vmul.f32 0.01, %v5156_v36  ;;  %v11267_v22 = vpop.f32.mrb[56].mxu1  ;;  %11316 = vmatmul.mubr.msk.f32.gmra.mrb[20].mxu1 %vm551_vm2, %v5289_v31  ;;  %v16464_v31 = vld [vmem:[#allocation3 + $0x82] sm:$0xff] }
 0x4c4   : > { %v5171_v28 = vadd.f32 %v11267_v22, %v4946_v13  ;;  %v5165_v62 = vpop.f32.mrb[57].mxu1  ;;  %12483 = vrot.lane.b32.xlu1 %v12482_v26, %s13386_s30  ;;  %v4955_v10 = vpop.f32.mrb[86].mxu0  ;;  %v5291_v41 = vsel %vm5227_vm3, %v5161_v23, %v5259_v59  ;;  %v12522_v23 = vpack.i.bf16 %v16413_v2, %v16451_v32  ;;  %v16466_v13 = vld [vmem:[#allocation3 + $0x91] sm:$0xff]  ;;  %v12532_v59 = vpack.i.bf16 %v16392_v52, %v16464_v31 }
 0x4c5   : > { %12478 = vrot.lane.b32.xlu0 %v12477_v35, %s13387_s27  ;;  %v5166_v39 = vadd.f32 %v5165_v62, %v4941_v47  ;;  %v4956_v58 = vadd.f32 %v16196_v45, %v4955_v10  ;;  %v4957_v7 = vpop.f32.mrb[87].mxu0  ;;  %v5290_v8 = vsel %vm5226_vm8, %v5156_v36, %v5258_v40  ;;  %5680 = vst.msk [vmem:[#allocation3 + $0x129] sm:$0xff] %vm551_vm2, %v5291_v41  ;;  %v16476_v40 = vld [vmem:[#allocation3 + $0x99] sm:$0xff] }
 0x4c6   : > { %vm5229_vm9 = vcmp.ge.f32.partialorder %v5171_v28, 0.0  ;;  %v5261_v44 = vmul.f32 0.01, %v5171_v28  ;;  %11318 = vmatprep.mubr.msk.f32.mxu1 %vm551_vm2, %v5290_v8  ;;  %5679 = vst.msk [vmem:[#allocation3 + $0x121] sm:$0xff] %vm551_vm2, %v5290_v8  ;;  %v12527_v26 = vpack.i.bf16 %v5887_v27, %v16466_v13  ;;  %v5890_v22 = vld [vmem:[#allocation3 + $0x98] sm:$0xff]  ;;  %v12542_v52 = vpack.i.bf16 %v5888_v15, %v16476_v40  ;;  %v5893_v15 = vld [vmem:[#allocation3 + $0xc0] sm:$0xff] }
 0x4c7   : > { %vm5228_vm10 = vcmp.ge.f32.partialorder %v5166_v39, 0.0  ;;  %v5260_v20 = vmul.f32 0.01, %v5166_v39  ;;  %v11270_v34 = vpop.f32.mrb[58].mxu1  ;;  %11319 = vmatmul.mubr.msk.f32.gmra.mrb[22].mxu1 %vm551_vm2, %v5291_v41  ;;  %v12537_v62 = vpack.i.bf16 %v16411_v24, %v5890_v22 }
 0x4c8   : > { %v5181_v25 = vadd.f32 %v11270_v34, %v4956_v58  ;;  %v5175_v49 = vpop.f32.mrb[59].mxu1  ;;  %12493 = vrot.lane.b32.xlu1 %v12492_v57, %s13384_s17  ;;  %v5293_v42 = vsel %vm5229_vm9, %v5171_v28, %v5261_v44  ;;  %v16482_v58 = vld [vmem:[#allocation3 + $0x92] sm:$0xff]  ;;  %v5923_v34 = vld [vmem:[#allocation3 + $0xa9] sm:$0xff] }
 0x4c9   : > { %12488 = vrot.lane.b32.xlu0 %v12487_v6, %s13384_s17  ;;  %v5176_v56 = vadd.f32 %v5175_v49, %v4951_v12  ;;  %v5292_v19 = vsel %vm5228_vm10, %v5166_v39, %v5260_v20  ;;  %5682 = vst.msk [vmem:[#allocation3 + $0x141] sm:$0xff] %vm551_vm2, %v5293_v42  ;;  %v5891_v39 = vld [vmem:[#allocation3 + $0xa8] sm:$0xff]  ;;  %v12547_v12 = vpack.i.bf16 %v16428_v61, %v16482_v58  ;;  %v16492_v20 = vld [vmem:[#allocation3 + $0x9a] sm:$0xff]  ;;  %v5924_v61 = vld [vmem:[#allocation3 + $0xb1] sm:$0xff] }
 0x4ca   : > { %vm5231_vm1 = vcmp.ge.f32.partialorder %v5181_v25, 0.0  ;;  %v5263_v30 = vmul.f32 0.01, %v5181_v25  ;;  %11321 = vmatprep.mubr.msk.f32.mxu1 %vm551_vm2, %v5292_v19  ;;  %5681 = vst.msk [vmem:[#allocation3 + $0x139] sm:$0xff] %vm551_vm2, %v5292_v19  ;;  %v12552_v6 = vpack.i.bf16 %v16453_v55, %v5891_v39  ;;  %v12562_v49 = vpack.i.bf16 %v16440_v51, %v16492_v20 }
 0x4cb   : > { %vm5230_vm11 = vcmp.ge.f32.partialorder %v5176_v56, 0.0  ;;  %v5262_v14 = vmul.f32 0.01, %v5176_v56  ;;  %v11273_v63 = vpop.f32.mrb[60].mxu1  ;;  %11322 = vmatmul.mubr.msk.f32.gmra.mrb[24].mxu1 %vm551_vm2, %v5293_v42  ;;  %v12557_v42 = vpack.i.bf16 %v16451_v32, %v5923_v34 }
 0x4cc   : > { %v5185_v50 = vpop.f32.mrb[61].mxu1  ;;  %12498 = vrot.lane.b32.xlu1 %v12497_v1, %s13387_s27  ;;  %v5295_v29 = vsel %vm5231_vm1, %v5181_v25, %v5263_v30  ;;  %v5892_v1 = vld [vmem:[#allocation3 + $0xb0] sm:$0xff] }
 0x4cd   : > { %12503 = vrot.lane.b32.xlu0 %v12502_v18, %s13386_s30  ;;  %v5294_v53 = vsel %vm5230_vm11, %v5176_v56, %v5262_v14  ;;  %5684 = vst.msk [vmem:[#allocation3 + $0x159] sm:$0xff] %vm551_vm2, %v5295_v29  ;;  %v12572_v14 = vpack.i.bf16 %v5890_v22, %v5924_v61  ;;  %v16556_v22 = vld [vmem:[#allocation3 + $0xf9] sm:$0xff] }
 0x4ce   : > { %11324 = vmatprep.mubr.msk.f32.mxu1 %vm551_vm2, %v5294_v53  ;;  %5683 = vst.msk [vmem:[#allocation3 + $0x151] sm:$0xff] %vm551_vm2, %v5294_v53 }
 0x4cf   : > { %11325 = vmatmul.mubr.msk.f32.gmra.mrb[26].mxu1 %vm551_vm2, %v5295_v29  ;;  %v16455_v43 = vpop.f32.mrb[62].mxu1  ;;  %v12582_v29 = vpack.i.bf16 %v16482_v58, %v5893_v15 }
 0x4d0   : > { %v4960_v5 = vpop.f32.mrb[88].mxu0  ;;  %12513 = vrot.lane.b32.xlu1 %v12512_v9, %s13386_s30  ;;  %v5195_v60 = vpop.f32.mrb[63].mxu1  ;;  %v5862_v9 = vld [vmem:[#allocation3 + $0xb2] sm:$0xff] }
 0x4d1   : > { %v4961_v17 = vadd.f32 %v16196_v45, %v4960_v5  ;;  %12508 = vrot.lane.b32.xlu0 %v12507_v11, %s13387_s27  ;;  %v4962_v0 = vpop.f32.mrb[89].mxu0  ;;  %v5925_v11 = vld [vmem:[#allocation3 + $0xc1] sm:$0xff]  ;;  %v12592_v5 = vpack.i.bf16 %v16476_v40, %v5862_v9 }
 0x4d2   : > { %v12587_v32 = vpack.i.bf16 %v5891_v39, %v5925_v11  ;;  %v16567_v39 = vld [vmem:[#allocation3 + $0xfa] sm:$0xff] }
 0x4d3   : > { %v5186_v48 = vadd.f32 %v5185_v50, %v4961_v17  ;;  %v5894_v17 = vld [vmem:[#allocation3 + $0xc8] sm:$0xff] }
 0x4d4   : > { %12523 = vrot.lane.b32.xlu1 %v12522_v23, %s13387_s27  ;;  %v12597_v0 = vpack.i.bf16 %v16492_v20, %v5894_v17  ;;  %v5927_v23 = vld [vmem:[#allocation3 + $0xd9] sm:$0xff] }
 0x4d5   : > { %v5264_v36 = vmul.f32 0.01, %v5186_v48  ;;  %12518 = vrot.lane.b32.xlu0 %v12517_v3, %s13384_s17  ;;  %vm5232_vm12 = vcmp.ge.f32.partialorder %v5186_v48, 0.0  ;;  %v12617_v3 = vpack.i.bf16 %v5893_v15, %v5927_v23 }
 0x4d7   : > { %v4965_v46 = vpop.f32.mrb[90].mxu0  ;;  %v5296_v35 = vsel %vm5232_vm12, %v5186_v48, %v5264_v36 }
 0x4d8   : > { %v4966_v47 = vadd.f32 %v16196_v45, %v4965_v46  ;;  %v4967_v37 = vpop.f32.mrb[91].mxu0  ;;  %11327 = vmatprep.mubr.msk.f32.mxu1 %vm551_vm2, %v5296_v35  ;;  %5685 = vst.msk [vmem:[#allocation3 + $0x169] sm:$0xff] %vm551_vm2, %v5296_v35  ;;  %12533 = vrot.lane.b32.xlu1 %v12532_v59, %s13384_s17  ;;  %v5897_v46 = vld [vmem:[#allocation3 + $0xf0] sm:$0xff]  ;;  %v5866_v35 = vld [vmem:[#allocation3 + $0xe2] sm:$0xff] }
 0x4d9   : > { %12528 = vrot.lane.b32.xlu0 %v12527_v26, %s13386_s30 }
 0x4da   : > { %v5191_v28 = vadd.f32 %v11273_v63, %v4966_v47  ;;  %v12567_v63 = vpack.i.bf16 %v16464_v31, %v5892_v1  ;;  %v16549_v47 = vld [vmem:[#allocation3 + $0xf1] sm:$0xff] }
 0x4dc   : > { %v5265_v10 = vmul.f32 0.01, %v5191_v28  ;;  %v4970_v41 = vpop.f32.mrb[92].mxu0  ;;  %vm5233_vm13 = vcmp.ge.f32.partialorder %v5191_v28, 0.0  ;;  %12543 = vrot.lane.b32.xlu1 %v12542_v52, %s13386_s30 }
 0x4dd   : > { %v4971_v7 = vadd.f32 %v16196_v45, %v4970_v41  ;;  %12538 = vrot.lane.b32.xlu0 %v12537_v62, %s13387_s27  ;;  %v4972_v8 = vpop.f32.mrb[93].mxu0  ;;  %v16563_v41 = vld [vmem:[#allocation3 + $0x108] sm:$0xff] }
 0x4de   : > { %v5297_v44 = vsel %vm5233_vm13, %v5191_v28, %v5265_v10  ;;  %v5898_v28 = vld [vmem:[#allocation3 + $0xf8] sm:$0xff]  ;;  %v16572_v8 = vld [vmem:[#allocation3 + $0x10a] sm:$0xff] }
 0x4df   : > { %v5196_v57 = vadd.f32 %v5195_v60, %v4971_v7  ;;  %11328 = vmatmul.mubr.msk.f32.gmra.mrb[28].mxu1 %vm551_vm2, %v5297_v44  ;;  %5686 = vst.msk [vmem:[#allocation3 + $0x171] sm:$0xff] %vm551_vm2, %v5297_v44  ;;  %v5863_v60 = vld [vmem:[#allocation3 + $0xc2] sm:$0xff]  ;;  %v5961_v10 = vld [vmem:[#allocation3 + $0xf2] sm:$0xff] }
 0x4e0   : > { %12553 = vrot.lane.b32.xlu1 %v12552_v6, %s13387_s27  ;;  %v12607_v48 = vpack.i.bf16 %v5923_v34, %v5863_v60  ;;  %v12642_v59 = vpack.i.bf16 %v5863_v60, %v5897_v46  ;;  %v12667_v7 = vpack.i.bf16 %v5927_v23, %v5961_v10  ;;  %v16576_v44 = vld [vmem:[#allocation3 + $0x109] sm:$0xff]  ;;  %v16590_v34 = vld [vmem:[#allocation3 + $0x111] sm:$0xff] }
 0x4e1   : > { %vm5234_vm14 = vcmp.ge.f32.partialorder %v5196_v57, 0.0  ;;  %v5266_v27 = vmul.f32 0.01, %v5196_v57  ;;  %12548 = vrot.lane.b32.xlu0 %v12547_v12, %s13384_s17  ;;  %v12677_v12 = vpack.i.bf16 %v5897_v46, %v16576_v44 }
 0x4e3   : > { %v4975_v25 = vpop.f32.mrb[94].mxu0  ;;  %v5298_v56 = vsel %vm5234_vm14, %v5196_v57, %v5266_v27  ;;  %v16580_v57 = vld [vmem:[#allocation3 + $0x112] sm:$0xff] }
 0x4e4   : > { %v4976_v19 = vadd.f32 %v16196_v45, %v4975_v25  ;;  %v4977_v30 = vpop.f32.mrb[95].mxu0  ;;  %11330 = vmatprep.mubr.msk.f32.mxu1 %vm551_vm2, %v5298_v56  ;;  %5687 = vst.msk [vmem:[#allocation3 + $0x181] sm:$0xff] %vm551_vm2, %v5298_v56  ;;  %12563 = vrot.lane.b32.xlu1 %v12562_v49, %s13384_s17  ;;  %v5861_v45 = vld [vmem:[#allocation3 + $0xaa] sm:$0xff]  ;;  %v12692_v56 = vpack.i.bf16 %v5898_v28, %v16590_v34 }
 0x4e5   : > { %12558 = vrot.lane.b32.xlu0 %v12557_v42, %s13386_s30  ;;  %v12577_v53 = vpack.i.bf16 %v16466_v13, %v5861_v45  ;;  %v5896_v13 = vld [vmem:[#allocation3 + $0xe0] sm:$0xff]  ;;  %v16592_v27 = vld [vmem:[#allocation3 + $0x110] sm:$0xff] }
 0x4e6   : > { %v5201_v18 = vadd.f32 %v16455_v43, %v4976_v19  ;;  %v5926_v43 = vld [vmem:[#allocation3 + $0xc9] sm:$0xff]  ;;  %v12627_v36 = vpack.i.bf16 %v5862_v9, %v5896_v13  ;;  %v12662_v52 = vpack.i.bf16 %v5896_v13, %v16556_v22  ;;  %v12687_v19 = vpack.i.bf16 %v5866_v35, %v16592_v27  ;;  %v16602_v30 = vld [vmem:[#allocation3 + $0x13a] sm:$0xff] }
 0x4e7   : > { %v12652_v37 = vpack.i.bf16 %v5926_v43, %v5866_v35  ;;  %v16596_v49 = vld [vmem:[#allocation3 + $0x12a] sm:$0xff] }
 0x4e8   : > { %v5267_v51 = vmul.f32 0.01, %v5201_v18  ;;  %vm5235_vm15 = vcmp.ge.f32.partialorder %v5201_v18, 0.0  ;;  %12573 = vrot.lane.b32.xlu1 %v12572_v14, %s13386_s30  ;;  %v5689_v14 = vld [vmem:[#allocation3] sm:$0xff]  ;;  %v16640_v13 = vld [vmem:[#allocation3 + $0x16a] sm:$0xff] }
 0x4e9   : > { %12568 = vrot.lane.b32.xlu0 %v12567_v63, %s13387_s27  ;;  %v16610_v63 = vld [vmem:[#allocation3 + $0x142] sm:$0xff] }
 0x4ea   : > { %v5299_v50 = vsel %vm5235_vm15, %v5201_v18, %v5267_v51 }
 0x4eb   : > { %11331 = vmatmul.mubr.msk.f32.gmra.mrb[30].mxu1 %vm551_vm2, %v5299_v50  ;;  %5688 = vst.msk [vmem:[#allocation3 + $0x189] sm:$0xff] %vm551_vm2, %v5299_v50  ;;  %v12697_v50 = vpack.i.bf16 %v16549_v47, %v16572_v8 }
 0x4ec   : > { %11341 = vmatprep.mubr.msk.f32.mxu1 %vm551_vm2, %v16298_v21  ;;  %12583 = vrot.lane.b32.xlu1 %v12582_v29, %s13387_s27  ;;  %v12602_v21 = vpack.i.bf16 %v5892_v1, %v5926_v43  ;;  %v16617_v29 = vld [vmem:[#allocation3 + $0x152] sm:$0xff] }
 0x4ed   : > { %12578 = vrot.lane.b32.xlu0 %v12577_v53, %s13384_s17 }
 0x4ef   : > { %11342 = vmatmul.mubr.msk.f32.vlgmr.msra.gmra.mrb[64].mxu1 %vm551_vm2, %v16293_v38  ;;  %v5895_v38 = vld [vmem:[#allocation3 + $0xd8] sm:$0xff] }
 0x4f0   : > { %11344 = vmatprep.mubr.msk.f32.mxu1 %vm551_vm2, %v16356_v33  ;;  %12593 = vrot.lane.b32.xlu1 %v12592_v5, %s13384_s17  ;;  %v12612_v33 = vpack.i.bf16 %v5861_v45, %v5895_v38  ;;  %v12647_v40 = vpack.i.bf16 %v5895_v38, %v16549_v47 }
 0x4f1   : > { %12588 = vrot.lane.b32.xlu0 %v12587_v32, %s13386_s30  ;;  %v16621_v32 = vld [vmem:[#allocation3 + $0x121] sm:$0xff] }
 0x4f3   : > { %11345 = vmatmul.mubr.msk.f32.gmra.mrb[66].mxu1 %vm551_vm2, %v16354_v54  ;;  %v5864_v54 = vld [vmem:[#allocation3 + $0xca] sm:$0xff] }
 0x4f4   : > { %11347 = vmatprep.mubr.msk.f32.mxu1 %vm551_vm2, %v16413_v2  ;;  %12603 = vrot.lane.b32.xlu1 %v12602_v21, %s13386_s30  ;;  %v12622_v2 = vpack.i.bf16 %v5924_v61, %v5864_v54  ;;  %v12657_v62 = vpack.i.bf16 %v5864_v54, %v5898_v28  ;;  %v16606_v61 = vld [vmem:[#allocation3 + $0x120] sm:$0xff] }
 0x4f5   : > { %12598 = vrot.lane.b32.xlu0 %v12597_v0, %s13387_s27 }
 0x4f7   : > { %11348 = vmatmul.mubr.msk.f32.gmra.mrb[68].mxu1 %vm551_vm2, %v16411_v24  ;;  %v5928_v24 = vld [vmem:[#allocation3 + $0xe1] sm:$0xff] }
 0x4f8   : > { %11350 = vmatprep.mubr.msk.f32.mxu1 %vm551_vm2, %v16453_v55  ;;  %12613 = vrot.lane.b32.xlu1 %v12612_v33, %s13387_s27  ;;  %v12632_v55 = vpack.i.bf16 %v5894_v17, %v5928_v24  ;;  %v12682_v6 = vpack.i.bf16 %v5928_v24, %v16567_v39  ;;  %v12712_v24 = vpack.i.bf16 %v16556_v22, %v16580_v57  ;;  %v16653_v22 = vld [vmem:[#allocation3 + $0x172] sm:$0xff] }
 0x4f9   : > { %12608 = vrot.lane.b32.xlu0 %v12607_v48, %s13384_s17  ;;  %v5690_v48 = vld [vmem:[#allocation3 + $0x8] sm:$0xff] }
 0x4fb   : > { %11351 = vmatmul.mubr.msk.f32.gmra.mrb[70].mxu1 %vm551_vm2, %v16464_v31  ;;  %v5865_v31 = vld [vmem:[#allocation3 + $0xda] sm:$0xff] }
 0x4fc   : > { %11353 = vmatprep.mubr.msk.f32.mxu1 %vm551_vm2, %v16482_v58  ;;  %12623 = vrot.lane.b32.xlu1 %v12622_v2, %s13384_s17  ;;  %v12637_v26 = vpack.i.bf16 %v5925_v11, %v5865_v31  ;;  %v12672_v58 = vpack.i.bf16 %v5865_v31, %v16563_v41 }
 0x4fd   : > { %12618 = vrot.lane.b32.xlu0 %v12617_v3, %s13386_s30 }
 0x4ff   : > { %11354 = vmatmul.mubr.msk.f32.gmra.mrb[72].mxu1 %vm551_vm2, %v16492_v20  ;;  %v16586_v20 = vld [vmem:[#allocation3 + $0x122] sm:$0xff] }
 0x500   : > { %11356 = vmatprep.mubr.msk.f32.mxu1 %vm551_vm2, %v5861_v45  ;;  %12633 = vrot.lane.b32.xlu1 %v12632_v55, %s13386_s30  ;;  %v12702_v45 = vpack.i.bf16 %v5961_v10, %v16606_v61 }
 0x501   : > { %12628 = vrot.lane.b32.xlu0 %v12627_v36, %s13387_s27 }
 0x503   : > { %11357 = vmatmul.mubr.msk.f32.gmra.mrb[74].mxu1 %vm551_vm2, %v5862_v9 }
 0x504   : > { %11359 = vmatprep.mubr.msk.f32.mxu1 %vm551_vm2, %v5863_v60  ;;  %12643 = vrot.lane.b32.xlu1 %v12642_v59, %s13387_s27  ;;  %v16629_v60 = vld [vmem:[#allocation3 + $0x15a] sm:$0xff] }
 0x505   : > { %12638 = vrot.lane.b32.xlu0 %v12637_v26, %s13384_s17  ;;  %v5818_v59 = vld [vmem:[#allocation3 + $0x21] sm:$0xff]  ;;  %v16644_v26 = vld [vmem:[#allocation3 + $0x129] sm:$0xff] }
 0x507   : > { %11360 = vmatmul.mubr.msk.f32.gmra.mrb[76].mxu1 %vm551_vm2, %v5864_v54 }
 0x508   : > { %11362 = vmatprep.mubr.msk.f32.mxu1 %vm551_vm2, %v5865_v31  ;;  %12653 = vrot.lane.b32.xlu1 %v12652_v37, %s13384_s17  ;;  %v16649_v37 = vld [vmem:[#allocation3 + $0x128] sm:$0xff] }
 0x509   : > { %12648 = vrot.lane.b32.xlu0 %v12647_v40, %s13386_s30 }
 0x50b   : > { %11363 = vmatmul.mubr.msk.f32.gmra.mrb[78].mxu1 %vm551_vm2, %v5866_v35 }
 0x50c   : > { %11365 = vmatprep.mubr.msk.f32.mxu1 %vm551_vm2, %v5961_v10  ;;  %12663 = vrot.lane.b32.xlu1 %v12662_v52, %s13386_s30 }
 0x50d   : > { %12658 = vrot.lane.b32.xlu0 %v12657_v62, %s13387_s27 }
 0x50f   : > { %11366 = vmatmul.mubr.msk.f32.gmra.mrb[80].mxu1 %vm551_vm2, %v16567_v39 }
 0x510   : > { %11368 = vmatprep.mubr.msk.f32.mxu1 %vm551_vm2, %v16572_v8  ;;  %12673 = vrot.lane.b32.xlu1 %v12672_v58, %s13387_s27  ;;  %v12722_v58 = vpack.i.bf16 %v16592_v27, %v16644_v26 }
 0x511   : > { %12668 = vrot.lane.b32.xlu0 %v12667_v7, %s13384_s17  ;;  %v16662_v7 = vld [vmem:[#allocation3 + $0x182] sm:$0xff] }
 0x513   : > { %11369 = vmatmul.mubr.msk.f32.gmra.mrb[82].mxu1 %vm551_vm2, %v16580_v57 }
 0x514   : > { %11371 = vmatprep.mubr.msk.f32.mxu1 %vm551_vm2, %v16586_v20  ;;  %12683 = vrot.lane.b32.xlu1 %v12682_v6, %s13384_s17  ;;  %v12717_v6 = vpack.i.bf16 %v16567_v39, %v16649_v37 }
 0x515   : > { %12678 = vrot.lane.b32.xlu0 %v12677_v12, %s13386_s30  ;;  %v12404_v25 = vpop.permute.xlu1 %12403  ;;  %v16668_v12 = vld [vmem:[#allocation3 + $0x138] sm:$0xff] }
 0x516   : > { %v12399_v42 = vpop.permute.xlu0 %12398  ;;  %v12406_v43 = vunpack.i.h.bf16 %v12404_v25  ;;  %v12405_v17 = vunpack.i.l.bf16 %v12404_v25  ;;  %v12732_v39 = vpack.i.bf16 %v16572_v8, %v16668_v12 }
 0x517   : > { %11372 = vmatmul.mubr.msk.f32.gmra.mrb[84].mxu1 %vm551_vm2, %v16596_v49  ;;  %v12401_v1 = vunpack.i.h.bf16 %v12399_v42  ;;  %v12400_v18 = vunpack.i.l.bf16 %v12399_v42 }
 0x518   : > { %11374 = vmatprep.mubr.msk.f32.mxu1 %vm551_vm2, %v16602_v30  ;;  %12693 = vrot.lane.b32.xlu1 %v12692_v56, %s13386_s30  ;;  %v6842_v35 = vsel %vm551_vm2, %v5818_v59, %v12405_v17  ;;  %v6746_v47 = vsel %vm551_vm2, %v5690_v48, %v12406_v43  ;;  %v16672_v56 = vld [vmem:[#allocation3 + $0x18a] sm:$0xff] }
 0x519   : > { %12688 = vrot.lane.b32.xlu0 %v12687_v19, %s13387_s27  ;;  %v6745_v21 = vsel %vm551_vm2, %v5689_v14, %v12401_v1  ;;  %v6841_v0 = vsel %vm551_vm2, %v16306_v4, %v12400_v18  ;;  %v12707_v4 = vpack.i.bf16 %v16563_v41, %v16621_v32  ;;  %v12727_v1 = vpack.i.bf16 %v16576_v44, %v16586_v20 }
 0x51a   : > { %v12409_v51 = vpop.permute.xlu1 %12408 }
 0x51b   : > { %v12414_v15 = vpop.permute.xlu0 %12413  ;;  %11375 = vmatmul.mubr.msk.f32.gmra.mrb[86].mxu1 %vm551_vm2, %v16610_v63  ;;  %v12411_v53 = vunpack.i.h.bf16 %v12409_v51  ;;  %v12410_v9 = vunpack.i.l.bf16 %v12409_v51 }
 0x51c   : > { %v12416_v11 = vunpack.i.h.bf16 %v12414_v15  ;;  %v12415_v5 = vunpack.i.l.bf16 %v12414_v15  ;;  %11377 = vmatprep.mubr.msk.f32.mxu1 %vm551_vm2, %v16617_v29  ;;  %12703 = vrot.lane.b32.xlu1 %v12702_v45, %s13387_s27  ;;  %v5819_v45 = vld [vmem:[#allocation3 + $0x31] sm:$0xff] }
 0x51d   : > { %12698 = vrot.lane.b32.xlu0 %v12697_v50, %s13384_s17  ;;  %v6873_v38 = vsel %vm4453_vm4, %v6841_v0, %v12410_v9  ;;  %v6777_v33 = vsel %vm4453_vm4, %v6745_v21, %v12411_v53  ;;  %v16680_v50 = vld [vmem:[#allocation3 + $0x139] sm:$0xff] }
 0x51e   : > { %v12424_v54 = vpop.permute.xlu1 %12423  ;;  %v6905_v2 = vsel %vm4486_vm5, %v6873_v38, %v12415_v5  ;;  %v6809_v3 = vsel %vm4486_vm5, %v6777_v33, %v12416_v11  ;;  %v5691_v53 = vld [vmem:[#allocation3 + $0x18] sm:$0xff]  ;;  %v12742_v38 = vpack.i.bf16 %v16590_v34, %v16596_v49  ;;  %v12737_v33 = vpack.i.bf16 %v16606_v61, %v16680_v50  ;;  %v16698_v34 = vld [vmem:[#allocation3 + $0x140] sm:$0xff] }
 0x51f   : > { %v12419_v23 = vpop.permute.xlu0 %12418  ;;  %11378 = vmatmul.mubr.msk.f32.gmra.mrb[88].mxu1 %vm551_vm2, %v16629_v60  ;;  %v12426_v55 = vunpack.i.h.bf16 %v12424_v54  ;;  %v12425_v36 = vunpack.i.l.bf16 %v12424_v54  ;;  %7140 = vmatprep.mubr.f32.mxu0 %v6905_v2 }
 0x520   : > { %v12421_v46 = vunpack.i.h.bf16 %v12419_v23  ;;  %v12420_v31 = vunpack.i.l.bf16 %v12419_v23  ;;  %11380 = vmatprep.mubr.msk.f32.mxu1 %vm551_vm2, %v16640_v13  ;;  %7141 = vmatmul.mubr.f32.vlgmr.msra.gmra.mrb[96].mxu0 %v6809_v3 }
 0x521   : > { %12713 = vrot.lane.b32.xlu1 %v12712_v24, %s13384_s17  ;;  %12708 = vrot.lane.b32.xlu0 %v12707_v4, %s13386_s30  ;;  %v5820_v24 = vld [vmem:[#allocation3 + $0x39] sm:$0xff]  ;;  %v16694_v4 = vld [vmem:[#allocation3 + $0x141] sm:$0xff] }
 0x522   : > { %v6874_v40 = vsel %vm4453_vm4, %v6842_v35, %v12420_v31  ;;  %v6778_v28 = vsel %vm4453_vm4, %v6746_v47, %v12421_v46  ;;  %v12434_v52 = vpop.permute.xlu1 %12433 }
 0x523   : > { %v12429_v62 = vpop.permute.xlu0 %12428  ;;  %v6906_v10 = vsel %vm4486_vm5, %v6874_v40, %v12425_v36  ;;  %11381 = vmatmul.mubr.msk.f32.gmra.mrb[90].mxu1 %vm551_vm2, %v16653_v22  ;;  %v6810_v41 = vsel %vm4486_vm5, %v6778_v28, %v12426_v55  ;;  %v12436_v9 = vunpack.i.h.bf16 %v12434_v52  ;;  %v12435_v11 = vunpack.i.l.bf16 %v12434_v52  ;;  %v5692_v55 = vld [vmem:[#allocation3 + $0x20] sm:$0xff] }
 0x524   : > { %7145 = vmatprep.mubr.f32.mxu0 %v6906_v10  ;;  %11383 = vmatprep.mubr.msk.f32.mxu1 %vm551_vm2, %v16662_v7  ;;  %v12431_v25 = vunpack.i.h.bf16 %v12429_v62  ;;  %v12430_v42 = vunpack.i.l.bf16 %v12429_v62  ;;  %v12752_v40 = vpack.i.bf16 %v16649_v37, %v16694_v4  ;;  %v12747_v52 = vpack.i.bf16 %v16580_v57, %v16698_v34  ;;  %v16710_v62 = vld [vmem:[#allocation3 + $0x150] sm:$0xff] }
 0x525   : > { %7146 = vmatmul.mubr.f32.gmra.mrb[98].mxu0 %v6810_v41  ;;  %12723 = vrot.lane.b32.xlu1 %v12722_v58, %s13386_s30  ;;  %v6844_v36 = vsel %vm551_vm2, %v5820_v24, %v12435_v11  ;;  %v6748_v61 = vsel %vm551_vm2, %v5692_v55, %v12436_v9  ;;  %v12762_v37 = vpack.i.bf16 %v16586_v20, %v16710_v62 }
 0x526   : > { %12718 = vrot.lane.b32.xlu0 %v12717_v6, %s13387_s27  ;;  %v12439_v27 = vpop.permute.xlu1 %12438  ;;  %v6843_v5 = vsel %vm551_vm2, %v5819_v45, %v12430_v42  ;;  %v6747_v43 = vsel %vm551_vm2, %v5691_v53, %v12431_v25  ;;  %v12757_v25 = vpack.i.bf16 %v16621_v32, %v16602_v30 }
 0x527   : > { %v12444_v19 = vpop.permute.xlu0 %12443  ;;  %11384 = vmatmul.mubr.msk.f32.gmra.mrb[92].mxu1 %vm551_vm2, %v16672_v56  ;;  %v12441_v18 = vunpack.i.h.bf16 %v12439_v27  ;;  %v12440_v14 = vunpack.i.l.bf16 %v12439_v27 }
 0x528   : > { %v12446_v51 = vunpack.i.h.bf16 %v12444_v19  ;;  %v12445_v15 = vunpack.i.l.bf16 %v12444_v19 }
 0x529   : > { %12733 = vrot.lane.b32.xlu1 %v12732_v39, %s13387_s27  ;;  %v6875_v8 = vsel %vm4453_vm4, %v6843_v5, %v12440_v14  ;;  %v6779_v44 = vsel %vm4453_vm4, %v6747_v43, %v12441_v18  ;;  %v5821_v39 = vld [vmem:[#allocation3 + $0x49] sm:$0xff]  ;;  %v12772_v5 = vpack.i.bf16 %v16644_v26, %v16610_v63  ;;  %v16736_v26 = vld [vmem:[#allocation3 + $0x158] sm:$0xff] }
 0x52a   : > { %12728 = vrot.lane.b32.xlu0 %v12727_v1, %s13384_s17  ;;  %v12454_v17 = vpop.permute.xlu1 %12453  ;;  %v6907_v0 = vsel %vm4486_vm5, %v6875_v8, %v12445_v15  ;;  %v6811_v48 = vsel %vm4486_vm5, %v6779_v44, %v12446_v51  ;;  %v16718_v1 = vld [vmem:[#allocation3 + $0x151] sm:$0xff] }
 0x52b   : > { %v12449_v21 = vpop.permute.xlu0 %12448  ;;  %v12456_v54 = vunpack.i.h.bf16 %v12454_v17  ;;  %v12455_v23 = vunpack.i.l.bf16 %v12454_v17  ;;  %7150 = vmatprep.mubr.f32.mxu0 %v6907_v0  ;;  %v5693_v18 = vld [vmem:[#allocation3 + $0x30] sm:$0xff]  ;;  %v12767_v43 = vpack.i.bf16 %v16668_v12, %v16718_v1 }
 0x52c   : > { %v12451_v2 = vunpack.i.h.bf16 %v12449_v21  ;;  %v12450_v3 = vunpack.i.l.bf16 %v12449_v21  ;;  %7151 = vmatmul.mubr.f32.gmra.mrb[100].mxu0 %v6811_v48  ;;  %v5694_v48 = vld [vmem:[#allocation3 + $0x38] sm:$0xff] }
 0x52d   : > { %12743 = vrot.lane.b32.xlu1 %v12742_v38, %s13384_s17  ;;  %v5822_v38 = vld [vmem:[#allocation3 + $0x51] sm:$0xff] }
 0x52e   : > { %12738 = vrot.lane.b32.xlu0 %v12737_v33, %s13386_s30  ;;  %v6876_v46 = vsel %vm4453_vm4, %v6844_v36, %v12450_v3  ;;  %v6780_v31 = vsel %vm4453_vm4, %v6748_v61, %v12451_v2  ;;  %v12464_v59 = vpop.permute.xlu1 %12463  ;;  %v16732_v33 = vld [vmem:[#allocation3 + $0x159] sm:$0xff] }
 0x52f   : > { %v12459_v35 = vpop.permute.xlu0 %12458  ;;  %v6908_v47 = vsel %vm4486_vm5, %v6876_v46, %v12455_v23  ;;  %v6812_v28 = vsel %vm4486_vm5, %v6780_v31, %v12456_v54  ;;  %v12466_v14 = vunpack.i.h.bf16 %v12464_v59  ;;  %v12465_v51 = vunpack.i.l.bf16 %v12464_v59  ;;  %v16748_v31 = vld [vmem:[#allocation3 + $0x168] sm:$0xff] }
 0x530   : > { %7155 = vmatprep.mubr.f32.mxu0 %v6908_v47  ;;  %v12461_v10 = vunpack.i.h.bf16 %v12459_v35  ;;  %v12460_v41 = vunpack.i.l.bf16 %v12459_v35  ;;  %v12782_v36 = vpack.i.bf16 %v16698_v34, %v16732_v33  ;;  %v12777_v46 = vpack.i.bf16 %v16596_v49, %v16736_v26 }
 0x531   : > { %12753 = vrot.lane.b32.xlu1 %v12752_v40, %s13386_s30  ;;  %7156 = vmatmul.mubr.f32.gmra.mrb[102].mxu0 %v6812_v28  ;;  %v6846_v54 = vsel %vm551_vm2, %v5822_v38, %v12465_v51  ;;  %v6750_v12 = vsel %vm551_vm2, %v5694_v48, %v12466_v14  ;;  %v12792_v34 = vpack.i.bf16 %v16602_v30, %v16748_v31 }
 0x532   : > { %12748 = vrot.lane.b32.xlu0 %v12747_v52, %s13387_s27  ;;  %v12469_v58 = vpop.permute.xlu1 %12468  ;;  %v6845_v15 = vsel %vm551_vm2, %v5821_v39, %v12460_v41  ;;  %v6749_v45 = vsel %vm551_vm2, %v5693_v18, %v12461_v10  ;;  %v12787_v28 = vpack.i.bf16 %v16680_v50, %v16617_v29  ;;  %v12802_v14 = vpack.i.bf16 %v16694_v4, %v16629_v60  ;;  %v16774_v4 = vld [vmem:[#allocation3 + $0x170] sm:$0xff] }
 0x533   : > { %v12474_v6 = vpop.permute.xlu0 %12473  ;;  %v12471_v42 = vunpack.i.h.bf16 %v12469_v58  ;;  %v12470_v27 = vunpack.i.l.bf16 %v12469_v58  ;;  %v5823_v58 = vld [vmem:[#allocation3 + $0x61] sm:$0xff] }
 0x534   : > { %v12476_v57 = vunpack.i.h.bf16 %v12474_v6  ;;  %v12475_v19 = vunpack.i.l.bf16 %v12474_v6  ;;  %v16756_v6 = vld [vmem:[#allocation3 + $0x169] sm:$0xff] }
 0x535   : > { %12763 = vrot.lane.b32.xlu1 %v12762_v37, %s13387_s27  ;;  %v6877_v20 = vsel %vm4453_vm4, %v6845_v15, %v12470_v27  ;;  %v6781_v32 = vsel %vm4453_vm4, %v6749_v45, %v12471_v42  ;;  %v5695_v37 = vld [vmem:[#allocation3 + $0x48] sm:$0xff]  ;;  %v12797_v51 = vpack.i.bf16 %v16710_v62, %v16756_v6 }
 0x536   : > { %12758 = vrot.lane.b32.xlu0 %v12757_v25, %s13384_s17  ;;  %v12484_v53 = vpop.permute.xlu1 %12483  ;;  %v6909_v11 = vsel %vm4486_vm5, %v6877_v20, %v12475_v19  ;;  %v6813_v8 = vsel %vm4486_vm5, %v6781_v32, %v12476_v57 }
 0x537   : > { %v12479_v9 = vpop.permute.xlu0 %12478  ;;  %v12486_v44 = vunpack.i.h.bf16 %v12484_v53  ;;  %v12485_v17 = vunpack.i.l.bf16 %v12484_v53  ;;  %7160 = vmatprep.mubr.f32.mxu0 %v6909_v11  ;;  %v16770_v11 = vld [vmem:[#allocation3 + $0x171] sm:$0xff] }
 0x538   : > { %v12481_v21 = vunpack.i.h.bf16 %v12479_v9  ;;  %v12480_v0 = vunpack.i.l.bf16 %v12479_v9  ;;  %7161 = vmatmul.mubr.f32.gmra.mrb[104].mxu0 %v6813_v8  ;;  %v5824_v9 = vld [vmem:[#allocation3 + $0x69] sm:$0xff]  ;;  %v12812_v38 = vpack.i.bf16 %v16736_v26, %v16770_v11 }
 0x539   : > { %12773 = vrot.lane.b32.xlu1 %v12772_v5, %s13384_s17  ;;  %v5696_v5 = vld [vmem:[#allocation3 + $0x50] sm:$0xff] }
 0x53a   : > { %12768 = vrot.lane.b32.xlu0 %v12767_v43, %s13386_s30  ;;  %v6878_v23 = vsel %vm4453_vm4, %v6846_v54, %v12480_v0  ;;  %v6782_v2 = vsel %vm4453_vm4, %v6750_v12, %v12481_v21  ;;  %v12494_v3 = vpop.permute.xlu1 %12493 }
 0x53b   : > { %v12489_v24 = vpop.permute.xlu0 %12488  ;;  %v6910_v55 = vsel %vm4486_vm5, %v6878_v23, %v12485_v17  ;;  %v6814_v61 = vsel %vm4486_vm5, %v6782_v2, %v12486_v44  ;;  %v12496_v25 = vunpack.i.h.bf16 %v12494_v3  ;;  %v12495_v42 = vunpack.i.l.bf16 %v12494_v3  ;;  %v16786_v2 = vld [vmem:[#allocation3 + $0x180] sm:$0xff] }
 0x53c   : > { %7165 = vmatprep.mubr.f32.mxu0 %v6910_v55  ;;  %v12491_v59 = vunpack.i.h.bf16 %v12489_v24  ;;  %v12490_v35 = vunpack.i.l.bf16 %v12489_v24  ;;  %v12807_v23 = vpack.i.bf16 %v16610_v63, %v16774_v4  ;;  %v5825_v55 = vld [vmem:[#allocation3 + $0x79] sm:$0xff]  ;;  %v12822_v63 = vpack.i.bf16 %v16617_v29, %v16786_v2 }
 0x53d   : > { %12783 = vrot.lane.b32.xlu1 %v12782_v36, %s13386_s30  ;;  %7166 = vmatmul.mubr.f32.gmra.mrb[106].mxu0 %v6814_v61  ;;  %v6848_v43 = vsel %vm551_vm2, %v5824_v9, %v12495_v42  ;;  %v6752_v62 = vsel %vm551_vm2, %v5696_v5, %v12496_v25  ;;  %v5697_v36 = vld [vmem:[#allocation3 + $0x60] sm:$0xff]  ;;  %v12832_v25 = vpack.i.bf16 %v16732_v33, %v16653_v22 }
 0x53e   : > { %12778 = vrot.lane.b32.xlu0 %v12777_v46, %s13387_s27  ;;  %v12499_v47 = vpop.permute.xlu1 %12498  ;;  %v6847_v27 = vsel %vm551_vm2, %v5823_v58, %v12490_v35  ;;  %v6751_v57 = vsel %vm551_vm2, %v5695_v37, %v12491_v59 }
 0x53f   : > { %v12504_v40 = vpop.permute.xlu0 %12503  ;;  %v12501_v52 = vunpack.i.h.bf16 %v12499_v47  ;;  %v12500_v10 = vunpack.i.l.bf16 %v12499_v47 }
 0x540   : > { %v12506_v49 = vunpack.i.h.bf16 %v12504_v40  ;;  %v12505_v41 = vunpack.i.l.bf16 %v12504_v40  ;;  %v12817_v40 = vpack.i.bf16 %v16718_v1, %v16640_v13 }
 0x541   : > { %12793 = vrot.lane.b32.xlu1 %v12792_v34, %s13387_s27  ;;  %v6879_v30 = vsel %vm4453_vm4, %v6847_v27, %v12500_v10  ;;  %v6783_v50 = vsel %vm4453_vm4, %v6751_v57, %v12501_v52  ;;  %v16796_v34 = vld [vmem:[#allocation3 + $0x181] sm:$0xff] }
 0x542   : > { %12788 = vrot.lane.b32.xlu0 %v12787_v28, %s13384_s17  ;;  %v12514_v19 = vpop.permute.xlu1 %12513  ;;  %v6911_v18 = vsel %vm4486_vm5, %v6879_v30, %v12505_v41  ;;  %v6815_v15 = vsel %vm4486_vm5, %v6783_v50, %v12506_v49  ;;  %v12827_v42 = vpack.i.bf16 %v16748_v31, %v16796_v34 }
 0x543   : > { %v12509_v39 = vpop.permute.xlu0 %12508  ;;  %v12516_v45 = vunpack.i.h.bf16 %v12514_v19  ;;  %v12515_v20 = vunpack.i.l.bf16 %v12514_v19  ;;  %7170 = vmatprep.mubr.f32.mxu0 %v6911_v18  ;;  %v5826_v19 = vld [vmem:[#allocation3 + $0x81] sm:$0xff] }
 0x544   : > { %v12511_v32 = vunpack.i.h.bf16 %v12509_v39  ;;  %v12510_v53 = vunpack.i.l.bf16 %v12509_v39  ;;  %7171 = vmatmul.mubr.f32.gmra.mrb[108].mxu0 %v6815_v15  ;;  %v16808_v39 = vld [vmem:[#allocation3 + $0x189] sm:$0xff] }
 0x545   : > { %12803 = vrot.lane.b32.xlu1 %v12802_v14, %s13384_s17  ;;  %v5698_v18 = vld [vmem:[#allocation3 + $0x68] sm:$0xff]  ;;  %v12842_v9 = vpack.i.bf16 %v16774_v4, %v16808_v39 }
 0x546   : > { %12798 = vrot.lane.b32.xlu0 %v12797_v51, %s13386_s30  ;;  %v6880_v8 = vsel %vm4453_vm4, %v6848_v43, %v12510_v53  ;;  %v6784_v44 = vsel %vm4453_vm4, %v6752_v62, %v12511_v32  ;;  %v12524_v17 = vpop.permute.xlu1 %12523  ;;  %v16812_v51 = vld [vmem:[#allocation3 + $0x188] sm:$0xff] }
 0x547   : > { %v12519_v21 = vpop.permute.xlu0 %12518  ;;  %v6912_v0 = vsel %vm4486_vm5, %v6880_v8, %v12515_v20  ;;  %v6816_v48 = vsel %vm4486_vm5, %v6784_v44, %v12516_v45  ;;  %v12526_v3 = vunpack.i.h.bf16 %v12524_v17  ;;  %v12525_v24 = vunpack.i.l.bf16 %v12524_v17  ;;  %v5911_v44 = vld [vmem:[#allocation3 + $0x198] sm:$0xff] }
 0x548   : > { %v12521_v54 = vunpack.i.h.bf16 %v12519_v21  ;;  %v12520_v12 = vunpack.i.l.bf16 %v12519_v21  ;;  %7175 = vmatprep.mubr.f32.mxu0 %v6912_v0  ;;  %v12837_v8 = vpack.i.bf16 %v16629_v60, %v16812_v51  ;;  %v5699_v17 = vld [vmem:[#allocation3 + $0x78] sm:$0xff] }
 0x549   : > { %12813 = vrot.lane.b32.xlu1 %v12812_v38, %s13386_s30  ;;  %7176 = vmatmul.mubr.f32.gmra.mrb[110].mxu0 %v6816_v48  ;;  %v5827_v38 = vld [vmem:[#allocation3 + $0x91] sm:$0xff]  ;;  %v5975_v48 = vld [vmem:[#allocation3 + $0x19a] sm:$0xff] }
 0x54a   : > { %12808 = vrot.lane.b32.xlu0 %v12807_v23, %s13387_s27  ;;  %v6849_v26 = vsel %vm551_vm2, %v5825_v55, %v12520_v12  ;;  %v6753_v61 = vsel %vm551_vm2, %v5697_v36, %v12521_v54  ;;  %v12534_v46 = vpop.permute.xlu1 %12533  ;;  %v5976_v54 = vld [vmem:[#allocation3 + $0x1a2] sm:$0xff]  ;;  %11386 = vmatprep.mubr.msk.f32.mxu1 %vm551_vm2, %v5975_v48  ;;  %v12847_v36 = vpack.i.bf16 %v16756_v6, %v16662_v7 }
 0x54b   : > { %v12529_v59 = vpop.permute.xlu0 %12528  ;;  %v12536_v28 = vunpack.i.h.bf16 %v12534_v46  ;;  %v12535_v52 = vunpack.i.l.bf16 %v12534_v46  ;;  %v6881_v10 = vsel %vm4453_vm4, %v6849_v26, %v12525_v24  ;;  %v6785_v49 = vsel %vm4453_vm4, %v6753_v61, %v12526_v3  ;;  %11387 = vmatmul.mubr.msk.f32.gmra.mrb[94].mxu1 %vm551_vm2, %v5976_v54  ;;  %v5943_v26 = vld [vmem:[#allocation3 + $0x199] sm:$0xff] }
 0x54c   : > { %v12531_v35 = vunpack.i.h.bf16 %v12529_v59  ;;  %v12530_v47 = vunpack.i.l.bf16 %v12529_v59  ;;  %v12852_v3 = vpack.i.bf16 %v16640_v13, %v5911_v44  ;;  %v12862_v7 = vpack.i.bf16 %v16770_v11, %v16672_v56 }
 0x54d   : > { %12823 = vrot.lane.b32.xlu1 %v12822_v63, %s13387_s27  ;;  %v6850_v14 = vsel %vm551_vm2, %v5826_v19, %v12535_v52  ;;  %v6754_v15 = vsel %vm551_vm2, %v5698_v18, %v12536_v28  ;;  %v12857_v28 = vpack.i.bf16 %v16786_v2, %v5943_v26 }
 0x54e   : > { %12818 = vrot.lane.b32.xlu0 %v12817_v40, %s13384_s17  ;;  %v6913_v41 = vsel %vm4486_vm5, %v6881_v10, %v12530_v47  ;;  %v6817_v29 = vsel %vm4486_vm5, %v6785_v49, %v12531_v35  ;;  %v12544_v58 = vpop.permute.xlu1 %12543 }
 0x54f   : > { %v12539_v37 = vpop.permute.xlu0 %12538  ;;  %7180 = vmatprep.mubr.f32.mxu0 %v6913_v41  ;;  %v12546_v27 = vunpack.i.h.bf16 %v12544_v58  ;;  %v12545_v57 = vunpack.i.l.bf16 %v12544_v58  ;;  %v5944_v58 = vld [vmem:[#allocation3 + $0x1a1] sm:$0xff] }
 0x550   : > { %v12541_v30 = vunpack.i.h.bf16 %v12539_v37  ;;  %v12540_v50 = vunpack.i.l.bf16 %v12539_v37  ;;  %7181 = vmatmul.mubr.f32.gmra.mrb[112].mxu0 %v6817_v29  ;;  %v5828_v29 = vld [vmem:[#allocation3 + $0x99] sm:$0xff]  ;;  %v12872_v19 = vpack.i.bf16 %v16812_v51, %v5944_v58 }
 0x551   : > { %12833 = vrot.lane.b32.xlu1 %v12832_v25, %s13384_s17  ;;  %v5700_v37 = vld [vmem:[#allocation3 + $0x80] sm:$0xff] }
 0x552   : > { %12828 = vrot.lane.b32.xlu0 %v12827_v42, %s13386_s30  ;;  %v6882_v31 = vsel %vm4453_vm4, %v6850_v14, %v12540_v50  ;;  %v6786_v45 = vsel %vm4453_vm4, %v6754_v15, %v12541_v30  ;;  %v12554_v20 = vpop.permute.xlu1 %12553  ;;  %v5912_v42 = vld [vmem:[#allocation3 + $0x1a0] sm:$0xff] }
 0x553   : > { %v12549_v32 = vpop.permute.xlu0 %12548  ;;  %v6914_v53 = vsel %vm4486_vm5, %v6882_v31, %v12545_v57  ;;  %v6818_v5 = vsel %vm4486_vm5, %v6786_v45, %v12546_v27  ;;  %v12556_v21 = vunpack.i.h.bf16 %v12554_v20  ;;  %v12555_v0 = vunpack.i.l.bf16 %v12554_v20 }
 0x554   : > { %v12551_v43 = vunpack.i.h.bf16 %v12549_v32  ;;  %v12550_v62 = vunpack.i.l.bf16 %v12549_v32  ;;  %7185 = vmatprep.mubr.f32.mxu0 %v6914_v53  ;;  %v12867_v31 = vpack.i.bf16 %v16653_v22, %v5912_v42  ;;  %v5829_v32 = vld [vmem:[#allocation3 + $0xa9] sm:$0xff] }
 0x555   : > { %12843 = vrot.lane.b32.xlu1 %v12842_v9, %s13386_s30  ;;  %7186 = vmatmul.mubr.f32.gmra.mrb[114].mxu0 %v6818_v5  ;;  %v5701_v53 = vld [vmem:[#allocation3 + $0x90] sm:$0xff] }
 0x556   : > { %12838 = vrot.lane.b32.xlu0 %v12837_v8, %s13387_s27  ;;  %v6851_v4 = vsel %vm551_vm2, %v5827_v38, %v12550_v62  ;;  %v6755_v12 = vsel %vm551_vm2, %v5699_v17, %v12551_v43  ;;  %v12564_v23 = vpop.permute.xlu1 %12563 }
 0x557   : > { %v12559_v60 = vpop.permute.xlu0 %12558  ;;  %v12566_v61 = vunpack.i.h.bf16 %v12564_v23  ;;  %v12565_v46 = vunpack.i.l.bf16 %v12564_v23  ;;  %v6883_v59 = vsel %vm4453_vm4, %v6851_v4, %v12555_v0  ;;  %v6787_v63 = vsel %vm4453_vm4, %v6755_v12, %v12556_v21 }
 0x558   : > { %v12561_v24 = vunpack.i.h.bf16 %v12559_v60  ;;  %v12560_v55 = vunpack.i.l.bf16 %v12559_v60 }
 0x559   : > { %12853 = vrot.lane.b32.xlu1 %v12852_v3, %s13387_s27  ;;  %v6852_v25 = vsel %vm551_vm2, %v5828_v29, %v12565_v46  ;;  %v6756_v27 = vsel %vm551_vm2, %v5700_v37, %v12566_v61  ;;  %v5830_v3 = vld [vmem:[#allocation3 + $0xb1] sm:$0xff] }
 0x55a   : > { %12848 = vrot.lane.b32.xlu0 %v12847_v36, %s13384_s17  ;;  %v6915_v13 = vsel %vm4486_vm5, %v6883_v59, %v12560_v55  ;;  %v6819_v35 = vsel %vm4486_vm5, %v6787_v63, %v12561_v24  ;;  %v12574_v47 = vpop.permute.xlu1 %12573  ;;  %v5702_v24 = vld [vmem:[#allocation3 + $0x98] sm:$0xff] }
 0x55b   : > { %v12569_v40 = vpop.permute.xlu0 %12568  ;;  %7190 = vmatprep.mubr.f32.mxu0 %v6915_v13  ;;  %v12576_v52 = vunpack.i.h.bf16 %v12574_v47  ;;  %v12575_v10 = vunpack.i.l.bf16 %v12574_v47 }
 0x55c   : > { %v12571_v49 = vunpack.i.h.bf16 %v12569_v40  ;;  %v12570_v41 = vunpack.i.l.bf16 %v12569_v40  ;;  %7191 = vmatmul.mubr.f32.gmra.mrb[116].mxu0 %v6819_v35 }
 0x55d   : > { %12863 = vrot.lane.b32.xlu1 %v12862_v7, %s13384_s17 }
 0x55e   : > { %12858 = vrot.lane.b32.xlu0 %v12857_v28, %s13386_s30  ;;  %v6884_v56 = vsel %vm4453_vm4, %v6852_v25, %v12570_v41  ;;  %v6788_v2 = vsel %vm4453_vm4, %v6756_v27, %v12571_v49  ;;  %v12584_v57 = vpop.permute.xlu1 %12583  ;;  %v5831_v28 = vld [vmem:[#allocation3 + $0xc1] sm:$0xff] }
 0x55f   : > { %v12579_v30 = vpop.permute.xlu0 %12578  ;;  %v6916_v50 = vsel %vm4486_vm5, %v6884_v56, %v12575_v10  ;;  %v6820_v18 = vsel %vm4486_vm5, %v6788_v2, %v12576_v52  ;;  %v12586_v45 = vunpack.i.h.bf16 %v12584_v57  ;;  %v12585_v20 = vunpack.i.l.bf16 %v12584_v57  ;;  %v5703_v52 = vld [vmem:[#allocation3 + $0xa8] sm:$0xff] }
 0x560   : > { %v12581_v14 = vunpack.i.h.bf16 %v12579_v30  ;;  %v12580_v15 = vunpack.i.l.bf16 %v12579_v30  ;;  %7195 = vmatprep.mubr.f32.mxu0 %v6916_v50 }
 0x561   : > { %12873 = vrot.lane.b32.xlu1 %v12872_v19, %s13386_s30  ;;  %7196 = vmatmul.mubr.f32.gmra.mrb[118].mxu0 %v6820_v18 }
 0x562   : > { %12868 = vrot.lane.b32.xlu0 %v12867_v31, %s13387_s27  ;;  %v6853_v9 = vsel %vm551_vm2, %v5829_v32, %v12580_v15  ;;  %v6757_v51 = vsel %vm551_vm2, %v5701_v53, %v12581_v14  ;;  %v12594_v5 = vpop.permute.xlu1 %12593  ;;  %v5832_v31 = vld [vmem:[#allocation3 + $0xc9] sm:$0xff] }
 0x563   : > { %v12589_v43 = vpop.permute.xlu0 %12588  ;;  %v12596_v44 = vunpack.i.h.bf16 %v12594_v5  ;;  %v12595_v17 = vunpack.i.l.bf16 %v12594_v5  ;;  %v6885_v22 = vsel %vm4453_vm4, %v6853_v9, %v12585_v20  ;;  %v6789_v21 = vsel %vm4453_vm4, %v6757_v51, %v12586_v45  ;;  %v5704_v45 = vld [vmem:[#allocation3 + $0xb0] sm:$0xff] }
 0x564   : > { %v12591_v62 = vunpack.i.h.bf16 %v12589_v43  ;;  %v12590_v8 = vunpack.i.l.bf16 %v12589_v43 }
 0x565   : > { %v6854_v55 = vsel %vm551_vm2, %v5830_v3, %v12595_v17  ;;  %v6758_v36 = vsel %vm551_vm2, %v5702_v24, %v12596_v44 }
 0x566   : > { %v6917_v0 = vsel %vm4486_vm5, %v6885_v22, %v12590_v8  ;;  %v6821_v38 = vsel %vm4486_vm5, %v6789_v21, %v12591_v62  ;;  %v12604_v48 = vpop.permute.xlu1 %12603  ;;  %v5833_v21 = vld [vmem:[#allocation3 + $0xd9] sm:$0xff] }
 0x567   : > { %v12599_v54 = vpop.permute.xlu0 %12598  ;;  %7200 = vmatprep.mubr.f32.mxu0 %v6917_v0  ;;  %v12606_v4 = vunpack.i.h.bf16 %v12604_v48  ;;  %v12605_v12 = vunpack.i.l.bf16 %v12604_v48  ;;  %v5705_v0 = vld [vmem:[#allocation3 + $0xc0] sm:$0xff] }
 0x568   : > { %v12601_v23 = vunpack.i.h.bf16 %v12599_v54  ;;  %v12600_v60 = vunpack.i.l.bf16 %v12599_v54  ;;  %7201 = vmatmul.mubr.f32.gmra.mrb[120].mxu0 %v6821_v38  ;;  %v7622_v54 = vld [vmem:[%s18287_s12] sm:$0xff] }
 0x56a   : > { %v6886_v26 = vsel %vm4453_vm4, %v6854_v55, %v12600_v60  ;;  %v6790_v61 = vsel %vm4453_vm4, %v6758_v36, %v12601_v23  ;;  %v12614_v46 = vpop.permute.xlu1 %12613 }
 0x56b   : > { %v12609_v59 = vpop.permute.xlu0 %12608  ;;  %v6918_v63 = vsel %vm4486_vm5, %v6886_v26, %v12605_v12  ;;  %v6822_v13 = vsel %vm4486_vm5, %v6790_v61, %v12606_v4  ;;  %v12616_v40 = vunpack.i.h.bf16 %v12614_v46  ;;  %v12615_v7 = vunpack.i.l.bf16 %v12614_v46  ;;  %v7623_v4 = vld [vmem:[%s18287_s12 + $0x8] sm:$0xff] }
 0x56c   : > { %v12611_v35 = vunpack.i.h.bf16 %v12609_v59  ;;  %v12610_v47 = vunpack.i.l.bf16 %v12609_v59  ;;  %7205 = vmatprep.mubr.f32.mxu0 %v6918_v63  ;;  %v11693_v60 = vpack.c.bf16 %v7623_v4, %v7622_v54  ;;  %v7624_v63 = vld [vmem:[%s18287_s12 + $0x10] sm:$0xff] }
 0x56d   : > { %7206 = vmatmul.mubr.f32.gmra.mrb[122].mxu0 %v6822_v13  ;;  %v7625_v13 = vld [vmem:[%s18287_s12 + $0x18] sm:$0xff]  ;;  %v5708_v54 = vld [vmem:[#allocation3 + $0xe0] sm:$0xff] }
 0x56e   : > { %v6855_v10 = vsel %vm551_vm2, %v5831_v28, %v12610_v47  ;;  %v6759_v49 = vsel %vm551_vm2, %v5703_v52, %v12611_v35  ;;  %v12624_v41 = vpop.permute.xlu1 %12623  ;;  %11694 = vmatprep.subr.bf16.mxu1 %v11693_v60 }
 0x56f   : > { %v12619_v29 = vpop.permute.xlu0 %12618  ;;  %v12626_v25 = vunpack.i.h.bf16 %v12624_v41  ;;  %v12625_v42 = vunpack.i.l.bf16 %v12624_v41  ;;  %v6887_v27 = vsel %vm4453_vm4, %v6855_v10, %v12615_v7  ;;  %v6791_v56 = vsel %vm4453_vm4, %v6759_v49, %v12616_v40  ;;  %11696 = vmatpush3.bf16.msra.mxu1 %v11693_v60  ;;  %v5834_v49 = vld [vmem:[#allocation3 + $0xe1] sm:$0xff] }
 0x570   : > { %v12621_v58 = vunpack.i.h.bf16 %v12619_v29  ;;  %v12620_v37 = vunpack.i.l.bf16 %v12619_v29  ;;  %v11697_v40 = vpack.c.bf16 %v7625_v13, %v7624_v63  ;;  %v5706_v41 = vld [vmem:[#allocation3 + $0xc8] sm:$0xff]  ;;  %v5709_v13 = vld [vmem:[#allocation3 + $0xf0] sm:$0xff] }
 0x571   : > { %v6856_v20 = vsel %vm551_vm2, %v5832_v31, %v12625_v42  ;;  %v6760_v32 = vsel %vm551_vm2, %v5704_v45, %v12626_v25  ;;  %v5837_v63 = vld [vmem:[#allocation3 + $0x109] sm:$0xff] }
 0x572   : > { %v6919_v2 = vsel %vm4486_vm5, %v6887_v27, %v12620_v37  ;;  %v6823_v57 = vsel %vm4486_vm5, %v6791_v56, %v12621_v58  ;;  %v12634_v30 = vpop.permute.xlu1 %12633  ;;  %11698 = vmatprep.subr.bf16.mxu1 %v11697_v40 }
 0x573   : > { %v12629_v50 = vpop.permute.xlu0 %12628  ;;  %7210 = vmatprep.mubr.f32.mxu0 %v6919_v2  ;;  %v12636_v19 = vunpack.i.h.bf16 %v12634_v30  ;;  %v12635_v18 = vunpack.i.l.bf16 %v12634_v30  ;;  %11700 = vmatpush3.bf16.msra.mxu1 %v11697_v40 }
 0x574   : > { %v12631_v14 = vunpack.i.h.bf16 %v12629_v50  ;;  %v12630_v15 = vunpack.i.l.bf16 %v12629_v50  ;;  %7211 = vmatmul.mubr.f32.gmra.mrb[124].mxu0 %v6823_v57 }
 0x576   : > { %v6888_v53 = vsel %vm4453_vm4, %v6856_v20, %v12630_v15  ;;  %v6792_v9 = vsel %vm4453_vm4, %v6760_v32, %v12631_v14  ;;  %v12644_v51 = vpop.permute.xlu1 %12643  ;;  %v5707_v14 = vld [vmem:[#allocation3 + $0xd8] sm:$0xff] }
 0x577   : > { %v12639_v5 = vpop.permute.xlu0 %12638  ;;  %v6920_v43 = vsel %vm4486_vm5, %v6888_v53, %v12635_v18  ;;  %v6824_v62 = vsel %vm4486_vm5, %v6792_v9, %v12636_v19  ;;  %v12646_v17 = vunpack.i.h.bf16 %v12644_v51  ;;  %v12645_v22 = vunpack.i.l.bf16 %v12644_v51  ;;  %v5835_v18 = vld [vmem:[#allocation3 + $0xf1] sm:$0xff] }
 0x578   : > { %v12641_v8 = vunpack.i.h.bf16 %v12639_v5  ;;  %v12640_v44 = vunpack.i.l.bf16 %v12639_v5  ;;  %7215 = vmatprep.mubr.f32.mxu0 %v6920_v43 }
 0x579   : > { %7216 = vmatmul.mubr.f32.gmra.mrb[126].mxu0 %v6824_v62 }
 0x57a   : > { %v6857_v38 = vsel %vm551_vm2, %v5833_v21, %v12640_v44  ;;  %v6761_v48 = vsel %vm551_vm2, %v5705_v0, %v12641_v8  ;;  %v12654_v12 = vpop.permute.xlu1 %12653 }
 0x57b   : > { %v12649_v23 = vpop.permute.xlu0 %12648  ;;  %v12656_v55 = vunpack.i.h.bf16 %v12654_v12  ;;  %v12655_v36 = vunpack.i.l.bf16 %v12654_v12  ;;  %v6889_v26 = vsel %vm4453_vm4, %v6857_v38, %v12645_v22  ;;  %v6793_v61 = vsel %vm4453_vm4, %v6761_v48, %v12646_v17  ;;  %v5836_v48 = vld [vmem:[#allocation3 + $0xf9] sm:$0xff] }
 0x57c   : > { %v12651_v3 = vunpack.i.h.bf16 %v12649_v23  ;;  %v12650_v24 = vunpack.i.l.bf16 %v12649_v23 }
 0x57d   : > { %v6858_v29 = vsel %vm551_vm2, %v5834_v49, %v12655_v36  ;;  %v6762_v58 = vsel %vm551_vm2, %v5706_v41, %v12656_v55 }
 0x57e   : > { %v6921_v46 = vsel %vm4486_vm5, %v6889_v26, %v12650_v24  ;;  %v6825_v59 = vsel %vm4486_vm5, %v6793_v61, %v12651_v3  ;;  %v12664_v35 = vpop.permute.xlu1 %12663 }
 0x57f   : > { %v12659_v47 = vpop.permute.xlu0 %12658  ;;  %7220 = vmatprep.mubr.f32.mxu0 %v6921_v46  ;;  %v12666_v7 = vunpack.i.h.bf16 %v12664_v35  ;;  %v12665_v28 = vunpack.i.l.bf16 %v12664_v35 }
 0x580   : > { %v12661_v52 = vunpack.i.h.bf16 %v12659_v47  ;;  %v12660_v10 = vunpack.i.l.bf16 %v12659_v47  ;;  %7221 = vmatmul.mubr.f32.gmra.mrb[128].mxu0 %v6825_v59 }
 0x582   : > { %v6890_v37 = vsel %vm4453_vm4, %v6858_v29, %v12660_v10  ;;  %v6794_v25 = vsel %vm4453_vm4, %v6762_v58, %v12661_v52  ;;  %v12674_v42 = vpop.permute.xlu1 %12673 }
 0x583   : > { %v12669_v27 = vpop.permute.xlu0 %12668  ;;  %v6922_v56 = vsel %vm4486_vm5, %v6890_v37, %v12665_v28  ;;  %v6826_v2 = vsel %vm4486_vm5, %v6794_v25, %v12666_v7  ;;  %v12676_v50 = vunpack.i.h.bf16 %v12674_v42  ;;  %v12675_v19 = vunpack.i.l.bf16 %v12674_v42 }
 0x584   : > { %v12671_v57 = vunpack.i.h.bf16 %v12669_v27  ;;  %v12670_v30 = vunpack.i.l.bf16 %v12669_v27  ;;  %7225 = vmatprep.mubr.f32.mxu0 %v6922_v56 }
 0x585   : > { %7226 = vmatmul.mubr.f32.gmra.mrb[130].mxu0 %v6826_v2 }
 0x586   : > { %v6859_v15 = vsel %vm551_vm2, %v5835_v18, %v12670_v30  ;;  %v6763_v31 = vsel %vm551_vm2, %v5707_v14, %v12671_v57  ;;  %v12684_v45 = vpop.permute.xlu1 %12683  ;;  %v5838_v30 = vld [vmem:[#allocation3 + $0x111] sm:$0xff] }
 0x587   : > { %v12679_v20 = vpop.permute.xlu0 %12678  ;;  %v12686_v9 = vunpack.i.h.bf16 %v12684_v45  ;;  %v12685_v51 = vunpack.i.l.bf16 %v12684_v45  ;;  %v6891_v5 = vsel %vm4453_vm4, %v6859_v15, %v12675_v19  ;;  %v6795_v43 = vsel %vm4453_vm4, %v6763_v31, %v12676_v50  ;;  %v5710_v50 = vld [vmem:[#allocation3 + $0xf8] sm:$0xff] }
 0x588   : > { %v12681_v32 = vunpack.i.h.bf16 %v12679_v20  ;;  %v12680_v53 = vunpack.i.l.bf16 %v12679_v20 }
 0x589   : > { %v6860_v4 = vsel %vm551_vm2, %v5836_v48, %v12685_v51  ;;  %v6764_v12 = vsel %vm551_vm2, %v5708_v54, %v12686_v9 }
 0x58a   : > { %v6923_v62 = vsel %vm4486_vm5, %v6891_v5, %v12680_v53  ;;  %v6827_v8 = vsel %vm4486_vm5, %v6795_v43, %v12681_v32  ;;  %v12694_v44 = vpop.permute.xlu1 %12693  ;;  %v5839_v43 = vld [vmem:[#allocation3 + $0x121] sm:$0xff] }
 0x58b   : > { %v12689_v17 = vpop.permute.xlu0 %12688  ;;  %7230 = vmatprep.mubr.f32.mxu0 %v6923_v62  ;;  %v12696_v22 = vunpack.i.h.bf16 %v12694_v44  ;;  %v12695_v21 = vunpack.i.l.bf16 %v12694_v44  ;;  %v5711_v62 = vld [vmem:[#allocation3 + $0x108] sm:$0xff] }
 0x58c   : > { %v12691_v0 = vunpack.i.h.bf16 %v12689_v17  ;;  %v12690_v38 = vunpack.i.l.bf16 %v12689_v17  ;;  %7231 = vmatmul.mubr.f32.gmra.mrb[132].mxu0 %v6827_v8 }
 0x58e   : > { %v6892_v23 = vsel %vm4453_vm4, %v6860_v4, %v12690_v38  ;;  %v6796_v60 = vsel %vm4453_vm4, %v6764_v12, %v12691_v0  ;;  %v12704_v3 = vpop.permute.xlu1 %12703 }
 0x58f   : > { %v12699_v24 = vpop.permute.xlu0 %12698  ;;  %v6924_v55 = vsel %vm4486_vm5, %v6892_v23, %v12695_v21  ;;  %v6828_v36 = vsel %vm4486_vm5, %v6796_v60, %v12696_v22  ;;  %v12706_v46 = vunpack.i.h.bf16 %v12704_v3  ;;  %v12705_v59 = vunpack.i.l.bf16 %v12704_v3 }
 0x590   : > { %v12701_v26 = vunpack.i.h.bf16 %v12699_v24  ;;  %v12700_v61 = vunpack.i.l.bf16 %v12699_v24  ;;  %7235 = vmatprep.mubr.f32.mxu0 %v6924_v55 }
 0x591   : > { %7236 = vmatmul.mubr.f32.gmra.mrb[134].mxu0 %v6828_v36 }
 0x592   : > { %v6861_v47 = vsel %vm551_vm2, %v5837_v63, %v12700_v61  ;;  %v6765_v40 = vsel %vm551_vm2, %v5709_v13, %v12701_v26  ;;  %v5840_v61 = vld [vmem:[#allocation3 + $0x129] sm:$0xff] }
 0x593   : > { %v12714_v35 = vpop.permute.xlu1 %12713  ;;  %v12709_v7 = vpop.permute.xlu0 %12708  ;;  %v6893_v41 = vsel %vm4453_vm4, %v6861_v47, %v12705_v59  ;;  %v6797_v29 = vsel %vm4453_vm4, %v6765_v40, %v12706_v46  ;;  %v5712_v46 = vld [vmem:[#allocation3 + $0x110] sm:$0xff] }
 0x594   : > { %v12711_v28 = vunpack.i.h.bf16 %v12709_v7  ;;  %v12710_v52 = vunpack.i.l.bf16 %v12709_v7  ;;  %v12716_v10 = vunpack.i.h.bf16 %v12714_v35  ;;  %v12715_v49 = vunpack.i.l.bf16 %v12714_v35 }
 0x596   : > { %v6925_v37 = vsel %vm4486_vm5, %v6893_v41, %v12710_v52  ;;  %v6829_v25 = vsel %vm4486_vm5, %v6797_v29, %v12711_v28  ;;  %v6862_v19 = vsel %vm551_vm2, %v5838_v30, %v12715_v49  ;;  %v6766_v18 = vsel %vm551_vm2, %v5710_v50, %v12716_v10  ;;  %v5841_v29 = vld [vmem:[#allocation3 + $0x139] sm:$0xff] }
 0x597   : > { %v12724_v58 = vpop.permute.xlu1 %12723  ;;  %7240 = vmatprep.mubr.f32.mxu0 %v6925_v37 }
 0x598   : > { %v12726_v42 = vunpack.i.h.bf16 %v12724_v58  ;;  %v12725_v27 = vunpack.i.l.bf16 %v12724_v58  ;;  %v12719_v56 = vpop.permute.xlu0 %12718  ;;  %7241 = vmatmul.mubr.f32.gmra.mrb[136].mxu0 %v6829_v25  ;;  %v5713_v58 = vld [vmem:[#allocation3 + $0x120] sm:$0xff] }
 0x599   : > { %v12721_v2 = vunpack.i.h.bf16 %v12719_v56  ;;  %v12720_v57 = vunpack.i.l.bf16 %v12719_v56 }
 0x59b   : > { %v12734_v14 = vpop.permute.xlu1 %12733  ;;  %v6894_v15 = vsel %vm4453_vm4, %v6862_v19, %v12720_v57  ;;  %v6798_v31 = vsel %vm4453_vm4, %v6766_v18, %v12721_v2 }
 0x59c   : > { %v12729_v45 = vpop.permute.xlu0 %12728  ;;  %v6926_v20 = vsel %vm4486_vm5, %v6894_v15, %v12725_v27  ;;  %v6830_v32 = vsel %vm4486_vm5, %v6798_v31, %v12726_v42  ;;  %v12736_v51 = vunpack.i.h.bf16 %v12734_v14  ;;  %v12735_v5 = vunpack.i.l.bf16 %v12734_v14 }
 0x59d   : > { %v12731_v53 = vunpack.i.h.bf16 %v12729_v45  ;;  %v12730_v9 = vunpack.i.l.bf16 %v12729_v45  ;;  %7245 = vmatprep.mubr.f32.mxu0 %v6926_v20 }
 0x59e   : > { %7246 = vmatmul.mubr.f32.gmra.mrb[138].mxu0 %v6830_v32 }
 0x59f   : > { %v12744_v8 = vpop.permute.xlu1 %12743  ;;  %v6863_v44 = vsel %vm551_vm2, %v5839_v43, %v12730_v9  ;;  %v6767_v17 = vsel %vm551_vm2, %v5711_v62, %v12731_v53  ;;  %v5842_v9 = vld [vmem:[#allocation3 + $0x141] sm:$0xff] }
 0x5a0   : > { %v12739_v22 = vpop.permute.xlu0 %12738  ;;  %v12746_v38 = vunpack.i.h.bf16 %v12744_v8  ;;  %v12745_v48 = vunpack.i.l.bf16 %v12744_v8  ;;  %v6895_v54 = vsel %vm4453_vm4, %v6863_v44, %v12735_v5  ;;  %v6799_v4 = vsel %vm4453_vm4, %v6767_v17, %v12736_v51  ;;  %v5714_v51 = vld [vmem:[#allocation3 + $0x128] sm:$0xff] }
 0x5a1   : > { %v12741_v21 = vunpack.i.h.bf16 %v12739_v22  ;;  %v12740_v0 = vunpack.i.l.bf16 %v12739_v22 }
 0x5a2   : > { %v6864_v59 = vsel %vm551_vm2, %v5840_v61, %v12745_v48  ;;  %v6768_v63 = vsel %vm551_vm2, %v5712_v46, %v12746_v38 }
 0x5a3   : > { %v12754_v12 = vpop.permute.xlu1 %12753  ;;  %v6927_v23 = vsel %vm4486_vm5, %v6895_v54, %v12740_v0  ;;  %v6831_v60 = vsel %vm4486_vm5, %v6799_v4, %v12741_v21  ;;  %v5715_v4 = vld [vmem:[#allocation3 + $0x138] sm:$0xff] }
 0x5a4   : > { %v12756_v3 = vunpack.i.h.bf16 %v12754_v12  ;;  %v12755_v24 = vunpack.i.l.bf16 %v12754_v12  ;;  %v12749_v55 = vpop.permute.xlu0 %12748  ;;  %7250 = vmatprep.mubr.f32.mxu0 %v6927_v23 }
 0x5a5   : > { %v12751_v36 = vunpack.i.h.bf16 %v12749_v55  ;;  %v12750_v26 = vunpack.i.l.bf16 %v12749_v55  ;;  %7251 = vmatmul.mubr.f32.gmra.mrb[140].mxu0 %v6831_v60 }
 0x5a7   : > { %v12764_v13 = vpop.permute.xlu1 %12763  ;;  %v6896_v35 = vsel %vm4453_vm4, %v6864_v59, %v12750_v26  ;;  %v6800_v47 = vsel %vm4453_vm4, %v6768_v63, %v12751_v36 }
 0x5a8   : > { %v12759_v40 = vpop.permute.xlu0 %12758  ;;  %v6928_v7 = vsel %vm4486_vm5, %v6896_v35, %v12755_v24  ;;  %v6832_v28 = vsel %vm4486_vm5, %v6800_v47, %v12756_v3  ;;  %v12766_v49 = vunpack.i.h.bf16 %v12764_v13  ;;  %v12765_v41 = vunpack.i.l.bf16 %v12764_v13 }
 0x5a9   : > { %v12761_v52 = vunpack.i.h.bf16 %v12759_v40  ;;  %v12760_v10 = vunpack.i.l.bf16 %v12759_v40  ;;  %7255 = vmatprep.mubr.f32.mxu0 %v6928_v7 }
 0x5aa   : > { %7256 = vmatmul.mubr.f32.gmra.mrb[142].mxu0 %v6832_v28  ;;  %v5716_v28 = vld [vmem:[#allocation3 + $0x140] sm:$0xff] }
 0x5ab   : > { %v12774_v37 = vpop.permute.xlu1 %12773  ;;  %v6865_v25 = vsel %vm551_vm2, %v5841_v29, %v12760_v10  ;;  %v6769_v42 = vsel %vm551_vm2, %v5713_v58, %v12761_v52 }
 0x5ac   : > { %v12769_v27 = vpop.permute.xlu0 %12768  ;;  %v12776_v57 = vunpack.i.h.bf16 %v12774_v37  ;;  %v12775_v30 = vunpack.i.l.bf16 %v12774_v37  ;;  %v6897_v50 = vsel %vm4453_vm4, %v6865_v25, %v12765_v41  ;;  %v6801_v19 = vsel %vm4453_vm4, %v6769_v42, %v12766_v49 }
 0x5ad   : > { %v12771_v56 = vunpack.i.h.bf16 %v12769_v27  ;;  %v12770_v2 = vunpack.i.l.bf16 %v12769_v27 }
 0x5ae   : > { %v6866_v5 = vsel %vm551_vm2, %v5842_v9, %v12775_v30  ;;  %v6770_v43 = vsel %vm551_vm2, %v5714_v51, %v12776_v57 }
 0x5af   : > { %v12784_v18 = vpop.permute.xlu1 %12783  ;;  %v6929_v14 = vsel %vm4486_vm5, %v6897_v50, %v12770_v2  ;;  %v6833_v15 = vsel %vm4486_vm5, %v6801_v19, %v12771_v56 }
 0x5b0   : > { %v12786_v31 = vunpack.i.h.bf16 %v12784_v18  ;;  %v12785_v45 = vunpack.i.l.bf16 %v12784_v18  ;;  %v12779_v20 = vpop.permute.xlu0 %12778  ;;  %7260 = vmatprep.mubr.f32.mxu0 %v6929_v14 }
 0x5b1   : > { %v12781_v32 = vunpack.i.h.bf16 %v12779_v20  ;;  %v12780_v53 = vunpack.i.l.bf16 %v12779_v20  ;;  %7261 = vmatmul.mubr.f32.gmra.mrb[144].mxu0 %v6833_v15  ;;  %v9259_v20 = vld [vmem:[%s18282_s7] sm:$0xff] }
 0x5b3   : > { %v12794_v62 = vpop.permute.xlu1 %12793  ;;  %v6898_v8 = vsel %vm4453_vm4, %v6866_v5, %v12780_v53  ;;  %v6802_v44 = vsel %vm4453_vm4, %v6770_v43, %v12781_v32  ;;  %v9260_v32 = vld [vmem:[%s18282_s7 + $0x8] sm:$0xff] }
 0x5b4   : > { %v12789_v17 = vpop.permute.xlu0 %12788  ;;  %v6930_v22 = vsel %vm4486_vm5, %v6898_v8, %v12785_v45  ;;  %v6834_v21 = vsel %vm4486_vm5, %v6802_v44, %v12786_v31  ;;  %v12796_v48 = vunpack.i.h.bf16 %v12794_v62  ;;  %v12795_v54 = vunpack.i.l.bf16 %v12794_v62 }
 0x5b5   : > { %v12791_v0 = vunpack.i.h.bf16 %v12789_v17  ;;  %v12790_v38 = vunpack.i.l.bf16 %v12789_v17  ;;  %7265 = vmatprep.mubr.f32.mxu0 %v6930_v22  ;;  %v11702_v5 = vpack.c.bf16 %v9260_v32, %v9259_v20 }
 0x5b6   : > { %7266 = vmatmul.mubr.f32.gmra.mrb[146].mxu0 %v6834_v21 }
 0x5b7   : > { %v12804_v12 = vpop.permute.xlu1 %12803  ;;  %v6867_v23 = vsel %vm551_vm2, %v16718_v1, %v12790_v38  ;;  %v6771_v60 = vsel %vm551_vm2, %v5715_v4, %v12791_v0  ;;  %11703 = vmatpush1.bf16.msra.mxu0 %v11702_v5 }
 0x5b8   : > { %v12799_v3 = vpop.permute.xlu0 %12798  ;;  %v12806_v36 = vunpack.i.h.bf16 %v12804_v12  ;;  %v12805_v26 = vunpack.i.l.bf16 %v12804_v12  ;;  %v6899_v61 = vsel %vm4453_vm4, %v6867_v23, %v12795_v54  ;;  %v6803_v46 = vsel %vm4453_vm4, %v6771_v60, %v12796_v48  ;;  %v5718_v48 = vld [vmem:[#allocation3 + $0x158] sm:$0xff]  ;;  %11704 = vmatprep.subr.bf16.mxu0 %v13385_v16 }
 0x5b9   : > { %v12801_v24 = vunpack.i.h.bf16 %v12799_v3  ;;  %v12800_v55 = vunpack.i.l.bf16 %v12799_v3 }
 0x5ba   : > { %v6868_v52 = vsel %vm551_vm2, %v16732_v33, %v12805_v26  ;;  %v6772_v10 = vsel %vm551_vm2, %v5716_v28, %v12806_v36  ;;  %v5717_v33 = vld [vmem:[#allocation3 + $0x150] sm:$0xff] }
 0x5bb   : > { %v12814_v59 = vpop.permute.xlu1 %12813  ;;  %v6931_v63 = vsel %vm4486_vm5, %v6899_v61, %v12800_v55  ;;  %v6835_v13 = vsel %vm4486_vm5, %v6803_v46, %v12801_v24 }
 0x5bc   : > { %v12816_v35 = vunpack.i.h.bf16 %v12814_v59  ;;  %v12815_v47 = vunpack.i.l.bf16 %v12814_v59  ;;  %v12809_v40 = vpop.permute.xlu0 %12808  ;;  %7270 = vmatprep.mubr.f32.mxu0 %v6931_v63 }
 0x5bd   : > { %v12811_v1 = vunpack.i.h.bf16 %v12809_v40  ;;  %v12810_v7 = vunpack.i.l.bf16 %v12809_v40  ;;  %7271 = vmatmul.mubr.f32.gmra.mrb[148].mxu0 %v6835_v13  ;;  %v5719_v13 = vld [vmem:[#allocation3 + $0x168] sm:$0xff] }
 0x5bf   : > { %v12824_v49 = vpop.permute.xlu1 %12823  ;;  %v6900_v41 = vsel %vm4453_vm4, %v6868_v52, %v12810_v7  ;;  %v6804_v29 = vsel %vm4453_vm4, %v6772_v10, %v12811_v1 }
 0x5c0   : > { %v12819_v58 = vpop.permute.xlu0 %12818  ;;  %v6932_v37 = vsel %vm4486_vm5, %v6900_v41, %v12815_v47  ;;  %v6836_v25 = vsel %vm4486_vm5, %v6804_v29, %v12816_v35  ;;  %v12826_v56 = vunpack.i.h.bf16 %v12824_v49  ;;  %v12825_v2 = vunpack.i.l.bf16 %v12824_v49  ;;  %v9261_v49 = vld [vmem:[%s18282_s7 + $0x10] sm:$0xff]  ;;  %v9262_v41 = vld [vmem:[%s18282_s7 + $0x18] sm:$0xff] }
 0x5c1   : > { %v12821_v42 = vunpack.i.h.bf16 %v12819_v58  ;;  %v12820_v27 = vunpack.i.l.bf16 %v12819_v58  ;;  %7275 = vmatprep.mubr.f32.mxu0 %v6932_v37 }
 0x5c2   : > { %7276 = vmatmul.mubr.f32.gmra.mrb[150].mxu0 %v6836_v25  ;;  %v16964_v57 = vpop.f32.mrb[64].mxu1  ;;  %v11705_v25 = vpack.c.bf16 %v9262_v41, %v9261_v49 }
 0x5c3   : > { %v12834_v30 = vpop.permute.xlu1 %12833  ;;  %v16966_v50 = vpop.f32.mrb[65].mxu1  ;;  %v6869_v19 = vsel %vm551_vm2, %v16756_v6, %v12820_v27  ;;  %v6773_v18 = vsel %vm551_vm2, %v5717_v33, %v12821_v42 }
 0x5c4   : > { %v12829_v14 = vpop.permute.xlu0 %12828  ;;  %v12836_v15 = vunpack.i.h.bf16 %v12834_v30  ;;  %v12835_v53 = vunpack.i.l.bf16 %v12834_v30  ;;  %v6901_v9 = vsel %vm4453_vm4, %v6869_v19, %v12825_v2  ;;  %v6805_v6 = vsel %vm4453_vm4, %v6773_v18, %v12826_v56  ;;  %11706 = vmatpush1.bf16.msra.mxu0 %v11705_v25 }
 0x5c5   : > { %v12831_v31 = vunpack.i.h.bf16 %v12829_v14  ;;  %v12830_v45 = vunpack.i.l.bf16 %v12829_v14  ;;  %11707 = vmatprep.subr.bf16.mxu0 %v13385_v16 }
 0x5c6   : > { %v16978_v51 = vpop.f32.mrb[66].mxu1  ;;  %v6870_v4 = vsel %vm551_vm2, %v16770_v11, %v12835_v53  ;;  %v6774_v12 = vsel %vm551_vm2, %v5718_v48, %v12836_v15  ;;  %v5720_v15 = vld [vmem:[#allocation3 + $0x170] sm:$0xff]  ;;  %v9268_v48 = vld [vmem:[%s18282_s7 + $0x48] sm:$0xff] }
 0x5c7   : > { %v12844_v43 = vpop.permute.xlu1 %12843  ;;  %v6933_v62 = vsel %vm4486_vm5, %v6901_v9, %v12830_v45  ;;  %v6837_v8 = vsel %vm4486_vm5, %v6805_v6, %v12831_v31  ;;  %v16983_v44 = vpop.f32.mrb[67].mxu1  ;;  %v9263_v31 = vld [vmem:[%s18282_s7 + $0x20] sm:$0xff]  ;;  %v9264_v45 = vld [vmem:[%s18282_s7 + $0x28] sm:$0xff] }
 0x5c8   : > { %v12846_v17 = vunpack.i.h.bf16 %v12844_v43  ;;  %v12845_v22 = vunpack.i.l.bf16 %v12844_v43  ;;  %v12839_v21 = vpop.permute.xlu0 %12838  ;;  %7280 = vmatprep.mubr.f32.mxu0 %v6933_v62  ;;  %v11708_v9 = vpack.c.bf16 %v9264_v45, %v9263_v31 }
 0x5c9   : > { %v12841_v0 = vunpack.i.h.bf16 %v12839_v21  ;;  %v12840_v38 = vunpack.i.l.bf16 %v12839_v21  ;;  %7281 = vmatmul.mubr.f32.gmra.mrb[152].mxu0 %v6837_v8 }
 0x5ca   : > { %v16986_v54 = vpop.f32.mrb[68].mxu1  ;;  %11709 = vmatpush1.bf16.msra.mxu0 %v11708_v9 }
 0x5cb   : > { %v12854_v23 = vpop.permute.xlu1 %12853  ;;  %v6902_v60 = vsel %vm4453_vm4, %v6870_v4, %v12840_v38  ;;  %v16992_v3 = vpop.f32.mrb[69].mxu1  ;;  %v6806_v24 = vsel %vm4453_vm4, %v6774_v12, %v12841_v0  ;;  %11710 = vmatprep.subr.bf16.mxu0 %v13385_v16  ;;  %v9267_v38 = vld [vmem:[%s18282_s7 + $0x40] sm:$0xff] }
 0x5cc   : > { %v12849_v55 = vpop.permute.xlu0 %12848  ;;  %v6934_v36 = vsel %vm4486_vm5, %v6902_v60, %v12845_v22  ;;  %v6838_v26 = vsel %vm4486_vm5, %v6806_v24, %v12846_v17  ;;  %v12856_v59 = vunpack.i.h.bf16 %v12854_v23  ;;  %v12855_v63 = vunpack.i.l.bf16 %v12854_v23  ;;  %v9265_v17 = vld [vmem:[%s18282_s7 + $0x30] sm:$0xff]  ;;  %v9270_v24 = vld [vmem:[%s18282_s7 + $0x58] sm:$0xff] }
 0x5cd   : > { %v12851_v61 = vunpack.i.h.bf16 %v12849_v55  ;;  %v12850_v46 = vunpack.i.l.bf16 %v12849_v55  ;;  %7285 = vmatprep.mubr.f32.mxu0 %v6934_v36  ;;  %v11714_v12 = vpack.c.bf16 %v9268_v48, %v9267_v38  ;;  %v9269_v60 = vld [vmem:[%s18282_s7 + $0x50] sm:$0xff] }
 0x5ce   : > { %7286 = vmatmul.mubr.f32.gmra.mrb[154].mxu0 %v6838_v26  ;;  %v16997_v11 = vpop.f32.mrb[70].mxu1  ;;  %v11717_v36 = vpack.c.bf16 %v9270_v24, %v9269_v60 }
 0x5cf   : > { %v12864_v35 = vpop.permute.xlu1 %12863  ;;  %v16999_v47 = vpop.f32.mrb[71].mxu1  ;;  %v6871_v40 = vsel %vm551_vm2, %v16796_v34, %v12850_v46  ;;  %v6775_v1 = vsel %vm551_vm2, %v5719_v13, %v12851_v61  ;;  %v9271_v61 = vld [vmem:[%s18282_s7 + $0x60] sm:$0xff]  ;;  %v9272_v46 = vld [vmem:[%s18282_s7 + $0x68] sm:$0xff] }
 0x5d0   : > { %v12859_v7 = vpop.permute.xlu0 %12858  ;;  %v12866_v28 = vunpack.i.h.bf16 %v12864_v35  ;;  %v12865_v29 = vunpack.i.l.bf16 %v12864_v35  ;;  %v6903_v58 = vsel %vm4453_vm4, %v6871_v40, %v12855_v63  ;;  %v6807_v34 = vsel %vm4453_vm4, %v6775_v1, %v12856_v59  ;;  %v9273_v35 = vld [vmem:[%s18282_s7 + $0x70] sm:$0xff]  ;;  %v9274_v40 = vld [vmem:[%s18282_s7 + $0x78] sm:$0xff] }
 0x5d1   : > { %v12861_v52 = vunpack.i.h.bf16 %v12859_v7  ;;  %v12860_v10 = vunpack.i.l.bf16 %v12859_v7  ;;  %v11720_v59 = vpack.c.bf16 %v9272_v46, %v9271_v61  ;;  %v11723_v7 = vpack.c.bf16 %v9274_v40, %v9273_v35  ;;  %v9286_v35 = vld [vmem:[%s18282_s7 + $0xd8] sm:$0xff] }
 0x5d2   : > { %v17011_v37 = vpop.f32.mrb[72].mxu1  ;;  %v6872_v32 = vsel %vm551_vm2, %v16808_v39, %v12865_v29  ;;  %v6776_v53 = vsel %vm551_vm2, %v5720_v15, %v12866_v28  ;;  %v9266_v39 = vld [vmem:[%s18282_s7 + $0x38] sm:$0xff] }
 0x5d3   : > { %v12874_v42 = vpop.permute.xlu1 %12873  ;;  %v6935_v27 = vsel %vm4486_vm5, %v6903_v58, %v12860_v10  ;;  %v6839_v56 = vsel %vm4486_vm5, %v6807_v34, %v12861_v52  ;;  %v17016_v2 = vpop.f32.mrb[73].mxu1  ;;  %v11711_v22 = vpack.c.bf16 %v9266_v39, %v9265_v17  ;;  %v9275_v52 = vld [vmem:[%s18282_s7 + $0x80] sm:$0xff]  ;;  %v9276_v10 = vld [vmem:[%s18282_s7 + $0x88] sm:$0xff]  ;;  %v9277_v58 = vld [vmem:[%s18282_s7 + $0x90] sm:$0xff] }
 0x5d4   : > { %v12876_v33 = vunpack.i.h.bf16 %v12874_v42  ;;  %v12875_v30 = vunpack.i.l.bf16 %v12874_v42  ;;  %v12869_v19 = vpop.permute.xlu0 %12868  ;;  %7290 = vmatprep.mubr.f32.mxu0 %v6935_v27  ;;  %v11726_v41 = vpack.c.bf16 %v9276_v10, %v9275_v52  ;;  %v9278_v34 = vld [vmem:[%s18282_s7 + $0x98] sm:$0xff]  ;;  %v17114_v42 = vld [vmem:[%s18281_s6] ss:$0 sm:$0xff] }
 0x5d5   : > { %v12871_v18 = vunpack.i.h.bf16 %v12869_v19  ;;  %v12870_v14 = vunpack.i.l.bf16 %v12869_v19  ;;  %7291 = vmatmul.mubr.f32.gmra.mrb[156].mxu0 %v6839_v56  ;;  %v11729_v27 = vpack.c.bf16 %v9278_v34, %v9277_v58  ;;  %v8044_v10 = vld [vmem:[#allocation3 + $0x9] sm:$0xff] }
 0x5d6   : > { %v17025_v20 = vpop.f32.mrb[74].mxu1  ;;  %11712 = vmatpush1.bf16.msra.mxu0 %v11711_v22 }
 0x5d7   : > { %v6904_v6 = vsel %vm4453_vm4, %v6872_v32, %v12870_v14  ;;  %v17031_v5 = vpop.f32.mrb[75].mxu1  ;;  %v6808_v43 = vsel %vm4453_vm4, %v6776_v53, %v12871_v18  ;;  %11713 = vmatprep.subr.bf16.mxu0 %v13385_v16  ;;  %v9279_v18 = vld [vmem:[%s18282_s7 + $0xa0] sm:$0xff]  ;;  %v9280_v14 = vld [vmem:[%s18282_s7 + $0xa8] sm:$0xff] }
 0x5d8   : > { %v6936_v62 = vsel %vm4486_vm5, %v6904_v6, %v12875_v30  ;;  %v6840_v8 = vsel %vm4486_vm5, %v6808_v43, %v12876_v33  ;;  %v11732_v31 = vpack.c.bf16 %v9280_v14, %v9279_v18 }
 0x5d9   : > { %7295 = vmatprep.mubr.f32.mxu0 %v6936_v62  ;;  %v9281_v62 = vld [vmem:[%s18282_s7 + $0xb0] sm:$0xff] }
 0x5da   : > { %7296 = vmatmul.mubr.f32.gmra.mrb[158].mxu0 %v6840_v8  ;;  %v17043_v21 = vpop.f32.mrb[76].mxu1  ;;  %v9282_v8 = vld [vmem:[%s18282_s7 + $0xb8] sm:$0xff] }
 0x5db   : > { %v17045_v0 = vpop.f32.mrb[77].mxu1  ;;  %11715 = vmatpush1.bf16.msra.mxu0 %v11714_v12  ;;  %v11735_v17 = vpack.c.bf16 %v9282_v8, %v9281_v62  ;;  %v9283_v12 = vld [vmem:[%s18282_s7 + $0xc0] sm:$0xff] }
 0x5dc   : > { %11716 = vmatprep.subr.bf16.mxu0 %v13385_v16 }
 0x5de   : > { %v17054_v4 = vpop.f32.mrb[78].mxu1 }
 0x5df   : > { %v17056_v23 = vpop.f32.mrb[79].mxu1  ;;  %11718 = vmatpush1.bf16.msra.mxu0 %v11717_v36 }
 0x5e0   : > { %11719 = vmatprep.subr.bf16.mxu0 %v13385_v16 }
 0x5e2   : > { %v17065_v55 = vpop.f32.mrb[80].mxu1 }
 0x5e3   : > { %v17067_v26 = vpop.f32.mrb[81].mxu1  ;;  %11721 = vmatpush1.bf16.msra.mxu0 %v11720_v59  ;;  %v9285_v59 = vld [vmem:[%s18282_s7 + $0xd0] sm:$0xff] }
 0x5e4   : > { %11722 = vmatprep.subr.bf16.mxu0 %v13385_v16  ;;  %v11741_v40 = vpack.c.bf16 %v9286_v35, %v9285_v59  ;;  %v8076_v35 = vld [vmem:[#allocation3 + $0xa] sm:$0xff] }
 0x5e6   : > { %v17076_v63 = vpop.f32.mrb[82].mxu1 }
 0x5e7   : > { %v17078_v13 = vpop.f32.mrb[83].mxu1  ;;  %11724 = vmatpush1.bf16.msra.mxu0 %v11723_v7 }
 0x5e8   : > { %11725 = vmatprep.subr.bf16.mxu0 %v13385_v16 }
 0x5ea   : > { %v17087_v1 = vpop.f32.mrb[84].mxu1 }
 0x5eb   : > { %v17089_v28 = vpop.f32.mrb[85].mxu1  ;;  %11727 = vmatpush1.bf16.msra.mxu0 %v11726_v41  ;;  %v8043_v41 = vld [vmem:[#allocation3 + $0x1] sm:$0xff] }
 0x5ec   : > { %11728 = vmatprep.subr.bf16.mxu0 %v13385_v16 }
 0x5ee   : > { %v17098_v49 = vpop.f32.mrb[86].mxu1 }
 0x5ef   : > { %v17100_v29 = vpop.f32.mrb[87].mxu1  ;;  %11730 = vmatpush1.bf16.msra.mxu0 %v11729_v27 }
 0x5f0   : > { %11731 = vmatprep.subr.bf16.mxu0 %v13385_v16 }
 0x5f2   : > { %v17109_v25 = vpop.f32.mrb[88].mxu1 }
 0x5f3   : > { %v17116_v56 = vpop.f32.mrb[89].mxu1  ;;  %v7142_v33 = vpop.f32.mrb[96].mxu0  ;;  %11733 = vmatpush1.bf16.msra.mxu0 %v11732_v31 }
 0x5f4   : > { %v7143_v30 = vadd.f32 %v17114_v42, %v7142_v33  ;;  %v7144_v19 = vpop.f32.mrb[97].mxu0  ;;  %11734 = vmatprep.subr.bf16.mxu0 %v13385_v16  ;;  %v9287_v33 = vld [vmem:[%s18282_s7 + $0xe0] sm:$0xff] }
 0x5f6   : > { %v17126_v15 = vpop.f32.mrb[90].mxu1  ;;  %v7368_v45 = vadd.f32 %v16966_v50, %v7143_v30  ;;  %v9288_v30 = vld [vmem:[%s18282_s7 + $0xe8] sm:$0xff] }
 0x5f7   : > { %v17129_v32 = vpop.f32.mrb[91].mxu1  ;;  %11736 = vmatpush1.bf16.msra.mxu0 %v11735_v17 }
 0x5f8   : > { %v7147_v53 = vpop.f32.mrb[98].mxu0  ;;  %v7558_v9 = vmul.f32 0.01, %v7368_v45  ;;  %vm7526_vm6 = vcmp.ge.f32.partialorder %v7368_v45, 0.0  ;;  %11737 = vmatprep.subr.bf16.mxu0 %v13385_v16 }
 0x5f9   : > { %v7148_v6 = vadd.f32 %v17114_v42, %v7147_v53  ;;  %v7149_v43 = vpop.f32.mrb[99].mxu0 }
 0x5fa   : > { %v17139_v50 = vpop.f32.mrb[92].mxu1  ;;  %v7590_v38 = vsel %vm7526_vm6, %v7368_v45, %v7558_v9 }
 0x5fb   : > { %v7373_v39 = vadd.f32 %v16964_v57, %v7148_v6  ;;  %v17142_v22 = vpop.f32.mrb[93].mxu1  ;;  %11397 = vmatprep.mubr.msk.f32.mxu1 %vm551_vm2, %v7590_v38  ;;  %7979 = vst.msk [vmem:[#allocation3 + $0x19] sm:$0xff] %vm551_vm2, %v7590_v38  ;;  %v9284_v57 = vld [vmem:[%s18282_s7 + $0xc8] sm:$0xff]  ;;  %v9290_v6 = vld [vmem:[%s18282_s7 + $0xf8] sm:$0xff] }
 0x5fc   : > { %v11738_v60 = vpack.c.bf16 %v9284_v57, %v9283_v12 }
 0x5fd   : > { %vm7527_vm7 = vcmp.ge.f32.partialorder %v7373_v39, 0.0  ;;  %v7559_v48 = vmul.f32 0.01, %v7373_v39 }
 0x5fe   : > { %11739 = vmatpush1.bf16.msra.mxu0 %v11738_v60 }
 0x5ff   : > { %v7591_v24 = vsel %vm7527_vm7, %v7373_v39, %v7559_v48  ;;  %v7152_v36 = vpop.f32.mrb[100].mxu0  ;;  %11740 = vmatprep.subr.bf16.mxu0 %v13385_v16  ;;  %v8075_v39 = vld [vmem:[#allocation3 + $0x2] sm:$0xff] }
 0x600   : > { %7980 = vst.msk [vmem:[#allocation3 + $0x21] sm:$0xff] %vm551_vm2, %v7591_v24  ;;  %11398 = vmatmul.mubr.msk.f32.vlgmr.msra.gmra.mrb[0].mxu1 %vm551_vm2, %v7591_v24  ;;  %v7153_v61 = vadd.f32 %v17114_v42, %v7152_v36  ;;  %v7154_v46 = vpop.f32.mrb[101].mxu0 }
 0x602   : > { %v7378_v7 = vadd.f32 %v16983_v44, %v7153_v61  ;;  %11742 = vmatpush1.bf16.msra.mxu0 %v11741_v40  ;;  %v11744_v44 = vpack.c.bf16 %v9288_v30, %v9287_v33  ;;  %v8107_v12 = vld [vmem:[#allocation3 + $0x18] sm:$0xff] }
 0x603   : > { %11743 = vmatprep.subr.bf16.mxu0 %v13385_v16 }
 0x604   : > { %v7157_v52 = vpop.f32.mrb[102].mxu0  ;;  %v7560_v58 = vmul.f32 0.01, %v7378_v7  ;;  %vm7528_vm3 = vcmp.ge.f32.partialorder %v7378_v7, 0.0 }
 0x605   : > { %v7158_v34 = vadd.f32 %v17114_v42, %v7157_v52  ;;  %v7159_v27 = vpop.f32.mrb[103].mxu0 }
 0x606   : > { %v7592_v18 = vsel %vm7528_vm3, %v7378_v7, %v7560_v58  ;;  %11745 = vmatpush1.bf16.msra.mxu0 %v11744_v44  ;;  %v17207_v44 = vld [vmem:[#allocation3 + $0x19] sm:$0xff] }
 0x607   : > { %v7383_v19 = vadd.f32 %v16978_v51, %v7158_v34  ;;  %v17173_v14 = vld [vmem:[#allocation3 + $0x22] sm:$0xff]  ;;  %v17175_v31 = vld [vmem:[#allocation3 + $0x1a] sm:$0xff]  ;;  %11400 = vmatprep.mubr.msk.f32.mxu1 %vm551_vm2, %v7592_v18  ;;  %7981 = vst.msk [vmem:[#allocation3 + $0x31] sm:$0xff] %vm551_vm2, %v7592_v18  ;;  %11746 = vmatprep.subr.bf16.mxu0 %v13385_v16 }
 0x608   : > { %v12882_v45 = vpack.i.bf16 %v8044_v10, %v17173_v14  ;;  %v12877_v53 = vpack.i.bf16 %v8043_v41, %v17175_v31  ;;  %v9289_v51 = vld [vmem:[%s18282_s7 + $0xf0] sm:$0xff] }
 0x609   : > { %v7561_v9 = vmul.f32 0.01, %v7383_v19  ;;  %vm7529_vm8 = vcmp.ge.f32.partialorder %v7383_v19, 0.0  ;;  %v11747_v43 = vpack.c.bf16 %v9290_v6, %v9289_v51  ;;  %v8108_v7 = vld [vmem:[#allocation3 + $0x20] sm:$0xff] }
 0x60a   : > { %12883 = vrot.lane.b32.xlu1 %v12882_v45, %s13384_s17  ;;  %12878 = vrot.lane.b32.xlu0 %v12877_v53, %s13384_s17  ;;  %v8046_v30 = vld [vmem:[#allocation3 + $0x21] sm:$0xff] }
 0x60b   : > { %v7593_v62 = vsel %vm7529_vm8, %v7383_v19, %v7561_v9  ;;  %v7162_v8 = vpop.f32.mrb[104].mxu0  ;;  %11748 = vmatpush1.bf16.msra.mxu0 %v11747_v43 }
 0x60c   : > { %11401 = vmatmul.mubr.msk.f32.gmra.mrb[2].mxu1 %vm551_vm2, %v7593_v62  ;;  %7982 = vst.msk [vmem:[#allocation3 + $0x39] sm:$0xff] %vm551_vm2, %v7593_v62  ;;  %v7163_v16 = vadd.f32 %v17114_v42, %v7162_v8  ;;  %v7164_v17 = vpop.f32.mrb[105].mxu0 }
 0x60e   : > { %v7388_v38 = vadd.f32 %v16992_v3, %v7163_v16  ;;  %v8203_v48 = vld [vmem:[#allocation3 + $0x30] sm:$0xff] }
 0x60f   : > { %v17194_v57 = vld [vmem:[#allocation3 + $0x31] sm:$0xff]  ;;  %v12887_v24 = vpack.i.bf16 %v8075_v39, %v8203_v48 }
 0x610   : > { %v7167_v60 = vpop.f32.mrb[106].mxu0  ;;  %v12892_v36 = vpack.i.bf16 %v8107_v12, %v17194_v57  ;;  %v7562_v61 = vmul.f32 0.01, %v7388_v38  ;;  %vm7530_vm9 = vcmp.ge.f32.partialorder %v7388_v38, 0.0 }
 0x611   : > { %v7168_v46 = vadd.f32 %v17114_v42, %v7167_v60  ;;  %v7169_v59 = vpop.f32.mrb[107].mxu0  ;;  %12888 = vrot.lane.b32.xlu1 %v12887_v24, %s13387_s27 }
 0x612   : > { %12893 = vrot.lane.b32.xlu0 %v12892_v36, %s13386_s30  ;;  %v7594_v40 = vsel %vm7530_vm9, %v7388_v38, %v7562_v61 }
 0x613   : > { %v7393_v3 = vadd.f32 %v16986_v54, %v7168_v46  ;;  %v8236_v52 = vld [vmem:[#allocation3 + $0x39] sm:$0xff]  ;;  %11403 = vmatprep.mubr.msk.f32.mxu1 %vm551_vm2, %v7594_v40  ;;  %7983 = vst.msk [vmem:[#allocation3 + $0x49] sm:$0xff] %vm551_vm2, %v7594_v40 }
 0x614   : > { %v8204_v10 = vld [vmem:[#allocation3 + $0x38] sm:$0xff]  ;;  %v12902_v41 = vpack.i.bf16 %v8108_v7, %v8236_v52 }
 0x615   : > { %v12897_v58 = vpack.i.bf16 %v8076_v35, %v8204_v10  ;;  %v7563_v34 = vmul.f32 0.01, %v7393_v3  ;;  %vm7531_vm10 = vcmp.ge.f32.partialorder %v7393_v3, 0.0  ;;  %v17203_v27 = vld [vmem:[#allocation3 + $0x3a] sm:$0xff]  ;;  %v8173_v33 = vld [vmem:[#allocation3 + $0x32] sm:$0xff] }
 0x616   : > { %12903 = vrot.lane.b32.xlu1 %v12902_v41, %s13386_s30  ;;  %v12912_v18 = vpack.i.bf16 %v8046_v30, %v17203_v27  ;;  %v12907_v45 = vpack.i.bf16 %v17207_v44, %v8173_v33 }
 0x617   : > { %12898 = vrot.lane.b32.xlu0 %v12897_v58, %s13387_s27  ;;  %v7595_v54 = vsel %vm7531_vm10, %v7393_v3, %v7563_v34  ;;  %v7172_v19 = vpop.f32.mrb[108].mxu0 }
 0x618   : > { %11404 = vmatmul.mubr.msk.f32.gmra.mrb[4].mxu1 %vm551_vm2, %v7595_v54  ;;  %7984 = vst.msk [vmem:[#allocation3 + $0x51] sm:$0xff] %vm551_vm2, %v7595_v54  ;;  %v7173_v53 = vadd.f32 %v17114_v42, %v7172_v19  ;;  %v7174_v9 = vpop.f32.mrb[109].mxu0 }
 0x61a   : > { %12913 = vrot.lane.b32.xlu1 %v12912_v18, %s13384_s17  ;;  %v7398_v51 = vadd.f32 %v16999_v47, %v7173_v53  ;;  %v8205_v6 = vld [vmem:[#allocation3 + $0x48] sm:$0xff] }
 0x61b   : > { %12908 = vrot.lane.b32.xlu0 %v12907_v45, %s13384_s17  ;;  %v17217_v43 = vld [vmem:[#allocation3 + $0x49] sm:$0xff]  ;;  %v12917_v8 = vpack.i.bf16 %v17175_v31, %v8205_v6 }
 0x61c   : > { %v7177_v62 = vpop.f32.mrb[110].mxu0  ;;  %v12922_v16 = vpack.i.bf16 %v8203_v48, %v17217_v43  ;;  %v7564_v17 = vmul.f32 0.01, %v7398_v51  ;;  %vm7532_vm1 = vcmp.ge.f32.partialorder %v7398_v51, 0.0 }
 0x61d   : > { %v7178_v39 = vadd.f32 %v17114_v42, %v7177_v62  ;;  %v7179_v38 = vpop.f32.mrb[111].mxu0 }
 0x61e   : > { %12918 = vrot.lane.b32.xlu1 %v12917_v8, %s13387_s27  ;;  %v7596_v47 = vsel %vm7532_vm1, %v7398_v51, %v7564_v17 }
 0x61f   : > { %12923 = vrot.lane.b32.xlu0 %v12922_v16, %s13386_s30  ;;  %v7403_v12 = vadd.f32 %v16997_v11, %v7178_v39  ;;  %v8238_v60 = vld [vmem:[#allocation3 + $0x51] sm:$0xff]  ;;  %11406 = vmatprep.mubr.msk.f32.mxu1 %vm551_vm2, %v7596_v47  ;;  %7985 = vst.msk [vmem:[#allocation3 + $0x61] sm:$0xff] %vm551_vm2, %v7596_v47 }
 0x620   : > { %v8206_v24 = vld [vmem:[#allocation3 + $0x50] sm:$0xff]  ;;  %v12932_v31 = vpack.i.bf16 %v8204_v10, %v8238_v60 }
 0x621   : > { %v12927_v48 = vpack.i.bf16 %v17173_v14, %v8206_v24  ;;  %v7565_v36 = vmul.f32 0.01, %v7403_v12  ;;  %vm7533_vm11 = vcmp.ge.f32.partialorder %v7403_v12, 0.0  ;;  %v17228_v61 = vld [vmem:[#allocation3 + $0x52] sm:$0xff]  ;;  %v17230_v46 = vld [vmem:[#allocation3 + $0x4a] sm:$0xff] }
 0x622   : > { %12933 = vrot.lane.b32.xlu1 %v12932_v31, %s13386_s30  ;;  %v12942_v14 = vpack.i.bf16 %v8236_v52, %v17228_v61  ;;  %v12937_v40 = vpack.i.bf16 %v17194_v57, %v17230_v46  ;;  %v17249_v57 = vpop.f32.mrb[94].mxu1  ;;  %v9291_v31 = vld [vmem:[%s18282_s7 + $0x100] sm:$0xff] }
 0x623   : > { %12928 = vrot.lane.b32.xlu0 %v12927_v48, %s13387_s27  ;;  %v7182_v11 = vpop.f32.mrb[112].mxu0  ;;  %v7597_v59 = vsel %vm7533_vm11, %v7403_v12, %v7565_v36  ;;  %v17256_v53 = vpop.f32.mrb[95].mxu1 }
 0x624   : > { %v7183_v35 = vadd.f32 %v17114_v42, %v7182_v11  ;;  %v7184_v3 = vpop.f32.mrb[113].mxu0  ;;  %11407 = vmatmul.mubr.msk.f32.gmra.mrb[6].mxu1 %vm551_vm2, %v7597_v59  ;;  %7986 = vst.msk [vmem:[#allocation3 + $0x69] sm:$0xff] %vm551_vm2, %v7597_v59 }
 0x626   : > { %v7408_v7 = vadd.f32 %v17016_v2, %v7183_v35  ;;  %12943 = vrot.lane.b32.xlu1 %v12942_v14, %s13384_s17  ;;  %v8207_v10 = vld [vmem:[#allocation3 + $0x60] sm:$0xff]  ;;  %v9294_v14 = vld [vmem:[%s18282_s7 + $0x118] sm:$0xff] }
 0x627   : > { %12938 = vrot.lane.b32.xlu0 %v12937_v40, %s13384_s17  ;;  %v17243_v41 = vld [vmem:[#allocation3 + $0x61] sm:$0xff]  ;;  %v12947_v54 = vpack.i.bf16 %v8173_v33, %v8207_v10 }
 0x628   : > { %v7566_v58 = vmul.f32 0.01, %v7408_v7  ;;  %v7187_v34 = vpop.f32.mrb[114].mxu0  ;;  %v12952_v30 = vpack.i.bf16 %v8205_v6, %v17243_v41  ;;  %vm7534_vm12 = vcmp.ge.f32.partialorder %v7408_v7, 0.0 }
 0x629   : > { %v7188_v52 = vadd.f32 %v17114_v42, %v7187_v34  ;;  %v7189_v19 = vpop.f32.mrb[115].mxu0 }
 0x62a   : > { %12948 = vrot.lane.b32.xlu1 %v12947_v54, %s13387_s27  ;;  %v7598_v2 = vsel %vm7534_vm12, %v7408_v7, %v7566_v58 }
 0x62b   : > { %12953 = vrot.lane.b32.xlu0 %v12952_v30, %s13386_s30  ;;  %v7413_v18 = vadd.f32 %v17011_v37, %v7188_v52  ;;  %11409 = vmatprep.mubr.msk.f32.mxu1 %vm551_vm2, %v7598_v2  ;;  %7987 = vst.msk [vmem:[#allocation3 + $0x79] sm:$0xff] %vm551_vm2, %v7598_v2  ;;  %v17254_v33 = vld [vmem:[#allocation3 + $0x69] sm:$0xff] }
 0x62c   : > { %v8208_v45 = vld [vmem:[#allocation3 + $0x68] sm:$0xff]  ;;  %v12962_v9 = vpack.i.bf16 %v8206_v24, %v17254_v33 }
 0x62d   : > { %v12957_v51 = vpack.i.bf16 %v17203_v27, %v8208_v45  ;;  %v7567_v6 = vmul.f32 0.01, %v7413_v18  ;;  %vm7535_vm13 = vcmp.ge.f32.partialorder %v7413_v18, 0.0  ;;  %v17260_v62 = vld [vmem:[#allocation3 + $0x6a] sm:$0xff]  ;;  %v17262_v8 = vld [vmem:[#allocation3 + $0x62] sm:$0xff] }
 0x62e   : > { %12963 = vrot.lane.b32.xlu1 %v12962_v9, %s13386_s30  ;;  %v12972_v27 = vpack.i.bf16 %v8238_v60, %v17260_v62  ;;  %v12967_v38 = vpack.i.bf16 %v17217_v43, %v17262_v8  ;;  %v9292_v43 = vld [vmem:[%s18282_s7 + $0x108] sm:$0xff] }
 0x62f   : > { %12958 = vrot.lane.b32.xlu0 %v12957_v51, %s13387_s27  ;;  %v7192_v37 = vpop.f32.mrb[116].mxu0  ;;  %v7599_v16 = vsel %vm7535_vm13, %v7413_v18, %v7567_v6  ;;  %v17285_v11 = vpack.c.bf16 %v9292_v43, %v9291_v31 }
 0x630   : > { %v7193_v17 = vadd.f32 %v17114_v42, %v7192_v37  ;;  %v7194_v39 = vpop.f32.mrb[117].mxu0  ;;  %11410 = vmatmul.mubr.msk.f32.gmra.mrb[8].mxu1 %vm551_vm2, %v7599_v16  ;;  %7988 = vst.msk [vmem:[#allocation3 + $0x81] sm:$0xff] %vm551_vm2, %v7599_v16 }
 0x631   : > { %11765 = vmatprep.subr.bf16.mxu1 %v17285_v11  ;;  %11750 = vmatprep.subr.bf16.mxu0 %v17285_v11 }
 0x632   : > { %v7418_v12 = vadd.f32 %v17031_v5, %v7193_v17  ;;  %12973 = vrot.lane.b32.xlu1 %v12972_v27, %s13384_s17  ;;  %v8209_v47 = vld [vmem:[#allocation3 + $0x78] sm:$0xff]  ;;  %11767 = vmatpush3.bf16.msra.mxu1 %v17285_v11 }
 0x633   : > { %12968 = vrot.lane.b32.xlu0 %v12967_v38, %s13384_s17  ;;  %v17275_v24 = vld [vmem:[#allocation3 + $0x79] sm:$0xff]  ;;  %v12977_v48 = vpack.i.bf16 %v17230_v46, %v8209_v47 }
 0x634   : > { %v12982_v60 = vpack.i.bf16 %v8207_v10, %v17275_v24  ;;  %v7568_v5 = vmul.f32 0.01, %v7418_v12  ;;  %v7197_v36 = vpop.f32.mrb[118].mxu0  ;;  %vm7536_vm14 = vcmp.ge.f32.partialorder %v7418_v12, 0.0  ;;  %v9293_v46 = vld [vmem:[%s18282_s7 + $0x110] sm:$0xff] }
 0x635   : > { %v7198_v59 = vadd.f32 %v17114_v42, %v7197_v36  ;;  %v7199_v35 = vpop.f32.mrb[119].mxu0  ;;  %v17300_v58 = vpack.c.bf16 %v9294_v14, %v9293_v46 }
 0x636   : > { %12978 = vrot.lane.b32.xlu1 %v12977_v48, %s13387_s27  ;;  %v7600_v3 = vsel %vm7536_vm14, %v7418_v12, %v7568_v5 }
 0x637   : > { %12983 = vrot.lane.b32.xlu0 %v12982_v60, %s13386_s30  ;;  %v7423_v40 = vadd.f32 %v17025_v20, %v7198_v59  ;;  %11412 = vmatprep.mubr.msk.f32.mxu1 %vm551_vm2, %v7600_v3  ;;  %7989 = vst.msk [vmem:[#allocation3 + $0x91] sm:$0xff] %vm551_vm2, %v7600_v3  ;;  %v8242_v7 = vld [vmem:[#allocation3 + $0x81] sm:$0xff] }
 0x638   : > { %v8210_v10 = vld [vmem:[#allocation3 + $0x80] sm:$0xff]  ;;  %v12992_v34 = vpack.i.bf16 %v8208_v45, %v8242_v7  ;;  %11766 = vmatprep.subr.bf16.mxu1 %v17300_v58 }
 0x639   : > { %v12987_v54 = vpack.i.bf16 %v17228_v61, %v8210_v10  ;;  %v7569_v30 = vmul.f32 0.01, %v7423_v40  ;;  %vm7537_vm15 = vcmp.ge.f32.partialorder %v7423_v40, 0.0  ;;  %v17305_v20 = vld [vmem:[#allocation3 + $0x82] sm:$0xff]  ;;  %v8179_v52 = vld [vmem:[#allocation3 + $0x7a] sm:$0xff]  ;;  %11768 = vmatpush3.bf16.msra.mxu1 %v17300_v58 }
 0x63a   : > { %12993 = vrot.lane.b32.xlu1 %v12992_v34, %s13386_s30  ;;  %v13002_v45 = vpack.i.bf16 %v17254_v33, %v17305_v20  ;;  %v12997_v9 = vpack.i.bf16 %v17243_v41, %v8179_v52 }
 0x63b   : > { %12988 = vrot.lane.b32.xlu0 %v12987_v54, %s13387_s27  ;;  %v7202_v19 = vpop.f32.mrb[120].mxu0  ;;  %v7601_v2 = vsel %vm7537_vm15, %v7423_v40, %v7569_v30 }
 0x63c   : > { %v7203_v18 = vadd.f32 %v17114_v42, %v7202_v19  ;;  %v7204_v61 = vpop.f32.mrb[121].mxu0  ;;  %11413 = vmatmul.mubr.msk.f32.gmra.mrb[10].mxu1 %vm551_vm2, %v7601_v2  ;;  %7990 = vst.msk [vmem:[#allocation3 + $0x99] sm:$0xff] %vm551_vm2, %v7601_v2 }
 0x63e   : > { %v7428_v51 = vadd.f32 %v17045_v0, %v7203_v18  ;;  %13003 = vrot.lane.b32.xlu1 %v13002_v45, %s13384_s17  ;;  %v8211_v6 = vld [vmem:[#allocation3 + $0x90] sm:$0xff] }
 0x63f   : > { %12998 = vrot.lane.b32.xlu0 %v12997_v9, %s13384_s17  ;;  %v17320_v37 = vld [vmem:[#allocation3 + $0x91] sm:$0xff]  ;;  %v13007_v16 = vpack.i.bf16 %v17262_v8, %v8211_v6 }
 0x640   : > { %v13012_v17 = vpack.i.bf16 %v8209_v47, %v17320_v37  ;;  %v7570_v39 = vmul.f32 0.01, %v7428_v51  ;;  %v7207_v27 = vpop.f32.mrb[122].mxu0  ;;  %vm7538_vm6 = vcmp.ge.f32.partialorder %v7428_v51, 0.0 }
 0x641   : > { %v7208_v41 = vadd.f32 %v17114_v42, %v7207_v27  ;;  %v7209_v33 = vpop.f32.mrb[123].mxu0 }
 0x642   : > { %13008 = vrot.lane.b32.xlu1 %v13007_v16, %s13387_s27  ;;  %v7602_v0 = vsel %vm7538_vm6, %v7428_v51, %v7570_v39 }
 0x643   : > { %13013 = vrot.lane.b32.xlu0 %v13012_v17, %s13386_s30  ;;  %v7433_v38 = vadd.f32 %v17043_v21, %v7208_v41  ;;  %11415 = vmatprep.mubr.msk.f32.mxu1 %vm551_vm2, %v7602_v0  ;;  %7991 = vst.msk [vmem:[#allocation3 + $0xa9] sm:$0xff] %vm551_vm2, %v7602_v0  ;;  %v8244_v8 = vld [vmem:[#allocation3 + $0x99] sm:$0xff] }
 0x644   : > { %v8212_v12 = vld [vmem:[#allocation3 + $0x98] sm:$0xff]  ;;  %v13022_v47 = vpack.i.bf16 %v8210_v10, %v8244_v8 }
 0x645   : > { %v13017_v31 = vpack.i.bf16 %v17260_v62, %v8212_v12  ;;  %v7571_v48 = vmul.f32 0.01, %v7433_v38  ;;  %vm7539_vm7 = vcmp.ge.f32.partialorder %v7433_v38, 0.0  ;;  %v17331_v60 = vld [vmem:[#allocation3 + $0x9a] sm:$0xff]  ;;  %v8181_v43 = vld [vmem:[#allocation3 + $0x92] sm:$0xff] }
 0x646   : > { %13023 = vrot.lane.b32.xlu1 %v13022_v47, %s13386_s30  ;;  %v13032_v62 = vpack.i.bf16 %v8242_v7, %v17331_v60  ;;  %v13027_v35 = vpack.i.bf16 %v17275_v24, %v8181_v43 }
 0x647   : > { %13018 = vrot.lane.b32.xlu0 %v13017_v31, %s13387_s27  ;;  %v7212_v5 = vpop.f32.mrb[124].mxu0  ;;  %v7603_v21 = vsel %vm7539_vm7, %v7433_v38, %v7571_v48 }
 0x648   : > { %v7213_v36 = vadd.f32 %v17114_v42, %v7212_v5  ;;  %v7214_v59 = vpop.f32.mrb[125].mxu0  ;;  %11416 = vmatmul.mubr.msk.f32.gmra.mrb[12].mxu1 %vm551_vm2, %v7603_v21  ;;  %7992 = vst.msk [vmem:[#allocation3 + $0xb1] sm:$0xff] %vm551_vm2, %v7603_v21 }
 0x64a   : > { %v7438_v3 = vadd.f32 %v17056_v23, %v7213_v36  ;;  %13033 = vrot.lane.b32.xlu1 %v13032_v62, %s13384_s17  ;;  %v8213_v46 = vld [vmem:[#allocation3 + $0xa8] sm:$0xff] }
 0x64b   : > { %13028 = vrot.lane.b32.xlu0 %v13027_v35, %s13384_s17  ;;  %v17343_v14 = vld [vmem:[#allocation3 + $0xa9] sm:$0xff]  ;;  %v13037_v40 = vpack.i.bf16 %v8179_v52, %v8213_v46 }
 0x64c   : > { %v13042_v10 = vpack.i.bf16 %v8211_v6, %v17343_v14  ;;  %v7572_v34 = vmul.f32 0.01, %v7438_v3  ;;  %v7217_v54 = vpop.f32.mrb[126].mxu0  ;;  %vm7540_vm3 = vcmp.ge.f32.partialorder %v7438_v3, 0.0 }
 0x64d   : > { %v7218_v30 = vadd.f32 %v17114_v42, %v7217_v54  ;;  %v7219_v7 = vpop.f32.mrb[127].mxu0 }
 0x64e   : > { %13038 = vrot.lane.b32.xlu1 %v13037_v40, %s13387_s27  ;;  %v7604_v23 = vsel %vm7540_vm3, %v7438_v3, %v7572_v34 }
 0x64f   : > { %13043 = vrot.lane.b32.xlu0 %v13042_v10, %s13386_s30  ;;  %v7443_v24 = vadd.f32 %v17054_v4, %v7218_v30  ;;  %11418 = vmatprep.mubr.msk.f32.mxu1 %vm551_vm2, %v7604_v23  ;;  %7993 = vst.msk [vmem:[#allocation3 + $0xc1] sm:$0xff] %vm551_vm2, %v7604_v23  ;;  %v8246_v52 = vld [vmem:[#allocation3 + $0xb1] sm:$0xff] }
 0x650   : > { %v8214_v19 = vld [vmem:[#allocation3 + $0xb0] sm:$0xff]  ;;  %v13052_v2 = vpack.i.bf16 %v8212_v12, %v8246_v52 }
 0x651   : > { %v13047_v18 = vpack.i.bf16 %v17305_v20, %v8214_v19  ;;  %v7573_v61 = vmul.f32 0.01, %v7443_v24  ;;  %vm7541_vm8 = vcmp.ge.f32.partialorder %v7443_v24, 0.0  ;;  %v17353_v45 = vld [vmem:[#allocation3 + $0xb2] sm:$0xff]  ;;  %v8183_v9 = vld [vmem:[#allocation3 + $0xaa] sm:$0xff] }
 0x652   : > { %13053 = vrot.lane.b32.xlu1 %v13052_v2, %s13386_s30  ;;  %v13062_v20 = vpack.i.bf16 %v8244_v8, %v17353_v45  ;;  %v13057_v17 = vpack.i.bf16 %v17320_v37, %v8183_v9 }
 0x653   : > { %13048 = vrot.lane.b32.xlu0 %v13047_v18, %s13387_s27  ;;  %v7222_v51 = vpop.f32.mrb[128].mxu0  ;;  %v7605_v4 = vsel %vm7541_vm8, %v7443_v24, %v7573_v61 }
 0x654   : > { %v7223_v6 = vadd.f32 %v17114_v42, %v7222_v51  ;;  %v7224_v16 = vpop.f32.mrb[129].mxu0  ;;  %11419 = vmatmul.mubr.msk.f32.gmra.mrb[14].mxu1 %vm551_vm2, %v7605_v4  ;;  %7994 = vst.msk [vmem:[#allocation3 + $0xc9] sm:$0xff] %vm551_vm2, %v7605_v4 }
 0x656   : > { %v7448_v39 = vadd.f32 %v17067_v26, %v7223_v6  ;;  %13063 = vrot.lane.b32.xlu1 %v13062_v20, %s13384_s17  ;;  %v8215_v27 = vld [vmem:[#allocation3 + $0xc0] sm:$0xff] }
 0x657   : > { %13058 = vrot.lane.b32.xlu0 %v13057_v17, %s13384_s17  ;;  %v17365_v41 = vld [vmem:[#allocation3 + $0xc1] sm:$0xff]  ;;  %v13067_v33 = vpack.i.bf16 %v8181_v43, %v8215_v27 }
 0x658   : > { %v13072_v0 = vpack.i.bf16 %v8213_v46, %v17365_v41  ;;  %v7574_v38 = vmul.f32 0.01, %v7448_v39  ;;  %v7227_v12 = vpop.f32.mrb[130].mxu0  ;;  %vm7542_vm9 = vcmp.ge.f32.partialorder %v7448_v39, 0.0 }
 0x659   : > { %v7228_v47 = vadd.f32 %v17114_v42, %v7227_v12  ;;  %v7229_v8 = vpop.f32.mrb[131].mxu0 }
 0x65a   : > { %13068 = vrot.lane.b32.xlu1 %v13067_v33, %s13387_s27  ;;  %v7606_v26 = vsel %vm7542_vm9, %v7448_v39, %v7574_v38 }
 0x65b   : > { %13073 = vrot.lane.b32.xlu0 %v13072_v0, %s13386_s30  ;;  %v7453_v37 = vadd.f32 %v17065_v55, %v7228_v47  ;;  %11421 = vmatprep.mubr.msk.f32.mxu1 %vm551_vm2, %v7606_v26  ;;  %7995 = vst.msk [vmem:[#allocation3 + $0xd9] sm:$0xff] %vm551_vm2, %v7606_v26  ;;  %v8248_v31 = vld [vmem:[#allocation3 + $0xc9] sm:$0xff] }
 0x65c   : > { %v8216_v48 = vld [vmem:[#allocation3 + $0xc8] sm:$0xff]  ;;  %v13082_v43 = vpack.i.bf16 %v8214_v19, %v8248_v31 }
 0x65d   : > { %v13077_v5 = vpack.i.bf16 %v17331_v60, %v8216_v48  ;;  %v7575_v21 = vmul.f32 0.01, %v7453_v37  ;;  %vm7543_vm10 = vcmp.ge.f32.partialorder %v7453_v37, 0.0  ;;  %v17375_v36 = vld [vmem:[#allocation3 + $0xca] sm:$0xff]  ;;  %v8185_v59 = vld [vmem:[#allocation3 + $0xc2] sm:$0xff] }
 0x65e   : > { %13083 = vrot.lane.b32.xlu1 %v13082_v43, %s13386_s30  ;;  %v13092_v60 = vpack.i.bf16 %v8246_v52, %v17375_v36  ;;  %v13087_v46 = vpack.i.bf16 %v17343_v14, %v8185_v59 }
 0x65f   : > { %13078 = vrot.lane.b32.xlu0 %v13077_v5, %s13387_s27  ;;  %v7232_v62 = vpop.f32.mrb[132].mxu0  ;;  %v7607_v55 = vsel %vm7543_vm10, %v7453_v37, %v7575_v21 }
 0x660   : > { %v7233_v35 = vadd.f32 %v17114_v42, %v7232_v62  ;;  %v7234_v3 = vpop.f32.mrb[133].mxu0  ;;  %11422 = vmatmul.mubr.msk.f32.gmra.mrb[16].mxu1 %vm551_vm2, %v7607_v55  ;;  %7996 = vst.msk [vmem:[#allocation3 + $0xe1] sm:$0xff] %vm551_vm2, %v7607_v55 }
 0x662   : > { %v7458_v40 = vadd.f32 %v17078_v13, %v7233_v35  ;;  %13093 = vrot.lane.b32.xlu1 %v13092_v60, %s13384_s17  ;;  %v8217_v10 = vld [vmem:[#allocation3 + $0xd8] sm:$0xff] }
 0x663   : > { %13088 = vrot.lane.b32.xlu0 %v13087_v46, %s13384_s17  ;;  %v17387_v34 = vld [vmem:[#allocation3 + $0xd9] sm:$0xff]  ;;  %v13097_v54 = vpack.i.bf16 %v8183_v9, %v8217_v10 }
 0x664   : > { %v13102_v30 = vpack.i.bf16 %v8215_v27, %v17387_v34  ;;  %v7576_v7 = vmul.f32 0.01, %v7458_v40  ;;  %v7237_v23 = vpop.f32.mrb[134].mxu0  ;;  %vm7544_vm1 = vcmp.ge.f32.partialorder %v7458_v40, 0.0 }
 0x665   : > { %v7238_v24 = vadd.f32 %v17114_v42, %v7237_v23  ;;  %v7239_v52 = vpop.f32.mrb[135].mxu0 }
 0x666   : > { %13098 = vrot.lane.b32.xlu1 %v13097_v54, %s13387_s27  ;;  %v7608_v13 = vsel %vm7544_vm1, %v7458_v40, %v7576_v7 }
 0x667   : > { %13103 = vrot.lane.b32.xlu0 %v13102_v30, %s13386_s30  ;;  %v7463_v14 = vadd.f32 %v17076_v63, %v7238_v24  ;;  %11424 = vmatprep.mubr.msk.f32.mxu1 %vm551_vm2, %v7608_v13  ;;  %7997 = vst.msk [vmem:[#allocation3 + $0xf1] sm:$0xff] %vm551_vm2, %v7608_v13  ;;  %v8250_v19 = vld [vmem:[#allocation3 + $0xe1] sm:$0xff] }
 0x668   : > { %v8218_v2 = vld [vmem:[#allocation3 + $0xe0] sm:$0xff]  ;;  %v13112_v18 = vpack.i.bf16 %v8216_v48, %v8250_v19 }
 0x669   : > { %v13107_v61 = vpack.i.bf16 %v17353_v45, %v8218_v2  ;;  %v7577_v9 = vmul.f32 0.01, %v7463_v14  ;;  %vm7545_vm11 = vcmp.ge.f32.partialorder %v7463_v14, 0.0  ;;  %v17397_v51 = vld [vmem:[#allocation3 + $0xe2] sm:$0xff]  ;;  %v17399_v4 = vld [vmem:[#allocation3 + $0xda] sm:$0xff] }
 0x66a   : > { %13113 = vrot.lane.b32.xlu1 %v13112_v18, %s13386_s30  ;;  %v13122_v16 = vpack.i.bf16 %v8248_v31, %v17397_v51  ;;  %v13117_v45 = vpack.i.bf16 %v17365_v41, %v17399_v4 }
 0x66b   : > { %13108 = vrot.lane.b32.xlu0 %v13107_v61, %s13387_s27  ;;  %v7609_v63 = vsel %vm7545_vm11, %v7463_v14, %v7577_v9  ;;  %v7242_v6 = vpop.f32.mrb[136].mxu0 }
 0x66c   : > { %11425 = vmatmul.mubr.msk.f32.gmra.mrb[18].mxu1 %vm551_vm2, %v7609_v63  ;;  %7998 = vst.msk [vmem:[#allocation3 + $0xf9] sm:$0xff] %vm551_vm2, %v7609_v63  ;;  %v7243_v20 = vadd.f32 %v17114_v42, %v7242_v6  ;;  %v7244_v17 = vpop.f32.mrb[137].mxu0 }
 0x66e   : > { %13123 = vrot.lane.b32.xlu1 %v13122_v16, %s13384_s17  ;;  %v8219_v39 = vld [vmem:[#allocation3 + $0xf0] sm:$0xff]  ;;  %v7468_v33 = vadd.f32 %v17089_v28, %v7243_v20  ;;  %v8011_v16 = vld [vmem:[#allocation3] sm:$0xff] }
 0x66f   : > { %13118 = vrot.lane.b32.xlu0 %v13117_v45, %s13384_s17  ;;  %v17411_v27 = vld [vmem:[#allocation3 + $0xf1] sm:$0xff]  ;;  %v13127_v0 = vpack.i.bf16 %v8185_v59, %v8219_v39 }
 0x670   : > { %v13132_v38 = vpack.i.bf16 %v8217_v10, %v17411_v27  ;;  %v7578_v12 = vmul.f32 0.01, %v7468_v33  ;;  %vm7546_vm12 = vcmp.ge.f32.partialorder %v7468_v33, 0.0 }
 0x671   : > { %v7247_v47 = vpop.f32.mrb[138].mxu0 }
 0x672   : > { %v7248_v41 = vadd.f32 %v17114_v42, %v7247_v47  ;;  %v7249_v8 = vpop.f32.mrb[139].mxu0  ;;  %13128 = vrot.lane.b32.xlu1 %v13127_v0, %s13387_s27  ;;  %v7610_v26 = vsel %vm7546_vm12, %v7468_v33, %v7578_v12 }
 0x673   : > { %13133 = vrot.lane.b32.xlu0 %v13132_v38, %s13386_s30  ;;  %v17418_v37 = vld [vmem:[#allocation3 + $0xf9] sm:$0xff]  ;;  %11427 = vmatprep.mubr.msk.f32.mxu1 %vm551_vm2, %v7610_v26  ;;  %7999 = vst.msk [vmem:[#allocation3 + $0x109] sm:$0xff] %vm551_vm2, %v7610_v26 }
 0x674   : > { %v8220_v31 = vld [vmem:[#allocation3 + $0xf8] sm:$0xff]  ;;  %v7473_v48 = vadd.f32 %v17087_v1, %v7248_v41  ;;  %v13142_v28 = vpack.i.bf16 %v8218_v2, %v17418_v37 }
 0x675   : > { %v13137_v43 = vpack.i.bf16 %v17375_v36, %v8220_v31  ;;  %v17425_v5 = vld [vmem:[#allocation3 + $0xfa] sm:$0xff]  ;;  %v17427_v21 = vld [vmem:[#allocation3 + $0xf2] sm:$0xff] }
 0x676   : > { %v7579_v59 = vmul.f32 0.01, %v7473_v48  ;;  %13143 = vrot.lane.b32.xlu1 %v13142_v28, %s13386_s30  ;;  %vm7547_vm13 = vcmp.ge.f32.partialorder %v7473_v48, 0.0  ;;  %v13152_v55 = vpack.i.bf16 %v8250_v19, %v17425_v5  ;;  %v13147_v35 = vpack.i.bf16 %v17387_v34, %v17427_v21 }
 0x677   : > { %13138 = vrot.lane.b32.xlu0 %v13137_v43, %s13387_s27 }
 0x678   : > { %v7252_v62 = vpop.f32.mrb[140].mxu0  ;;  %v7611_v1 = vsel %vm7547_vm13, %v7473_v48, %v7579_v59 }
 0x679   : > { %v7253_v3 = vadd.f32 %v17114_v42, %v7252_v62  ;;  %v7254_v36 = vpop.f32.mrb[141].mxu0  ;;  %11428 = vmatmul.mubr.msk.f32.gmra.mrb[20].mxu1 %vm551_vm2, %v7611_v1  ;;  %8000 = vst.msk [vmem:[#allocation3 + $0x111] sm:$0xff] %vm551_vm2, %v7611_v1 }
 0x67a   : > { %13153 = vrot.lane.b32.xlu1 %v13152_v55, %s13384_s17  ;;  %v17440_v46 = vld [vmem:[#allocation3 + $0x108] sm:$0xff] }
 0x67b   : > { %13148 = vrot.lane.b32.xlu0 %v13147_v35, %s13384_s17  ;;  %v7478_v60 = vadd.f32 %v17100_v29, %v7253_v3  ;;  %v17442_v40 = vld [vmem:[#allocation3 + $0x109] sm:$0xff]  ;;  %v13157_v10 = vpack.i.bf16 %v17399_v4, %v17440_v46 }
 0x67c   : > { %v13162_v34 = vpack.i.bf16 %v8219_v39, %v17442_v40  ;;  %v12879_v29 = vpop.permute.xlu0 %12878  ;;  %v17451_v13 = vpop.permute.xlu1 %12883  ;;  %v8012_v36 = vld [vmem:[#allocation3 + $0x8] sm:$0xff] }
 0x67d   : > { %v7580_v54 = vmul.f32 0.01, %v7478_v60  ;;  %v7257_v30 = vpop.f32.mrb[142].mxu0  ;;  %vm7548_vm14 = vcmp.ge.f32.partialorder %v7478_v60, 0.0  ;;  %v12881_v63 = vunpack.i.h.bf16 %v12879_v29  ;;  %v12886_v45 = vunpack.i.h.bf16 %v17451_v13 }
 0x67e   : > { %v7258_v7 = vadd.f32 %v17114_v42, %v7257_v30  ;;  %v7259_v23 = vpop.f32.mrb[143].mxu0  ;;  %13158 = vrot.lane.b32.xlu1 %v13157_v10, %s13387_s27  ;;  %v12885_v28 = vunpack.i.l.bf16 %v17451_v13 }
 0x67f   : > { %13163 = vrot.lane.b32.xlu0 %v13162_v34, %s13386_s30  ;;  %v7612_v24 = vsel %vm7548_vm14, %v7478_v60, %v7580_v54  ;;  %v9067_v26 = vsel %vm551_vm2, %v8011_v16, %v12881_v63 }
 0x680   : > { %v7483_v52 = vadd.f32 %v17098_v49, %v7258_v7  ;;  %11430 = vmatprep.mubr.msk.f32.mxu1 %vm551_vm2, %v7612_v24  ;;  %8001 = vst.msk [vmem:[#allocation3 + $0x121] sm:$0xff] %vm551_vm2, %v7612_v24  ;;  %v17455_v14 = vld [vmem:[#allocation3 + $0x111] sm:$0xff]  ;;  %v12880_v49 = vunpack.i.l.bf16 %v12879_v29 }
 0x681   : > { %v17457_v19 = vld [vmem:[#allocation3 + $0x110] sm:$0xff]  ;;  %v13172_v2 = vpack.i.bf16 %v8220_v31, %v17455_v14 }
 0x682   : > { %v13167_v18 = vpack.i.bf16 %v17397_v51, %v17457_v19  ;;  %v17462_v61 = vld [vmem:[#allocation3 + $0x112] sm:$0xff]  ;;  %v7581_v9 = vmul.f32 0.01, %v7483_v52  ;;  %vm7549_vm15 = vcmp.ge.f32.partialorder %v7483_v52, 0.0  ;;  %v17464_v6 = vld [vmem:[#allocation3 + $0x10a] sm:$0xff] }
 0x683   : > { %13173 = vrot.lane.b32.xlu1 %v13172_v2, %s13386_s30  ;;  %v12889_v17 = vpop.permute.xlu1 %12888  ;;  %v13182_v33 = vpack.i.bf16 %v17418_v37, %v17462_v61  ;;  %v13177_v8 = vpack.i.bf16 %v17411_v27, %v17464_v6  ;;  %v9163_v37 = vsel %vm551_vm2, %v17207_v44, %v12880_v49  ;;  %v9068_v2 = vsel %vm551_vm2, %v8012_v36, %v12886_v45 }
 0x684   : > { %13168 = vrot.lane.b32.xlu0 %v13167_v18, %s13387_s27  ;;  %v7262_v20 = vpop.f32.mrb[144].mxu0  ;;  %v7613_v39 = vsel %vm7549_vm15, %v7483_v52, %v7581_v9  ;;  %v12891_v12 = vunpack.i.h.bf16 %v12889_v17  ;;  %v12890_v47 = vunpack.i.l.bf16 %v12889_v17  ;;  %v12894_v41 = vpop.permute.xlu0 %12893  ;;  %v8140_v52 = vld [vmem:[#allocation3 + $0x21] sm:$0xff] }
 0x685   : > { %v7263_v0 = vadd.f32 %v17114_v42, %v7262_v20  ;;  %v7264_v38 = vpop.f32.mrb[145].mxu0  ;;  %11431 = vmatmul.mubr.msk.f32.gmra.mrb[22].mxu1 %vm551_vm2, %v7613_v39  ;;  %8002 = vst.msk [vmem:[#allocation3 + $0x129] sm:$0xff] %vm551_vm2, %v7613_v39  ;;  %v12896_v31 = vunpack.i.h.bf16 %v12894_v41  ;;  %v12895_v48 = vunpack.i.l.bf16 %v12894_v41  ;;  %v9164_v13 = vsel %vm551_vm2, %v8140_v52, %v12885_v28 }
 0x686   : > { %v9099_v59 = vsel %vm4453_vm4, %v9067_v26, %v12891_v12  ;;  %v9195_v62 = vsel %vm4453_vm4, %v9163_v37, %v12890_v47 }
 0x687   : > { %v7488_v43 = vadd.f32 %v17116_v56, %v7263_v0  ;;  %13183 = vrot.lane.b32.xlu1 %v13182_v33, %s13384_s17  ;;  %v17485_v27 = vld [vmem:[#allocation3 + $0x120] sm:$0xff]  ;;  %v9227_v35 = vsel %vm4486_vm5, %v9195_v62, %v12895_v48  ;;  %v9131_v44 = vsel %vm4486_vm5, %v9099_v59, %v12896_v31 }
 0x688   : > { %13178 = vrot.lane.b32.xlu0 %v13177_v8, %s13384_s17  ;;  %v17487_v1 = vld [vmem:[#allocation3 + $0x121] sm:$0xff]  ;;  %v12904_v55 = vpop.permute.xlu1 %12903  ;;  %v13187_v56 = vpack.i.bf16 %v17427_v21, %v17485_v27  ;;  %9462 = vmatprep.mubr.f32.mxu0 %v9227_v35  ;;  %v8013_v35 = vld [vmem:[#allocation3 + $0x18] sm:$0xff] }
 0x689   : > { %v13192_v3 = vpack.i.bf16 %v17440_v46, %v17487_v1  ;;  %v7582_v60 = vmul.f32 0.01, %v7488_v43  ;;  %v7267_v10 = vpop.f32.mrb[146].mxu0  ;;  %v12906_v34 = vunpack.i.h.bf16 %v12904_v55  ;;  %v12905_v54 = vunpack.i.l.bf16 %v12904_v55  ;;  %v12899_v30 = vpop.permute.xlu0 %12898  ;;  %9463 = vmatmul.mubr.f32.vlgmr.msra.gmra.mrb[160].mxu0 %v9131_v44  ;;  %v8141_v55 = vld [vmem:[#allocation3 + $0x31] sm:$0xff] }
 0x68a   : > { %vm7550_vm6 = vcmp.ge.f32.partialorder %v7488_v43, 0.0  ;;  %v7268_v7 = vadd.f32 %v17114_v42, %v7267_v10  ;;  %v12901_v23 = vunpack.i.h.bf16 %v12899_v30  ;;  %v12900_v29 = vunpack.i.l.bf16 %v12899_v30  ;;  %v7269_v24 = vpop.f32.mrb[147].mxu0  ;;  %11752 = vmatpush3.bf16.msra.mxu0 %v17285_v11 }
 0x68b   : > { %13188 = vrot.lane.b32.xlu1 %v13187_v56, %s13387_s27  ;;  %v7614_v46 = vsel %vm7550_vm6, %v7488_v43, %v7582_v60  ;;  %11754 = vmatprep.subr.bf16.mxu0 %v17300_v58 }
 0x68c   : > { %13193 = vrot.lane.b32.xlu0 %v13192_v3, %s13386_s30  ;;  %v7493_v18 = vadd.f32 %v17109_v25, %v7268_v7  ;;  %11433 = vmatprep.mubr.msk.f32.mxu1 %vm551_vm2, %v7614_v46  ;;  %8003 = vst.msk [vmem:[#allocation3 + $0x139] sm:$0xff] %vm551_vm2, %v7614_v46  ;;  %v17503_v42 = vpop.permute.xlu1 %12913  ;;  %v9196_v9 = vsel %vm4453_vm4, %v9164_v13, %v12900_v29  ;;  %v17507_v49 = vld [vmem:[#allocation3 + $0x129] sm:$0xff] }
 0x68d   : > { %v9100_v63 = vsel %vm4453_vm4, %v9068_v2, %v12901_v23  ;;  %v17509_v16 = vld [vmem:[#allocation3 + $0x128] sm:$0xff]  ;;  %v12909_v20 = vpop.permute.xlu0 %12908  ;;  %v9228_v45 = vsel %vm4486_vm5, %v9196_v9, %v12905_v54  ;;  %v13202_v0 = vpack.i.bf16 %v17457_v19, %v17507_v49  ;;  %v12916_v12 = vunpack.i.h.bf16 %v17503_v42  ;;  %v17530_v19 = vld [vmem:[%s18281_s6] ss:$0 sm:$0xff]  ;;  %v8142_v9 = vld [vmem:[#allocation3 + $0x39] sm:$0xff] }
 0x68e   : > { %v9132_v25 = vsel %vm4486_vm5, %v9100_v63, %v12906_v34  ;;  %v7583_v17 = vmul.f32 0.01, %v7493_v18  ;;  %v12911_v39 = vunpack.i.h.bf16 %v12909_v20  ;;  %v12910_v33 = vunpack.i.l.bf16 %v12909_v20  ;;  %9467 = vmatprep.mubr.f32.mxu0 %v9228_v45  ;;  %v17517_v38 = vld [vmem:[#allocation3 + $0x12a] sm:$0xff]  ;;  %v17524_v31 = vld [vmem:[#allocation3 + $0x122] sm:$0xff]  ;;  %11756 = vmatpush3.bf16.msra.mxu0 %v17300_v58 }
 0x68f   : > { %9468 = vmatmul.mubr.f32.gmra.mrb[162].mxu0 %v9132_v25  ;;  %v13197_v11 = vpack.i.bf16 %v17425_v5, %v17509_v16  ;;  %vm7551_vm7 = vcmp.ge.f32.partialorder %v7493_v18, 0.0  ;;  %v12915_v47 = vunpack.i.l.bf16 %v17503_v42  ;;  %13203 = vrot.lane.b32.xlu1 %v13202_v0, %s13386_s30  ;;  %v13212_v62 = vpack.i.bf16 %v17455_v14, %v17517_v38  ;;  %v8014_v63 = vld [vmem:[#allocation3 + $0x20] sm:$0xff] }
 0x690   : > { %v7272_v41 = vpop.f32.mrb[148].mxu0  ;;  %v12919_v8 = vpop.permute.xlu1 %12918  ;;  %v7615_v26 = vsel %vm7551_vm7, %v7493_v18, %v7583_v17  ;;  %v9165_v3 = vsel %vm551_vm2, %v8141_v55, %v12910_v33  ;;  %v9069_v36 = vsel %vm551_vm2, %v8013_v35, %v12911_v39  ;;  %v13207_v10 = vpack.i.bf16 %v17442_v40, %v17524_v31 }
 0x691   : > { %13198 = vrot.lane.b32.xlu0 %v13197_v11, %s13387_s27  ;;  %v7273_v48 = vadd.f32 %v17530_v19, %v7272_v41  ;;  %v7274_v37 = vpop.f32.mrb[149].mxu0  ;;  %v12921_v28 = vunpack.i.h.bf16 %v12919_v8  ;;  %v12920_v43 = vunpack.i.l.bf16 %v12919_v8  ;;  %v12924_v59 = vpop.permute.xlu0 %12923  ;;  %11434 = vmatmul.mubr.msk.f32.gmra.mrb[24].mxu1 %vm551_vm2, %v7615_v26  ;;  %8004 = vst.msk [vmem:[#allocation3 + $0x141] sm:$0xff] %vm551_vm2, %v7615_v26  ;;  %v9166_v25 = vsel %vm551_vm2, %v8142_v9, %v12915_v47 }
 0x692   : > { %v12926_v44 = vunpack.i.h.bf16 %v12924_v59  ;;  %v12925_v56 = vunpack.i.l.bf16 %v12924_v59  ;;  %v9070_v17 = vsel %vm551_vm2, %v8014_v63, %v12916_v12 }
 0x693   : > { %v7498_v60 = vadd.f32 %v17129_v32, %v7273_v48  ;;  %v9197_v34 = vsel %vm4453_vm4, %v9165_v3, %v12920_v43  ;;  %v17544_v54 = vld [vmem:[#allocation3 + $0x138] sm:$0xff]  ;;  %v9101_v30 = vsel %vm4453_vm4, %v9069_v36, %v12921_v28  ;;  %13213 = vrot.lane.b32.xlu1 %v13212_v62, %s13384_s17 }
 0x694   : > { %v17546_v14 = vld [vmem:[#allocation3 + $0x139] sm:$0xff]  ;;  %v12934_v7 = vpop.permute.xlu1 %12933  ;;  %v9229_v23 = vsel %vm4486_vm5, %v9197_v34, %v12925_v56  ;;  %v13217_v58 = vpack.i.bf16 %v17464_v6, %v17544_v54  ;;  %v9133_v32 = vsel %vm4486_vm5, %v9101_v30, %v12926_v44  ;;  %v8143_v30 = vld [vmem:[#allocation3 + $0x49] sm:$0xff] }
 0x695   : > { %v7584_v29 = vmul.f32 0.01, %v7498_v60  ;;  %13208 = vrot.lane.b32.xlu0 %v13207_v10, %s13384_s17  ;;  %v7277_v40 = vpop.f32.mrb[150].mxu0  ;;  %v12935_v24 = vunpack.i.l.bf16 %v12934_v7  ;;  %v12929_v52 = vpop.permute.xlu0 %12928  ;;  %9472 = vmatprep.mubr.f32.mxu0 %v9229_v23  ;;  %v13222_v46 = vpack.i.bf16 %v17485_v27, %v17546_v14  ;;  %vm7552_vm3 = vcmp.ge.f32.partialorder %v7498_v60, 0.0 }
 0x696   : > { %v7278_v13 = vadd.f32 %v17530_v19, %v7277_v40  ;;  %v12931_v2 = vunpack.i.h.bf16 %v12929_v52  ;;  %v12930_v18 = vunpack.i.l.bf16 %v12929_v52  ;;  %v7279_v42 = vpop.f32.mrb[151].mxu0  ;;  %9473 = vmatmul.mubr.f32.gmra.mrb[164].mxu0 %v9133_v32  ;;  %v12936_v20 = vunpack.i.h.bf16 %v12934_v7  ;;  %v8015_v7 = vld [vmem:[#allocation3 + $0x30] sm:$0xff] }
 0x697   : > { %v7616_v45 = vsel %vm7552_vm3, %v7498_v60, %v7584_v29  ;;  %13218 = vrot.lane.b32.xlu1 %v13217_v58, %s13387_s27 }
 0x698   : > { %v7503_v39 = vadd.f32 %v17126_v15, %v7278_v13  ;;  %11436 = vmatprep.mubr.msk.f32.mxu1 %vm551_vm2, %v7616_v45  ;;  %8005 = vst.msk [vmem:[#allocation3 + $0x151] sm:$0xff] %vm551_vm2, %v7616_v45  ;;  %v17564_v27 = vpop.permute.xlu1 %12943  ;;  %v9198_v33 = vsel %vm4453_vm4, %v9166_v25, %v12930_v18  ;;  %v17567_v0 = vld [vmem:[#allocation3 + $0x141] sm:$0xff]  ;;  %v9102_v47 = vsel %vm4453_vm4, %v9070_v17, %v12931_v2 }
 0x699   : > { %v17569_v11 = vld [vmem:[#allocation3 + $0x140] sm:$0xff]  ;;  %13223 = vrot.lane.b32.xlu0 %v13222_v46, %s13386_s30  ;;  %v12939_v12 = vpop.permute.xlu0 %12938  ;;  %v9230_v15 = vsel %vm4486_vm5, %v9198_v33, %v12935_v24  ;;  %v13232_v41 = vpack.i.bf16 %v17509_v16, %v17567_v0  ;;  %v9134_v43 = vsel %vm4486_vm5, %v9102_v47, %v12936_v20  ;;  %v12946_v59 = vunpack.i.h.bf16 %v17564_v27  ;;  %v8144_v33 = vld [vmem:[#allocation3 + $0x51] sm:$0xff] }
 0x69a   : > { %v7585_v8 = vmul.f32 0.01, %v7503_v39  ;;  %v12941_v26 = vunpack.i.h.bf16 %v12939_v12  ;;  %v12940_v48 = vunpack.i.l.bf16 %v12939_v12  ;;  %9477 = vmatprep.mubr.f32.mxu0 %v9230_v15  ;;  %v13227_v37 = vpack.i.bf16 %v17462_v61, %v17569_v11  ;;  %v17578_v28 = vld [vmem:[#allocation3 + $0x142] sm:$0xff]  ;;  %v17584_v44 = vld [vmem:[#allocation3 + $0x13a] sm:$0xff] }
 0x69b   : > { %vm7553_vm8 = vcmp.ge.f32.partialorder %v7503_v39, 0.0  ;;  %v12945_v62 = vunpack.i.l.bf16 %v17564_v27  ;;  %13233 = vrot.lane.b32.xlu1 %v13232_v41, %s13386_s30  ;;  %9478 = vmatmul.mubr.f32.gmra.mrb[166].mxu0 %v9134_v43  ;;  %v13242_v34 = vpack.i.bf16 %v17507_v49, %v17578_v28  ;;  %v13237_v24 = vpack.i.bf16 %v17487_v1, %v17584_v44  ;;  %v8016_v47 = vld [vmem:[#allocation3 + $0x38] sm:$0xff] }
 0x69c   : > { %v7282_v16 = vpop.f32.mrb[152].mxu0  ;;  %v12949_v55 = vpop.permute.xlu1 %12948  ;;  %v7617_v35 = vsel %vm7553_vm8, %v7503_v39, %v7585_v8  ;;  %v9167_v32 = vsel %vm551_vm2, %v8143_v30, %v12940_v48  ;;  %v9071_v29 = vsel %vm551_vm2, %v8015_v7, %v12941_v26  ;;  %v9072_v8 = vsel %vm551_vm2, %v8016_v47, %v12946_v59 }
 0x69d   : > { %13228 = vrot.lane.b32.xlu0 %v13227_v37, %s13387_s27  ;;  %v7283_v56 = vadd.f32 %v17530_v19, %v7282_v16  ;;  %v7284_v3 = vpop.f32.mrb[153].mxu0  ;;  %v12951_v36 = vunpack.i.h.bf16 %v12949_v55  ;;  %v12950_v60 = vunpack.i.l.bf16 %v12949_v55  ;;  %v12954_v10 = vpop.permute.xlu0 %12953  ;;  %11437 = vmatmul.mubr.msk.f32.gmra.mrb[26].mxu1 %vm551_vm2, %v7617_v35  ;;  %8006 = vst.msk [vmem:[#allocation3 + $0x159] sm:$0xff] %vm551_vm2, %v7617_v35  ;;  %v9168_v41 = vsel %vm551_vm2, %v8144_v33, %v12945_v62 }
 0x69e   : > { %v12956_v23 = vunpack.i.h.bf16 %v12954_v10  ;;  %v12955_v58 = vunpack.i.l.bf16 %v12954_v10 }
 0x69f   : > { %v7508_v40 = vadd.f32 %v17142_v22, %v7283_v56  ;;  %v9199_v52 = vsel %vm4453_vm4, %v9167_v32, %v12950_v60  ;;  %v17598_v46 = vld [vmem:[#allocation3 + $0x150] sm:$0xff]  ;;  %v9103_v49 = vsel %vm4453_vm4, %v9071_v29, %v12951_v36  ;;  %13243 = vrot.lane.b32.xlu1 %v13242_v34, %s13384_s17 }
 0x6a0   : > { %v17600_v13 = vld [vmem:[#allocation3 + $0x151] sm:$0xff]  ;;  %v12964_v2 = vpop.permute.xlu1 %12963  ;;  %v9231_v18 = vsel %vm4486_vm5, %v9199_v52, %v12955_v58  ;;  %v13247_v42 = vpack.i.bf16 %v17524_v31, %v17598_v46  ;;  %v9135_v22 = vsel %vm4486_vm5, %v9103_v49, %v12956_v23  ;;  %v8145_v49 = vld [vmem:[#allocation3 + $0x61] sm:$0xff] }
 0x6a1   : > { %v7586_v9 = vmul.f32 0.01, %v7508_v40  ;;  %13238 = vrot.lane.b32.xlu0 %v13237_v24, %s13384_s17  ;;  %v7287_v1 = vpop.f32.mrb[154].mxu0  ;;  %v12965_v63 = vunpack.i.l.bf16 %v12964_v2  ;;  %v12959_v20 = vpop.permute.xlu0 %12958  ;;  %9482 = vmatprep.mubr.f32.mxu0 %v9231_v18  ;;  %v13252_v45 = vpack.i.bf16 %v17544_v54, %v17600_v13  ;;  %vm7554_vm9 = vcmp.ge.f32.partialorder %v7508_v40, 0.0 }
 0x6a2   : > { %v7288_v25 = vadd.f32 %v17530_v19, %v7287_v1  ;;  %v12961_v17 = vunpack.i.h.bf16 %v12959_v20  ;;  %v12960_v39 = vunpack.i.l.bf16 %v12959_v20  ;;  %v7289_v27 = vpop.f32.mrb[155].mxu0  ;;  %9483 = vmatmul.mubr.f32.gmra.mrb[168].mxu0 %v9135_v22  ;;  %v12966_v12 = vunpack.i.h.bf16 %v12964_v2  ;;  %v8017_v2 = vld [vmem:[#allocation3 + $0x48] sm:$0xff] }
 0x6a3   : > { %v7618_v15 = vsel %vm7554_vm9, %v7508_v40, %v7586_v9  ;;  %13248 = vrot.lane.b32.xlu1 %v13247_v42, %s13387_s27 }
 0x6a4   : > { %v7513_v26 = vadd.f32 %v17139_v50, %v7288_v25  ;;  %11439 = vmatprep.mubr.msk.f32.mxu1 %vm551_vm2, %v7618_v15  ;;  %8007 = vst.msk [vmem:[#allocation3 + $0x169] sm:$0xff] %vm551_vm2, %v7618_v15  ;;  %v17618_v54 = vpop.permute.xlu1 %12973  ;;  %v9200_v48 = vsel %vm4453_vm4, %v9168_v41, %v12960_v39  ;;  %v17621_v37 = vld [vmem:[#allocation3 + $0x159] sm:$0xff]  ;;  %v9104_v62 = vsel %vm4453_vm4, %v9072_v8, %v12961_v17 }
 0x6a5   : > { %v17623_v43 = vld [vmem:[#allocation3 + $0x158] sm:$0xff]  ;;  %13253 = vrot.lane.b32.xlu0 %v13252_v45, %s13386_s30  ;;  %v12969_v59 = vpop.permute.xlu0 %12968  ;;  %v9232_v50 = vsel %vm4486_vm5, %v9200_v48, %v12965_v63  ;;  %v13262_v16 = vpack.i.bf16 %v17569_v11, %v17621_v37  ;;  %v9136_v60 = vsel %vm4486_vm5, %v9104_v62, %v12966_v12  ;;  %v12976_v10 = vunpack.i.h.bf16 %v17618_v54  ;;  %v8146_v48 = vld [vmem:[#allocation3 + $0x69] sm:$0xff] }
 0x6a6   : > { %v7587_v55 = vmul.f32 0.01, %v7513_v26  ;;  %v12971_v35 = vunpack.i.h.bf16 %v12969_v59  ;;  %v12970_v56 = vunpack.i.l.bf16 %v12969_v59  ;;  %9487 = vmatprep.mubr.f32.mxu0 %v9232_v50  ;;  %v13257_v3 = vpack.i.bf16 %v17517_v38, %v17623_v43  ;;  %v17632_v36 = vld [vmem:[#allocation3 + $0x15a] sm:$0xff]  ;;  %v17638_v23 = vld [vmem:[#allocation3 + $0x152] sm:$0xff] }
 0x6a7   : > { %vm7555_vm10 = vcmp.ge.f32.partialorder %v7513_v26, 0.0  ;;  %v12975_v34 = vunpack.i.l.bf16 %v17618_v54  ;;  %13263 = vrot.lane.b32.xlu1 %v13262_v16, %s13386_s30  ;;  %9488 = vmatmul.mubr.f32.gmra.mrb[170].mxu0 %v9136_v60  ;;  %v13272_v52 = vpack.i.bf16 %v17567_v0, %v17632_v36  ;;  %v13267_v63 = vpack.i.bf16 %v17546_v14, %v17638_v23  ;;  %v8018_v62 = vld [vmem:[#allocation3 + $0x50] sm:$0xff] }
 0x6a8   : > { %v7292_v11 = vpop.f32.mrb[156].mxu0  ;;  %v12979_v30 = vpop.permute.xlu1 %12978  ;;  %v7619_v7 = vsel %vm7555_vm10, %v7513_v26, %v7587_v55  ;;  %v9169_v22 = vsel %vm551_vm2, %v8145_v49, %v12970_v56  ;;  %v9073_v9 = vsel %vm551_vm2, %v8017_v2, %v12971_v35  ;;  %v9074_v55 = vsel %vm551_vm2, %v8018_v62, %v12976_v10  ;;  %v8020_v62 = vld [vmem:[#allocation3 + $0x68] sm:$0xff] }
 0x6a9   : > { %13258 = vrot.lane.b32.xlu0 %v13257_v3, %s13387_s27  ;;  %v7293_v58 = vadd.f32 %v17530_v19, %v7292_v11  ;;  %v7294_v32 = vpop.f32.mrb[157].mxu0  ;;  %v12981_v29 = vunpack.i.h.bf16 %v12979_v30  ;;  %v12980_v40 = vunpack.i.l.bf16 %v12979_v30  ;;  %v12984_v24 = vpop.permute.xlu0 %12983  ;;  %11440 = vmatmul.mubr.msk.f32.gmra.mrb[28].mxu1 %vm551_vm2, %v7619_v7  ;;  %8008 = vst.msk [vmem:[#allocation3 + $0x171] sm:$0xff] %vm551_vm2, %v7619_v7  ;;  %v9170_v16 = vsel %vm551_vm2, %v8146_v48, %v12975_v34  ;;  %v8148_v48 = vld [vmem:[#allocation3 + $0x81] sm:$0xff] }
 0x6aa   : > { %v12986_v18 = vunpack.i.h.bf16 %v12984_v24  ;;  %v12985_v42 = vunpack.i.l.bf16 %v12984_v24 }
 0x6ab   : > { %v7518_v1 = vadd.f32 %v17256_v53, %v7293_v58  ;;  %v9201_v20 = vsel %vm4453_vm4, %v9169_v22, %v12980_v40  ;;  %v17652_v45 = vld [vmem:[#allocation3 + $0x168] sm:$0xff]  ;;  %v9105_v0 = vsel %vm4453_vm4, %v9073_v9, %v12981_v29  ;;  %13273 = vrot.lane.b32.xlu1 %v13272_v52, %s13384_s17  ;;  %v8147_v22 = vld [vmem:[#allocation3 + $0x79] sm:$0xff] }
 0x6ac   : > { %v17654_v25 = vld [vmem:[#allocation3 + $0x169] sm:$0xff]  ;;  %v12994_v17 = vpop.permute.xlu1 %12993  ;;  %v9233_v39 = vsel %vm4486_vm5, %v9201_v20, %v12985_v42  ;;  %v13277_v27 = vpack.i.bf16 %v17584_v44, %v17652_v45  ;;  %v9137_v53 = vsel %vm4486_vm5, %v9105_v0, %v12986_v18  ;;  %v8019_v9 = vld [vmem:[#allocation3 + $0x60] sm:$0xff] }
 0x6ad   : > { %vm7556_vm1 = vcmp.ge.f32.partialorder %v7518_v1, 0.0  ;;  %v7588_v14 = vmul.f32 0.01, %v7518_v1  ;;  %13268 = vrot.lane.b32.xlu0 %v13267_v63, %s13384_s17  ;;  %v7297_v33 = vpop.f32.mrb[158].mxu0  ;;  %v12995_v47 = vunpack.i.l.bf16 %v12994_v17  ;;  %v12989_v12 = vpop.permute.xlu0 %12988  ;;  %9492 = vmatprep.mubr.f32.mxu0 %v9233_v39  ;;  %v13282_v15 = vpack.i.bf16 %v17598_v46, %v17654_v25 }
 0x6ae   : > { %v7298_v41 = vadd.f32 %v17530_v19, %v7297_v33  ;;  %v12991_v8 = vunpack.i.h.bf16 %v12989_v12  ;;  %v12990_v26 = vunpack.i.l.bf16 %v12989_v12  ;;  %v7299_v54 = vpop.f32.mrb[159].mxu0  ;;  %9493 = vmatmul.mubr.f32.gmra.mrb[172].mxu0 %v9137_v53  ;;  %v12996_v59 = vunpack.i.h.bf16 %v12994_v17 }
 0x6af   : > { %v7620_v50 = vsel %vm7556_vm1, %v7518_v1, %v7588_v14  ;;  %13278 = vrot.lane.b32.xlu1 %v13277_v27, %s13387_s27 }
 0x6b0   : > { %v7523_v35 = vadd.f32 %v17249_v57, %v7298_v41  ;;  %11442 = vmatprep.mubr.msk.f32.mxu1 %vm551_vm2, %v7620_v50  ;;  %8009 = vst.msk [vmem:[#allocation3 + $0x181] sm:$0xff] %vm551_vm2, %v7620_v50  ;;  %v17673_v19 = vpop.permute.xlu1 %13003  ;;  %v9202_v46 = vsel %vm4453_vm4, %v9170_v16, %v12990_v26  ;;  %v17676_v56 = vld [vmem:[#allocation3 + $0x171] sm:$0xff]  ;;  %v9106_v60 = vsel %vm4453_vm4, %v9074_v55, %v12991_v8 }
 0x6b1   : > { %v17678_v3 = vld [vmem:[#allocation3 + $0x170] sm:$0xff]  ;;  %13283 = vrot.lane.b32.xlu0 %v13282_v15, %s13386_s30  ;;  %v12999_v10 = vpop.permute.xlu0 %12998  ;;  %v9234_v57 = vsel %vm4486_vm5, %v9202_v46, %v12995_v47  ;;  %v13292_v34 = vpack.i.bf16 %v17623_v43, %v17676_v56  ;;  %v9138_v29 = vsel %vm4486_vm5, %v9106_v60, %v12996_v59  ;;  %v13006_v43 = vunpack.i.h.bf16 %v17673_v19  ;;  %v8233_v50 = vld [vmem:[#allocation3 + $0x198] sm:$0xff] }
 0x6b2   : > { %v7589_v11 = vmul.f32 0.01, %v7523_v35  ;;  %v13001_v30 = vunpack.i.h.bf16 %v12999_v10  ;;  %v13000_v7 = vunpack.i.l.bf16 %v12999_v10  ;;  %9497 = vmatprep.mubr.f32.mxu0 %v9234_v57  ;;  %v13287_v58 = vpack.i.bf16 %v17578_v28, %v17678_v3  ;;  %v17687_v32 = vld [vmem:[#allocation3 + $0x172] sm:$0xff]  ;;  %v17691_v52 = vld [vmem:[#allocation3 + $0x16a] sm:$0xff] }
 0x6b3   : > { %vm7557_vm11 = vcmp.ge.f32.partialorder %v7523_v35, 0.0  ;;  %13293 = vrot.lane.b32.xlu1 %v13292_v34, %s13386_s30  ;;  %9498 = vmatmul.mubr.f32.gmra.mrb[174].mxu0 %v9138_v29  ;;  %v13302_v42 = vpack.i.bf16 %v17621_v37, %v17687_v32  ;;  %v13005_v17 = vunpack.i.l.bf16 %v17673_v19  ;;  %v13297_v39 = vpack.i.bf16 %v17600_v13, %v17691_v52 }
 0x6b4   : > { %v13009_v40 = vpop.permute.xlu1 %13008  ;;  %v7621_v24 = vsel %vm7557_vm11, %v7523_v35, %v7589_v11  ;;  %v9171_v20 = vsel %vm551_vm2, %v8147_v22, %v13000_v7  ;;  %v9075_v0 = vsel %vm551_vm2, %v8019_v9, %v13001_v30  ;;  %v9076_v16 = vsel %vm551_vm2, %v8020_v62, %v13006_v43  ;;  %v8021_v43 = vld [vmem:[#allocation3 + $0x78] sm:$0xff] }
 0x6b5   : > { %13288 = vrot.lane.b32.xlu0 %v13287_v58, %s13387_s27  ;;  %v13011_v49 = vunpack.i.h.bf16 %v13009_v40  ;;  %v13010_v2 = vunpack.i.l.bf16 %v13009_v40  ;;  %v13014_v18 = vpop.permute.xlu0 %13013  ;;  %11443 = vmatmul.mubr.msk.f32.gmra.mrb[30].mxu1 %vm551_vm2, %v7621_v24  ;;  %8010 = vst.msk [vmem:[#allocation3 + $0x189] sm:$0xff] %vm551_vm2, %v7621_v24  ;;  %v9172_v59 = vsel %vm551_vm2, %v8148_v48, %v13005_v17  ;;  %v13312_v57 = vpack.i.bf16 %v17691_v52, %v8233_v50  ;;  %v8149_v24 = vld [vmem:[#allocation3 + $0x91] sm:$0xff] }
 0x6b6   : > { %v13016_v1 = vunpack.i.h.bf16 %v13014_v18  ;;  %v13015_v63 = vunpack.i.l.bf16 %v13014_v18  ;;  %11474 = vmatprep.mubr.msk.f32.mxu1 %vm551_vm2, %v17399_v4 }
 0x6b7   : > { %v9203_v27 = vsel %vm4453_vm4, %v9171_v20, %v13010_v2  ;;  %v17707_v53 = vld [vmem:[#allocation3 + $0x180] sm:$0xff]  ;;  %v9107_v14 = vsel %vm4453_vm4, %v9075_v0, %v13011_v49  ;;  %13303 = vrot.lane.b32.xlu1 %v13302_v42, %s13384_s17 }
 0x6b8   : > { %v17709_v37 = vld [vmem:[#allocation3 + $0x181] sm:$0xff]  ;;  %v13024_v4 = vpop.permute.xlu1 %13023  ;;  %v9235_v33 = vsel %vm4486_vm5, %v9203_v27, %v13015_v63  ;;  %v13307_v47 = vpack.i.bf16 %v17638_v23, %v17707_v53  ;;  %v9139_v12 = vsel %vm4486_vm5, %v9107_v14, %v13016_v1 }
 0x6b9   : > { %13298 = vrot.lane.b32.xlu0 %v13297_v39, %s13384_s17  ;;  %v13025_v13 = vunpack.i.l.bf16 %v13024_v4  ;;  %v13019_v15 = vpop.permute.xlu0 %13018  ;;  %11475 = vmatmul.mubr.msk.f32.vlgmr.msra.gmra.mrb[96].mxu1 %vm551_vm2, %v17397_v51  ;;  %v13317_v41 = vpack.i.bf16 %v17652_v45, %v17709_v37  ;;  %v13026_v8 = vunpack.i.h.bf16 %v13024_v4 }
 0x6ba   : > { %v13021_v26 = vunpack.i.h.bf16 %v13019_v15  ;;  %v13020_v54 = vunpack.i.l.bf16 %v13019_v15  ;;  %9502 = vmatprep.mubr.f32.mxu0 %v9235_v33  ;;  %11477 = vmatprep.mubr.msk.f32.mxu1 %vm551_vm2, %v17427_v21  ;;  %v8150_v33 = vld [vmem:[#allocation3 + $0x99] sm:$0xff]  ;;  %v8266_v15 = vld [vmem:[#allocation3 + $0x1a1] sm:$0xff] }
 0x6bb   : > { %9503 = vmatmul.mubr.f32.gmra.mrb[176].mxu0 %v9139_v12  ;;  %13308 = vrot.lane.b32.xlu1 %v13307_v47, %s13387_s27  ;;  %v8022_v47 = vld [vmem:[#allocation3 + $0x80] sm:$0xff] }
 0x6bc   : > { %v13034_v51 = vpop.permute.xlu1 %13033  ;;  %v9204_v45 = vsel %vm4453_vm4, %v9172_v59, %v13020_v54  ;;  %v17728_v55 = vld [vmem:[#allocation3 + $0x188] sm:$0xff]  ;;  %v9108_v35 = vsel %vm4453_vm4, %v9076_v16, %v13021_v26  ;;  %v8234_v26 = vld [vmem:[#allocation3 + $0x1a0] sm:$0xff] }
 0x6bd   : > { %13318 = vrot.lane.b32.xlu0 %v13317_v41, %s13386_s30  ;;  %v13029_v21 = vpop.permute.xlu0 %13028  ;;  %11478 = vmatmul.mubr.msk.f32.gmra.mrb[98].mxu1 %vm551_vm2, %v17425_v5  ;;  %v9236_v19 = vsel %vm4486_vm5, %v9204_v45, %v13025_v13  ;;  %v13322_v46 = vpack.i.bf16 %v17632_v36, %v17728_v55  ;;  %v9140_v34 = vsel %vm4486_vm5, %v9108_v35, %v13026_v8  ;;  %v17741_v11 = vld [vmem:[#allocation3 + $0x189] sm:$0xff]  ;;  %v13036_v7 = vunpack.i.h.bf16 %v13034_v51 }
 0x6be   : > { %v13031_v60 = vunpack.i.h.bf16 %v13029_v21  ;;  %v13030_v10 = vunpack.i.l.bf16 %v13029_v21  ;;  %9507 = vmatprep.mubr.f32.mxu0 %v9236_v19  ;;  %11480 = vmatprep.mubr.msk.f32.mxu1 %vm551_vm2, %v17464_v6  ;;  %v17744_v30 = vld [vmem:[#allocation3 + $0x182] sm:$0xff]  ;;  %v13327_v6 = vpack.i.bf16 %v17678_v3, %v17741_v11  ;;  %v13035_v22 = vunpack.i.l.bf16 %v13034_v51  ;;  %v17758_v1 = vld [vmem:[#allocation3 + $0x18a] sm:$0xff] }
 0x6bf   : > { %9508 = vmatmul.mubr.f32.gmra.mrb[178].mxu0 %v9140_v34  ;;  %13313 = vrot.lane.b32.xlu1 %v13312_v57, %s13387_s27  ;;  %v13332_v9 = vpack.i.bf16 %v17654_v25, %v17744_v30  ;;  %v13342_v4 = vpack.i.bf16 %v17676_v56, %v17758_v1  ;;  %v9078_v41 = vsel %vm551_vm2, %v8022_v47, %v13036_v7  ;;  %v8151_v35 = vld [vmem:[#allocation3 + $0xa9] sm:$0xff] }
 0x6c0   : > { %v13039_v5 = vpop.permute.xlu1 %13038  ;;  %v9173_v18 = vsel %vm551_vm2, %v8149_v24, %v13030_v10  ;;  %v9077_v42 = vsel %vm551_vm2, %v8021_v43, %v13031_v60  ;;  %v9174_v13 = vsel %vm551_vm2, %v8150_v33, %v13035_v22  ;;  %v13352_v59 = vpack.i.bf16 %v17728_v55, %v8266_v15  ;;  %v8023_v21 = vld [vmem:[#allocation3 + $0x90] sm:$0xff]  ;;  %v8024_v43 = vld [vmem:[#allocation3 + $0x98] sm:$0xff] }
 0x6c1   : > { %13323 = vrot.lane.b32.xlu0 %v13322_v46, %s13387_s27  ;;  %v13041_v58 = vunpack.i.h.bf16 %v13039_v5  ;;  %v13040_v29 = vunpack.i.l.bf16 %v13039_v5  ;;  %v13044_v40 = vpop.permute.xlu0 %13043  ;;  %11481 = vmatmul.mubr.msk.f32.gmra.mrb[100].mxu1 %vm551_vm2, %v17462_v61  ;;  %v13347_v50 = vpack.i.bf16 %v17687_v32, %v8234_v26  ;;  %v8152_v24 = vld [vmem:[#allocation3 + $0xb1] sm:$0xff] }
 0x6c2   : > { %v13046_v49 = vunpack.i.h.bf16 %v13044_v40  ;;  %v13045_v2 = vunpack.i.l.bf16 %v13044_v40  ;;  %11483 = vmatprep.mubr.msk.f32.mxu1 %vm551_vm2, %v17524_v31  ;;  %v8265_v31 = vld [vmem:[#allocation3 + $0x199] sm:$0xff] }
 0x6c3   : > { %v9205_v61 = vsel %vm4453_vm4, %v9173_v18, %v13040_v29  ;;  %v9109_v3 = vsel %vm4453_vm4, %v9077_v42, %v13041_v58  ;;  %13328 = vrot.lane.b32.xlu1 %v13327_v6, %s13386_s30  ;;  %v13337_v12 = vpack.i.bf16 %v17707_v53, %v8265_v31  ;;  %v8297_v18 = vld [vmem:[#allocation3 + $0x19a] sm:$0xff] }
 0x6c4   : > { %v13054_v63 = vpop.permute.xlu1 %13053  ;;  %v9237_v20 = vsel %vm4486_vm5, %v9205_v61, %v13045_v2  ;;  %v9141_v0 = vsel %vm4486_vm5, %v9109_v3, %v13046_v49 }
 0x6c5   : > { %13333 = vrot.lane.b32.xlu0 %v13332_v9, %s13384_s17  ;;  %v13056_v17 = vunpack.i.h.bf16 %v13054_v63  ;;  %v13055_v39 = vunpack.i.l.bf16 %v13054_v63  ;;  %v13049_v27 = vpop.permute.xlu0 %13048  ;;  %11484 = vmatmul.mubr.msk.f32.gmra.mrb[102].mxu1 %vm551_vm2, %v17517_v38 }
 0x6c6   : > { %v13051_v25 = vunpack.i.h.bf16 %v13049_v27  ;;  %v13050_v14 = vunpack.i.l.bf16 %v13049_v27  ;;  %9512 = vmatprep.mubr.f32.mxu0 %v9237_v20  ;;  %11486 = vmatprep.mubr.msk.f32.mxu1 %vm551_vm2, %v17584_v44  ;;  %v8298_v20 = vld [vmem:[#allocation3 + $0x1a2] sm:$0xff] }
 0x6c7   : > { %9513 = vmatmul.mubr.f32.gmra.mrb[180].mxu0 %v9141_v0  ;;  %13343 = vrot.lane.b32.xlu1 %v13342_v4, %s13384_s17  ;;  %v8153_v27 = vld [vmem:[#allocation3 + $0xc1] sm:$0xff] }
 0x6c8   : > { %v13064_v38 = vpop.permute.xlu1 %13063  ;;  %v9206_v8 = vsel %vm4453_vm4, %v9174_v13, %v13050_v14  ;;  %v9110_v44 = vsel %vm4453_vm4, %v9078_v41, %v13051_v25  ;;  %v8025_v25 = vld [vmem:[#allocation3 + $0xa8] sm:$0xff] }
 0x6c9   : > { %13338 = vrot.lane.b32.xlu0 %v13337_v12, %s13386_s30  ;;  %v13059_v56 = vpop.permute.xlu0 %13058  ;;  %11487 = vmatmul.mubr.msk.f32.gmra.mrb[104].mxu1 %vm551_vm2, %v17578_v28  ;;  %v9238_v53 = vsel %vm4486_vm5, %v9206_v8, %v13055_v39  ;;  %v9142_v54 = vsel %vm4486_vm5, %v9110_v44, %v13056_v17  ;;  %v13066_v60 = vunpack.i.h.bf16 %v13064_v38  ;;  %v13065_v10 = vunpack.i.l.bf16 %v13064_v38 }
 0x6ca   : > { %v13061_v48 = vunpack.i.h.bf16 %v13059_v56  ;;  %v13060_v62 = vunpack.i.l.bf16 %v13059_v56  ;;  %9517 = vmatprep.mubr.f32.mxu0 %v9238_v53  ;;  %11489 = vmatprep.mubr.msk.f32.mxu1 %vm551_vm2, %v17638_v23 }
 0x6cb   : > { %9518 = vmatmul.mubr.f32.gmra.mrb[182].mxu0 %v9142_v54  ;;  %13353 = vrot.lane.b32.xlu1 %v13352_v59, %s13386_s30  ;;  %v9176_v49 = vsel %vm551_vm2, %v8152_v24, %v13065_v10  ;;  %v9080_v2 = vsel %vm551_vm2, %v8024_v43, %v13066_v60 }
 0x6cc   : > { %v13069_v16 = vpop.permute.xlu1 %13068  ;;  %v9175_v55 = vsel %vm551_vm2, %v8151_v35, %v13060_v62  ;;  %v9079_v46 = vsel %vm551_vm2, %v8023_v21, %v13061_v48  ;;  %v8154_v48 = vld [vmem:[#allocation3 + $0xc9] sm:$0xff] }
 0x6cd   : > { %13348 = vrot.lane.b32.xlu0 %v13347_v50, %s13387_s27  ;;  %v13071_v28 = vunpack.i.h.bf16 %v13069_v16  ;;  %v13070_v51 = vunpack.i.l.bf16 %v13069_v16  ;;  %v13074_v45 = vpop.permute.xlu0 %13073  ;;  %11490 = vmatmul.mubr.msk.f32.gmra.mrb[106].mxu1 %vm551_vm2, %v17632_v36  ;;  %v8026_v62 = vld [vmem:[#allocation3 + $0xb0] sm:$0xff]  ;;  %s18174_s27 = scalar_lea.vmem %s18290_s15, %s18356_s26 }
 0x6ce   : > { %v13076_v19 = vunpack.i.h.bf16 %v13074_v45  ;;  %v13075_v23 = vunpack.i.l.bf16 %v13074_v45  ;;  %11492 = vmatprep.mubr.msk.f32.mxu1 %vm551_vm2, %v17691_v52 }
 0x6cf   : > { %v9207_v57 = vsel %vm4453_vm4, %v9175_v55, %v13070_v51  ;;  %v9111_v34 = vsel %vm4453_vm4, %v9079_v46, %v13071_v28 }
 0x6d0   : > { %v13084_v5 = vpop.permute.xlu1 %13083  ;;  %v9239_v36 = vsel %vm4486_vm5, %v9207_v57, %v13075_v23  ;;  %v9143_v7 = vsel %vm4486_vm5, %v9111_v34, %v13076_v19  ;;  %v8155_v57 = vld [vmem:[#allocation3 + $0xd9] sm:$0xff] }
 0x6d1   : > { %v13086_v58 = vunpack.i.h.bf16 %v13084_v5  ;;  %v13085_v29 = vunpack.i.l.bf16 %v13084_v5  ;;  %v13079_v40 = vpop.permute.xlu0 %13078  ;;  %11493 = vmatmul.mubr.msk.f32.gmra.mrb[108].mxu1 %vm551_vm2, %v17687_v32  ;;  %9522 = vmatprep.mubr.f32.mxu0 %v9239_v36  ;;  %v8027_v34 = vld [vmem:[#allocation3 + $0xc0] sm:$0xff] }
 0x6d2   : > { %v13081_v52 = vunpack.i.h.bf16 %v13079_v40  ;;  %v13080_v6 = vunpack.i.l.bf16 %v13079_v40  ;;  %11495 = vmatprep.mubr.msk.f32.mxu1 %vm551_vm2, %v17744_v30  ;;  %9523 = vmatmul.mubr.f32.gmra.mrb[184].mxu0 %v9143_v7 }
 0x6d4   : > { %v13094_v42 = vpop.permute.xlu1 %13093  ;;  %v9208_v22 = vsel %vm4453_vm4, %v9176_v49, %v13080_v6  ;;  %v9112_v9 = vsel %vm4453_vm4, %v9080_v2, %v13081_v52 }
 0x6d5   : > { %v13089_v32 = vpop.permute.xlu0 %13088  ;;  %11496 = vmatmul.mubr.msk.f32.gmra.mrb[110].mxu1 %vm551_vm2, %v17758_v1  ;;  %v9240_v61 = vsel %vm4486_vm5, %v9208_v22, %v13085_v29  ;;  %v9144_v30 = vsel %vm4486_vm5, %v9112_v9, %v13086_v58  ;;  %v13096_v47 = vunpack.i.h.bf16 %v13094_v42  ;;  %v13095_v12 = vunpack.i.l.bf16 %v13094_v42 }
 0x6d6   : > { %v13091_v3 = vunpack.i.h.bf16 %v13089_v32  ;;  %v13090_v63 = vunpack.i.l.bf16 %v13089_v32  ;;  %9527 = vmatprep.mubr.f32.mxu0 %v9240_v61  ;;  %11498 = vmatprep.mubr.msk.f32.mxu1 %vm551_vm2, %v8297_v18  ;;  %v8156_v32 = vld [vmem:[#allocation3 + $0xe1] sm:$0xff] }
 0x6d7   : > { %9528 = vmatmul.mubr.f32.gmra.mrb[186].mxu0 %v9144_v30  ;;  %v9178_v59 = vsel %vm551_vm2, %v8154_v48, %v13095_v12  ;;  %v9082_v50 = vsel %vm551_vm2, %v8026_v62, %v13096_v47  ;;  %v8028_v61 = vld [vmem:[#allocation3 + $0xc8] sm:$0xff]  ;;  %v8157_v47 = vld [vmem:[#allocation3 + $0xf1] sm:$0xff] }
 0x6d8   : > { %v13099_v31 = vpop.permute.xlu1 %13098  ;;  %v9177_v4 = vsel %vm551_vm2, %v8153_v27, %v13090_v63  ;;  %v9081_v33 = vsel %vm551_vm2, %v8025_v25, %v13091_v3  ;;  %v8029_v12 = vld [vmem:[#allocation3 + $0xd8] sm:$0xff] }
 0x6d9   : > { %v13101_v0 = vunpack.i.h.bf16 %v13099_v31  ;;  %v13100_v17 = vunpack.i.l.bf16 %v13099_v31  ;;  %v13104_v39 = vpop.permute.xlu0 %13103  ;;  %11499 = vmatmul.mubr.msk.f32.gmra.mrb[112].mxu1 %vm551_vm2, %v8298_v20 }
 0x6da   : > { %v13106_v1 = vunpack.i.h.bf16 %v13104_v39  ;;  %v13105_v14 = vunpack.i.l.bf16 %v13104_v39 }
 0x6db   : > { %v9209_v13 = vsel %vm4453_vm4, %v9177_v4, %v13100_v17  ;;  %v9113_v15 = vsel %vm4453_vm4, %v9081_v33, %v13101_v0 }
 0x6dc   : > { %v13114_v41 = vpop.permute.xlu1 %13113  ;;  %v9241_v38 = vsel %vm4486_vm5, %v9209_v13, %v13105_v14  ;;  %v9145_v8 = vsel %vm4486_vm5, %v9113_v15, %v13106_v1 }
 0x6dd   : > { %v13116_v26 = vunpack.i.h.bf16 %v13114_v41  ;;  %v13115_v44 = vunpack.i.l.bf16 %v13114_v41  ;;  %v13109_v56 = vpop.permute.xlu0 %13108  ;;  %9532 = vmatprep.mubr.f32.mxu0 %v9241_v38 }
 0x6de   : > { %v13111_v53 = vunpack.i.h.bf16 %v13109_v56  ;;  %v13110_v54 = vunpack.i.l.bf16 %v13109_v56  ;;  %9533 = vmatmul.mubr.f32.gmra.mrb[188].mxu0 %v9145_v8 }
 0x6e0   : > { %v13124_v16 = vpop.permute.xlu1 %13123  ;;  %v9210_v28 = vsel %vm4453_vm4, %v9178_v59, %v13110_v54  ;;  %v9114_v51 = vsel %vm4453_vm4, %v9082_v50, %v13111_v53 }
 0x6e1   : > { %v13119_v45 = vpop.permute.xlu0 %13118  ;;  %v9242_v35 = vsel %vm4486_vm5, %v9210_v28, %v13115_v44  ;;  %v9146_v21 = vsel %vm4486_vm5, %v9114_v51, %v13116_v26  ;;  %v13126_v29 = vunpack.i.h.bf16 %v13124_v16  ;;  %v13125_v40 = vunpack.i.l.bf16 %v13124_v16  ;;  %v8158_v51 = vld [vmem:[#allocation3 + $0xf9] sm:$0xff] }
 0x6e2   : > { %v13121_v19 = vunpack.i.h.bf16 %v13119_v45  ;;  %v13120_v23 = vunpack.i.l.bf16 %v13119_v45  ;;  %9537 = vmatprep.mubr.f32.mxu0 %v9242_v35  ;;  %v8030_v45 = vld [vmem:[#allocation3 + $0xe0] sm:$0xff] }
 0x6e3   : > { %9538 = vmatmul.mubr.f32.gmra.mrb[190].mxu0 %v9146_v21  ;;  %v9180_v30 = vsel %vm551_vm2, %v8156_v32, %v13125_v40  ;;  %v9084_v3 = vsel %vm551_vm2, %v8028_v61, %v13126_v29 }
 0x6e4   : > { %v13129_v55 = vpop.permute.xlu1 %13128  ;;  %v9179_v7 = vsel %vm551_vm2, %v8155_v57, %v13120_v23  ;;  %v9083_v58 = vsel %vm551_vm2, %v8027_v34, %v13121_v19 }
 0x6e5   : > { %v13131_v46 = vunpack.i.h.bf16 %v13129_v55  ;;  %v13130_v60 = vunpack.i.l.bf16 %v13129_v55  ;;  %v13134_v10 = vpop.permute.xlu0 %13133 }
 0x6e6   : > { %v13136_v5 = vunpack.i.h.bf16 %v13134_v10  ;;  %v13135_v36 = vunpack.i.l.bf16 %v13134_v10 }
 0x6e7   : > { %v9211_v52 = vsel %vm4453_vm4, %v9179_v7, %v13130_v60  ;;  %v9115_v6 = vsel %vm4453_vm4, %v9083_v58, %v13131_v46 }
 0x6e8   : > { %v13144_v24 = vpop.permute.xlu1 %13143  ;;  %v9243_v43 = vsel %vm4486_vm5, %v9211_v52, %v13135_v36  ;;  %v9147_v49 = vsel %vm4486_vm5, %v9115_v6, %v13136_v5  ;;  %v8159_v52 = vld [vmem:[#allocation3 + $0x109] sm:$0xff] }
 0x6e9   : > { %v13146_v2 = vunpack.i.h.bf16 %v13144_v24  ;;  %v13145_v18 = vunpack.i.l.bf16 %v13144_v24  ;;  %v13139_v42 = vpop.permute.xlu0 %13138  ;;  %9542 = vmatprep.mubr.f32.mxu0 %v9243_v43  ;;  %v8031_v6 = vld [vmem:[#allocation3 + $0xf0] sm:$0xff] }
 0x6ea   : > { %v13141_v22 = vunpack.i.h.bf16 %v13139_v42  ;;  %v13140_v9 = vunpack.i.l.bf16 %v13139_v42  ;;  %9543 = vmatmul.mubr.f32.gmra.mrb[192].mxu0 %v9147_v49 }
 0x6ec   : > { %v13154_v63 = vpop.permute.xlu1 %13153  ;;  %v9212_v20 = vsel %vm4453_vm4, %v9180_v30, %v13140_v9  ;;  %v9116_v31 = vsel %vm4453_vm4, %v9084_v3, %v13141_v22 }
 0x6ed   : > { %v13149_v0 = vpop.permute.xlu0 %13148  ;;  %v9244_v17 = vsel %vm4486_vm5, %v9212_v20, %v13145_v18  ;;  %v9148_v39 = vsel %vm4486_vm5, %v9116_v31, %v13146_v2  ;;  %v13156_v8 = vunpack.i.h.bf16 %v13154_v63  ;;  %v13155_v26 = vunpack.i.l.bf16 %v13154_v63  ;;  %v8160_v31 = vld [vmem:[#allocation3 + $0x111] sm:$0xff] }
 0x6ee   : > { %v13151_v27 = vunpack.i.h.bf16 %v13149_v0  ;;  %v13150_v25 = vunpack.i.l.bf16 %v13149_v0  ;;  %9547 = vmatprep.mubr.f32.mxu0 %v9244_v17  ;;  %v8032_v0 = vld [vmem:[#allocation3 + $0xf8] sm:$0xff] }
 0x6ef   : > { %9548 = vmatmul.mubr.f32.gmra.mrb[194].mxu0 %v9148_v39  ;;  %v9182_v35 = vsel %vm551_vm2, %v8158_v51, %v13155_v26  ;;  %v9086_v21 = vsel %vm551_vm2, %v8030_v45, %v13156_v8  ;;  %v8161_v8 = vld [vmem:[#allocation3 + $0x121] sm:$0xff] }
 0x6f0   : > { %v13159_v1 = vpop.permute.xlu1 %13158  ;;  %v9181_v41 = vsel %vm551_vm2, %v8157_v47, %v13150_v25  ;;  %v9085_v38 = vsel %vm551_vm2, %v8029_v12, %v13151_v27  ;;  %v8033_v26 = vld [vmem:[#allocation3 + $0x108] sm:$0xff] }
 0x6f1   : > { %v13161_v14 = vunpack.i.h.bf16 %v13159_v1  ;;  %v13160_v4 = vunpack.i.l.bf16 %v13159_v1  ;;  %v13164_v33 = vpop.permute.xlu0 %13163 }
 0x6f2   : > { %v13166_v13 = vunpack.i.h.bf16 %v13164_v33  ;;  %v13165_v15 = vunpack.i.l.bf16 %v13164_v33 }
 0x6f3   : > { %v9213_v44 = vsel %vm4453_vm4, %v9181_v41, %v13160_v4  ;;  %v9117_v56 = vsel %vm4453_vm4, %v9085_v38, %v13161_v14 }
 0x6f4   : > { %v9245_v53 = vsel %vm4486_vm5, %v9213_v44, %v13165_v15  ;;  %v9149_v54 = vsel %vm4486_vm5, %v9117_v56, %v13166_v13 }
 0x6f5   : > { %v13174_v48 = vpop.permute.xlu1 %13173  ;;  %9552 = vmatprep.mubr.f32.mxu0 %v9245_v53 }
 0x6f6   : > { %v13169_v62 = vpop.permute.xlu0 %13168  ;;  %v13176_v59 = vunpack.i.h.bf16 %v13174_v48  ;;  %v13175_v50 = vunpack.i.l.bf16 %v13174_v48  ;;  %9553 = vmatmul.mubr.f32.gmra.mrb[196].mxu0 %v9149_v54 }
 0x6f7   : > { %v13171_v16 = vunpack.i.h.bf16 %v13169_v62  ;;  %v13170_v28 = vunpack.i.l.bf16 %v13169_v62 }
 0x6f9   : > { %v9214_v19 = vsel %vm4453_vm4, %v9182_v35, %v13170_v28  ;;  %v9118_v23 = vsel %vm4453_vm4, %v9086_v21, %v13171_v16  ;;  %v13184_v55 = vpop.permute.xlu1 %13183 }
 0x6fa   : > { %v13179_v46 = vpop.permute.xlu0 %13178  ;;  %v9246_v60 = vsel %vm4486_vm5, %v9214_v19, %v13175_v50  ;;  %v9150_v10 = vsel %vm4486_vm5, %v9118_v23, %v13176_v59  ;;  %v13186_v18 = vunpack.i.h.bf16 %v13184_v55  ;;  %v13185_v42 = vunpack.i.l.bf16 %v13184_v55  ;;  %v8162_v55 = vld [vmem:[#allocation3 + $0x129] sm:$0xff] }
 0x6fb   : > { %9557 = vmatprep.mubr.f32.mxu0 %v9246_v60  ;;  %v13181_v57 = vunpack.i.h.bf16 %v13179_v46  ;;  %v13180_v34 = vunpack.i.l.bf16 %v13179_v46  ;;  %v8034_v46 = vld [vmem:[#allocation3 + $0x110] sm:$0xff] }
 0x6fc   : > { %9558 = vmatmul.mubr.f32.gmra.mrb[198].mxu0 %v9150_v10  ;;  %v9184_v17 = vsel %vm551_vm2, %v8160_v31, %v13185_v42  ;;  %v9088_v39 = vsel %vm551_vm2, %v8032_v0, %v13186_v18 }
 0x6fd   : > { %v13189_v5 = vpop.permute.xlu1 %13188  ;;  %v9183_v24 = vsel %vm551_vm2, %v8159_v52, %v13180_v34  ;;  %v9087_v43 = vsel %vm551_vm2, %v8031_v6, %v13181_v57 }
 0x6fe   : > { %v13194_v36 = vpop.permute.xlu0 %13193  ;;  %v13191_v7 = vunpack.i.h.bf16 %v13189_v5  ;;  %v13190_v58 = vunpack.i.l.bf16 %v13189_v5 }
 0x6ff   : > { %v13196_v29 = vunpack.i.h.bf16 %v13194_v36  ;;  %v13195_v40 = vunpack.i.l.bf16 %v13194_v36 }
 0x700   : > { %v9215_v49 = vsel %vm4453_vm4, %v9183_v24, %v13190_v58  ;;  %v9119_v2 = vsel %vm4453_vm4, %v9087_v43, %v13191_v7 }
 0x701   : > { %v9247_v22 = vsel %vm4486_vm5, %v9215_v49, %v13195_v40  ;;  %v9151_v9 = vsel %vm4486_vm5, %v9119_v2, %v13196_v29  ;;  %v13204_v32 = vpop.permute.xlu1 %13203  ;;  %v8163_v49 = vld [vmem:[#allocation3 + $0x139] sm:$0xff] }
 0x702   : > { %9562 = vmatprep.mubr.f32.mxu0 %v9247_v22  ;;  %v13206_v61 = vunpack.i.h.bf16 %v13204_v32  ;;  %v13205_v30 = vunpack.i.l.bf16 %v13204_v32  ;;  %v8035_v2 = vld [vmem:[#allocation3 + $0x120] sm:$0xff] }
 0x703   : > { %v13199_v3 = vpop.permute.xlu0 %13198  ;;  %9563 = vmatmul.mubr.f32.gmra.mrb[200].mxu0 %v9151_v9 }
 0x704   : > { %v13201_v63 = vunpack.i.h.bf16 %v13199_v3  ;;  %v13200_v20 = vunpack.i.l.bf16 %v13199_v3 }
 0x705   : > { %v13214_v27 = vpop.permute.xlu1 %13213 }
 0x706   : > { %v9216_v25 = vsel %vm4453_vm4, %v9184_v17, %v13200_v20  ;;  %v9120_v1 = vsel %vm4453_vm4, %v9088_v39, %v13201_v63  ;;  %v13216_v48 = vunpack.i.h.bf16 %v13214_v27  ;;  %v13215_v62 = vunpack.i.l.bf16 %v13214_v27 }
 0x707   : > { %v13209_v14 = vpop.permute.xlu0 %13208  ;;  %v9248_v4 = vsel %vm4486_vm5, %v9216_v25, %v13205_v30  ;;  %v9152_v33 = vsel %vm4486_vm5, %v9120_v1, %v13206_v61  ;;  %v8164_v1 = vld [vmem:[#allocation3 + $0x141] sm:$0xff] }
 0x708   : > { %v13211_v47 = vunpack.i.h.bf16 %v13209_v14  ;;  %v13210_v12 = vunpack.i.l.bf16 %v13209_v14  ;;  %9567 = vmatprep.mubr.f32.mxu0 %v9248_v4  ;;  %v9186_v60 = vsel %vm551_vm2, %v8162_v55, %v13215_v62  ;;  %v9090_v10 = vsel %vm551_vm2, %v8034_v46, %v13216_v48  ;;  %v8036_v14 = vld [vmem:[#allocation3 + $0x128] sm:$0xff]  ;;  %v8165_v48 = vld [vmem:[#allocation3 + $0x151] sm:$0xff] }
 0x709   : > { %9568 = vmatmul.mubr.f32.gmra.mrb[202].mxu0 %v9152_v33  ;;  %v13219_v13 = vpop.permute.xlu1 %13218  ;;  %v8037_v62 = vld [vmem:[#allocation3 + $0x138] sm:$0xff] }
 0x70a   : > { %v13221_v15 = vunpack.i.h.bf16 %v13219_v13  ;;  %v13220_v41 = vunpack.i.l.bf16 %v13219_v13  ;;  %v9185_v53 = vsel %vm551_vm2, %v8161_v8, %v13210_v12  ;;  %v9089_v54 = vsel %vm551_vm2, %v8033_v26, %v13211_v47 }
 0x70b   : > { %v13224_v38 = vpop.permute.xlu0 %13223 }
 0x70c   : > { %v13226_v44 = vunpack.i.h.bf16 %v13224_v38  ;;  %v13225_v56 = vunpack.i.l.bf16 %v13224_v38  ;;  %v9217_v59 = vsel %vm4453_vm4, %v9185_v53, %v13220_v41  ;;  %v9121_v50 = vsel %vm4453_vm4, %v9089_v54, %v13221_v15 }
 0x70d   : > { %v13234_v16 = vpop.permute.xlu1 %13233 }
 0x70e   : > { %v9249_v28 = vsel %vm4486_vm5, %v9217_v59, %v13225_v56  ;;  %v9153_v51 = vsel %vm4486_vm5, %v9121_v50, %v13226_v44  ;;  %v13236_v45 = vunpack.i.h.bf16 %v13234_v16  ;;  %v13235_v35 = vunpack.i.l.bf16 %v13234_v16 }
 0x70f   : > { %v13229_v21 = vpop.permute.xlu0 %13228  ;;  %9572 = vmatprep.mubr.f32.mxu0 %v9249_v28 }
 0x710   : > { %v13231_v19 = vunpack.i.h.bf16 %v13229_v21  ;;  %v13230_v23 = vunpack.i.l.bf16 %v13229_v21  ;;  %9573 = vmatmul.mubr.f32.gmra.mrb[204].mxu0 %v9153_v51 }
 0x711   : > { %v13244_v57 = vpop.permute.xlu1 %13243 }
 0x712   : > { %v9218_v34 = vsel %vm4453_vm4, %v9186_v60, %v13230_v23  ;;  %v9122_v5 = vsel %vm4453_vm4, %v9090_v10, %v13231_v19  ;;  %v13246_v32 = vunpack.i.h.bf16 %v13244_v57  ;;  %v13245_v61 = vunpack.i.l.bf16 %v13244_v57 }
 0x713   : > { %v13239_v36 = vpop.permute.xlu0 %13238  ;;  %v9250_v7 = vsel %vm4486_vm5, %v9218_v34, %v13235_v35  ;;  %v9154_v58 = vsel %vm4486_vm5, %v9122_v5, %v13236_v45  ;;  %v8166_v5 = vld [vmem:[#allocation3 + $0x159] sm:$0xff] }
 0x714   : > { %v13241_v29 = vunpack.i.h.bf16 %v13239_v36  ;;  %v13240_v40 = vunpack.i.l.bf16 %v13239_v36  ;;  %9577 = vmatprep.mubr.f32.mxu0 %v9250_v7  ;;  %v9188_v4 = vsel %vm551_vm2, %v8164_v1, %v13245_v61  ;;  %v9092_v33 = vsel %vm551_vm2, %v8036_v14, %v13246_v32  ;;  %v8038_v36 = vld [vmem:[#allocation3 + $0x140] sm:$0xff]  ;;  %v8167_v32 = vld [vmem:[#allocation3 + $0x169] sm:$0xff] }
 0x715   : > { %9578 = vmatmul.mubr.f32.gmra.mrb[206].mxu0 %v9154_v58  ;;  %v13249_v52 = vpop.permute.xlu1 %13248  ;;  %v8039_v61 = vld [vmem:[#allocation3 + $0x150] sm:$0xff] }
 0x716   : > { %v13251_v6 = vunpack.i.h.bf16 %v13249_v52  ;;  %v13250_v24 = vunpack.i.l.bf16 %v13249_v52  ;;  %v9187_v22 = vsel %vm551_vm2, %v8163_v49, %v13240_v40  ;;  %v9091_v9 = vsel %vm551_vm2, %v8035_v2, %v13241_v29 }
 0x717   : > { %v13254_v43 = vpop.permute.xlu0 %13253 }
 0x718   : > { %v13256_v18 = vunpack.i.h.bf16 %v13254_v43  ;;  %v13255_v42 = vunpack.i.l.bf16 %v13254_v43  ;;  %v9219_v30 = vsel %vm4453_vm4, %v9187_v22, %v13250_v24  ;;  %v9123_v3 = vsel %vm4453_vm4, %v9091_v9, %v13251_v6 }
 0x719   : > { %v13264_v63 = vpop.permute.xlu1 %13263 }
 0x71a   : > { %v9251_v20 = vsel %vm4486_vm5, %v9219_v30, %v13255_v42  ;;  %v9155_v31 = vsel %vm4486_vm5, %v9123_v3, %v13256_v18  ;;  %v13266_v0 = vunpack.i.h.bf16 %v13264_v63  ;;  %v13265_v17 = vunpack.i.l.bf16 %v13264_v63 }
 0x71b   : > { %v13259_v39 = vpop.permute.xlu0 %13258  ;;  %9582 = vmatprep.mubr.f32.mxu0 %v9251_v20 }
 0x71c   : > { %v13261_v27 = vunpack.i.h.bf16 %v13259_v39  ;;  %v13260_v25 = vunpack.i.l.bf16 %v13259_v39  ;;  %9583 = vmatmul.mubr.f32.gmra.mrb[208].mxu0 %v9155_v31 }
 0x71d   : > { %v13274_v47 = vpop.permute.xlu1 %13273 }
 0x71e   : > { %v9220_v12 = vsel %vm4453_vm4, %v9188_v4, %v13260_v25  ;;  %v9124_v13 = vsel %vm4453_vm4, %v9092_v33, %v13261_v27  ;;  %v13276_v51 = vunpack.i.h.bf16 %v13274_v47  ;;  %v13275_v45 = vunpack.i.l.bf16 %v13274_v47 }
 0x71f   : > { %v13269_v15 = vpop.permute.xlu0 %13268  ;;  %v9252_v41 = vsel %vm4486_vm5, %v9220_v12, %v13265_v17  ;;  %v9156_v38 = vsel %vm4486_vm5, %v9124_v13, %v13266_v0  ;;  %v8168_v12 = vld [vmem:[#allocation3 + $0x171] sm:$0xff] }
 0x720   : > { %v13271_v8 = vunpack.i.h.bf16 %v13269_v15  ;;  %v13270_v26 = vunpack.i.l.bf16 %v13269_v15  ;;  %9587 = vmatprep.mubr.f32.mxu0 %v9252_v41  ;;  %v9190_v7 = vsel %vm551_vm2, %v8166_v5, %v13275_v45  ;;  %v9094_v58 = vsel %vm551_vm2, %v8038_v36, %v13276_v51  ;;  %v8040_v13 = vld [vmem:[#allocation3 + $0x158] sm:$0xff] }
 0x721   : > { %9588 = vmatmul.mubr.f32.gmra.mrb[210].mxu0 %v9156_v38  ;;  %v13279_v44 = vpop.permute.xlu1 %13278 }
 0x722   : > { %v13281_v56 = vunpack.i.h.bf16 %v13279_v44  ;;  %v13280_v53 = vunpack.i.l.bf16 %v13279_v44  ;;  %v9189_v16 = vsel %vm551_vm2, %v8165_v48, %v13270_v26  ;;  %v9093_v28 = vsel %vm551_vm2, %v8037_v62, %v13271_v8 }
 0x723   : > { %v13284_v54 = vpop.permute.xlu0 %13283 }
 0x724   : > { %v13286_v59 = vunpack.i.h.bf16 %v13284_v54  ;;  %v13285_v50 = vunpack.i.l.bf16 %v13284_v54  ;;  %v9221_v35 = vsel %vm4453_vm4, %v9189_v16, %v13280_v53  ;;  %v9125_v21 = vsel %vm4453_vm4, %v9093_v28, %v13281_v56 }
 0x725   : > { %v13294_v19 = vpop.permute.xlu1 %13293 }
 0x726   : > { %v9253_v23 = vsel %vm4486_vm5, %v9221_v35, %v13285_v50  ;;  %v9157_v55 = vsel %vm4486_vm5, %v9125_v21, %v13286_v59  ;;  %v13296_v46 = vunpack.i.h.bf16 %v13294_v19  ;;  %v13295_v60 = vunpack.i.l.bf16 %v13294_v19  ;;  %v8041_v59 = vld [vmem:[#allocation3 + $0x168] sm:$0xff] }
 0x727   : > { %v13289_v10 = vpop.permute.xlu0 %13288  ;;  %9592 = vmatprep.mubr.f32.mxu0 %v9253_v23 }
 0x728   : > { %v13291_v57 = vunpack.i.h.bf16 %v13289_v10  ;;  %v13290_v34 = vunpack.i.l.bf16 %v13289_v10  ;;  %9593 = vmatmul.mubr.f32.gmra.mrb[212].mxu0 %v9157_v55 }
 0x729   : > { %v13304_v29 = vpop.permute.xlu1 %13303 }
 0x72a   : > { %v9222_v40 = vsel %vm4453_vm4, %v9190_v7, %v13290_v34  ;;  %v9126_v52 = vsel %vm4453_vm4, %v9094_v58, %v13291_v57  ;;  %v13306_v25 = vunpack.i.h.bf16 %v13304_v29  ;;  %v13305_v1 = vunpack.i.l.bf16 %v13304_v29  ;;  %v8042_v29 = vld [vmem:[#allocation3 + $0x170] sm:$0xff] }
 0x72b   : > { %v13299_v6 = vpop.permute.xlu0 %13298  ;;  %v9254_v24 = vsel %vm4486_vm5, %v9222_v40, %v13295_v60  ;;  %v9158_v43 = vsel %vm4486_vm5, %v9126_v52, %v13296_v46 }
 0x72c   : > { %v13301_v49 = vunpack.i.h.bf16 %v13299_v6  ;;  %v13300_v2 = vunpack.i.l.bf16 %v13299_v6  ;;  %9597 = vmatprep.mubr.f32.mxu0 %v9254_v24  ;;  %v9192_v8 = vsel %vm551_vm2, %v8168_v12, %v13305_v1  ;;  %v9096_v26 = vsel %vm551_vm2, %v8040_v13, %v13306_v25 }
 0x72d   : > { %9598 = vmatmul.mubr.f32.gmra.mrb[214].mxu0 %v9158_v43  ;;  %v13309_v18 = vpop.permute.xlu1 %13308 }
 0x72e   : > { %v13311_v42 = vunpack.i.h.bf16 %v13309_v18  ;;  %v13310_v22 = vunpack.i.l.bf16 %v13309_v18  ;;  %v9191_v63 = vsel %vm551_vm2, %v8167_v32, %v13300_v2  ;;  %v9095_v20 = vsel %vm551_vm2, %v8039_v61, %v13301_v49  ;;  %v8267_v2 = vld [vmem:[#allocation3 + $0x32] sm:$0xff]  ;;  %v8268_v18 = vld [vmem:[#allocation3 + $0x3a] sm:$0xff]  ;;  %v8274_v61 = vld [vmem:[#allocation3 + $0x82] sm:$0xff] }
 0x72f   : > { %v13319_v9 = vpop.permute.xlu0 %13318  ;;  %v8273_v32 = vld [vmem:[#allocation3 + $0x7a] sm:$0xff] }
 0x730   : > { %v13321_v30 = vunpack.i.h.bf16 %v13319_v9  ;;  %v13320_v3 = vunpack.i.l.bf16 %v13319_v9  ;;  %v9223_v31 = vsel %vm4453_vm4, %v9191_v63, %v13310_v22  ;;  %v9127_v0 = vsel %vm4453_vm4, %v9095_v20, %v13311_v42  ;;  %v8269_v42 = vld [vmem:[#allocation3 + $0x4a] sm:$0xff]  ;;  %v8271_v22 = vld [vmem:[#allocation3 + $0x62] sm:$0xff]  ;;  %v8278_v20 = vld [vmem:[#allocation3 + $0xb2] sm:$0xff] }
 0x731   : > { %v13314_v17 = vpop.permute.xlu1 %13313  ;;  %v8272_v9 = vld [vmem:[#allocation3 + $0x6a] sm:$0xff] }
 0x732   : > { %v9255_v39 = vsel %vm4486_vm5, %v9223_v31, %v13320_v3  ;;  %v9159_v27 = vsel %vm4486_vm5, %v9127_v0, %v13321_v30  ;;  %v13316_v51 = vunpack.i.h.bf16 %v13314_v17  ;;  %v13315_v45 = vunpack.i.l.bf16 %v13314_v17  ;;  %v8275_v30 = vld [vmem:[#allocation3 + $0x92] sm:$0xff]  ;;  %v8276_v3 = vld [vmem:[#allocation3 + $0x9a] sm:$0xff]  ;;  %v8277_v63 = vld [vmem:[#allocation3 + $0xaa] sm:$0xff] }
 0x733   : > { %v13324_v14 = vpop.permute.xlu0 %13323  ;;  %9602 = vmatprep.mubr.f32.mxu0 %v9255_v39  ;;  %v8279_v31 = vld [vmem:[#allocation3 + $0xc2] sm:$0xff]  ;;  %v8280_v39 = vld [vmem:[#allocation3 + $0xca] sm:$0xff] }
 0x734   : > { %v13326_v4 = vunpack.i.h.bf16 %v13324_v14  ;;  %v13325_v33 = vunpack.i.l.bf16 %v13324_v14  ;;  %9603 = vmatmul.mubr.f32.gmra.mrb[216].mxu0 %v9159_v27 }
 0x735   : > { %v13329_v47 = vpop.permute.xlu1 %13328 }
 0x736   : > { %v13331_v15 = vunpack.i.h.bf16 %v13329_v47  ;;  %v13330_v41 = vunpack.i.l.bf16 %v13329_v47  ;;  %v9224_v53 = vsel %vm4453_vm4, %v9192_v8, %v13325_v33  ;;  %v9128_v54 = vsel %vm4453_vm4, %v9096_v26, %v13326_v4 }
 0x737   : > { %v13334_v38 = vpop.permute.xlu0 %13333 }
 0x738   : > { %v13336_v44 = vunpack.i.h.bf16 %v13334_v38  ;;  %v13335_v56 = vunpack.i.l.bf16 %v13334_v38  ;;  %v9256_v48 = vsel %vm4486_vm5, %v9224_v53, %v13330_v41  ;;  %v9160_v62 = vsel %vm4486_vm5, %v9128_v54, %v13331_v15  ;;  %v9944_v41 = vld [vmem:[%s18288_s13] sm:$0xff]  ;;  %v9945_v38 = vld [vmem:[%s18288_s13 + $0x8] sm:$0xff] }
 0x739   : > { %v13344_v50 = vpop.permute.xlu1 %13343  ;;  %9607 = vmatprep.mubr.f32.mxu0 %v9256_v48  ;;  %v11757_v26 = vpack.c.bf16 %v9945_v38, %v9944_v41 }
 0x73a   : > { %v9193_v16 = vsel %vm551_vm2, %v17709_v37, %v13335_v56  ;;  %v9097_v28 = vsel %vm551_vm2, %v8041_v59, %v13336_v44  ;;  %9608 = vmatmul.mubr.f32.gmra.mrb[218].mxu0 %v9160_v62  ;;  %v13346_v23 = vunpack.i.h.bf16 %v13344_v50  ;;  %v13345_v55 = vunpack.i.l.bf16 %v13344_v50 }
 0x73b   : > { %v13339_v35 = vpop.permute.xlu0 %13338  ;;  %v9225_v46 = vsel %vm4453_vm4, %v9193_v16, %v13315_v45  ;;  %v9129_v60 = vsel %vm4453_vm4, %v9097_v28, %v13316_v51  ;;  %11758 = vmatprep.subr.bf16.mxu1 %v11757_v26  ;;  %v9946_v45 = vld [vmem:[%s18288_s13 + $0x10] sm:$0xff] }
 0x73c   : > { %v13341_v21 = vunpack.i.h.bf16 %v13339_v35  ;;  %v13340_v19 = vunpack.i.l.bf16 %v13339_v35  ;;  %v9194_v40 = vsel %vm551_vm2, %v17741_v11, %v13345_v55  ;;  %v9098_v52 = vsel %vm551_vm2, %v8042_v29, %v13346_v23  ;;  %v8270_v11 = vld [vmem:[#allocation3 + $0x52] sm:$0xff]  ;;  %11760 = vmatpush3.bf16.msra.mxu1 %v11757_v26  ;;  %v9947_v35 = vld [vmem:[%s18288_s13 + $0x18] sm:$0xff] }
 0x73d   : > { %v13354_v10 = vpop.permute.xlu1 %13353 }
 0x73e   : > { %v9257_v57 = vsel %vm4486_vm5, %v9225_v46, %v13340_v19  ;;  %v9161_v34 = vsel %vm4486_vm5, %v9129_v60, %v13341_v21  ;;  %v13356_v37 = vunpack.i.h.bf16 %v13354_v10  ;;  %v13355_v5 = vunpack.i.l.bf16 %v13354_v10 }
 0x73f   : > { %v13349_v36 = vpop.permute.xlu0 %13348  ;;  %9612 = vmatprep.mubr.f32.mxu0 %v9257_v57  ;;  %v11761_v19 = vpack.c.bf16 %v9947_v35, %v9946_v45 }
 0x740   : > { %v13351_v7 = vunpack.i.h.bf16 %v13349_v36  ;;  %v13350_v58 = vunpack.i.l.bf16 %v13349_v36  ;;  %9613 = vmatmul.mubr.f32.gmra.mrb[220].mxu0 %v9161_v34 }
 0x741   : > { %11762 = vmatprep.subr.bf16.mxu1 %v11761_v19 }
 0x742   : > { %v9226_v6 = vsel %vm4453_vm4, %v9194_v40, %v13350_v58  ;;  %v9130_v24 = vsel %vm4453_vm4, %v9098_v52, %v13351_v7  ;;  %11764 = vmatpush3.bf16.msra.mxu1 %v11761_v19 }
 0x743   : > { %v9258_v43 = vsel %vm4486_vm5, %v9226_v6, %v13355_v5  ;;  %v9162_v49 = vsel %vm4486_vm5, %v9130_v24, %v13356_v37 }
 0x744   : > { %9617 = vmatprep.mubr.f32.mxu0 %v9258_v43 }
 0x745   : > { %9618 = vmatmul.mubr.f32.gmra.mrb[222].mxu0 %v9162_v49 }
 0x746   : > { %11453 = vmatprep.mubr.msk.f32.mxu0 %vm551_vm2, %v8267_v2 }
 0x749   : > { %11454 = vmatmul.mubr.msk.f32.vlgmr.msra.gmra.mrb[224].mxu0 %vm551_vm2, %v8268_v18 }
 0x74a   : > { %11456 = vmatprep.mubr.msk.f32.mxu0 %vm551_vm2, %v8269_v42  ;;  %v17989_v42 = vld [vmem:[%s18283_s8] ss:$0 sm:$0xff] }
 0x74d   : > { %11457 = vmatmul.mubr.msk.f32.gmra.mrb[226].mxu0 %vm551_vm2, %v8270_v11 }
 0x74e   : > { %11459 = vmatprep.mubr.msk.f32.mxu0 %vm551_vm2, %v8271_v22 }
 0x751   : > { %11460 = vmatmul.mubr.msk.f32.gmra.mrb[228].mxu0 %vm551_vm2, %v8272_v9 }
 0x752   : > { %11462 = vmatprep.mubr.msk.f32.mxu0 %vm551_vm2, %v8273_v32 }
 0x755   : > { %11463 = vmatmul.mubr.msk.f32.gmra.mrb[230].mxu0 %vm551_vm2, %v8274_v61 }
 0x756   : > { %11465 = vmatprep.mubr.msk.f32.mxu0 %vm551_vm2, %v8275_v30 }
 0x759   : > { %11466 = vmatmul.mubr.msk.f32.gmra.mrb[232].mxu0 %vm551_vm2, %v8276_v3 }
 0x75a   : > { %11468 = vmatprep.mubr.msk.f32.mxu0 %vm551_vm2, %v8277_v63 }
 0x75c   : > { %v17934_v0 = vpop.f32.mrb[160].mxu0 }
 0x75d   : > { %11469 = vmatmul.mubr.msk.f32.gmra.mrb[234].mxu0 %vm551_vm2, %v8278_v20  ;;  %v9466_v17 = vpop.f32.mrb[161].mxu0 }
 0x75e   : > { %11471 = vmatprep.mubr.msk.f32.mxu0 %vm551_vm2, %v8279_v31 }
 0x761   : > { %11472 = vmatmul.mubr.msk.f32.gmra.mrb[236].mxu0 %vm551_vm2, %v8280_v39 }
 0x762   : > { %v17938_v27 = vpop.f32.mrb[162].mxu0 }
 0x763   : > { %v9471_v25 = vpop.f32.mrb[163].mxu0 }
 0x769   : > { %v17940_v1 = vpop.f32.mrb[164].mxu0 }
 0x76a   : > { %v9476_v14 = vpop.f32.mrb[165].mxu0 }
 0x76e   : > { %v17942_v4 = vpop.f32.mrb[166].mxu0 }
 0x76f   : > { %v9481_v33 = vpop.f32.mrb[167].mxu0 }
 0x775   : > { %v17944_v47 = vpop.f32.mrb[168].mxu0 }
 0x776   : > { %v9486_v12 = vpop.f32.mrb[169].mxu0 }
 0x77a   : > { %v17946_v13 = vpop.f32.mrb[170].mxu0 }
 0x77b   : > { %v9491_v15 = vpop.f32.mrb[171].mxu0 }
 0x781   : > { %v17954_v8 = vpop.f32.mrb[172].mxu0 }
 0x782   : > { %v9496_v44 = vpop.f32.mrb[173].mxu0 }
 0x786   : > { %v17956_v56 = vpop.f32.mrb[174].mxu0 }
 0x787   : > { %v9501_v53 = vpop.f32.mrb[175].mxu0 }
 0x78c   : > { %v11476_v54 = vpop.f32.mrb[96].mxu1 }
 0x78d   : > { %v9759_v48 = vpop.f32.mrb[97].mxu1 }
 0x78e   : > { %v17958_v62 = vpop.f32.mrb[176].mxu0 }
 0x78f   : > { %v9506_v59 = vpop.f32.mrb[177].mxu0 }
 0x790   : > { %v11479_v50 = vpop.f32.mrb[98].mxu1 }
 0x791   : > { %v9769_v16 = vpop.f32.mrb[99].mxu1 }
 0x792   : > { %v17960_v28 = vpop.f32.mrb[178].mxu0 }
 0x793   : > { %v9511_v51 = vpop.f32.mrb[179].mxu0 }
 0x794   : > { %v11482_v21 = vpop.f32.mrb[100].mxu1 }
 0x795   : > { %v9779_v23 = vpop.f32.mrb[101].mxu1 }
 0x798   : > { %v11485_v55 = vpop.f32.mrb[102].mxu1 }
 0x799   : > { %v9789_v46 = vpop.f32.mrb[103].mxu1 }
 0x79a   : > { %v17968_v60 = vpop.f32.mrb[180].mxu0 }
 0x79b   : > { %v9516_v10 = vpop.f32.mrb[181].mxu0 }
 0x79c   : > { %v11488_v57 = vpop.f32.mrb[104].mxu1 }
 0x79d   : > { %v9799_v34 = vpop.f32.mrb[105].mxu1 }
 0x79e   : > { %v17970_v37 = vpop.f32.mrb[182].mxu0 }
 0x79f   : > { %v9521_v5 = vpop.f32.mrb[183].mxu0 }
 0x7a0   : > { %v11491_v36 = vpop.f32.mrb[106].mxu1 }
 0x7a1   : > { %v9809_v7 = vpop.f32.mrb[107].mxu1 }
 0x7a4   : > { %v17972_v58 = vpop.f32.mrb[108].mxu1 }
 0x7a5   : > { %v9819_v29 = vpop.f32.mrb[109].mxu1  ;;  %v17974_v40 = vpop.f32.mrb[184].mxu0 }
 0x7a6   : > { %v9526_v52 = vpop.f32.mrb[185].mxu0 }
 0x7a8   : > { %v17976_v6 = vpop.f32.mrb[110].mxu1 }
 0x7a9   : > { %v17978_v24 = vpop.f32.mrb[111].mxu1 }
 0x7aa   : > { %v17980_v43 = vpop.f32.mrb[186].mxu0 }
 0x7ab   : > { %v9531_v49 = vpop.f32.mrb[187].mxu0 }
 0x7ac   : > { %v17982_v2 = vpop.f32.mrb[112].mxu1 }
 0x7ad   : > { %v17984_v18 = vpop.f32.mrb[113].mxu1 }
 0x7b1   : > { %v9534_v11 = vpop.f32.mrb[188].mxu0 }
 0x7b2   : > { %v9535_v22 = vadd.f32 %v17989_v42, %v9534_v11  ;;  %v9536_v9 = vpop.f32.mrb[189].mxu0 }
 0x7b4   : > { %v17992_v32 = vadd.f32 %v9759_v48, %v9535_v22 }
 0x7b6   : > { %v9539_v61 = vpop.f32.mrb[190].mxu0 }
 0x7b7   : > { %v9540_v30 = vadd.f32 %v17989_v42, %v9539_v61  ;;  %v9541_v3 = vpop.f32.mrb[191].mxu0 }
 0x7b9   : > { %v17995_v63 = vadd.f32 %v11476_v54, %v9540_v30 }
 0x7bd   : > { %v9544_v20 = vpop.f32.mrb[192].mxu0 }
 0x7be   : > { %v9545_v31 = vadd.f32 %v17989_v42, %v9544_v20  ;;  %v9546_v17 = vpop.f32.mrb[193].mxu0 }
 0x7c0   : > { %v17998_v39 = vadd.f32 %v9769_v16, %v9545_v31 }
 0x7c2   : > { %v9549_v25 = vpop.f32.mrb[194].mxu0 }
 0x7c3   : > { %v9550_v14 = vadd.f32 %v17989_v42, %v9549_v25  ;;  %v9551_v33 = vpop.f32.mrb[195].mxu0 }
 0x7c5   : > { %v18001_v12 = vadd.f32 %v11479_v50, %v9550_v14 }
 0x7c9   : > { %v9554_v15 = vpop.f32.mrb[196].mxu0 }
 0x7ca   : > { %v9555_v41 = vadd.f32 %v17989_v42, %v9554_v15  ;;  %v9556_v38 = vpop.f32.mrb[197].mxu0 }
 0x7cc   : > { %v18004_v26 = vadd.f32 %v9779_v23, %v9555_v41 }
 0x7cf   : > { %v9559_v44 = vpop.f32.mrb[198].mxu0 }
 0x7d0   : > { %v9560_v53 = vadd.f32 %v17989_v42, %v9559_v44  ;;  %v9561_v54 = vpop.f32.mrb[199].mxu0 }
 0x7d2   : > { %v18007_v48 = vadd.f32 %v11482_v21, %v9560_v53 }
 0x7d6   : > { %v9564_v59 = vpop.f32.mrb[200].mxu0 }
 0x7d7   : > { %v9565_v16 = vadd.f32 %v17989_v42, %v9564_v59  ;;  %v9566_v51 = vpop.f32.mrb[201].mxu0 }
 0x7d9   : > { %v18010_v45 = vadd.f32 %v9789_v46, %v9565_v16 }
 0x7dc   : > { %v9569_v50 = vpop.f32.mrb[202].mxu0 }
 0x7dd   : > { %v9570_v35 = vadd.f32 %v17989_v42, %v9569_v50  ;;  %v9571_v19 = vpop.f32.mrb[203].mxu0 }
 0x7df   : > { %v18013_v10 = vadd.f32 %v11485_v55, %v9570_v35 }
 0x7e3   : > { %v9574_v23 = vpop.f32.mrb[204].mxu0 }
 0x7e4   : > { %v9575_v5 = vadd.f32 %v17989_v42, %v9574_v23  ;;  %v9576_v52 = vpop.f32.mrb[205].mxu0 }
 0x7e6   : > { %v18016_v49 = vadd.f32 %v9799_v34, %v9575_v5 }
 0x7e8   : > { %v9579_v21 = vpop.f32.mrb[206].mxu0 }
 0x7e9   : > { %v9580_v11 = vadd.f32 %v17989_v42, %v9579_v21  ;;  %v9581_v22 = vpop.f32.mrb[207].mxu0 }
 0x7eb   : > { %v18019_v9 = vadd.f32 %v11488_v57, %v9580_v11 }
 0x7ef   : > { %v9584_v46 = vpop.f32.mrb[208].mxu0 }
 0x7f0   : > { %v9585_v61 = vadd.f32 %v17989_v42, %v9584_v46  ;;  %v9586_v30 = vpop.f32.mrb[209].mxu0 }
 0x7f1   : > { %v9475_v30 = vadd.f32 %v17989_v42, %v17940_v1 }
 0x7f2   : > { %v18022_v3 = vadd.f32 %v9809_v7, %v9585_v61 }
 0x7f4   : > { %v9589_v55 = vpop.f32.mrb[210].mxu0 }
 0x7f5   : > { %v9590_v20 = vadd.f32 %v17989_v42, %v9589_v55  ;;  %v9591_v31 = vpop.f32.mrb[211].mxu0 }
 0x7f7   : > { %v18025_v17 = vadd.f32 %v11491_v36, %v9590_v20 }
 0x7fb   : > { %v9594_v34 = vpop.f32.mrb[212].mxu0 }
 0x7fc   : > { %v9595_v25 = vadd.f32 %v17989_v42, %v9594_v34  ;;  %v9596_v14 = vpop.f32.mrb[213].mxu0 }
 0x7fe   : > { %v18028_v33 = vadd.f32 %v9819_v29, %v9595_v25 }
 0x800   : > { %v9599_v57 = vpop.f32.mrb[214].mxu0 }
 0x801   : > { %v9600_v15 = vadd.f32 %v17989_v42, %v9599_v57  ;;  %v9601_v41 = vpop.f32.mrb[215].mxu0 }
 0x803   : > { %v18032_v38 = vadd.f32 %v17972_v58, %v9600_v15 }
 0x807   : > { %v9604_v7 = vpop.f32.mrb[216].mxu0 }
 0x808   : > { %v9605_v44 = vadd.f32 %v17989_v42, %v9604_v7  ;;  %v9606_v53 = vpop.f32.mrb[217].mxu0 }
 0x80a   : > { %v18036_v36 = vadd.f32 %v17978_v24, %v9605_v44  ;;  %v9470_v24 = vadd.f32 %v17989_v42, %v17938_v27 }
 0x80d   : > { %v9609_v54 = vpop.f32.mrb[218].mxu0 }
 0x80e   : > { %v9610_v59 = vadd.f32 %v17989_v42, %v9609_v54  ;;  %v9611_v16 = vpop.f32.mrb[219].mxu0 }
 0x810   : > { %v18040_v29 = vadd.f32 %v17976_v6, %v9610_v59  ;;  %v9465_v6 = vadd.f32 %v17989_v42, %v17934_v0  ;;  %v9490_v0 = vadd.f32 %v17989_v42, %v17946_v13  ;;  %v9500_v13 = vadd.f32 %v17989_v42, %v17956_v56 }
 0x811   : > { %v9510_v56 = vadd.f32 %v17989_v42, %v17960_v28  ;;  %v9520_v28 = vadd.f32 %v17989_v42, %v17970_v37  ;;  %v9530_v37 = vadd.f32 %v17989_v42, %v17980_v43 }
 0x813   : > { %v9614_v51 = vpop.f32.mrb[220].mxu0 }
 0x814   : > { %v9615_v50 = vadd.f32 %v17989_v42, %v9614_v51  ;;  %v9616_v35 = vpop.f32.mrb[221].mxu0 }
 0x816   : > { %v18044_v58 = vadd.f32 %v17984_v18, %v9615_v50  ;;  %v9480_v18 = vadd.f32 %v17989_v42, %v17942_v4  ;;  %v9485_v4 = vadd.f32 %v17989_v42, %v17944_v47  ;;  %v9495_v47 = vadd.f32 %v17989_v42, %v17954_v8 }
 0x817   : > { %v9505_v8 = vadd.f32 %v17989_v42, %v17958_v62  ;;  %v9515_v62 = vadd.f32 %v17989_v42, %v17968_v60  ;;  %v9525_v60 = vadd.f32 %v17989_v42, %v17974_v40 }
 0x818   : > { %v9619_v19 = vpop.f32.mrb[222].mxu0 }
 0x819   : > { %v9620_v23 = vadd.f32 %v17989_v42, %v9619_v19  ;;  %v9621_v5 = vpop.f32.mrb[223].mxu0  ;;  %v9895_v42 = vmul.f32 0.01, %v17995_v63 }
 0x81b   : > { %v18050_v52 = vadd.f32 %v17982_v2, %v9620_v23 }
 0x81c   : > { %v11455_v21 = vpop.f32.mrb[224].mxu0 }
 0x81d   : > { %v9695_v11 = vadd.f32 %v11455_v21, %v9470_v24  ;;  %v9689_v22 = vpop.f32.mrb[225].mxu0 }
 0x81e   : > { %v9690_v46 = vadd.f32 %v9689_v22, %v9465_v6 }
 0x81f   : > { %v9881_v61 = vmul.f32 0.01, %v9695_v11  ;;  %vm9849_vm4 = vcmp.ge.f32.partialorder %v9695_v11, 0.0 }
 0x820   : > { %vm9848_vm5 = vcmp.ge.f32.partialorder %v9690_v46, 0.0  ;;  %v9880_v27 = vmul.f32 0.01, %v9690_v46  ;;  %v11458_v55 = vpop.f32.mrb[226].mxu0 }
 0x821   : > { %v9705_v2 = vadd.f32 %v11458_v55, %v9480_v18  ;;  %v9699_v20 = vpop.f32.mrb[227].mxu0  ;;  %v9913_v25 = vsel %vm9849_vm4, %v9695_v11, %v9881_v61  ;;  %vm9862_vm4 = vcmp.ge.f32.partialorder %v17992_v32, 0.0 }
 0x822   : > { %v9700_v31 = vadd.f32 %v9699_v20, %v9475_v30  ;;  %v9912_v34 = vsel %vm9848_vm5, %v9690_v46, %v9880_v27  ;;  %vm9863_vm5 = vcmp.ge.f32.partialorder %v17995_v63, 0.0 }
 0x823   : > { %v9883_v14 = vmul.f32 0.01, %v9705_v2  ;;  %11509 = vmatprep.mubr.msk.f32.mxu1 %vm551_vm2, %v9912_v34  ;;  %vm9851_vm12 = vcmp.ge.f32.partialorder %v9705_v2, 0.0 }
 0x824   : > { %vm9850_vm13 = vcmp.ge.f32.partialorder %v9700_v31, 0.0  ;;  %v9882_v1 = vmul.f32 0.01, %v9700_v31  ;;  %v11461_v57 = vpop.f32.mrb[228].mxu0  ;;  %11510 = vmatmul.mubr.msk.f32.vlgmr.msra.gmra.mrb[0].mxu1 %vm551_vm2, %v9913_v25 }
 0x825   : > { %v9715_v15 = vadd.f32 %v11461_v57, %v9490_v0  ;;  %v9709_v41 = vpop.f32.mrb[229].mxu0  ;;  %v9915_v54 = vsel %vm9851_vm12, %v9705_v2, %v9883_v14  ;;  %vm9864_vm12 = vcmp.ge.f32.partialorder %v17998_v39, 0.0 }
 0x826   : > { %v9710_v7 = vadd.f32 %v9709_v41, %v9485_v4  ;;  %v9914_v44 = vsel %vm9850_vm13, %v9700_v31, %v9882_v1  ;;  %vm9865_vm13 = vcmp.ge.f32.partialorder %v18001_v12, 0.0 }
 0x827   : > { %v9885_v53 = vmul.f32 0.01, %v9715_v15  ;;  %11512 = vmatprep.mubr.msk.f32.mxu1 %vm551_vm2, %v9914_v44  ;;  %vm9853_vm14 = vcmp.ge.f32.partialorder %v9715_v15, 0.0 }
 0x828   : > { %vm9852_vm15 = vcmp.ge.f32.partialorder %v9710_v7, 0.0  ;;  %v9884_v59 = vmul.f32 0.01, %v9710_v7  ;;  %v11464_v16 = vpop.f32.mrb[230].mxu0  ;;  %11513 = vmatmul.mubr.msk.f32.gmra.mrb[2].mxu1 %vm551_vm2, %v9915_v54 }
 0x829   : > { %v9725_v51 = vadd.f32 %v11464_v16, %v9500_v13  ;;  %v9719_v50 = vpop.f32.mrb[231].mxu0  ;;  %v9917_v5 = vsel %vm9853_vm14, %v9715_v15, %v9885_v53  ;;  %v9896_v53 = vmul.f32 0.01, %v17998_v39  ;;  %v9898_v16 = vmul.f32 0.01, %v18004_v26 }
 0x82a   : > { %v9720_v35 = vadd.f32 %v9719_v50, %v9495_v47  ;;  %v9916_v19 = vsel %vm9852_vm15, %v9710_v7, %v9884_v59  ;;  %v9894_v7 = vmul.f32 0.01, %v17992_v32  ;;  %v9897_v47 = vmul.f32 0.01, %v18001_v12 }
 0x82b   : > { %v9887_v23 = vmul.f32 0.01, %v9725_v51  ;;  %11515 = vmatprep.mubr.msk.f32.mxu1 %vm551_vm2, %v9916_v19  ;;  %vm9855_vm6 = vcmp.ge.f32.partialorder %v9725_v51, 0.0  ;;  %v9927_v59 = vsel %vm9863_vm5, %v17995_v63, %v9895_v42  ;;  %vm9866_vm14 = vcmp.ge.f32.partialorder %v18004_v26, 0.0 }
 0x82c   : > { %vm9854_vm7 = vcmp.ge.f32.partialorder %v9720_v35, 0.0  ;;  %v9886_v24 = vmul.f32 0.01, %v9720_v35  ;;  %v11467_v6 = vpop.f32.mrb[232].mxu0  ;;  %11516 = vmatmul.mubr.msk.f32.gmra.mrb[4].mxu1 %vm551_vm2, %v9917_v5  ;;  %v9926_v54 = vsel %vm9862_vm4, %v17992_v32, %v9894_v7  ;;  %v9899_v32 = vmul.f32 0.01, %v18007_v48 }
 0x82d   : > { %v9735_v21 = vadd.f32 %v11467_v6, %v9510_v56  ;;  %v9729_v11 = vpop.f32.mrb[233].mxu0  ;;  %v9919_v61 = vsel %vm9855_vm6, %v9725_v51, %v9887_v23  ;;  %v9928_v51 = vsel %vm9864_vm12, %v17998_v39, %v9896_v53  ;;  %v9929_v50 = vsel %vm9865_vm13, %v18001_v12, %v9897_v47 }
 0x82e   : > { %v9730_v22 = vadd.f32 %v9729_v11, %v9505_v8  ;;  %v9918_v46 = vsel %vm9854_vm7, %v9720_v35, %v9886_v24  ;;  %v9900_v35 = vmul.f32 0.01, %v18010_v45  ;;  %v9930_v63 = vsel %vm9866_vm14, %v18004_v26, %v9898_v16 }
 0x82f   : > { %v9889_v18 = vmul.f32 0.01, %v9735_v21  ;;  %11518 = vmatprep.mubr.msk.f32.mxu1 %vm551_vm2, %v9918_v46  ;;  %vm9857_vm3 = vcmp.ge.f32.partialorder %v9735_v21, 0.0  ;;  %vm9867_vm15 = vcmp.ge.f32.partialorder %v18007_v48, 0.0  ;;  %vm9868_vm6 = vcmp.ge.f32.partialorder %v18010_v45, 0.0 }
 0x830   : > { %vm9856_vm8 = vcmp.ge.f32.partialorder %v9730_v22, 0.0  ;;  %v9888_v30 = vmul.f32 0.01, %v9730_v22  ;;  %v11470_v27 = vpop.f32.mrb[234].mxu0  ;;  %11519 = vmatmul.mubr.msk.f32.gmra.mrb[6].mxu1 %vm551_vm2, %v9919_v61  ;;  %v9901_v39 = vmul.f32 0.01, %v18013_v10  ;;  %v9931_v19 = vsel %vm9867_vm15, %v18007_v48, %v9899_v32 }
 0x831   : > { %v9745_v55 = vadd.f32 %v11470_v27, %v9520_v28  ;;  %v9739_v2 = vpop.f32.mrb[235].mxu0  ;;  %v9921_v0 = vsel %vm9857_vm3, %v9735_v21, %v9889_v18  ;;  %v9902_v56 = vmul.f32 0.01, %v18016_v49  ;;  %v9932_v12 = vsel %vm9868_vm6, %v18010_v45, %v9900_v35  ;;  %v18167_v28 = vld [vmem:[%s18289_s14] ss:$0 sm:$0xff] }
 0x832   : > { %v9740_v20 = vadd.f32 %v9739_v2, %v9515_v62  ;;  %v9920_v31 = vsel %vm9856_vm8, %v9730_v22, %v9888_v30  ;;  %vm9869_vm7 = vcmp.ge.f32.partialorder %v18013_v10, 0.0  ;;  %vm9870_vm3 = vcmp.ge.f32.partialorder %v18016_v49, 0.0 }
 0x833   : > { %v9891_v34 = vmul.f32 0.01, %v9745_v55  ;;  %11521 = vmatprep.mubr.msk.f32.mxu1 %vm551_vm2, %v9920_v31  ;;  %vm9859_vm9 = vcmp.ge.f32.partialorder %v9745_v55, 0.0  ;;  %v9903_v26 = vmul.f32 0.01, %v18019_v9  ;;  %v9933_v23 = vsel %vm9869_vm7, %v18013_v10, %v9901_v39 }
 0x834   : > { %vm9858_vm10 = vcmp.ge.f32.partialorder %v9740_v20, 0.0  ;;  %v9890_v25 = vmul.f32 0.01, %v9740_v20  ;;  %v11473_v14 = vpop.f32.mrb[236].mxu0  ;;  %11522 = vmatmul.mubr.msk.f32.gmra.mrb[8].mxu1 %vm551_vm2, %v9921_v0  ;;  %v9904_v5 = vmul.f32 0.01, %v18022_v3  ;;  %v9934_v48 = vsel %vm9870_vm3, %v18016_v49, %v9902_v56 }
 0x835   : > { %v9755_v4 = vadd.f32 %v11473_v14, %v9530_v37  ;;  %v9749_v1 = vpop.f32.mrb[237].mxu0  ;;  %v9923_v43 = vsel %vm9859_vm9, %v9745_v55, %v9891_v34  ;;  %vm9871_vm8 = vcmp.ge.f32.partialorder %v18019_v9, 0.0  ;;  %vm9872_vm9 = vcmp.ge.f32.partialorder %v18022_v3, 0.0 }
 0x836   : > { %v9750_v57 = vadd.f32 %v9749_v1, %v9525_v60  ;;  %v9922_v15 = vsel %vm9858_vm10, %v9740_v20, %v9890_v25  ;;  %v9905_v45 = vmul.f32 0.01, %v18025_v17  ;;  %v9935_v8 = vsel %vm9871_vm8, %v18019_v9, %v9903_v26 }
 0x837   : > { %v9893_v41 = vmul.f32 0.01, %v9755_v4  ;;  %11524 = vmatprep.mubr.msk.f32.mxu1 %vm551_vm2, %v9922_v15  ;;  %vm9861_vm1 = vcmp.ge.f32.partialorder %v9755_v4, 0.0  ;;  %v9906_v24 = vmul.f32 0.01, %v18028_v33  ;;  %v9936_v10 = vsel %vm9872_vm9, %v18022_v3, %v9904_v5 }
 0x838   : > { %vm9860_vm11 = vcmp.ge.f32.partialorder %v9750_v57, 0.0  ;;  %v9892_v44 = vmul.f32 0.01, %v9750_v57  ;;  %11525 = vmatmul.mubr.msk.f32.gmra.mrb[10].mxu1 %vm551_vm2, %v9923_v43  ;;  %vm9873_vm10 = vcmp.ge.f32.partialorder %v18025_v17, 0.0  ;;  %v9907_v49 = vmul.f32 0.01, %v18032_v38 }
 0x839   : > { %v9925_v13 = vsel %vm9861_vm1, %v9755_v4, %v9893_v41  ;;  %vm9874_vm1 = vcmp.ge.f32.partialorder %v18028_v33, 0.0  ;;  %v9937_v6 = vsel %vm9873_vm10, %v18025_v17, %v9905_v45  ;;  %v9908_v21 = vmul.f32 0.01, %v18036_v36 }
 0x83a   : > { %v9924_v40 = vsel %vm9860_vm11, %v9750_v57, %v9892_v44  ;;  %v9938_v9 = vsel %vm9874_vm1, %v18028_v33, %v9906_v24  ;;  %vm9875_vm11 = vcmp.ge.f32.partialorder %v18032_v38, 0.0  ;;  %vm9876_vm4 = vcmp.ge.f32.partialorder %v18036_v36, 0.0 }
 0x83b   : > { %11527 = vmatprep.mubr.msk.f32.mxu1 %vm551_vm2, %v9924_v40  ;;  %v9909_v3 = vmul.f32 0.01, %v18040_v29  ;;  %v9939_v11 = vsel %vm9875_vm11, %v18032_v38, %v9907_v49  ;;  %v9910_v22 = vmul.f32 0.01, %v18044_v58  ;;  %v9940_v17 = vsel %vm9876_vm4, %v18036_v36, %v9908_v21 }
 0x83c   : > { %11528 = vmatmul.mubr.msk.f32.gmra.mrb[12].mxu1 %vm551_vm2, %v9925_v13  ;;  %vm9877_vm5 = vcmp.ge.f32.partialorder %v18040_v29, 0.0  ;;  %vm9878_vm12 = vcmp.ge.f32.partialorder %v18044_v58, 0.0  ;;  %v9911_v33 = vmul.f32 0.01, %v18050_v52  ;;  %vm9879_vm13 = vcmp.ge.f32.partialorder %v18050_v52, 0.0 }
 0x83d   : > { %11530 = vmatprep.mubr.msk.f32.mxu1 %vm551_vm2, %v9926_v54  ;;  %v9941_v46 = vsel %vm9877_vm5, %v18040_v29, %v9909_v3  ;;  %v9942_v38 = vsel %vm9878_vm12, %v18044_v58, %v9910_v22 }
 0x83e   : > { %v9943_v36 = vsel %vm9879_vm13, %v18050_v52, %v9911_v33 }
 0x840   : > { %11531 = vmatmul.mubr.msk.f32.gmra.mrb[14].mxu1 %vm551_vm2, %v9927_v59 }
 0x841   : > { %11533 = vmatprep.mubr.msk.f32.mxu1 %vm551_vm2, %v9928_v51 }
 0x844   : > { %11534 = vmatmul.mubr.msk.f32.gmra.mrb[16].mxu1 %vm551_vm2, %v9929_v50 }
 0x845   : > { %11536 = vmatprep.mubr.msk.f32.mxu1 %vm551_vm2, %v9930_v63 }
 0x848   : > { %11537 = vmatmul.mubr.msk.f32.gmra.mrb[18].mxu1 %vm551_vm2, %v9931_v19 }
 0x849   : > { %11539 = vmatprep.mubr.msk.f32.mxu1 %vm551_vm2, %v9932_v12 }
 0x84c   : > { %11540 = vmatmul.mubr.msk.f32.gmra.mrb[20].mxu1 %vm551_vm2, %v9933_v23 }
 0x84d   : > { %11542 = vmatprep.mubr.msk.f32.mxu1 %vm551_vm2, %v9934_v48 }
 0x850   : > { %11543 = vmatmul.mubr.msk.f32.gmra.mrb[22].mxu1 %vm551_vm2, %v9935_v8 }
 0x851   : > { %11545 = vmatprep.mubr.msk.f32.mxu1 %vm551_vm2, %v9936_v10 }
 0x854   : > { %11546 = vmatmul.mubr.msk.f32.gmra.mrb[24].mxu1 %vm551_vm2, %v9937_v6 }
 0x855   : > { %11548 = vmatprep.mubr.msk.f32.mxu1 %vm551_vm2, %v9938_v9 }
 0x858   : > { %11549 = vmatmul.mubr.msk.f32.gmra.mrb[26].mxu1 %vm551_vm2, %v9939_v11 }
 0x859   : > { %11551 = vmatprep.mubr.msk.f32.mxu1 %vm551_vm2, %v9940_v17 }
 0x85c   : > { %11552 = vmatmul.mubr.msk.f32.gmra.mrb[28].mxu1 %vm551_vm2, %v9941_v46 }
 0x85d   : > { %11554 = vmatprep.mubr.msk.f32.mxu1 %vm551_vm2, %v9942_v38 }
 0x860   : > { %11555 = vmatmul.mubr.msk.f32.gmra.mrb[30].mxu1 %vm551_vm2, %v9943_v36 }
 0x8f7   : > { %v11511_v29 = vpop.f32.mrb[0].mxu1 }
 0x8f8   : > { %v10309_v58 = vadd.f32 %v11511_v29, %v18167_v28  ;;  %v10110_v52 = vpop.f32.mrb[1].mxu1 }
 0x8f9   : > { %v10308_v18 = vadd.f32 %v18167_v28, %v10110_v52 }
 0x8fa   : > { %10341 = vst.msk [vmem:[%s18174_s27 + $0x8] sm:$0xff] %vm495_vm0, %v10309_v58 }
 0x8fb   : > { %10340 = vst.msk [vmem:[%s18174_s27] sm:$0xff] %vm495_vm0, %v10308_v18  ;;  %v11514_v61 = vpop.f32.mrb[2].mxu1 }
 0x8fc   : > { %v10311_v62 = vadd.f32 %v11514_v61, %v18167_v28  ;;  %v10120_v30 = vpop.f32.mrb[3].mxu1 }
 0x8fd   : > { %v10310_v27 = vadd.f32 %v18167_v28, %v10120_v30 }
 0x8fe   : > { %10343 = vst.msk [vmem:[%s18174_s27 + $0x18] sm:$0xff] %vm495_vm0, %v10311_v62 }
 0x8ff   : > { %10342 = vst.msk [vmem:[%s18174_s27 + $0x10] sm:$0xff] %vm495_vm0, %v10310_v27  ;;  %v11517_v55 = vpop.f32.mrb[4].mxu1 }
 0x900   : > { %v10313_v2 = vadd.f32 %v11517_v55, %v18167_v28  ;;  %v10130_v20 = vpop.f32.mrb[5].mxu1 }
 0x901   : > { %v10312_v31 = vadd.f32 %v18167_v28, %v10130_v20 }
 0x902   : > { %10345 = vst.msk [vmem:[%s18174_s27 + $0x28] sm:$0xff] %vm495_vm0, %v10313_v2 }
 0x903   : > { %10344 = vst.msk [vmem:[%s18174_s27 + $0x20] sm:$0xff] %vm495_vm0, %v10312_v31  ;;  %v11520_v37 = vpop.f32.mrb[6].mxu1 }
 0x904   : > { %v10315_v34 = vadd.f32 %v11520_v37, %v18167_v28  ;;  %v10140_v0 = vpop.f32.mrb[7].mxu1 }
 0x905   : > { %v10314_v60 = vadd.f32 %v18167_v28, %v10140_v0 }
 0x906   : > { %10347 = vst.msk [vmem:[%s18174_s27 + $0x38] sm:$0xff] %vm495_vm0, %v10315_v34 }
 0x907   : > { %10346 = vst.msk [vmem:[%s18174_s27 + $0x30] sm:$0xff] %vm495_vm0, %v10314_v60  ;;  %v11523_v25 = vpop.f32.mrb[8].mxu1 }
 0x908   : > { %v10317_v14 = vadd.f32 %v11523_v25, %v18167_v28  ;;  %v10150_v4 = vpop.f32.mrb[9].mxu1 }
 0x909   : > { %v10316_v1 = vadd.f32 %v18167_v28, %v10150_v4 }
 0x90a   : > { %10349 = vst.msk [vmem:[%s18174_s27 + $0x48] sm:$0xff] %vm495_vm0, %v10317_v14 }
 0x90b   : > { %10348 = vst.msk [vmem:[%s18174_s27 + $0x40] sm:$0xff] %vm495_vm0, %v10316_v1  ;;  %v11526_v57 = vpop.f32.mrb[10].mxu1 }
 0x90c   : > { %v10319_v15 = vadd.f32 %v11526_v57, %v18167_v28  ;;  %v10160_v41 = vpop.f32.mrb[11].mxu1 }
 0x90d   : > { %v10318_v43 = vadd.f32 %v18167_v28, %v10160_v41 }
 0x90e   : > { %10351 = vst.msk [vmem:[%s18174_s27 + $0x58] sm:$0xff] %vm495_vm0, %v10319_v15 }
 0x90f   : > { %10350 = vst.msk [vmem:[%s18174_s27 + $0x50] sm:$0xff] %vm495_vm0, %v10318_v43  ;;  %v11529_v7 = vpop.f32.mrb[12].mxu1 }
 0x910   : > { %v10321_v44 = vadd.f32 %v11529_v7, %v18167_v28  ;;  %v10170_v40 = vpop.f32.mrb[13].mxu1 }
 0x911   : > { %v10320_v42 = vadd.f32 %v18167_v28, %v10170_v40 }
 0x912   : > { %10353 = vst.msk [vmem:[%s18174_s27 + $0x68] sm:$0xff] %vm495_vm0, %v10321_v44 }
 0x913   : > { %10352 = vst.msk [vmem:[%s18174_s27 + $0x60] sm:$0xff] %vm495_vm0, %v10320_v42  ;;  %v11532_v13 = vpop.f32.mrb[14].mxu1 }
 0x914   : > { %v10323_v53 = vadd.f32 %v11532_v13, %v18167_v28  ;;  %v10180_v54 = vpop.f32.mrb[15].mxu1 }
 0x915   : > { %v10322_v47 = vadd.f32 %v18167_v28, %v10180_v54 }
 0x916   : > { %10355 = vst.msk [vmem:[%s18174_s27 + $0x78] sm:$0xff] %vm495_vm0, %v10323_v53 }
 0x917   : > { %10354 = vst.msk [vmem:[%s18174_s27 + $0x70] sm:$0xff] %vm495_vm0, %v10322_v47  ;;  %v11535_v59 = vpop.f32.mrb[16].mxu1 }
 0x918   : > { %v10325_v16 = vadd.f32 %v11535_v59, %v18167_v28  ;;  %v10190_v51 = vpop.f32.mrb[17].mxu1 }
 0x919   : > { %v10324_v32 = vadd.f32 %v18167_v28, %v10190_v51 }
 0x91a   : > { %10357 = vst.msk [vmem:[%s18174_s27 + $0x88] sm:$0xff] %vm495_vm0, %v10325_v16 }
 0x91b   : > { %10356 = vst.msk [vmem:[%s18174_s27 + $0x80] sm:$0xff] %vm495_vm0, %v10324_v32  ;;  %v11538_v50 = vpop.f32.mrb[18].mxu1 }
 0x91c   : > { %v10327_v35 = vadd.f32 %v11538_v50, %v18167_v28  ;;  %v10200_v63 = vpop.f32.mrb[19].mxu1 }
 0x91d   : > { %v10326_v39 = vadd.f32 %v18167_v28, %v10200_v63 }
 0x91e   : > { %10359 = vst.msk [vmem:[%s18174_s27 + $0x98] sm:$0xff] %vm495_vm0, %v10327_v35 }
 0x91f   : > { %10358 = vst.msk [vmem:[%s18174_s27 + $0x90] sm:$0xff] %vm495_vm0, %v10326_v39  ;;  %v11541_v19 = vpop.f32.mrb[20].mxu1 }
 0x920   : > { %v10329_v56 = vadd.f32 %v11541_v19, %v18167_v28  ;;  %v10210_v12 = vpop.f32.mrb[21].mxu1 }
 0x921   : > { %v10328_v26 = vadd.f32 %v18167_v28, %v10210_v12 }
 0x922   : > { %10361 = vst.msk [vmem:[%s18174_s27 + $0xa8] sm:$0xff] %vm495_vm0, %v10329_v56 }
 0x923   : > { %10360 = vst.msk [vmem:[%s18174_s27 + $0xa0] sm:$0xff] %vm495_vm0, %v10328_v26  ;;  %v11544_v23 = vpop.f32.mrb[22].mxu1 }
 0x924   : > { %v10331_v5 = vadd.f32 %v11544_v23, %v18167_v28  ;;  %v10220_v48 = vpop.f32.mrb[23].mxu1 }
 0x925   : > { %v10330_v45 = vadd.f32 %v18167_v28, %v10220_v48 }
 0x926   : > { %10363 = vst.msk [vmem:[%s18174_s27 + $0xb8] sm:$0xff] %vm495_vm0, %v10331_v5 }
 0x927   : > { %10362 = vst.msk [vmem:[%s18174_s27 + $0xb0] sm:$0xff] %vm495_vm0, %v10330_v45  ;;  %v11547_v8 = vpop.f32.mrb[24].mxu1 }
 0x928   : > { %v10333_v24 = vadd.f32 %v11547_v8, %v18167_v28  ;;  %v10230_v10 = vpop.f32.mrb[25].mxu1 }
 0x929   : > { %v10332_v49 = vadd.f32 %v18167_v28, %v10230_v10 }
 0x92a   : > { %10365 = vst.msk [vmem:[%s18174_s27 + $0xc8] sm:$0xff] %vm495_vm0, %v10333_v24 }
 0x92b   : > { %10364 = vst.msk [vmem:[%s18174_s27 + $0xc0] sm:$0xff] %vm495_vm0, %v10332_v49  ;;  %v11550_v6 = vpop.f32.mrb[26].mxu1 }
 0x92c   : > { %v10335_v21 = vadd.f32 %v11550_v6, %v18167_v28  ;;  %v10240_v9 = vpop.f32.mrb[27].mxu1 }
 0x92d   : > { %v10334_v3 = vadd.f32 %v18167_v28, %v10240_v9 }
 0x92e   : > { %10367 = vst.msk [vmem:[%s18174_s27 + $0xd8] sm:$0xff] %vm495_vm0, %v10335_v21 }
 0x92f   : > { %10366 = vst.msk [vmem:[%s18174_s27 + $0xd0] sm:$0xff] %vm495_vm0, %v10334_v3  ;;  %v11553_v11 = vpop.f32.mrb[28].mxu1 }
 0x930   : > { %v10337_v22 = vadd.f32 %v11553_v11, %v18167_v28  ;;  %v10250_v17 = vpop.f32.mrb[29].mxu1 }
 0x931   : > { %v10336_v33 = vadd.f32 %v18167_v28, %v10250_v17 }
 0x932   : > { %10369 = vst.msk [vmem:[%s18174_s27 + $0xe8] sm:$0xff] %vm495_vm0, %v10337_v22 }
 0x933   : > { %10368 = vst.msk [vmem:[%s18174_s27 + $0xe0] sm:$0xff] %vm495_vm0, %v10336_v33  ;;  %v11556_v46 = vpop.f32.mrb[30].mxu1 }
 0x934   : > { %v10339_v38 = vadd.f32 %v11556_v46, %v18167_v28  ;;  %v10260_v36 = vpop.f32.mrb[31].mxu1 }
 0x935   : > { %v10338_v29 = vadd.f32 %v18167_v28, %v10260_v36 }
 0x936   : > { %10371 = vst.msk [vmem:[%s18174_s27 + $0xf8] sm:$0xff] %vm495_vm0, %v10339_v38 }
 0x937   : > { %10370 = vst.msk [vmem:[%s18174_s27 + $0xf0] sm:$0xff] %vm495_vm0, %v10338_v29 }
 0x938 PF: > { %s25_s18 = sadd.s32 1, %s13374_s18  }
 0x939   : > { %p22_p4 = scmp.ge.s32.totalorder %s25_s18, 4  }
 0x93b   :  { %24 = sbr.rel (!%p22_p4) target bundleno = 1 (0x1), region = 114 }

</bundles_post_ra>
